<compile_context>
chip_gen: v7x
topology: tpu7x:2x2x1
jax: 0.10.0
libtpu: 0.0.40
codegen_flags: <defaults>
</compile_context>

<pallas_src>
import math
from functools import partial

import jax
import jax.numpy as jnp
from jax import lax
from jax.experimental import pallas as pl
from jax.experimental.pallas import tpu as pltpu

MASK_FILL = -1000000000.0   # additive equivalent of masked_fill(mask==1, -1e9)
LN_EPS = 1e-6


# ----------------------- in-kernel building blocks (jnp on loaded tiles) -----

def _layer_norm(x, gamma, beta):
    # Matches MCAN's LayerNorm: torch.std is the *unbiased* estimator (ddof=1)
    # and eps is added to std (not to var).
    mean = jnp.mean(x, axis=-1, keepdims=True)
    centered = x - mean
    var = jnp.sum(centered * centered, axis=-1, keepdims=True) / (x.shape[-1] - 1)
    std = jnp.sqrt(var)
    return gamma * centered / (std + LN_EPS) + beta


def _ffn(x, w1, b1, w2, b2):
    # MLP = Linear(H, FF) -> ReLU -> (dropout: identity, eval) -> Linear(FF, H)
    h = jnp.maximum(jnp.dot(x, w1, preferred_element_type=jnp.float32) + b1, 0.0)
    return jnp.dot(h, w2, preferred_element_type=jnp.float32) + b2


def _mhatt(v, k, q, mask_bias, aw_ref, ab_ref, base, n_head, d_head):
    """Fused multi-head attention for one batch element.

    v, k : (Sk, H); q : (Sq, H); mask_bias : (1, Sk) additive bias or None.
    aw_ref : (N, H, H) stacked [Wv, Wk, Wq, Wmerge] groups (stored as (in, out)).
    ab_ref : (N, 1, H) matching biases.  `base` selects the 4-weight group.
    Returns (Sq, H), heads already merged (lane-dense)."""
    wv, bv = aw_ref[base + 0], ab_ref[base + 0]
    wk, bk = aw_ref[base + 1], ab_ref[base + 1]
    wq, bq = aw_ref[base + 2], ab_ref[base + 2]
    wm, bm = aw_ref[base + 3], ab_ref[base + 3]

    vp = jnp.dot(v, wv, preferred_element_type=jnp.float32) + bv    # (Sk, H)
    kp = jnp.dot(k, wk, preferred_element_type=jnp.float32) + bk    # (Sk, H)
    qp = jnp.dot(q, wq, preferred_element_type=jnp.float32) + bq    # (Sq, H)

    scale = 1.0 / math.sqrt(d_head)
    out = None
    for h in range(n_head):               # static unroll: all heads, one grid step
        lo = h * d_head
        qh = qp[:, lo:lo + d_head]        # (Sq, Dh)
        kh = kp[:, lo:lo + d_head]        # (Sk, Dh)
        vh = vp[:, lo:lo + d_head]        # (Sk, Dh)

        # scores = q . k^T / sqrt(Dh)  (contract last dims, no explicit transpose)
        s = lax.dot_general(qh, kh, (((1,), (1,)), ((), ())),
                            preferred_element_type=jnp.float32) * scale
        if mask_bias is not None:
            s = s + mask_bias             # additive key-padding bias (-1e9 masked)
        s = s - jnp.max(s, axis=-1, keepdims=True)
        p = jnp.exp(s)
        # softmax denominator on the EUP (approx reciprocal) — frees VPU slots
        p = p * pl.reciprocal(jnp.sum(p, axis=-1, keepdims=True), approx=True)
        # TODO(synk): attention-map dropout is identity in eval mode.
        ctx = jnp.dot(p, vh, preferred_element_type=jnp.float32)    # (Sq, Dh)

        # Head merge fused into the output projection:
        #   concat_h(ctx_h) @ Wm == sum_h ctx_h @ Wm[h*Dh:(h+1)*Dh, :]
        contrib = jnp.dot(ctx, wm[lo:lo + d_head, :],
                          preferred_element_type=jnp.float32)       # (Sq, H)
        out = contrib if out is None else out + contrib
    return out + bm


# --------------------------------- fused kernel --------------------------------

def _mca_ed_kernel(n_head, d_head, num_layers,
                   ques_ref, img_ref, kg_ref, qmb_ref, kmb_ref,
                   eaw_ref, eab_ref, ew1_ref, eb1_ref, ew2_ref, eb2_ref,
                   eg_ref, ebt_ref,
                   daw_ref, dab_ref, dw1_ref, db1_ref, dw2_ref, db2_ref,
                   dg_ref, dbt_ref,
                   x_out_ref, y_out_ref):
    """Entire MCA_ED forward for one batch element, fully in VMEM."""
    x = ques_ref[0]               # question  (Sq, H)
    y = img_ref[0]                # image     (Si, H)
    z = kg_ref[0]                 # knowledge (Sk, H)
    qmb = qmb_ref[0]              # (1, Sq) additive key-mask bias
    kmb = kmb_ref[0]              # (1, Sk) additive key-mask bias

    # ----- encoder: stacked SA layers -----
    for l in range(num_layers):   # static unroll over layers
        x = _layer_norm(
            x + _mhatt(x, x, x, qmb, eaw_ref, eab_ref, 4 * l, n_head, d_head),
            eg_ref[2 * l], ebt_ref[2 * l])
        x = _layer_norm(
            x + _ffn(x, ew1_ref[l], eb1_ref[l], ew2_ref[l], eb2_ref[l]),
            eg_ref[2 * l + 1], ebt_ref[2 * l + 1])
    x_out_ref[0] = x              # lane-dense (Sq, H) store; x stays in VMEM below

    # ----- decoder: stacked SGA layers (cross-attend to encoder output & kg) ---
    for l in range(num_layers):
        y = _layer_norm(
            y + _mhatt(y, y, y, None, daw_ref, dab_ref, 12 * l + 0, n_head, d_head),
            dg_ref[4 * l + 0], dbt_ref[4 * l + 0])
        y = _layer_norm(
            y + _mhatt(x, x, y, qmb, daw_ref, dab_ref, 12 * l + 4, n_head, d_head),
            dg_ref[4 * l + 1], dbt_ref[4 * l + 1])
        y = _layer_norm(
            y + _mhatt(z, z, y, kmb, daw_ref, dab_ref, 12 * l + 8, n_head, d_head),
            dg_ref[4 * l + 2], dbt_ref[4 * l + 2])
        y = _layer_norm(
            y + _ffn(y, dw1_ref[l], db1_ref[l], dw2_ref[l], db2_ref[l]),
            dg_ref[4 * l + 3], dbt_ref[4 * l + 3])
    y_out_ref[0] = y              # lane-dense (Si, H) store


# ------------------------------ pallas_call wrapper ----------------------------

def _rep_spec(arr):
    """Full-array block, replicated across the batch grid."""
    nd = arr.ndim
    return pl.BlockSpec(arr.shape, lambda b, _nd=nd: (0,) * _nd)


def _batch_spec(shape):
    """(1, dim1, dim2) block indexed by the batch grid axis."""
    return pl.BlockSpec((1,) + tuple(shape[1:]), lambda b: (b, 0, 0))


def pack_mca_params(params):
    """Stack per-layer parameter dicts into whole-stack arrays (done once)."""
    enc, dec = params["enc"], params["dec"]

    def cat(side, key):
        return jnp.concatenate([p[key] for p in side], axis=0)

    def stk(side, key):
        return jnp.stack([p[key] for p in side], axis=0)

    return {
        "eaw": cat(enc, "att_w"),   # (L*4,  H, H)
        "eab": cat(enc, "att_b"),   # (L*4,  1, H)
        "ew1": stk(enc, "ffn_w1"),  # (L, H, FF)
        "eb1": stk(enc, "ffn_b1"),  # (L, 1, FF)
        "ew2": stk(enc, "ffn_w2"),  # (L, FF, H)
        "eb2": stk(enc, "ffn_b2"),  # (L, 1, H)
        "eg":  cat(enc, "ln_g"),    # (L*2, 1, H)
        "ebt": cat(enc, "ln_b"),    # (L*2, 1, H)
        "daw": cat(dec, "att_w"),   # (L*12, H, H)
        "dab": cat(dec, "att_b"),   # (L*12, 1, H)
        "dw1": stk(dec, "ffn_w1"),
        "db1": stk(dec, "ffn_b1"),
        "dw2": stk(dec, "ffn_w2"),
        "db2": stk(dec, "ffn_b2"),
        "dg":  cat(dec, "ln_g"),    # (L*4, 1, H)
        "dbt": cat(dec, "ln_b"),    # (L*4, 1, H)
    }


def mca_ed_forward(packed, ques, ques_mask, kg, kg_mask, img_feat,
                   n_head, num_layers):
    """Mirrors MCA_ED.forward (eval mode). Masks: 1 == masked key."""
    bsz, sq, hsz = ques.shape
    si = img_feat.shape[1]
    d_head = hsz // n_head

    qmb = ques_mask.astype(jnp.float32)[:, None, :] * MASK_FILL   # (B, 1, Sq)
    kmb = kg_mask.astype(jnp.float32)[:, None, :] * MASK_FILL     # (B, 1, Sk)

    args = (ques, img_feat, kg, qmb, kmb,
            packed["eaw"], packed["eab"], packed["ew1"], packed["eb1"],
            packed["ew2"], packed["eb2"], packed["eg"], packed["ebt"],
            packed["daw"], packed["dab"], packed["dw1"], packed["db1"],
            packed["dw2"], packed["db2"], packed["dg"], packed["dbt"])

    in_specs = [_batch_spec(ques.shape), _batch_spec(img_feat.shape),
                _batch_spec(kg.shape), _batch_spec(qmb.shape),
                _batch_spec(kmb.shape)]
    in_specs += [_rep_spec(a) for a in args[5:]]

    x_out, y_out = pl.pallas_call(
        partial(_mca_ed_kernel, n_head, d_head, num_layers),
        out_shape=(jax.ShapeDtypeStruct((bsz, sq, hsz), jnp.float32),
                   jax.ShapeDtypeStruct((bsz, si, hsz), jnp.float32)),
        grid=(bsz,),
        in_specs=in_specs,
        out_specs=(_batch_spec((bsz, sq, hsz)), _batch_spec((bsz, si, hsz))),
        compiler_params=pltpu.CompilerParams(
            dimension_semantics=("parallel",)),   # lets v7x split batch over 2 TCs
    )(*args)
    return x_out, y_out


# ------------------------------- parameter init --------------------------------

def _linear_init(key, in_size, out_size):
    k1, k2 = jax.random.split(key)
    bound = 1.0 / math.sqrt(in_size)
    w = jax.random.uniform(k1, (in_size, out_size), jnp.float32, -bound, bound)
    b = jax.random.uniform(k2, (1, out_size), jnp.float32, -bound, bound)
    return w, b


def _init_mhatt(key, h):
    ws, bs = [], []
    for k in jax.random.split(key, 4):            # order: v, k, q, merge
        w, b = _linear_init(k, h, h)
        ws.append(w)
        bs.append(b)
    return jnp.stack(ws), jnp.stack(bs)           # (4, H, H), (4, 1, H)


def _init_sa(key, h, ff):
    k1, k2, k3 = jax.random.split(key, 3)
    att_w, att_b = _init_mhatt(k1, h)
    w1, b1 = _linear_init(k2, h, ff)
    w2, b2 = _linear_init(k3, ff, h)
    return {"att_w": att_w, "att_b": att_b,
            "ffn_w1": w1, "ffn_b1": b1, "ffn_w2": w2, "ffn_b2": b2,
            "ln_g": jnp.ones((2, 1, h), jnp.float32),
            "ln_b": jnp.zeros((2, 1, h), jnp.float32)}


def _init_sga(key, h, ff):
    k1, k2, k3, k4, k5 = jax.random.split(key, 5)
    aw1, ab1 = _init_mhatt(k1, h)
    aw2, ab2 = _init_mhatt(k2, h)
    aw3, ab3 = _init_mhatt(k3, h)
    w1, b1 = _linear_init(k4, h, ff)
    w2, b2 = _linear_init(k5, ff, h)
    return {"att_w": jnp.concatenate([aw1, aw2, aw3], axis=0),   # (12, H, H)
            "att_b": jnp.concatenate([ab1, ab2, ab3], axis=0),   # (12, 1, H)
            "ffn_w1": w1, "ffn_b1": b1, "ffn_w2": w2, "ffn_b2": b2,
            "ln_g": jnp.ones((4, 1, h), jnp.float32),
            "ln_b": jnp.zeros((4, 1, h), jnp.float32)}


def init_mca_ed(key, h, ff, num_layers):
    keys = jax.random.split(key, 2 * num_layers)
    enc = [_init_sa(keys[i], h, ff) for i in range(num_layers)]
    dec = [_init_sga(keys[num_layers + i], h, ff) for i in range(num_layers)]
    return {"enc": enc, "dec": dec}


# -------------------------- pure-JAX reference (for checking) ------------------

def _ref_layer_norm(x, gamma, beta):
    mean = jnp.mean(x, axis=-1, keepdims=True)
    c = x - mean
    var = jnp.sum(c * c, axis=-1, keepdims=True) / (x.shape[-1] - 1)
    return gamma * c / (jnp.sqrt(var) + LN_EPS) + beta


def _ref_ffn(x, w1, b1, w2, b2):
    return jnp.maximum(x @ w1 + b1, 0.0) @ w2 + b2


def _ref_mhatt(v, k, q, mask_bias, aw, ab, base, n_head, d_head):
    bsz, sq, hsz = q.shape

    def proj(t, w, bias):
        y = t @ w + bias
        return y.reshape(bsz, t.shape[1], n_head, d_head).transpose(0, 2, 1, 3)

    vp = proj(v, aw[base + 0], ab[base + 0])
    kp = proj(k, aw[base + 1], ab[base + 1])
    qp = proj(q, aw[base + 2], ab[base + 2])
    s = jnp.einsum("bhqd,bhkd->bhqk", qp, kp) / math.sqrt(d_head)
    if mask_bias is not None:
        s = s + mask_bias[:, None]            # (B, 1, 1, Sk)
    p = jax.nn.softmax(s, axis=-1)
    o = jnp.einsum("bhqk,bhkd->bhqd", p, vp)
    o = o.transpose(0, 2, 1, 3).reshape(bsz, sq, hsz)
    return o @ aw[base + 3] + ab[base + 3]


def _ref_sa(p, x, mb, n_head, d_head):
    x = _ref_layer_norm(
        x + _ref_mhatt(x, x, x, mb, p["att_w"], p["att_b"], 0, n_head, d_head),
        p["ln_g"][0], p["ln_b"][0])
    x = _ref_layer_norm(
        x + _ref_ffn(x, p["ffn_w1"], p["ffn_b1"], p["ffn_w2"], p["ffn_b2"]),
        p["ln_g"][1], p["ln_b"][1])
    return x


def _ref_sga(p, img, ques, qmb, kg, kmb, n_head, d_head):
    x = img
    x = _ref_layer_norm(
        x + _ref_mhatt(x, x, x, None, p["att_w"], p["att_b"], 0, n_head, d_head),
        p["ln_g"][0], p["ln_b"][0])
    x = _ref_layer_norm(
        x + _ref_mhatt(ques, ques, x, qmb, p["att_w"], p["att_b"], 4, n_head, d_head),
        p["ln_g"][1], p["ln_b"][1])
    x = _ref_layer_norm(
        x + _ref_mhatt(kg, kg, x, kmb, p["att_w"], p["att_b"], 8, n_head, d_head),
        p["ln_g"][2], p["ln_b"][2])
    x = _ref_layer_norm(
        x + _ref_ffn(x, p["ffn_w1"], p["ffn_b1"], p["ffn_w2"], p["ffn_b2"]),
        p["ln_g"][3], p["ln_b"][3])
    return x


def mca_ed_ref(params, ques, ques_mask, kg, kg_mask, img_feat, n_head):
    h = ques.shape[-1]
    d_head = h // n_head
    qmb = ques_mask.astype(jnp.float32)[:, None, :] * MASK_FILL
    kmb = kg_mask.astype(jnp.float32)[:, None, :] * MASK_FILL
    x = ques
    for p in params["enc"]:
        x = _ref_sa(p, x, qmb, n_head, d_head)
    y = img_feat
    for p in params["dec"]:
        y = _ref_sga(p, y, x, qmb, kg, kmb, n_head, d_head)
    return x, y


# ------------------------------------ main -------------------------------------

if __name__ == "__main__":
    # config: hidden_size=32, multi_head=4, hidden_size_head=8, ff_size=128,
    #         num_layers=2, dropout_r=0.1 (identity in eval mode)
    HIDDEN = 32
    MULTI_HEAD = 4
    FF_SIZE = 128
    NUM_LAYERS = 2
    B, S_QUES, S_KG, S_IMG = 2, 8, 8, 8

    root = jax.random.PRNGKey(0)
    k_par, k_q, k_kg, k_img = jax.random.split(root, 4)

    params = init_mca_ed(k_par, HIDDEN, FF_SIZE, NUM_LAYERS)
    packed = pack_mca_params(params)     # stack per-layer params once, outside jit

    ques = jax.random.normal(k_q, (B, S_QUES, HIDDEN), jnp.float32)
    kg = jax.random.normal(k_kg, (B, S_KG, HIDDEN), jnp.float32)
    img_feat = jax.random.normal(k_img, (B, S_IMG, HIDDEN), jnp.float32)

    # key-padding masks (1 == masked key), never fully-masked rows
    ques_mask = jnp.stack(
        [jnp.zeros((S_QUES,), jnp.int32),
         (jnp.arange(S_QUES) >= S_QUES - 2).astype(jnp.int32)], axis=0)
    kg_mask = jnp.stack(
        [(jnp.arange(S_KG) >= S_KG - 3).astype(jnp.int32),
         jnp.zeros((S_KG,), jnp.int32)], axis=0)

    fwd = jax.jit(partial(mca_ed_forward, n_head=MULTI_HEAD,
                          num_layers=NUM_LAYERS))
    x_out, y_out = fwd(packed, ques, ques_mask, kg, kg_mask, img_feat)
    jax.block_until_ready(x_out)
    jax.block_until_ready(y_out)
    assert x_out.shape == (B, S_QUES, HIDDEN)
    assert y_out.shape == (B, S_IMG, HIDDEN)

    # correctness check against a pure-JAX reference (loose tol: approx reciprocal)
    x_ref, y_ref = mca_ed_ref(params, ques, ques_mask, kg, kg_mask, img_feat,
                              MULTI_HEAD)
    assert bool(jnp.allclose(x_out, x_ref, rtol=2e-2, atol=2e-2))
    assert bool(jnp.allclose(y_out, y_ref, rtol=2e-2, atol=2e-2))

    print("KERNEL_OK")
</pallas_src>

<mosaic_0001>
module attributes {stable_mosaic.version = 11 : i64} {
  func.func @_mca_ed_kernel(%arg0: i32, %arg1: memref<1x8x32xf32, #tpu.memory_space<vmem>>, %arg2: memref<1x8x32xf32, #tpu.memory_space<vmem>>, %arg3: memref<1x8x32xf32, #tpu.memory_space<vmem>>, %arg4: memref<1x1x8xf32, #tpu.memory_space<vmem>>, %arg5: memref<1x1x8xf32, #tpu.memory_space<vmem>>, %arg6: memref<8x32x32xf32, #tpu.memory_space<vmem>>, %arg7: memref<8x1x32xf32, #tpu.memory_space<vmem>>, %arg8: memref<2x32x128xf32, #tpu.memory_space<vmem>>, %arg9: memref<2x1x128xf32, #tpu.memory_space<vmem>>, %arg10: memref<2x128x32xf32, #tpu.memory_space<vmem>>, %arg11: memref<2x1x32xf32, #tpu.memory_space<vmem>>, %arg12: memref<4x1x32xf32, #tpu.memory_space<vmem>>, %arg13: memref<4x1x32xf32, #tpu.memory_space<vmem>>, %arg14: memref<24x32x32xf32, #tpu.memory_space<vmem>>, %arg15: memref<24x1x32xf32, #tpu.memory_space<vmem>>, %arg16: memref<2x32x128xf32, #tpu.memory_space<vmem>>, %arg17: memref<2x1x128xf32, #tpu.memory_space<vmem>>, %arg18: memref<2x128x32xf32, #tpu.memory_space<vmem>>, %arg19: memref<2x1x32xf32, #tpu.memory_space<vmem>>, %arg20: memref<8x1x32xf32, #tpu.memory_space<vmem>>, %arg21: memref<8x1x32xf32, #tpu.memory_space<vmem>>, %arg22: memref<1x8x32xf32, #tpu.memory_space<vmem>>, %arg23: memref<1x8x32xf32, #tpu.memory_space<vmem>>) attributes {dimension_semantics = [#tpu.dimension_semantics<parallel>], iteration_bounds = array<i64: 2>, scalar_prefetch = 0 : i64, scratch_operands = 0 : i64, tpu.core_type = #tpu.core_type<tc>, window_params = [{transform_indices = @transform_0, window_bounds = array<i64: 1, 8, 32>}, {transform_indices = @transform_1, window_bounds = array<i64: 1, 8, 32>}, {transform_indices = @transform_2, window_bounds = array<i64: 1, 8, 32>}, {transform_indices = @transform_3, window_bounds = array<i64: 1, 1, 8>}, {transform_indices = @transform_4, window_bounds = array<i64: 1, 1, 8>}, {pipeline_mode = #tpu.pipeline_mode<synchronous>, transform_indices = @transform_5, window_bounds = array<i64: 8, 32, 32>}, {pipeline_mode = #tpu.pipeline_mode<synchronous>, transform_indices = @transform_6, window_bounds = array<i64: 8, 1, 32>}, {pipeline_mode = #tpu.pipeline_mode<synchronous>, transform_indices = @transform_7, window_bounds = array<i64: 2, 32, 128>}, {pipeline_mode = #tpu.pipeline_mode<synchronous>, transform_indices = @transform_8, window_bounds = array<i64: 2, 1, 128>}, {pipeline_mode = #tpu.pipeline_mode<synchronous>, transform_indices = @transform_9, window_bounds = array<i64: 2, 128, 32>}, {pipeline_mode = #tpu.pipeline_mode<synchronous>, transform_indices = @transform_10, window_bounds = array<i64: 2, 1, 32>}, {pipeline_mode = #tpu.pipeline_mode<synchronous>, transform_indices = @transform_11, window_bounds = array<i64: 4, 1, 32>}, {pipeline_mode = #tpu.pipeline_mode<synchronous>, transform_indices = @transform_12, window_bounds = array<i64: 4, 1, 32>}, {pipeline_mode = #tpu.pipeline_mode<synchronous>, transform_indices = @transform_13, window_bounds = array<i64: 24, 32, 32>}, {pipeline_mode = #tpu.pipeline_mode<synchronous>, transform_indices = @transform_14, window_bounds = array<i64: 24, 1, 32>}, {pipeline_mode = #tpu.pipeline_mode<synchronous>, transform_indices = @transform_15, window_bounds = array<i64: 2, 32, 128>}, {pipeline_mode = #tpu.pipeline_mode<synchronous>, transform_indices = @transform_16, window_bounds = array<i64: 2, 1, 128>}, {pipeline_mode = #tpu.pipeline_mode<synchronous>, transform_indices = @transform_17, window_bounds = array<i64: 2, 128, 32>}, {pipeline_mode = #tpu.pipeline_mode<synchronous>, transform_indices = @transform_18, window_bounds = array<i64: 2, 1, 32>}, {pipeline_mode = #tpu.pipeline_mode<synchronous>, transform_indices = @transform_19, window_bounds = array<i64: 8, 1, 32>}, {pipeline_mode = #tpu.pipeline_mode<synchronous>, transform_indices = @transform_20, window_bounds = array<i64: 8, 1, 32>}, {transform_indices = @transform_21, window_bounds = array<i64: 1, 8, 32>}, {transform_indices = @transform_22, window_bounds = array<i64: 1, 8, 32>}]} {
    %c0 = arith.constant 0 : index
    %c0_0 = arith.constant 0 : index
    %c0_1 = arith.constant 0 : index
    %0 = vector.load %arg1[%c0, %c0_0, %c0_1] : memref<1x8x32xf32, #tpu.memory_space<vmem>>, vector<1x8x32xf32>
    %1 = vector.shape_cast %0 : vector<1x8x32xf32> to vector<8x32xf32>
    %c0_2 = arith.constant 0 : index
    %c0_3 = arith.constant 0 : index
    %c0_4 = arith.constant 0 : index
    %2 = vector.load %arg2[%c0_2, %c0_3, %c0_4] : memref<1x8x32xf32, #tpu.memory_space<vmem>>, vector<1x8x32xf32>
    %3 = vector.shape_cast %2 : vector<1x8x32xf32> to vector<8x32xf32>
    %c0_5 = arith.constant 0 : index
    %c0_6 = arith.constant 0 : index
    %c0_7 = arith.constant 0 : index
    %4 = vector.load %arg3[%c0_5, %c0_6, %c0_7] : memref<1x8x32xf32, #tpu.memory_space<vmem>>, vector<1x8x32xf32>
    %5 = vector.shape_cast %4 : vector<1x8x32xf32> to vector<8x32xf32>
    %c0_8 = arith.constant 0 : index
    %c0_9 = arith.constant 0 : index
    %c0_10 = arith.constant 0 : index
    %6 = vector.load %arg4[%c0_8, %c0_9, %c0_10] : memref<1x1x8xf32, #tpu.memory_space<vmem>>, vector<1x1x8xf32>
    %7 = vector.shape_cast %6 : vector<1x1x8xf32> to vector<1x8xf32>
    %c0_11 = arith.constant 0 : index
    %c0_12 = arith.constant 0 : index
    %c0_13 = arith.constant 0 : index
    %8 = vector.load %arg5[%c0_11, %c0_12, %c0_13] : memref<1x1x8xf32, #tpu.memory_space<vmem>>, vector<1x1x8xf32>
    %9 = vector.shape_cast %8 : vector<1x1x8xf32> to vector<1x8xf32>
    %c0_14 = arith.constant 0 : index
    %c0_15 = arith.constant 0 : index
    %c0_16 = arith.constant 0 : index
    %10 = vector.load %arg6[%c0_14, %c0_15, %c0_16] : memref<8x32x32xf32, #tpu.memory_space<vmem>>, vector<1x32x32xf32>
    %11 = vector.shape_cast %10 : vector<1x32x32xf32> to vector<32x32xf32>
    %c0_17 = arith.constant 0 : index
    %c0_18 = arith.constant 0 : index
    %c0_19 = arith.constant 0 : index
    %12 = vector.load %arg7[%c0_17, %c0_18, %c0_19] : memref<8x1x32xf32, #tpu.memory_space<vmem>>, vector<1x1x32xf32>
    %13 = vector.shape_cast %12 : vector<1x1x32xf32> to vector<1x32xf32>
    %c1 = arith.constant 1 : index
    %c0_20 = arith.constant 0 : index
    %c0_21 = arith.constant 0 : index
    %14 = vector.load %arg6[%c1, %c0_20, %c0_21] : memref<8x32x32xf32, #tpu.memory_space<vmem>>, vector<1x32x32xf32>
    %15 = vector.shape_cast %14 : vector<1x32x32xf32> to vector<32x32xf32>
    %c1_22 = arith.constant 1 : index
    %c0_23 = arith.constant 0 : index
    %c0_24 = arith.constant 0 : index
    %16 = vector.load %arg7[%c1_22, %c0_23, %c0_24] : memref<8x1x32xf32, #tpu.memory_space<vmem>>, vector<1x1x32xf32>
    %17 = vector.shape_cast %16 : vector<1x1x32xf32> to vector<1x32xf32>
    %c2 = arith.constant 2 : index
    %c0_25 = arith.constant 0 : index
    %c0_26 = arith.constant 0 : index
    %18 = vector.load %arg6[%c2, %c0_25, %c0_26] : memref<8x32x32xf32, #tpu.memory_space<vmem>>, vector<1x32x32xf32>
    %19 = vector.shape_cast %18 : vector<1x32x32xf32> to vector<32x32xf32>
    %c2_27 = arith.constant 2 : index
    %c0_28 = arith.constant 0 : index
    %c0_29 = arith.constant 0 : index
    %20 = vector.load %arg7[%c2_27, %c0_28, %c0_29] : memref<8x1x32xf32, #tpu.memory_space<vmem>>, vector<1x1x32xf32>
    %21 = vector.shape_cast %20 : vector<1x1x32xf32> to vector<1x32xf32>
    %c3 = arith.constant 3 : index
    %c0_30 = arith.constant 0 : index
    %c0_31 = arith.constant 0 : index
    %22 = vector.load %arg6[%c3, %c0_30, %c0_31] : memref<8x32x32xf32, #tpu.memory_space<vmem>>, vector<1x32x32xf32>
    %23 = vector.shape_cast %22 : vector<1x32x32xf32> to vector<32x32xf32>
    %c3_32 = arith.constant 3 : index
    %c0_33 = arith.constant 0 : index
    %c0_34 = arith.constant 0 : index
    %24 = vector.load %arg7[%c3_32, %c0_33, %c0_34] : memref<8x1x32xf32, #tpu.memory_space<vmem>>, vector<1x1x32xf32>
    %25 = vector.shape_cast %24 : vector<1x1x32xf32> to vector<1x32xf32>
    %cst = arith.constant dense<0.000000e+00> : vector<8x32xf32>
    %26 = tpu.matmul %1, %11, %cst {dimension_numbers = #tpu.dot_dimension_numbers<[1], [0], [0], [1], [0, 0, 1, 1], [], []>} : vector<8x32xf32>, vector<32x32xf32>, vector<8x32xf32> -> vector<8x32xf32>
    %27 = vector.broadcast %13 : vector<1x32xf32> to vector<8x32xf32>
    %28 = arith.addf %26, %27 : vector<8x32xf32>
    %cst_35 = arith.constant dense<0.000000e+00> : vector<8x32xf32>
    %29 = tpu.matmul %1, %15, %cst_35 {dimension_numbers = #tpu.dot_dimension_numbers<[1], [0], [0], [1], [0, 0, 1, 1], [], []>} : vector<8x32xf32>, vector<32x32xf32>, vector<8x32xf32> -> vector<8x32xf32>
    %30 = vector.broadcast %17 : vector<1x32xf32> to vector<8x32xf32>
    %31 = arith.addf %29, %30 : vector<8x32xf32>
    %cst_36 = arith.constant dense<0.000000e+00> : vector<8x32xf32>
    %32 = tpu.matmul %1, %19, %cst_36 {dimension_numbers = #tpu.dot_dimension_numbers<[1], [0], [0], [1], [0, 0, 1, 1], [], []>} : vector<8x32xf32>, vector<32x32xf32>, vector<8x32xf32> -> vector<8x32xf32>
    %33 = vector.broadcast %21 : vector<1x32xf32> to vector<8x32xf32>
    %34 = arith.addf %32, %33 : vector<8x32xf32>
    %35 = vector.extract_strided_slice %34 {offsets = [0, 0], sizes = [8, 8], strides = [1, 1]} : vector<8x32xf32> to vector<8x8xf32>
    %36 = vector.extract_strided_slice %31 {offsets = [0, 0], sizes = [8, 8], strides = [1, 1]} : vector<8x32xf32> to vector<8x8xf32>
    %37 = vector.extract_strided_slice %28 {offsets = [0, 0], sizes = [8, 8], strides = [1, 1]} : vector<8x32xf32> to vector<8x8xf32>
    %cst_37 = arith.constant dense<0.000000e+00> : vector<8x8xf32>
    %38 = tpu.matmul %35, %36, %cst_37 {dimension_numbers = #tpu.dot_dimension_numbers<[1], [1], [0], [0], [0, 0, 1, 0], [], []>} : vector<8x8xf32>, vector<8x8xf32>, vector<8x8xf32> -> vector<8x8xf32>
    %cst_38 = arith.constant 0.353553385 : f32
    %39 = vector.broadcast %cst_38 : f32 to vector<8x8xf32>
    %40 = arith.mulf %38, %39 : vector<8x8xf32>
    %41 = vector.broadcast %7 : vector<1x8xf32> to vector<8x8xf32>
    %42 = arith.addf %40, %41 : vector<8x8xf32>
    %cst_39 = arith.constant dense<0xFF800000> : vector<8xf32>
    %43 = vector.multi_reduction <maximumf>, %42, %cst_39 [1] : vector<8x8xf32> to vector<8xf32>
    %44 = vector.shape_cast %43 : vector<8xf32> to vector<8x1xf32>
    %45 = vector.broadcast %44 : vector<8x1xf32> to vector<8x8xf32>
    %46 = arith.subf %42, %45 : vector<8x8xf32>
    %47 = math.exp %46 : vector<8x8xf32>
    %cst_40 = arith.constant dense<0.000000e+00> : vector<8xf32>
    %48 = vector.multi_reduction <add>, %47, %cst_40 [1] : vector<8x8xf32> to vector<8xf32>
    %49 = vector.shape_cast %48 : vector<8xf32> to vector<8x1xf32>
    %50 = tpu.reciprocal %49 {approx = true} : vector<8x1xf32> -> vector<8x1xf32>
    %51 = vector.broadcast %50 : vector<8x1xf32> to vector<8x8xf32>
    %52 = arith.mulf %47, %51 : vector<8x8xf32>
    %cst_41 = arith.constant dense<0.000000e+00> : vector<8x8xf32>
    %53 = tpu.matmul %52, %37, %cst_41 {dimension_numbers = #tpu.dot_dimension_numbers<[1], [0], [0], [1], [0, 0, 1, 1], [], []>} : vector<8x8xf32>, vector<8x8xf32>, vector<8x8xf32> -> vector<8x8xf32>
    %54 = vector.extract_strided_slice %23 {offsets = [0, 0], sizes = [8, 32], strides = [1, 1]} : vector<32x32xf32> to vector<8x32xf32>
    %cst_42 = arith.constant dense<0.000000e+00> : vector<8x32xf32>
    %55 = tpu.matmul %53, %54, %cst_42 {dimension_numbers = #tpu.dot_dimension_numbers<[1], [0], [0], [1], [0, 0, 1, 1], [], []>} : vector<8x8xf32>, vector<8x32xf32>, vector<8x32xf32> -> vector<8x32xf32>
    %56 = vector.extract_strided_slice %34 {offsets = [0, 8], sizes = [8, 8], strides = [1, 1]} : vector<8x32xf32> to vector<8x8xf32>
    %57 = vector.extract_strided_slice %31 {offsets = [0, 8], sizes = [8, 8], strides = [1, 1]} : vector<8x32xf32> to vector<8x8xf32>
    %58 = vector.extract_strided_slice %28 {offsets = [0, 8], sizes = [8, 8], strides = [1, 1]} : vector<8x32xf32> to vector<8x8xf32>
    %cst_43 = arith.constant dense<0.000000e+00> : vector<8x8xf32>
    %59 = tpu.matmul %56, %57, %cst_43 {dimension_numbers = #tpu.dot_dimension_numbers<[1], [1], [0], [0], [0, 0, 1, 0], [], []>} : vector<8x8xf32>, vector<8x8xf32>, vector<8x8xf32> -> vector<8x8xf32>
    %cst_44 = arith.constant 0.353553385 : f32
    %60 = vector.broadcast %cst_44 : f32 to vector<8x8xf32>
    %61 = arith.mulf %59, %60 : vector<8x8xf32>
    %62 = vector.broadcast %7 : vector<1x8xf32> to vector<8x8xf32>
    %63 = arith.addf %61, %62 : vector<8x8xf32>
    %cst_45 = arith.constant dense<0xFF800000> : vector<8xf32>
    %64 = vector.multi_reduction <maximumf>, %63, %cst_45 [1] : vector<8x8xf32> to vector<8xf32>
    %65 = vector.shape_cast %64 : vector<8xf32> to vector<8x1xf32>
    %66 = vector.broadcast %65 : vector<8x1xf32> to vector<8x8xf32>
    %67 = arith.subf %63, %66 : vector<8x8xf32>
    %68 = math.exp %67 : vector<8x8xf32>
    %cst_46 = arith.constant dense<0.000000e+00> : vector<8xf32>
    %69 = vector.multi_reduction <add>, %68, %cst_46 [1] : vector<8x8xf32> to vector<8xf32>
    %70 = vector.shape_cast %69 : vector<8xf32> to vector<8x1xf32>
    %71 = tpu.reciprocal %70 {approx = true} : vector<8x1xf32> -> vector<8x1xf32>
    %72 = vector.broadcast %71 : vector<8x1xf32> to vector<8x8xf32>
    %73 = arith.mulf %68, %72 : vector<8x8xf32>
    %cst_47 = arith.constant dense<0.000000e+00> : vector<8x8xf32>
    %74 = tpu.matmul %73, %58, %cst_47 {dimension_numbers = #tpu.dot_dimension_numbers<[1], [0], [0], [1], [0, 0, 1, 1], [], []>} : vector<8x8xf32>, vector<8x8xf32>, vector<8x8xf32> -> vector<8x8xf32>
    %75 = vector.extract_strided_slice %23 {offsets = [8, 0], sizes = [8, 32], strides = [1, 1]} : vector<32x32xf32> to vector<8x32xf32>
    %cst_48 = arith.constant dense<0.000000e+00> : vector<8x32xf32>
    %76 = tpu.matmul %74, %75, %cst_48 {dimension_numbers = #tpu.dot_dimension_numbers<[1], [0], [0], [1], [0, 0, 1, 1], [], []>} : vector<8x8xf32>, vector<8x32xf32>, vector<8x32xf32> -> vector<8x32xf32>
    %77 = arith.addf %55, %76 : vector<8x32xf32>
    %78 = vector.extract_strided_slice %34 {offsets = [0, 16], sizes = [8, 8], strides = [1, 1]} : vector<8x32xf32> to vector<8x8xf32>
    %79 = vector.extract_strided_slice %31 {offsets = [0, 16], sizes = [8, 8], strides = [1, 1]} : vector<8x32xf32> to vector<8x8xf32>
    %80 = vector.extract_strided_slice %28 {offsets = [0, 16], sizes = [8, 8], strides = [1, 1]} : vector<8x32xf32> to vector<8x8xf32>
    %cst_49 = arith.constant dense<0.000000e+00> : vector<8x8xf32>
    %81 = tpu.matmul %78, %79, %cst_49 {dimension_numbers = #tpu.dot_dimension_numbers<[1], [1], [0], [0], [0, 0, 1, 0], [], []>} : vector<8x8xf32>, vector<8x8xf32>, vector<8x8xf32> -> vector<8x8xf32>
    %cst_50 = arith.constant 0.353553385 : f32
    %82 = vector.broadcast %cst_50 : f32 to vector<8x8xf32>
    %83 = arith.mulf %81, %82 : vector<8x8xf32>
    %84 = vector.broadcast %7 : vector<1x8xf32> to vector<8x8xf32>
    %85 = arith.addf %83, %84 : vector<8x8xf32>
    %cst_51 = arith.constant dense<0xFF800000> : vector<8xf32>
    %86 = vector.multi_reduction <maximumf>, %85, %cst_51 [1] : vector<8x8xf32> to vector<8xf32>
    %87 = vector.shape_cast %86 : vector<8xf32> to vector<8x1xf32>
    %88 = vector.broadcast %87 : vector<8x1xf32> to vector<8x8xf32>
    %89 = arith.subf %85, %88 : vector<8x8xf32>
    %90 = math.exp %89 : vector<8x8xf32>
    %cst_52 = arith.constant dense<0.000000e+00> : vector<8xf32>
    %91 = vector.multi_reduction <add>, %90, %cst_52 [1] : vector<8x8xf32> to vector<8xf32>
    %92 = vector.shape_cast %91 : vector<8xf32> to vector<8x1xf32>
    %93 = tpu.reciprocal %92 {approx = true} : vector<8x1xf32> -> vector<8x1xf32>
    %94 = vector.broadcast %93 : vector<8x1xf32> to vector<8x8xf32>
    %95 = arith.mulf %90, %94 : vector<8x8xf32>
    %cst_53 = arith.constant dense<0.000000e+00> : vector<8x8xf32>
    %96 = tpu.matmul %95, %80, %cst_53 {dimension_numbers = #tpu.dot_dimension_numbers<[1], [0], [0], [1], [0, 0, 1, 1], [], []>} : vector<8x8xf32>, vector<8x8xf32>, vector<8x8xf32> -> vector<8x8xf32>
    %97 = vector.extract_strided_slice %23 {offsets = [16, 0], sizes = [8, 32], strides = [1, 1]} : vector<32x32xf32> to vector<8x32xf32>
    %cst_54 = arith.constant dense<0.000000e+00> : vector<8x32xf32>
    %98 = tpu.matmul %96, %97, %cst_54 {dimension_numbers = #tpu.dot_dimension_numbers<[1], [0], [0], [1], [0, 0, 1, 1], [], []>} : vector<8x8xf32>, vector<8x32xf32>, vector<8x32xf32> -> vector<8x32xf32>
    %99 = arith.addf %77, %98 : vector<8x32xf32>
    %100 = vector.extract_strided_slice %34 {offsets = [0, 24], sizes = [8, 8], strides = [1, 1]} : vector<8x32xf32> to vector<8x8xf32>
    %101 = vector.extract_strided_slice %31 {offsets = [0, 24], sizes = [8, 8], strides = [1, 1]} : vector<8x32xf32> to vector<8x8xf32>
    %102 = vector.extract_strided_slice %28 {offsets = [0, 24], sizes = [8, 8], strides = [1, 1]} : vector<8x32xf32> to vector<8x8xf32>
    %cst_55 = arith.constant dense<0.000000e+00> : vector<8x8xf32>
    %103 = tpu.matmul %100, %101, %cst_55 {dimension_numbers = #tpu.dot_dimension_numbers<[1], [1], [0], [0], [0, 0, 1, 0], [], []>} : vector<8x8xf32>, vector<8x8xf32>, vector<8x8xf32> -> vector<8x8xf32>
    %cst_56 = arith.constant 0.353553385 : f32
    %104 = vector.broadcast %cst_56 : f32 to vector<8x8xf32>
    %105 = arith.mulf %103, %104 : vector<8x8xf32>
    %106 = vector.broadcast %7 : vector<1x8xf32> to vector<8x8xf32>
    %107 = arith.addf %105, %106 : vector<8x8xf32>
    %cst_57 = arith.constant dense<0xFF800000> : vector<8xf32>
    %108 = vector.multi_reduction <maximumf>, %107, %cst_57 [1] : vector<8x8xf32> to vector<8xf32>
    %109 = vector.shape_cast %108 : vector<8xf32> to vector<8x1xf32>
    %110 = vector.broadcast %109 : vector<8x1xf32> to vector<8x8xf32>
    %111 = arith.subf %107, %110 : vector<8x8xf32>
    %112 = math.exp %111 : vector<8x8xf32>
    %cst_58 = arith.constant dense<0.000000e+00> : vector<8xf32>
    %113 = vector.multi_reduction <add>, %112, %cst_58 [1] : vector<8x8xf32> to vector<8xf32>
    %114 = vector.shape_cast %113 : vector<8xf32> to vector<8x1xf32>
    %115 = tpu.reciprocal %114 {approx = true} : vector<8x1xf32> -> vector<8x1xf32>
    %116 = vector.broadcast %115 : vector<8x1xf32> to vector<8x8xf32>
    %117 = arith.mulf %112, %116 : vector<8x8xf32>
    %cst_59 = arith.constant dense<0.000000e+00> : vector<8x8xf32>
    %118 = tpu.matmul %117, %102, %cst_59 {dimension_numbers = #tpu.dot_dimension_numbers<[1], [0], [0], [1], [0, 0, 1, 1], [], []>} : vector<8x8xf32>, vector<8x8xf32>, vector<8x8xf32> -> vector<8x8xf32>
    %119 = vector.extract_strided_slice %23 {offsets = [24, 0], sizes = [8, 32], strides = [1, 1]} : vector<32x32xf32> to vector<8x32xf32>
    %cst_60 = arith.constant dense<0.000000e+00> : vector<8x32xf32>
    %120 = tpu.matmul %118, %119, %cst_60 {dimension_numbers = #tpu.dot_dimension_numbers<[1], [0], [0], [1], [0, 0, 1, 1], [], []>} : vector<8x8xf32>, vector<8x32xf32>, vector<8x32xf32> -> vector<8x32xf32>
    %121 = arith.addf %99, %120 : vector<8x32xf32>
    %122 = vector.broadcast %25 : vector<1x32xf32> to vector<8x32xf32>
    %123 = arith.addf %121, %122 : vector<8x32xf32>
    %124 = arith.addf %1, %123 : vector<8x32xf32>
    %c0_61 = arith.constant 0 : index
    %c0_62 = arith.constant 0 : index
    %c0_63 = arith.constant 0 : index
    %125 = vector.load %arg12[%c0_61, %c0_62, %c0_63] : memref<4x1x32xf32, #tpu.memory_space<vmem>>, vector<1x1x32xf32>
    %126 = vector.shape_cast %125 : vector<1x1x32xf32> to vector<1x32xf32>
    %c0_64 = arith.constant 0 : index
    %c0_65 = arith.constant 0 : index
    %c0_66 = arith.constant 0 : index
    %127 = vector.load %arg13[%c0_64, %c0_65, %c0_66] : memref<4x1x32xf32, #tpu.memory_space<vmem>>, vector<1x1x32xf32>
    %128 = vector.shape_cast %127 : vector<1x1x32xf32> to vector<1x32xf32>
    %cst_67 = arith.constant dense<0.000000e+00> : vector<8xf32>
    %129 = vector.multi_reduction <add>, %124, %cst_67 [1] : vector<8x32xf32> to vector<8xf32>
    %130 = vector.shape_cast %129 : vector<8xf32> to vector<8x1xf32>
    %cst_68 = arith.constant 3.200000e+01 : f32
    %131 = vector.broadcast %cst_68 : f32 to vector<8x1xf32>
    %132 = arith.divf %130, %131 : vector<8x1xf32>
    %133 = vector.broadcast %132 : vector<8x1xf32> to vector<8x32xf32>
    %134 = arith.subf %124, %133 : vector<8x32xf32>
    %135 = arith.mulf %134, %134 : vector<8x32xf32>
    %cst_69 = arith.constant dense<0.000000e+00> : vector<8xf32>
    %136 = vector.multi_reduction <add>, %135, %cst_69 [1] : vector<8x32xf32> to vector<8xf32>
    %137 = vector.shape_cast %136 : vector<8xf32> to vector<8x1xf32>
    %cst_70 = arith.constant 3.100000e+01 : f32
    %138 = vector.broadcast %cst_70 : f32 to vector<8x1xf32>
    %139 = arith.divf %137, %138 : vector<8x1xf32>
    %140 = math.sqrt %139 : vector<8x1xf32>
    %141 = vector.broadcast %126 : vector<1x32xf32> to vector<8x32xf32>
    %142 = arith.mulf %141, %134 : vector<8x32xf32>
    %cst_71 = arith.constant 9.99999997E-7 : f32
    %143 = vector.broadcast %cst_71 : f32 to vector<8x1xf32>
    %144 = arith.addf %140, %143 : vector<8x1xf32>
    %145 = vector.broadcast %144 : vector<8x1xf32> to vector<8x32xf32>
    %146 = arith.divf %142, %145 : vector<8x32xf32>
    %147 = vector.broadcast %128 : vector<1x32xf32> to vector<8x32xf32>
    %148 = arith.addf %146, %147 : vector<8x32xf32>
    %c0_72 = arith.constant 0 : index
    %c0_73 = arith.constant 0 : index
    %c0_74 = arith.constant 0 : index
    %149 = vector.load %arg8[%c0_72, %c0_73, %c0_74] : memref<2x32x128xf32, #tpu.memory_space<vmem>>, vector<1x32x128xf32>
    %150 = vector.shape_cast %149 : vector<1x32x128xf32> to vector<32x128xf32>
    %c0_75 = arith.constant 0 : index
    %c0_76 = arith.constant 0 : index
    %c0_77 = arith.constant 0 : index
    %151 = vector.load %arg9[%c0_75, %c0_76, %c0_77] : memref<2x1x128xf32, #tpu.memory_space<vmem>>, vector<1x1x128xf32>
    %152 = vector.shape_cast %151 : vector<1x1x128xf32> to vector<1x128xf32>
    %c0_78 = arith.constant 0 : index
    %c0_79 = arith.constant 0 : index
    %c0_80 = arith.constant 0 : index
    %153 = vector.load %arg10[%c0_78, %c0_79, %c0_80] : memref<2x128x32xf32, #tpu.memory_space<vmem>>, vector<1x128x32xf32>
    %154 = vector.shape_cast %153 : vector<1x128x32xf32> to vector<128x32xf32>
    %c0_81 = arith.constant 0 : index
    %c0_82 = arith.constant 0 : index
    %c0_83 = arith.constant 0 : index
    %155 = vector.load %arg11[%c0_81, %c0_82, %c0_83] : memref<2x1x32xf32, #tpu.memory_space<vmem>>, vector<1x1x32xf32>
    %156 = vector.shape_cast %155 : vector<1x1x32xf32> to vector<1x32xf32>
    %cst_84 = arith.constant dense<0.000000e+00> : vector<8x128xf32>
    %157 = tpu.matmul %148, %150, %cst_84 {dimension_numbers = #tpu.dot_dimension_numbers<[1], [0], [0], [1], [0, 0, 1, 1], [], []>} : vector<8x32xf32>, vector<32x128xf32>, vector<8x128xf32> -> vector<8x128xf32>
    %158 = vector.broadcast %152 : vector<1x128xf32> to vector<8x128xf32>
    %159 = arith.addf %157, %158 : vector<8x128xf32>
    %cst_85 = arith.constant 0.000000e+00 : f32
    %160 = vector.broadcast %cst_85 : f32 to vector<8x128xf32>
    %161 = arith.maximumf %159, %160 : vector<8x128xf32>
    %cst_86 = arith.constant dense<0.000000e+00> : vector<8x32xf32>
    %162 = tpu.matmul %161, %154, %cst_86 {dimension_numbers = #tpu.dot_dimension_numbers<[1], [0], [0], [1], [0, 0, 1, 1], [], []>} : vector<8x128xf32>, vector<128x32xf32>, vector<8x32xf32> -> vector<8x32xf32>
    %163 = vector.broadcast %156 : vector<1x32xf32> to vector<8x32xf32>
    %164 = arith.addf %162, %163 : vector<8x32xf32>
    %165 = arith.addf %148, %164 : vector<8x32xf32>
    %c1_87 = arith.constant 1 : index
    %c0_88 = arith.constant 0 : index
    %c0_89 = arith.constant 0 : index
    %166 = vector.load %arg12[%c1_87, %c0_88, %c0_89] : memref<4x1x32xf32, #tpu.memory_space<vmem>>, vector<1x1x32xf32>
    %167 = vector.shape_cast %166 : vector<1x1x32xf32> to vector<1x32xf32>
    %c1_90 = arith.constant 1 : index
    %c0_91 = arith.constant 0 : index
    %c0_92 = arith.constant 0 : index
    %168 = vector.load %arg13[%c1_90, %c0_91, %c0_92] : memref<4x1x32xf32, #tpu.memory_space<vmem>>, vector<1x1x32xf32>
    %169 = vector.shape_cast %168 : vector<1x1x32xf32> to vector<1x32xf32>
    %cst_93 = arith.constant dense<0.000000e+00> : vector<8xf32>
    %170 = vector.multi_reduction <add>, %165, %cst_93 [1] : vector<8x32xf32> to vector<8xf32>
    %171 = vector.shape_cast %170 : vector<8xf32> to vector<8x1xf32>
    %cst_94 = arith.constant 3.200000e+01 : f32
    %172 = vector.broadcast %cst_94 : f32 to vector<8x1xf32>
    %173 = arith.divf %171, %172 : vector<8x1xf32>
    %174 = vector.broadcast %173 : vector<8x1xf32> to vector<8x32xf32>
    %175 = arith.subf %165, %174 : vector<8x32xf32>
    %176 = arith.mulf %175, %175 : vector<8x32xf32>
    %cst_95 = arith.constant dense<0.000000e+00> : vector<8xf32>
    %177 = vector.multi_reduction <add>, %176, %cst_95 [1] : vector<8x32xf32> to vector<8xf32>
    %178 = vector.shape_cast %177 : vector<8xf32> to vector<8x1xf32>
    %cst_96 = arith.constant 3.100000e+01 : f32
    %179 = vector.broadcast %cst_96 : f32 to vector<8x1xf32>
    %180 = arith.divf %178, %179 : vector<8x1xf32>
    %181 = math.sqrt %180 : vector<8x1xf32>
    %182 = vector.broadcast %167 : vector<1x32xf32> to vector<8x32xf32>
    %183 = arith.mulf %182, %175 : vector<8x32xf32>
    %cst_97 = arith.constant 9.99999997E-7 : f32
    %184 = vector.broadcast %cst_97 : f32 to vector<8x1xf32>
    %185 = arith.addf %181, %184 : vector<8x1xf32>
    %186 = vector.broadcast %185 : vector<8x1xf32> to vector<8x32xf32>
    %187 = arith.divf %183, %186 : vector<8x32xf32>
    %188 = vector.broadcast %169 : vector<1x32xf32> to vector<8x32xf32>
    %189 = arith.addf %187, %188 : vector<8x32xf32>
    %c4 = arith.constant 4 : index
    %c0_98 = arith.constant 0 : index
    %c0_99 = arith.constant 0 : index
    %190 = vector.load %arg6[%c4, %c0_98, %c0_99] : memref<8x32x32xf32, #tpu.memory_space<vmem>>, vector<1x32x32xf32>
    %191 = vector.shape_cast %190 : vector<1x32x32xf32> to vector<32x32xf32>
    %c4_100 = arith.constant 4 : index
    %c0_101 = arith.constant 0 : index
    %c0_102 = arith.constant 0 : index
    %192 = vector.load %arg7[%c4_100, %c0_101, %c0_102] : memref<8x1x32xf32, #tpu.memory_space<vmem>>, vector<1x1x32xf32>
    %193 = vector.shape_cast %192 : vector<1x1x32xf32> to vector<1x32xf32>
    %c5 = arith.constant 5 : index
    %c0_103 = arith.constant 0 : index
    %c0_104 = arith.constant 0 : index
    %194 = vector.load %arg6[%c5, %c0_103, %c0_104] : memref<8x32x32xf32, #tpu.memory_space<vmem>>, vector<1x32x32xf32>
    %195 = vector.shape_cast %194 : vector<1x32x32xf32> to vector<32x32xf32>
    %c5_105 = arith.constant 5 : index
    %c0_106 = arith.constant 0 : index
    %c0_107 = arith.constant 0 : index
    %196 = vector.load %arg7[%c5_105, %c0_106, %c0_107] : memref<8x1x32xf32, #tpu.memory_space<vmem>>, vector<1x1x32xf32>
    %197 = vector.shape_cast %196 : vector<1x1x32xf32> to vector<1x32xf32>
    %c6 = arith.constant 6 : index
    %c0_108 = arith.constant 0 : index
    %c0_109 = arith.constant 0 : index
    %198 = vector.load %arg6[%c6, %c0_108, %c0_109] : memref<8x32x32xf32, #tpu.memory_space<vmem>>, vector<1x32x32xf32>
    %199 = vector.shape_cast %198 : vector<1x32x32xf32> to vector<32x32xf32>
    %c6_110 = arith.constant 6 : index
    %c0_111 = arith.constant 0 : index
    %c0_112 = arith.constant 0 : index
    %200 = vector.load %arg7[%c6_110, %c0_111, %c0_112] : memref<8x1x32xf32, #tpu.memory_space<vmem>>, vector<1x1x32xf32>
    %201 = vector.shape_cast %200 : vector<1x1x32xf32> to vector<1x32xf32>
    %c7 = arith.constant 7 : index
    %c0_113 = arith.constant 0 : index
    %c0_114 = arith.constant 0 : index
    %202 = vector.load %arg6[%c7, %c0_113, %c0_114] : memref<8x32x32xf32, #tpu.memory_space<vmem>>, vector<1x32x32xf32>
    %203 = vector.shape_cast %202 : vector<1x32x32xf32> to vector<32x32xf32>
    %c7_115 = arith.constant 7 : index
    %c0_116 = arith.constant 0 : index
    %c0_117 = arith.constant 0 : index
    %204 = vector.load %arg7[%c7_115, %c0_116, %c0_117] : memref<8x1x32xf32, #tpu.memory_space<vmem>>, vector<1x1x32xf32>
    %205 = vector.shape_cast %204 : vector<1x1x32xf32> to vector<1x32xf32>
    %cst_118 = arith.constant dense<0.000000e+00> : vector<8x32xf32>
    %206 = tpu.matmul %189, %191, %cst_118 {dimension_numbers = #tpu.dot_dimension_numbers<[1], [0], [0], [1], [0, 0, 1, 1], [], []>} : vector<8x32xf32>, vector<32x32xf32>, vector<8x32xf32> -> vector<8x32xf32>
    %207 = vector.broadcast %193 : vector<1x32xf32> to vector<8x32xf32>
    %208 = arith.addf %206, %207 : vector<8x32xf32>
    %cst_119 = arith.constant dense<0.000000e+00> : vector<8x32xf32>
    %209 = tpu.matmul %189, %195, %cst_119 {dimension_numbers = #tpu.dot_dimension_numbers<[1], [0], [0], [1], [0, 0, 1, 1], [], []>} : vector<8x32xf32>, vector<32x32xf32>, vector<8x32xf32> -> vector<8x32xf32>
    %210 = vector.broadcast %197 : vector<1x32xf32> to vector<8x32xf32>
    %211 = arith.addf %209, %210 : vector<8x32xf32>
    %cst_120 = arith.constant dense<0.000000e+00> : vector<8x32xf32>
    %212 = tpu.matmul %189, %199, %cst_120 {dimension_numbers = #tpu.dot_dimension_numbers<[1], [0], [0], [1], [0, 0, 1, 1], [], []>} : vector<8x32xf32>, vector<32x32xf32>, vector<8x32xf32> -> vector<8x32xf32>
    %213 = vector.broadcast %201 : vector<1x32xf32> to vector<8x32xf32>
    %214 = arith.addf %212, %213 : vector<8x32xf32>
    %215 = vector.extract_strided_slice %214 {offsets = [0, 0], sizes = [8, 8], strides = [1, 1]} : vector<8x32xf32> to vector<8x8xf32>
    %216 = vector.extract_strided_slice %211 {offsets = [0, 0], sizes = [8, 8], strides = [1, 1]} : vector<8x32xf32> to vector<8x8xf32>
    %217 = vector.extract_strided_slice %208 {offsets = [0, 0], sizes = [8, 8], strides = [1, 1]} : vector<8x32xf32> to vector<8x8xf32>
    %cst_121 = arith.constant dense<0.000000e+00> : vector<8x8xf32>
    %218 = tpu.matmul %215, %216, %cst_121 {dimension_numbers = #tpu.dot_dimension_numbers<[1], [1], [0], [0], [0, 0, 1, 0], [], []>} : vector<8x8xf32>, vector<8x8xf32>, vector<8x8xf32> -> vector<8x8xf32>
    %cst_122 = arith.constant 0.353553385 : f32
    %219 = vector.broadcast %cst_122 : f32 to vector<8x8xf32>
    %220 = arith.mulf %218, %219 : vector<8x8xf32>
    %221 = vector.broadcast %7 : vector<1x8xf32> to vector<8x8xf32>
    %222 = arith.addf %220, %221 : vector<8x8xf32>
    %cst_123 = arith.constant dense<0xFF800000> : vector<8xf32>
    %223 = vector.multi_reduction <maximumf>, %222, %cst_123 [1] : vector<8x8xf32> to vector<8xf32>
    %224 = vector.shape_cast %223 : vector<8xf32> to vector<8x1xf32>
    %225 = vector.broadcast %224 : vector<8x1xf32> to vector<8x8xf32>
    %226 = arith.subf %222, %225 : vector<8x8xf32>
    %227 = math.exp %226 : vector<8x8xf32>
    %cst_124 = arith.constant dense<0.000000e+00> : vector<8xf32>
    %228 = vector.multi_reduction <add>, %227, %cst_124 [1] : vector<8x8xf32> to vector<8xf32>
    %229 = vector.shape_cast %228 : vector<8xf32> to vector<8x1xf32>
    %230 = tpu.reciprocal %229 {approx = true} : vector<8x1xf32> -> vector<8x1xf32>
    %231 = vector.broadcast %230 : vector<8x1xf32> to vector<8x8xf32>
    %232 = arith.mulf %227, %231 : vector<8x8xf32>
    %cst_125 = arith.constant dense<0.000000e+00> : vector<8x8xf32>
    %233 = tpu.matmul %232, %217, %cst_125 {dimension_numbers = #tpu.dot_dimension_numbers<[1], [0], [0], [1], [0, 0, 1, 1], [], []>} : vector<8x8xf32>, vector<8x8xf32>, vector<8x8xf32> -> vector<8x8xf32>
    %234 = vector.extract_strided_slice %203 {offsets = [0, 0], sizes = [8, 32], strides = [1, 1]} : vector<32x32xf32> to vector<8x32xf32>
    %cst_126 = arith.constant dense<0.000000e+00> : vector<8x32xf32>
    %235 = tpu.matmul %233, %234, %cst_126 {dimension_numbers = #tpu.dot_dimension_numbers<[1], [0], [0], [1], [0, 0, 1, 1], [], []>} : vector<8x8xf32>, vector<8x32xf32>, vector<8x32xf32> -> vector<8x32xf32>
    %236 = vector.extract_strided_slice %214 {offsets = [0, 8], sizes = [8, 8], strides = [1, 1]} : vector<8x32xf32> to vector<8x8xf32>
    %237 = vector.extract_strided_slice %211 {offsets = [0, 8], sizes = [8, 8], strides = [1, 1]} : vector<8x32xf32> to vector<8x8xf32>
    %238 = vector.extract_strided_slice %208 {offsets = [0, 8], sizes = [8, 8], strides = [1, 1]} : vector<8x32xf32> to vector<8x8xf32>
    %cst_127 = arith.constant dense<0.000000e+00> : vector<8x8xf32>
    %239 = tpu.matmul %236, %237, %cst_127 {dimension_numbers = #tpu.dot_dimension_numbers<[1], [1], [0], [0], [0, 0, 1, 0], [], []>} : vector<8x8xf32>, vector<8x8xf32>, vector<8x8xf32> -> vector<8x8xf32>
    %cst_128 = arith.constant 0.353553385 : f32
    %240 = vector.broadcast %cst_128 : f32 to vector<8x8xf32>
    %241 = arith.mulf %239, %240 : vector<8x8xf32>
    %242 = vector.broadcast %7 : vector<1x8xf32> to vector<8x8xf32>
    %243 = arith.addf %241, %242 : vector<8x8xf32>
    %cst_129 = arith.constant dense<0xFF800000> : vector<8xf32>
    %244 = vector.multi_reduction <maximumf>, %243, %cst_129 [1] : vector<8x8xf32> to vector<8xf32>
    %245 = vector.shape_cast %244 : vector<8xf32> to vector<8x1xf32>
    %246 = vector.broadcast %245 : vector<8x1xf32> to vector<8x8xf32>
    %247 = arith.subf %243, %246 : vector<8x8xf32>
    %248 = math.exp %247 : vector<8x8xf32>
    %cst_130 = arith.constant dense<0.000000e+00> : vector<8xf32>
    %249 = vector.multi_reduction <add>, %248, %cst_130 [1] : vector<8x8xf32> to vector<8xf32>
    %250 = vector.shape_cast %249 : vector<8xf32> to vector<8x1xf32>
    %251 = tpu.reciprocal %250 {approx = true} : vector<8x1xf32> -> vector<8x1xf32>
    %252 = vector.broadcast %251 : vector<8x1xf32> to vector<8x8xf32>
    %253 = arith.mulf %248, %252 : vector<8x8xf32>
    %cst_131 = arith.constant dense<0.000000e+00> : vector<8x8xf32>
    %254 = tpu.matmul %253, %238, %cst_131 {dimension_numbers = #tpu.dot_dimension_numbers<[1], [0], [0], [1], [0, 0, 1, 1], [], []>} : vector<8x8xf32>, vector<8x8xf32>, vector<8x8xf32> -> vector<8x8xf32>
    %255 = vector.extract_strided_slice %203 {offsets = [8, 0], sizes = [8, 32], strides = [1, 1]} : vector<32x32xf32> to vector<8x32xf32>
    %cst_132 = arith.constant dense<0.000000e+00> : vector<8x32xf32>
    %256 = tpu.matmul %254, %255, %cst_132 {dimension_numbers = #tpu.dot_dimension_numbers<[1], [0], [0], [1], [0, 0, 1, 1], [], []>} : vector<8x8xf32>, vector<8x32xf32>, vector<8x32xf32> -> vector<8x32xf32>
    %257 = arith.addf %235, %256 : vector<8x32xf32>
    %258 = vector.extract_strided_slice %214 {offsets = [0, 16], sizes = [8, 8], strides = [1, 1]} : vector<8x32xf32> to vector<8x8xf32>
    %259 = vector.extract_strided_slice %211 {offsets = [0, 16], sizes = [8, 8], strides = [1, 1]} : vector<8x32xf32> to vector<8x8xf32>
    %260 = vector.extract_strided_slice %208 {offsets = [0, 16], sizes = [8, 8], strides = [1, 1]} : vector<8x32xf32> to vector<8x8xf32>
    %cst_133 = arith.constant dense<0.000000e+00> : vector<8x8xf32>
    %261 = tpu.matmul %258, %259, %cst_133 {dimension_numbers = #tpu.dot_dimension_numbers<[1], [1], [0], [0], [0, 0, 1, 0], [], []>} : vector<8x8xf32>, vector<8x8xf32>, vector<8x8xf32> -> vector<8x8xf32>
    %cst_134 = arith.constant 0.353553385 : f32
    %262 = vector.broadcast %cst_134 : f32 to vector<8x8xf32>
    %263 = arith.mulf %261, %262 : vector<8x8xf32>
    %264 = vector.broadcast %7 : vector<1x8xf32> to vector<8x8xf32>
    %265 = arith.addf %263, %264 : vector<8x8xf32>
    %cst_135 = arith.constant dense<0xFF800000> : vector<8xf32>
    %266 = vector.multi_reduction <maximumf>, %265, %cst_135 [1] : vector<8x8xf32> to vector<8xf32>
    %267 = vector.shape_cast %266 : vector<8xf32> to vector<8x1xf32>
    %268 = vector.broadcast %267 : vector<8x1xf32> to vector<8x8xf32>
    %269 = arith.subf %265, %268 : vector<8x8xf32>
    %270 = math.exp %269 : vector<8x8xf32>
    %cst_136 = arith.constant dense<0.000000e+00> : vector<8xf32>
    %271 = vector.multi_reduction <add>, %270, %cst_136 [1] : vector<8x8xf32> to vector<8xf32>
    %272 = vector.shape_cast %271 : vector<8xf32> to vector<8x1xf32>
    %273 = tpu.reciprocal %272 {approx = true} : vector<8x1xf32> -> vector<8x1xf32>
    %274 = vector.broadcast %273 : vector<8x1xf32> to vector<8x8xf32>
    %275 = arith.mulf %270, %274 : vector<8x8xf32>
    %cst_137 = arith.constant dense<0.000000e+00> : vector<8x8xf32>
    %276 = tpu.matmul %275, %260, %cst_137 {dimension_numbers = #tpu.dot_dimension_numbers<[1], [0], [0], [1], [0, 0, 1, 1], [], []>} : vector<8x8xf32>, vector<8x8xf32>, vector<8x8xf32> -> vector<8x8xf32>
    %277 = vector.extract_strided_slice %203 {offsets = [16, 0], sizes = [8, 32], strides = [1, 1]} : vector<32x32xf32> to vector<8x32xf32>
    %cst_138 = arith.constant dense<0.000000e+00> : vector<8x32xf32>
    %278 = tpu.matmul %276, %277, %cst_138 {dimension_numbers = #tpu.dot_dimension_numbers<[1], [0], [0], [1], [0, 0, 1, 1], [], []>} : vector<8x8xf32>, vector<8x32xf32>, vector<8x32xf32> -> vector<8x32xf32>
    %279 = arith.addf %257, %278 : vector<8x32xf32>
    %280 = vector.extract_strided_slice %214 {offsets = [0, 24], sizes = [8, 8], strides = [1, 1]} : vector<8x32xf32> to vector<8x8xf32>
    %281 = vector.extract_strided_slice %211 {offsets = [0, 24], sizes = [8, 8], strides = [1, 1]} : vector<8x32xf32> to vector<8x8xf32>
    %282 = vector.extract_strided_slice %208 {offsets = [0, 24], sizes = [8, 8], strides = [1, 1]} : vector<8x32xf32> to vector<8x8xf32>
    %cst_139 = arith.constant dense<0.000000e+00> : vector<8x8xf32>
    %283 = tpu.matmul %280, %281, %cst_139 {dimension_numbers = #tpu.dot_dimension_numbers<[1], [1], [0], [0], [0, 0, 1, 0], [], []>} : vector<8x8xf32>, vector<8x8xf32>, vector<8x8xf32> -> vector<8x8xf32>
    %cst_140 = arith.constant 0.353553385 : f32
    %284 = vector.broadcast %cst_140 : f32 to vector<8x8xf32>
    %285 = arith.mulf %283, %284 : vector<8x8xf32>
    %286 = vector.broadcast %7 : vector<1x8xf32> to vector<8x8xf32>
    %287 = arith.addf %285, %286 : vector<8x8xf32>
    %cst_141 = arith.constant dense<0xFF800000> : vector<8xf32>
    %288 = vector.multi_reduction <maximumf>, %287, %cst_141 [1] : vector<8x8xf32> to vector<8xf32>
    %289 = vector.shape_cast %288 : vector<8xf32> to vector<8x1xf32>
    %290 = vector.broadcast %289 : vector<8x1xf32> to vector<8x8xf32>
    %291 = arith.subf %287, %290 : vector<8x8xf32>
    %292 = math.exp %291 : vector<8x8xf32>
    %cst_142 = arith.constant dense<0.000000e+00> : vector<8xf32>
    %293 = vector.multi_reduction <add>, %292, %cst_142 [1] : vector<8x8xf32> to vector<8xf32>
    %294 = vector.shape_cast %293 : vector<8xf32> to vector<8x1xf32>
    %295 = tpu.reciprocal %294 {approx = true} : vector<8x1xf32> -> vector<8x1xf32>
    %296 = vector.broadcast %295 : vector<8x1xf32> to vector<8x8xf32>
    %297 = arith.mulf %292, %296 : vector<8x8xf32>
    %cst_143 = arith.constant dense<0.000000e+00> : vector<8x8xf32>
    %298 = tpu.matmul %297, %282, %cst_143 {dimension_numbers = #tpu.dot_dimension_numbers<[1], [0], [0], [1], [0, 0, 1, 1], [], []>} : vector<8x8xf32>, vector<8x8xf32>, vector<8x8xf32> -> vector<8x8xf32>
    %299 = vector.extract_strided_slice %203 {offsets = [24, 0], sizes = [8, 32], strides = [1, 1]} : vector<32x32xf32> to vector<8x32xf32>
    %cst_144 = arith.constant dense<0.000000e+00> : vector<8x32xf32>
    %300 = tpu.matmul %298, %299, %cst_144 {dimension_numbers = #tpu.dot_dimension_numbers<[1], [0], [0], [1], [0, 0, 1, 1], [], []>} : vector<8x8xf32>, vector<8x32xf32>, vector<8x32xf32> -> vector<8x32xf32>
    %301 = arith.addf %279, %300 : vector<8x32xf32>
    %302 = vector.broadcast %205 : vector<1x32xf32> to vector<8x32xf32>
    %303 = arith.addf %301, %302 : vector<8x32xf32>
    %304 = arith.addf %189, %303 : vector<8x32xf32>
    %c2_145 = arith.constant 2 : index
    %c0_146 = arith.constant 0 : index
    %c0_147 = arith.constant 0 : index
    %305 = vector.load %arg12[%c2_145, %c0_146, %c0_147] : memref<4x1x32xf32, #tpu.memory_space<vmem>>, vector<1x1x32xf32>
    %306 = vector.shape_cast %305 : vector<1x1x32xf32> to vector<1x32xf32>
    %c2_148 = arith.constant 2 : index
    %c0_149 = arith.constant 0 : index
    %c0_150 = arith.constant 0 : index
    %307 = vector.load %arg13[%c2_148, %c0_149, %c0_150] : memref<4x1x32xf32, #tpu.memory_space<vmem>>, vector<1x1x32xf32>
    %308 = vector.shape_cast %307 : vector<1x1x32xf32> to vector<1x32xf32>
    %cst_151 = arith.constant dense<0.000000e+00> : vector<8xf32>
    %309 = vector.multi_reduction <add>, %304, %cst_151 [1] : vector<8x32xf32> to vector<8xf32>
    %310 = vector.shape_cast %309 : vector<8xf32> to vector<8x1xf32>
    %cst_152 = arith.constant 3.200000e+01 : f32
    %311 = vector.broadcast %cst_152 : f32 to vector<8x1xf32>
    %312 = arith.divf %310, %311 : vector<8x1xf32>
    %313 = vector.broadcast %312 : vector<8x1xf32> to vector<8x32xf32>
    %314 = arith.subf %304, %313 : vector<8x32xf32>
    %315 = arith.mulf %314, %314 : vector<8x32xf32>
    %cst_153 = arith.constant dense<0.000000e+00> : vector<8xf32>
    %316 = vector.multi_reduction <add>, %315, %cst_153 [1] : vector<8x32xf32> to vector<8xf32>
    %317 = vector.shape_cast %316 : vector<8xf32> to vector<8x1xf32>
    %cst_154 = arith.constant 3.100000e+01 : f32
    %318 = vector.broadcast %cst_154 : f32 to vector<8x1xf32>
    %319 = arith.divf %317, %318 : vector<8x1xf32>
    %320 = math.sqrt %319 : vector<8x1xf32>
    %321 = vector.broadcast %306 : vector<1x32xf32> to vector<8x32xf32>
    %322 = arith.mulf %321, %314 : vector<8x32xf32>
    %cst_155 = arith.constant 9.99999997E-7 : f32
    %323 = vector.broadcast %cst_155 : f32 to vector<8x1xf32>
    %324 = arith.addf %320, %323 : vector<8x1xf32>
    %325 = vector.broadcast %324 : vector<8x1xf32> to vector<8x32xf32>
    %326 = arith.divf %322, %325 : vector<8x32xf32>
    %327 = vector.broadcast %308 : vector<1x32xf32> to vector<8x32xf32>
    %328 = arith.addf %326, %327 : vector<8x32xf32>
    %c1_156 = arith.constant 1 : index
    %c0_157 = arith.constant 0 : index
    %c0_158 = arith.constant 0 : index
    %329 = vector.load %arg8[%c1_156, %c0_157, %c0_158] : memref<2x32x128xf32, #tpu.memory_space<vmem>>, vector<1x32x128xf32>
    %330 = vector.shape_cast %329 : vector<1x32x128xf32> to vector<32x128xf32>
    %c1_159 = arith.constant 1 : index
    %c0_160 = arith.constant 0 : index
    %c0_161 = arith.constant 0 : index
    %331 = vector.load %arg9[%c1_159, %c0_160, %c0_161] : memref<2x1x128xf32, #tpu.memory_space<vmem>>, vector<1x1x128xf32>
    %332 = vector.shape_cast %331 : vector<1x1x128xf32> to vector<1x128xf32>
    %c1_162 = arith.constant 1 : index
    %c0_163 = arith.constant 0 : index
    %c0_164 = arith.constant 0 : index
    %333 = vector.load %arg10[%c1_162, %c0_163, %c0_164] : memref<2x128x32xf32, #tpu.memory_space<vmem>>, vector<1x128x32xf32>
    %334 = vector.shape_cast %333 : vector<1x128x32xf32> to vector<128x32xf32>
    %c1_165 = arith.constant 1 : index
    %c0_166 = arith.constant 0 : index
    %c0_167 = arith.constant 0 : index
    %335 = vector.load %arg11[%c1_165, %c0_166, %c0_167] : memref<2x1x32xf32, #tpu.memory_space<vmem>>, vector<1x1x32xf32>
    %336 = vector.shape_cast %335 : vector<1x1x32xf32> to vector<1x32xf32>
    %cst_168 = arith.constant dense<0.000000e+00> : vector<8x128xf32>
    %337 = tpu.matmul %328, %330, %cst_168 {dimension_numbers = #tpu.dot_dimension_numbers<[1], [0], [0], [1], [0, 0, 1, 1], [], []>} : vector<8x32xf32>, vector<32x128xf32>, vector<8x128xf32> -> vector<8x128xf32>
    %338 = vector.broadcast %332 : vector<1x128xf32> to vector<8x128xf32>
    %339 = arith.addf %337, %338 : vector<8x128xf32>
    %cst_169 = arith.constant 0.000000e+00 : f32
    %340 = vector.broadcast %cst_169 : f32 to vector<8x128xf32>
    %341 = arith.maximumf %339, %340 : vector<8x128xf32>
    %cst_170 = arith.constant dense<0.000000e+00> : vector<8x32xf32>
    %342 = tpu.matmul %341, %334, %cst_170 {dimension_numbers = #tpu.dot_dimension_numbers<[1], [0], [0], [1], [0, 0, 1, 1], [], []>} : vector<8x128xf32>, vector<128x32xf32>, vector<8x32xf32> -> vector<8x32xf32>
    %343 = vector.broadcast %336 : vector<1x32xf32> to vector<8x32xf32>
    %344 = arith.addf %342, %343 : vector<8x32xf32>
    %345 = arith.addf %328, %344 : vector<8x32xf32>
    %c3_171 = arith.constant 3 : index
    %c0_172 = arith.constant 0 : index
    %c0_173 = arith.constant 0 : index
    %346 = vector.load %arg12[%c3_171, %c0_172, %c0_173] : memref<4x1x32xf32, #tpu.memory_space<vmem>>, vector<1x1x32xf32>
    %347 = vector.shape_cast %346 : vector<1x1x32xf32> to vector<1x32xf32>
    %c3_174 = arith.constant 3 : index
    %c0_175 = arith.constant 0 : index
    %c0_176 = arith.constant 0 : index
    %348 = vector.load %arg13[%c3_174, %c0_175, %c0_176] : memref<4x1x32xf32, #tpu.memory_space<vmem>>, vector<1x1x32xf32>
    %349 = vector.shape_cast %348 : vector<1x1x32xf32> to vector<1x32xf32>
    %cst_177 = arith.constant dense<0.000000e+00> : vector<8xf32>
    %350 = vector.multi_reduction <add>, %345, %cst_177 [1] : vector<8x32xf32> to vector<8xf32>
    %351 = vector.shape_cast %350 : vector<8xf32> to vector<8x1xf32>
    %cst_178 = arith.constant 3.200000e+01 : f32
    %352 = vector.broadcast %cst_178 : f32 to vector<8x1xf32>
    %353 = arith.divf %351, %352 : vector<8x1xf32>
    %354 = vector.broadcast %353 : vector<8x1xf32> to vector<8x32xf32>
    %355 = arith.subf %345, %354 : vector<8x32xf32>
    %356 = arith.mulf %355, %355 : vector<8x32xf32>
    %cst_179 = arith.constant dense<0.000000e+00> : vector<8xf32>
    %357 = vector.multi_reduction <add>, %356, %cst_179 [1] : vector<8x32xf32> to vector<8xf32>
    %358 = vector.shape_cast %357 : vector<8xf32> to vector<8x1xf32>
    %cst_180 = arith.constant 3.100000e+01 : f32
    %359 = vector.broadcast %cst_180 : f32 to vector<8x1xf32>
    %360 = arith.divf %358, %359 : vector<8x1xf32>
    %361 = math.sqrt %360 : vector<8x1xf32>
    %362 = vector.broadcast %347 : vector<1x32xf32> to vector<8x32xf32>
    %363 = arith.mulf %362, %355 : vector<8x32xf32>
    %cst_181 = arith.constant 9.99999997E-7 : f32
    %364 = vector.broadcast %cst_181 : f32 to vector<8x1xf32>
    %365 = arith.addf %361, %364 : vector<8x1xf32>
    %366 = vector.broadcast %365 : vector<8x1xf32> to vector<8x32xf32>
    %367 = arith.divf %363, %366 : vector<8x32xf32>
    %368 = vector.broadcast %349 : vector<1x32xf32> to vector<8x32xf32>
    %369 = arith.addf %367, %368 : vector<8x32xf32>
    %c0_182 = arith.constant 0 : index
    %c0_183 = arith.constant 0 : index
    %c0_184 = arith.constant 0 : index
    %370 = vector.load %arg22[%c0_182, %c0_183, %c0_184] : memref<1x8x32xf32, #tpu.memory_space<vmem>>, vector<1x8x32xf32>
    %371 = vector.shape_cast %370 : vector<1x8x32xf32> to vector<8x32xf32>
    %372 = vector.shape_cast %369 : vector<8x32xf32> to vector<1x8x32xf32>
    tpu.vector_store %arg22[%c0_182, %c0_183, %c0_184], %372 {strides = array<i32>} : memref<1x8x32xf32, #tpu.memory_space<vmem>>, vector<1x8x32xf32>,
    %c0_185 = arith.constant 0 : index
    %c0_186 = arith.constant 0 : index
    %c0_187 = arith.constant 0 : index
    %373 = vector.load %arg14[%c0_185, %c0_186, %c0_187] : memref<24x32x32xf32, #tpu.memory_space<vmem>>, vector<1x32x32xf32>
    %374 = vector.shape_cast %373 : vector<1x32x32xf32> to vector<32x32xf32>
    %c0_188 = arith.constant 0 : index
    %c0_189 = arith.constant 0 : index
    %c0_190 = arith.constant 0 : index
    %375 = vector.load %arg15[%c0_188, %c0_189, %c0_190] : memref<24x1x32xf32, #tpu.memory_space<vmem>>, vector<1x1x32xf32>
    %376 = vector.shape_cast %375 : vector<1x1x32xf32> to vector<1x32xf32>
    %c1_191 = arith.constant 1 : index
    %c0_192 = arith.constant 0 : index
    %c0_193 = arith.constant 0 : index
    %377 = vector.load %arg14[%c1_191, %c0_192, %c0_193] : memref<24x32x32xf32, #tpu.memory_space<vmem>>, vector<1x32x32xf32>
    %378 = vector.shape_cast %377 : vector<1x32x32xf32> to vector<32x32xf32>
    %c1_194 = arith.constant 1 : index
    %c0_195 = arith.constant 0 : index
    %c0_196 = arith.constant 0 : index
    %379 = vector.load %arg15[%c1_194, %c0_195, %c0_196] : memref<24x1x32xf32, #tpu.memory_space<vmem>>, vector<1x1x32xf32>
    %380 = vector.shape_cast %379 : vector<1x1x32xf32> to vector<1x32xf32>
    %c2_197 = arith.constant 2 : index
    %c0_198 = arith.constant 0 : index
    %c0_199 = arith.constant 0 : index
    %381 = vector.load %arg14[%c2_197, %c0_198, %c0_199] : memref<24x32x32xf32, #tpu.memory_space<vmem>>, vector<1x32x32xf32>
    %382 = vector.shape_cast %381 : vector<1x32x32xf32> to vector<32x32xf32>
    %c2_200 = arith.constant 2 : index
    %c0_201 = arith.constant 0 : index
    %c0_202 = arith.constant 0 : index
    %383 = vector.load %arg15[%c2_200, %c0_201, %c0_202] : memref<24x1x32xf32, #tpu.memory_space<vmem>>, vector<1x1x32xf32>
    %384 = vector.shape_cast %383 : vector<1x1x32xf32> to vector<1x32xf32>
    %c3_203 = arith.constant 3 : index
    %c0_204 = arith.constant 0 : index
    %c0_205 = arith.constant 0 : index
    %385 = vector.load %arg14[%c3_203, %c0_204, %c0_205] : memref<24x32x32xf32, #tpu.memory_space<vmem>>, vector<1x32x32xf32>
    %386 = vector.shape_cast %385 : vector<1x32x32xf32> to vector<32x32xf32>
    %c3_206 = arith.constant 3 : index
    %c0_207 = arith.constant 0 : index
    %c0_208 = arith.constant 0 : index
    %387 = vector.load %arg15[%c3_206, %c0_207, %c0_208] : memref<24x1x32xf32, #tpu.memory_space<vmem>>, vector<1x1x32xf32>
    %388 = vector.shape_cast %387 : vector<1x1x32xf32> to vector<1x32xf32>
    %cst_209 = arith.constant dense<0.000000e+00> : vector<8x32xf32>
    %389 = tpu.matmul %3, %374, %cst_209 {dimension_numbers = #tpu.dot_dimension_numbers<[1], [0], [0], [1], [0, 0, 1, 1], [], []>} : vector<8x32xf32>, vector<32x32xf32>, vector<8x32xf32> -> vector<8x32xf32>
    %390 = vector.broadcast %376 : vector<1x32xf32> to vector<8x32xf32>
    %391 = arith.addf %389, %390 : vector<8x32xf32>
    %cst_210 = arith.constant dense<0.000000e+00> : vector<8x32xf32>
    %392 = tpu.matmul %3, %378, %cst_210 {dimension_numbers = #tpu.dot_dimension_numbers<[1], [0], [0], [1], [0, 0, 1, 1], [], []>} : vector<8x32xf32>, vector<32x32xf32>, vector<8x32xf32> -> vector<8x32xf32>
    %393 = vector.broadcast %380 : vector<1x32xf32> to vector<8x32xf32>
    %394 = arith.addf %392, %393 : vector<8x32xf32>
    %cst_211 = arith.constant dense<0.000000e+00> : vector<8x32xf32>
    %395 = tpu.matmul %3, %382, %cst_211 {dimension_numbers = #tpu.dot_dimension_numbers<[1], [0], [0], [1], [0, 0, 1, 1], [], []>} : vector<8x32xf32>, vector<32x32xf32>, vector<8x32xf32> -> vector<8x32xf32>
    %396 = vector.broadcast %384 : vector<1x32xf32> to vector<8x32xf32>
    %397 = arith.addf %395, %396 : vector<8x32xf32>
    %398 = vector.extract_strided_slice %397 {offsets = [0, 0], sizes = [8, 8], strides = [1, 1]} : vector<8x32xf32> to vector<8x8xf32>
    %399 = vector.extract_strided_slice %394 {offsets = [0, 0], sizes = [8, 8], strides = [1, 1]} : vector<8x32xf32> to vector<8x8xf32>
    %400 = vector.extract_strided_slice %391 {offsets = [0, 0], sizes = [8, 8], strides = [1, 1]} : vector<8x32xf32> to vector<8x8xf32>
    %cst_212 = arith.constant dense<0.000000e+00> : vector<8x8xf32>
    %401 = tpu.matmul %398, %399, %cst_212 {dimension_numbers = #tpu.dot_dimension_numbers<[1], [1], [0], [0], [0, 0, 1, 0], [], []>} : vector<8x8xf32>, vector<8x8xf32>, vector<8x8xf32> -> vector<8x8xf32>
    %cst_213 = arith.constant 0.353553385 : f32
    %402 = vector.broadcast %cst_213 : f32 to vector<8x8xf32>
    %403 = arith.mulf %401, %402 : vector<8x8xf32>
    %cst_214 = arith.constant dense<0xFF800000> : vector<8xf32>
    %404 = vector.multi_reduction <maximumf>, %403, %cst_214 [1] : vector<8x8xf32> to vector<8xf32>
    %405 = vector.shape_cast %404 : vector<8xf32> to vector<8x1xf32>
    %406 = vector.broadcast %405 : vector<8x1xf32> to vector<8x8xf32>
    %407 = arith.subf %403, %406 : vector<8x8xf32>
    %408 = math.exp %407 : vector<8x8xf32>
    %cst_215 = arith.constant dense<0.000000e+00> : vector<8xf32>
    %409 = vector.multi_reduction <add>, %408, %cst_215 [1] : vector<8x8xf32> to vector<8xf32>
    %410 = vector.shape_cast %409 : vector<8xf32> to vector<8x1xf32>
    %411 = tpu.reciprocal %410 {approx = true} : vector<8x1xf32> -> vector<8x1xf32>
    %412 = vector.broadcast %411 : vector<8x1xf32> to vector<8x8xf32>
    %413 = arith.mulf %408, %412 : vector<8x8xf32>
    %cst_216 = arith.constant dense<0.000000e+00> : vector<8x8xf32>
    %414 = tpu.matmul %413, %400, %cst_216 {dimension_numbers = #tpu.dot_dimension_numbers<[1], [0], [0], [1], [0, 0, 1, 1], [], []>} : vector<8x8xf32>, vector<8x8xf32>, vector<8x8xf32> -> vector<8x8xf32>
    %415 = vector.extract_strided_slice %386 {offsets = [0, 0], sizes = [8, 32], strides = [1, 1]} : vector<32x32xf32> to vector<8x32xf32>
    %cst_217 = arith.constant dense<0.000000e+00> : vector<8x32xf32>
    %416 = tpu.matmul %414, %415, %cst_217 {dimension_numbers = #tpu.dot_dimension_numbers<[1], [0], [0], [1], [0, 0, 1, 1], [], []>} : vector<8x8xf32>, vector<8x32xf32>, vector<8x32xf32> -> vector<8x32xf32>
    %417 = vector.extract_strided_slice %397 {offsets = [0, 8], sizes = [8, 8], strides = [1, 1]} : vector<8x32xf32> to vector<8x8xf32>
    %418 = vector.extract_strided_slice %394 {offsets = [0, 8], sizes = [8, 8], strides = [1, 1]} : vector<8x32xf32> to vector<8x8xf32>
    %419 = vector.extract_strided_slice %391 {offsets = [0, 8], sizes = [8, 8], strides = [1, 1]} : vector<8x32xf32> to vector<8x8xf32>
    %cst_218 = arith.constant dense<0.000000e+00> : vector<8x8xf32>
    %420 = tpu.matmul %417, %418, %cst_218 {dimension_numbers = #tpu.dot_dimension_numbers<[1], [1], [0], [0], [0, 0, 1, 0], [], []>} : vector<8x8xf32>, vector<8x8xf32>, vector<8x8xf32> -> vector<8x8xf32>
    %cst_219 = arith.constant 0.353553385 : f32
    %421 = vector.broadcast %cst_219 : f32 to vector<8x8xf32>
    %422 = arith.mulf %420, %421 : vector<8x8xf32>
    %cst_220 = arith.constant dense<0xFF800000> : vector<8xf32>
    %423 = vector.multi_reduction <maximumf>, %422, %cst_220 [1] : vector<8x8xf32> to vector<8xf32>
    %424 = vector.shape_cast %423 : vector<8xf32> to vector<8x1xf32>
    %425 = vector.broadcast %424 : vector<8x1xf32> to vector<8x8xf32>
    %426 = arith.subf %422, %425 : vector<8x8xf32>
    %427 = math.exp %426 : vector<8x8xf32>
    %cst_221 = arith.constant dense<0.000000e+00> : vector<8xf32>
    %428 = vector.multi_reduction <add>, %427, %cst_221 [1] : vector<8x8xf32> to vector<8xf32>
    %429 = vector.shape_cast %428 : vector<8xf32> to vector<8x1xf32>
    %430 = tpu.reciprocal %429 {approx = true} : vector<8x1xf32> -> vector<8x1xf32>
    %431 = vector.broadcast %430 : vector<8x1xf32> to vector<8x8xf32>
    %432 = arith.mulf %427, %431 : vector<8x8xf32>
    %cst_222 = arith.constant dense<0.000000e+00> : vector<8x8xf32>
    %433 = tpu.matmul %432, %419, %cst_222 {dimension_numbers = #tpu.dot_dimension_numbers<[1], [0], [0], [1], [0, 0, 1, 1], [], []>} : vector<8x8xf32>, vector<8x8xf32>, vector<8x8xf32> -> vector<8x8xf32>
    %434 = vector.extract_strided_slice %386 {offsets = [8, 0], sizes = [8, 32], strides = [1, 1]} : vector<32x32xf32> to vector<8x32xf32>
    %cst_223 = arith.constant dense<0.000000e+00> : vector<8x32xf32>
    %435 = tpu.matmul %433, %434, %cst_223 {dimension_numbers = #tpu.dot_dimension_numbers<[1], [0], [0], [1], [0, 0, 1, 1], [], []>} : vector<8x8xf32>, vector<8x32xf32>, vector<8x32xf32> -> vector<8x32xf32>
    %436 = arith.addf %416, %435 : vector<8x32xf32>
    %437 = vector.extract_strided_slice %397 {offsets = [0, 16], sizes = [8, 8], strides = [1, 1]} : vector<8x32xf32> to vector<8x8xf32>
    %438 = vector.extract_strided_slice %394 {offsets = [0, 16], sizes = [8, 8], strides = [1, 1]} : vector<8x32xf32> to vector<8x8xf32>
    %439 = vector.extract_strided_slice %391 {offsets = [0, 16], sizes = [8, 8], strides = [1, 1]} : vector<8x32xf32> to vector<8x8xf32>
    %cst_224 = arith.constant dense<0.000000e+00> : vector<8x8xf32>
    %440 = tpu.matmul %437, %438, %cst_224 {dimension_numbers = #tpu.dot_dimension_numbers<[1], [1], [0], [0], [0, 0, 1, 0], [], []>} : vector<8x8xf32>, vector<8x8xf32>, vector<8x8xf32> -> vector<8x8xf32>
    %cst_225 = arith.constant 0.353553385 : f32
    %441 = vector.broadcast %cst_225 : f32 to vector<8x8xf32>
    %442 = arith.mulf %440, %441 : vector<8x8xf32>
    %cst_226 = arith.constant dense<0xFF800000> : vector<8xf32>
    %443 = vector.multi_reduction <maximumf>, %442, %cst_226 [1] : vector<8x8xf32> to vector<8xf32>
    %444 = vector.shape_cast %443 : vector<8xf32> to vector<8x1xf32>
    %445 = vector.broadcast %444 : vector<8x1xf32> to vector<8x8xf32>
    %446 = arith.subf %442, %445 : vector<8x8xf32>
    %447 = math.exp %446 : vector<8x8xf32>
    %cst_227 = arith.constant dense<0.000000e+00> : vector<8xf32>
    %448 = vector.multi_reduction <add>, %447, %cst_227 [1] : vector<8x8xf32> to vector<8xf32>
    %449 = vector.shape_cast %448 : vector<8xf32> to vector<8x1xf32>
    %450 = tpu.reciprocal %449 {approx = true} : vector<8x1xf32> -> vector<8x1xf32>
    %451 = vector.broadcast %450 : vector<8x1xf32> to vector<8x8xf32>
    %452 = arith.mulf %447, %451 : vector<8x8xf32>
    %cst_228 = arith.constant dense<0.000000e+00> : vector<8x8xf32>
    %453 = tpu.matmul %452, %439, %cst_228 {dimension_numbers = #tpu.dot_dimension_numbers<[1], [0], [0], [1], [0, 0, 1, 1], [], []>} : vector<8x8xf32>, vector<8x8xf32>, vector<8x8xf32> -> vector<8x8xf32>
    %454 = vector.extract_strided_slice %386 {offsets = [16, 0], sizes = [8, 32], strides = [1, 1]} : vector<32x32xf32> to vector<8x32xf32>
    %cst_229 = arith.constant dense<0.000000e+00> : vector<8x32xf32>
    %455 = tpu.matmul %453, %454, %cst_229 {dimension_numbers = #tpu.dot_dimension_numbers<[1], [0], [0], [1], [0, 0, 1, 1], [], []>} : vector<8x8xf32>, vector<8x32xf32>, vector<8x32xf32> -> vector<8x32xf32>
    %456 = arith.addf %436, %455 : vector<8x32xf32>
    %457 = vector.extract_strided_slice %397 {offsets = [0, 24], sizes = [8, 8], strides = [1, 1]} : vector<8x32xf32> to vector<8x8xf32>
    %458 = vector.extract_strided_slice %394 {offsets = [0, 24], sizes = [8, 8], strides = [1, 1]} : vector<8x32xf32> to vector<8x8xf32>
    %459 = vector.extract_strided_slice %391 {offsets = [0, 24], sizes = [8, 8], strides = [1, 1]} : vector<8x32xf32> to vector<8x8xf32>
    %cst_230 = arith.constant dense<0.000000e+00> : vector<8x8xf32>
    %460 = tpu.matmul %457, %458, %cst_230 {dimension_numbers = #tpu.dot_dimension_numbers<[1], [1], [0], [0], [0, 0, 1, 0], [], []>} : vector<8x8xf32>, vector<8x8xf32>, vector<8x8xf32> -> vector<8x8xf32>
    %cst_231 = arith.constant 0.353553385 : f32
    %461 = vector.broadcast %cst_231 : f32 to vector<8x8xf32>
    %462 = arith.mulf %460, %461 : vector<8x8xf32>
    %cst_232 = arith.constant dense<0xFF800000> : vector<8xf32>
    %463 = vector.multi_reduction <maximumf>, %462, %cst_232 [1] : vector<8x8xf32> to vector<8xf32>
    %464 = vector.shape_cast %463 : vector<8xf32> to vector<8x1xf32>
    %465 = vector.broadcast %464 : vector<8x1xf32> to vector<8x8xf32>
    %466 = arith.subf %462, %465 : vector<8x8xf32>
    %467 = math.exp %466 : vector<8x8xf32>
    %cst_233 = arith.constant dense<0.000000e+00> : vector<8xf32>
    %468 = vector.multi_reduction <add>, %467, %cst_233 [1] : vector<8x8xf32> to vector<8xf32>
    %469 = vector.shape_cast %468 : vector<8xf32> to vector<8x1xf32>
    %470 = tpu.reciprocal %469 {approx = true} : vector<8x1xf32> -> vector<8x1xf32>
    %471 = vector.broadcast %470 : vector<8x1xf32> to vector<8x8xf32>
    %472 = arith.mulf %467, %471 : vector<8x8xf32>
    %cst_234 = arith.constant dense<0.000000e+00> : vector<8x8xf32>
    %473 = tpu.matmul %472, %459, %cst_234 {dimension_numbers = #tpu.dot_dimension_numbers<[1], [0], [0], [1], [0, 0, 1, 1], [], []>} : vector<8x8xf32>, vector<8x8xf32>, vector<8x8xf32> -> vector<8x8xf32>
    %474 = vector.extract_strided_slice %386 {offsets = [24, 0], sizes = [8, 32], strides = [1, 1]} : vector<32x32xf32> to vector<8x32xf32>
    %cst_235 = arith.constant dense<0.000000e+00> : vector<8x32xf32>
    %475 = tpu.matmul %473, %474, %cst_235 {dimension_numbers = #tpu.dot_dimension_numbers<[1], [0], [0], [1], [0, 0, 1, 1], [], []>} : vector<8x8xf32>, vector<8x32xf32>, vector<8x32xf32> -> vector<8x32xf32>
    %476 = arith.addf %456, %475 : vector<8x32xf32>
    %477 = vector.broadcast %388 : vector<1x32xf32> to vector<8x32xf32>
    %478 = arith.addf %476, %477 : vector<8x32xf32>
    %479 = arith.addf %3, %478 : vector<8x32xf32>
    %c0_236 = arith.constant 0 : index
    %c0_237 = arith.constant 0 : index
    %c0_238 = arith.constant 0 : index
    %480 = vector.load %arg20[%c0_236, %c0_237, %c0_238] : memref<8x1x32xf32, #tpu.memory_space<vmem>>, vector<1x1x32xf32>
    %481 = vector.shape_cast %480 : vector<1x1x32xf32> to vector<1x32xf32>
    %c0_239 = arith.constant 0 : index
    %c0_240 = arith.constant 0 : index
    %c0_241 = arith.constant 0 : index
    %482 = vector.load %arg21[%c0_239, %c0_240, %c0_241] : memref<8x1x32xf32, #tpu.memory_space<vmem>>, vector<1x1x32xf32>
    %483 = vector.shape_cast %482 : vector<1x1x32xf32> to vector<1x32xf32>
    %cst_242 = arith.constant dense<0.000000e+00> : vector<8xf32>
    %484 = vector.multi_reduction <add>, %479, %cst_242 [1] : vector<8x32xf32> to vector<8xf32>
    %485 = vector.shape_cast %484 : vector<8xf32> to vector<8x1xf32>
    %cst_243 = arith.constant 3.200000e+01 : f32
    %486 = vector.broadcast %cst_243 : f32 to vector<8x1xf32>
    %487 = arith.divf %485, %486 : vector<8x1xf32>
    %488 = vector.broadcast %487 : vector<8x1xf32> to vector<8x32xf32>
    %489 = arith.subf %479, %488 : vector<8x32xf32>
    %490 = arith.mulf %489, %489 : vector<8x32xf32>
    %cst_244 = arith.constant dense<0.000000e+00> : vector<8xf32>
    %491 = vector.multi_reduction <add>, %490, %cst_244 [1] : vector<8x32xf32> to vector<8xf32>
    %492 = vector.shape_cast %491 : vector<8xf32> to vector<8x1xf32>
    %cst_245 = arith.constant 3.100000e+01 : f32
    %493 = vector.broadcast %cst_245 : f32 to vector<8x1xf32>
    %494 = arith.divf %492, %493 : vector<8x1xf32>
    %495 = math.sqrt %494 : vector<8x1xf32>
    %496 = vector.broadcast %481 : vector<1x32xf32> to vector<8x32xf32>
    %497 = arith.mulf %496, %489 : vector<8x32xf32>
    %cst_246 = arith.constant 9.99999997E-7 : f32
    %498 = vector.broadcast %cst_246 : f32 to vector<8x1xf32>
    %499 = arith.addf %495, %498 : vector<8x1xf32>
    %500 = vector.broadcast %499 : vector<8x1xf32> to vector<8x32xf32>
    %501 = arith.divf %497, %500 : vector<8x32xf32>
    %502 = vector.broadcast %483 : vector<1x32xf32> to vector<8x32xf32>
    %503 = arith.addf %501, %502 : vector<8x32xf32>
    %c4_247 = arith.constant 4 : index
    %c0_248 = arith.constant 0 : index
    %c0_249 = arith.constant 0 : index
    %504 = vector.load %arg14[%c4_247, %c0_248, %c0_249] : memref<24x32x32xf32, #tpu.memory_space<vmem>>, vector<1x32x32xf32>
    %505 = vector.shape_cast %504 : vector<1x32x32xf32> to vector<32x32xf32>
    %c4_250 = arith.constant 4 : index
    %c0_251 = arith.constant 0 : index
    %c0_252 = arith.constant 0 : index
    %506 = vector.load %arg15[%c4_250, %c0_251, %c0_252] : memref<24x1x32xf32, #tpu.memory_space<vmem>>, vector<1x1x32xf32>
    %507 = vector.shape_cast %506 : vector<1x1x32xf32> to vector<1x32xf32>
    %c5_253 = arith.constant 5 : index
    %c0_254 = arith.constant 0 : index
    %c0_255 = arith.constant 0 : index
    %508 = vector.load %arg14[%c5_253, %c0_254, %c0_255] : memref<24x32x32xf32, #tpu.memory_space<vmem>>, vector<1x32x32xf32>
    %509 = vector.shape_cast %508 : vector<1x32x32xf32> to vector<32x32xf32>
    %c5_256 = arith.constant 5 : index
    %c0_257 = arith.constant 0 : index
    %c0_258 = arith.constant 0 : index
    %510 = vector.load %arg15[%c5_256, %c0_257, %c0_258] : memref<24x1x32xf32, #tpu.memory_space<vmem>>, vector<1x1x32xf32>
    %511 = vector.shape_cast %510 : vector<1x1x32xf32> to vector<1x32xf32>
    %c6_259 = arith.constant 6 : index
    %c0_260 = arith.constant 0 : index
    %c0_261 = arith.constant 0 : index
    %512 = vector.load %arg14[%c6_259, %c0_260, %c0_261] : memref<24x32x32xf32, #tpu.memory_space<vmem>>, vector<1x32x32xf32>
    %513 = vector.shape_cast %512 : vector<1x32x32xf32> to vector<32x32xf32>
    %c6_262 = arith.constant 6 : index
    %c0_263 = arith.constant 0 : index
    %c0_264 = arith.constant 0 : index
    %514 = vector.load %arg15[%c6_262, %c0_263, %c0_264] : memref<24x1x32xf32, #tpu.memory_space<vmem>>, vector<1x1x32xf32>
    %515 = vector.shape_cast %514 : vector<1x1x32xf32> to vector<1x32xf32>
    %c7_265 = arith.constant 7 : index
    %c0_266 = arith.constant 0 : index
    %c0_267 = arith.constant 0 : index
    %516 = vector.load %arg14[%c7_265, %c0_266, %c0_267] : memref<24x32x32xf32, #tpu.memory_space<vmem>>, vector<1x32x32xf32>
    %517 = vector.shape_cast %516 : vector<1x32x32xf32> to vector<32x32xf32>
    %c7_268 = arith.constant 7 : index
    %c0_269 = arith.constant 0 : index
    %c0_270 = arith.constant 0 : index
    %518 = vector.load %arg15[%c7_268, %c0_269, %c0_270] : memref<24x1x32xf32, #tpu.memory_space<vmem>>, vector<1x1x32xf32>
    %519 = vector.shape_cast %518 : vector<1x1x32xf32> to vector<1x32xf32>
    %cst_271 = arith.constant dense<0.000000e+00> : vector<8x32xf32>
    %520 = tpu.matmul %369, %505, %cst_271 {dimension_numbers = #tpu.dot_dimension_numbers<[1], [0], [0], [1], [0, 0, 1, 1], [], []>} : vector<8x32xf32>, vector<32x32xf32>, vector<8x32xf32> -> vector<8x32xf32>
    %521 = vector.broadcast %507 : vector<1x32xf32> to vector<8x32xf32>
    %522 = arith.addf %520, %521 : vector<8x32xf32>
    %cst_272 = arith.constant dense<0.000000e+00> : vector<8x32xf32>
    %523 = tpu.matmul %369, %509, %cst_272 {dimension_numbers = #tpu.dot_dimension_numbers<[1], [0], [0], [1], [0, 0, 1, 1], [], []>} : vector<8x32xf32>, vector<32x32xf32>, vector<8x32xf32> -> vector<8x32xf32>
    %524 = vector.broadcast %511 : vector<1x32xf32> to vector<8x32xf32>
    %525 = arith.addf %523, %524 : vector<8x32xf32>
    %cst_273 = arith.constant dense<0.000000e+00> : vector<8x32xf32>
    %526 = tpu.matmul %503, %513, %cst_273 {dimension_numbers = #tpu.dot_dimension_numbers<[1], [0], [0], [1], [0, 0, 1, 1], [], []>} : vector<8x32xf32>, vector<32x32xf32>, vector<8x32xf32> -> vector<8x32xf32>
    %527 = vector.broadcast %515 : vector<1x32xf32> to vector<8x32xf32>
    %528 = arith.addf %526, %527 : vector<8x32xf32>
    %529 = vector.extract_strided_slice %528 {offsets = [0, 0], sizes = [8, 8], strides = [1, 1]} : vector<8x32xf32> to vector<8x8xf32>
    %530 = vector.extract_strided_slice %525 {offsets = [0, 0], sizes = [8, 8], strides = [1, 1]} : vector<8x32xf32> to vector<8x8xf32>
    %531 = vector.extract_strided_slice %522 {offsets = [0, 0], sizes = [8, 8], strides = [1, 1]} : vector<8x32xf32> to vector<8x8xf32>
    %cst_274 = arith.constant dense<0.000000e+00> : vector<8x8xf32>
    %532 = tpu.matmul %529, %530, %cst_274 {dimension_numbers = #tpu.dot_dimension_numbers<[1], [1], [0], [0], [0, 0, 1, 0], [], []>} : vector<8x8xf32>, vector<8x8xf32>, vector<8x8xf32> -> vector<8x8xf32>
    %cst_275 = arith.constant 0.353553385 : f32
    %533 = vector.broadcast %cst_275 : f32 to vector<8x8xf32>
    %534 = arith.mulf %532, %533 : vector<8x8xf32>
    %535 = vector.broadcast %7 : vector<1x8xf32> to vector<8x8xf32>
    %536 = arith.addf %534, %535 : vector<8x8xf32>
    %cst_276 = arith.constant dense<0xFF800000> : vector<8xf32>
    %537 = vector.multi_reduction <maximumf>, %536, %cst_276 [1] : vector<8x8xf32> to vector<8xf32>
    %538 = vector.shape_cast %537 : vector<8xf32> to vector<8x1xf32>
    %539 = vector.broadcast %538 : vector<8x1xf32> to vector<8x8xf32>
    %540 = arith.subf %536, %539 : vector<8x8xf32>
    %541 = math.exp %540 : vector<8x8xf32>
    %cst_277 = arith.constant dense<0.000000e+00> : vector<8xf32>
    %542 = vector.multi_reduction <add>, %541, %cst_277 [1] : vector<8x8xf32> to vector<8xf32>
    %543 = vector.shape_cast %542 : vector<8xf32> to vector<8x1xf32>
    %544 = tpu.reciprocal %543 {approx = true} : vector<8x1xf32> -> vector<8x1xf32>
    %545 = vector.broadcast %544 : vector<8x1xf32> to vector<8x8xf32>
    %546 = arith.mulf %541, %545 : vector<8x8xf32>
    %cst_278 = arith.constant dense<0.000000e+00> : vector<8x8xf32>
    %547 = tpu.matmul %546, %531, %cst_278 {dimension_numbers = #tpu.dot_dimension_numbers<[1], [0], [0], [1], [0, 0, 1, 1], [], []>} : vector<8x8xf32>, vector<8x8xf32>, vector<8x8xf32> -> vector<8x8xf32>
    %548 = vector.extract_strided_slice %517 {offsets = [0, 0], sizes = [8, 32], strides = [1, 1]} : vector<32x32xf32> to vector<8x32xf32>
    %cst_279 = arith.constant dense<0.000000e+00> : vector<8x32xf32>
    %549 = tpu.matmul %547, %548, %cst_279 {dimension_numbers = #tpu.dot_dimension_numbers<[1], [0], [0], [1], [0, 0, 1, 1], [], []>} : vector<8x8xf32>, vector<8x32xf32>, vector<8x32xf32> -> vector<8x32xf32>
    %550 = vector.extract_strided_slice %528 {offsets = [0, 8], sizes = [8, 8], strides = [1, 1]} : vector<8x32xf32> to vector<8x8xf32>
    %551 = vector.extract_strided_slice %525 {offsets = [0, 8], sizes = [8, 8], strides = [1, 1]} : vector<8x32xf32> to vector<8x8xf32>
    %552 = vector.extract_strided_slice %522 {offsets = [0, 8], sizes = [8, 8], strides = [1, 1]} : vector<8x32xf32> to vector<8x8xf32>
    %cst_280 = arith.constant dense<0.000000e+00> : vector<8x8xf32>
    %553 = tpu.matmul %550, %551, %cst_280 {dimension_numbers = #tpu.dot_dimension_numbers<[1], [1], [0], [0], [0, 0, 1, 0], [], []>} : vector<8x8xf32>, vector<8x8xf32>, vector<8x8xf32> -> vector<8x8xf32>
    %cst_281 = arith.constant 0.353553385 : f32
    %554 = vector.broadcast %cst_281 : f32 to vector<8x8xf32>
    %555 = arith.mulf %553, %554 : vector<8x8xf32>
    %556 = vector.broadcast %7 : vector<1x8xf32> to vector<8x8xf32>
    %557 = arith.addf %555, %556 : vector<8x8xf32>
    %cst_282 = arith.constant dense<0xFF800000> : vector<8xf32>
    %558 = vector.multi_reduction <maximumf>, %557, %cst_282 [1] : vector<8x8xf32> to vector<8xf32>
    %559 = vector.shape_cast %558 : vector<8xf32> to vector<8x1xf32>
    %560 = vector.broadcast %559 : vector<8x1xf32> to vector<8x8xf32>
    %561 = arith.subf %557, %560 : vector<8x8xf32>
    %562 = math.exp %561 : vector<8x8xf32>
    %cst_283 = arith.constant dense<0.000000e+00> : vector<8xf32>
    %563 = vector.multi_reduction <add>, %562, %cst_283 [1] : vector<8x8xf32> to vector<8xf32>
    %564 = vector.shape_cast %563 : vector<8xf32> to vector<8x1xf32>
    %565 = tpu.reciprocal %564 {approx = true} : vector<8x1xf32> -> vector<8x1xf32>
    %566 = vector.broadcast %565 : vector<8x1xf32> to vector<8x8xf32>
    %567 = arith.mulf %562, %566 : vector<8x8xf32>
    %cst_284 = arith.constant dense<0.000000e+00> : vector<8x8xf32>
    %568 = tpu.matmul %567, %552, %cst_284 {dimension_numbers = #tpu.dot_dimension_numbers<[1], [0], [0], [1], [0, 0, 1, 1], [], []>} : vector<8x8xf32>, vector<8x8xf32>, vector<8x8xf32> -> vector<8x8xf32>
    %569 = vector.extract_strided_slice %517 {offsets = [8, 0], sizes = [8, 32], strides = [1, 1]} : vector<32x32xf32> to vector<8x32xf32>
    %cst_285 = arith.constant dense<0.000000e+00> : vector<8x32xf32>
    %570 = tpu.matmul %568, %569, %cst_285 {dimension_numbers = #tpu.dot_dimension_numbers<[1], [0], [0], [1], [0, 0, 1, 1], [], []>} : vector<8x8xf32>, vector<8x32xf32>, vector<8x32xf32> -> vector<8x32xf32>
    %571 = arith.addf %549, %570 : vector<8x32xf32>
    %572 = vector.extract_strided_slice %528 {offsets = [0, 16], sizes = [8, 8], strides = [1, 1]} : vector<8x32xf32> to vector<8x8xf32>
    %573 = vector.extract_strided_slice %525 {offsets = [0, 16], sizes = [8, 8], strides = [1, 1]} : vector<8x32xf32> to vector<8x8xf32>
    %574 = vector.extract_strided_slice %522 {offsets = [0, 16], sizes = [8, 8], strides = [1, 1]} : vector<8x32xf32> to vector<8x8xf32>
    %cst_286 = arith.constant dense<0.000000e+00> : vector<8x8xf32>
    %575 = tpu.matmul %572, %573, %cst_286 {dimension_numbers = #tpu.dot_dimension_numbers<[1], [1], [0], [0], [0, 0, 1, 0], [], []>} : vector<8x8xf32>, vector<8x8xf32>, vector<8x8xf32> -> vector<8x8xf32>
    %cst_287 = arith.constant 0.353553385 : f32
    %576 = vector.broadcast %cst_287 : f32 to vector<8x8xf32>
    %577 = arith.mulf %575, %576 : vector<8x8xf32>
    %578 = vector.broadcast %7 : vector<1x8xf32> to vector<8x8xf32>
    %579 = arith.addf %577, %578 : vector<8x8xf32>
    %cst_288 = arith.constant dense<0xFF800000> : vector<8xf32>
    %580 = vector.multi_reduction <maximumf>, %579, %cst_288 [1] : vector<8x8xf32> to vector<8xf32>
    %581 = vector.shape_cast %580 : vector<8xf32> to vector<8x1xf32>
    %582 = vector.broadcast %581 : vector<8x1xf32> to vector<8x8xf32>
    %583 = arith.subf %579, %582 : vector<8x8xf32>
    %584 = math.exp %583 : vector<8x8xf32>
    %cst_289 = arith.constant dense<0.000000e+00> : vector<8xf32>
    %585 = vector.multi_reduction <add>, %584, %cst_289 [1] : vector<8x8xf32> to vector<8xf32>
    %586 = vector.shape_cast %585 : vector<8xf32> to vector<8x1xf32>
    %587 = tpu.reciprocal %586 {approx = true} : vector<8x1xf32> -> vector<8x1xf32>
    %588 = vector.broadcast %587 : vector<8x1xf32> to vector<8x8xf32>
    %589 = arith.mulf %584, %588 : vector<8x8xf32>
    %cst_290 = arith.constant dense<0.000000e+00> : vector<8x8xf32>
    %590 = tpu.matmul %589, %574, %cst_290 {dimension_numbers = #tpu.dot_dimension_numbers<[1], [0], [0], [1], [0, 0, 1, 1], [], []>} : vector<8x8xf32>, vector<8x8xf32>, vector<8x8xf32> -> vector<8x8xf32>
    %591 = vector.extract_strided_slice %517 {offsets = [16, 0], sizes = [8, 32], strides = [1, 1]} : vector<32x32xf32> to vector<8x32xf32>
    %cst_291 = arith.constant dense<0.000000e+00> : vector<8x32xf32>
    %592 = tpu.matmul %590, %591, %cst_291 {dimension_numbers = #tpu.dot_dimension_numbers<[1], [0], [0], [1], [0, 0, 1, 1], [], []>} : vector<8x8xf32>, vector<8x32xf32>, vector<8x32xf32> -> vector<8x32xf32>
    %593 = arith.addf %571, %592 : vector<8x32xf32>
    %594 = vector.extract_strided_slice %528 {offsets = [0, 24], sizes = [8, 8], strides = [1, 1]} : vector<8x32xf32> to vector<8x8xf32>
    %595 = vector.extract_strided_slice %525 {offsets = [0, 24], sizes = [8, 8], strides = [1, 1]} : vector<8x32xf32> to vector<8x8xf32>
    %596 = vector.extract_strided_slice %522 {offsets = [0, 24], sizes = [8, 8], strides = [1, 1]} : vector<8x32xf32> to vector<8x8xf32>
    %cst_292 = arith.constant dense<0.000000e+00> : vector<8x8xf32>
    %597 = tpu.matmul %594, %595, %cst_292 {dimension_numbers = #tpu.dot_dimension_numbers<[1], [1], [0], [0], [0, 0, 1, 0], [], []>} : vector<8x8xf32>, vector<8x8xf32>, vector<8x8xf32> -> vector<8x8xf32>
    %cst_293 = arith.constant 0.353553385 : f32
    %598 = vector.broadcast %cst_293 : f32 to vector<8x8xf32>
    %599 = arith.mulf %597, %598 : vector<8x8xf32>
    %600 = vector.broadcast %7 : vector<1x8xf32> to vector<8x8xf32>
    %601 = arith.addf %599, %600 : vector<8x8xf32>
    %cst_294 = arith.constant dense<0xFF800000> : vector<8xf32>
    %602 = vector.multi_reduction <maximumf>, %601, %cst_294 [1] : vector<8x8xf32> to vector<8xf32>
    %603 = vector.shape_cast %602 : vector<8xf32> to vector<8x1xf32>
    %604 = vector.broadcast %603 : vector<8x1xf32> to vector<8x8xf32>
    %605 = arith.subf %601, %604 : vector<8x8xf32>
    %606 = math.exp %605 : vector<8x8xf32>
    %cst_295 = arith.constant dense<0.000000e+00> : vector<8xf32>
    %607 = vector.multi_reduction <add>, %606, %cst_295 [1] : vector<8x8xf32> to vector<8xf32>
    %608 = vector.shape_cast %607 : vector<8xf32> to vector<8x1xf32>
    %609 = tpu.reciprocal %608 {approx = true} : vector<8x1xf32> -> vector<8x1xf32>
    %610 = vector.broadcast %609 : vector<8x1xf32> to vector<8x8xf32>
    %611 = arith.mulf %606, %610 : vector<8x8xf32>
    %cst_296 = arith.constant dense<0.000000e+00> : vector<8x8xf32>
    %612 = tpu.matmul %611, %596, %cst_296 {dimension_numbers = #tpu.dot_dimension_numbers<[1], [0], [0], [1], [0, 0, 1, 1], [], []>} : vector<8x8xf32>, vector<8x8xf32>, vector<8x8xf32> -> vector<8x8xf32>
    %613 = vector.extract_strided_slice %517 {offsets = [24, 0], sizes = [8, 32], strides = [1, 1]} : vector<32x32xf32> to vector<8x32xf32>
    %cst_297 = arith.constant dense<0.000000e+00> : vector<8x32xf32>
    %614 = tpu.matmul %612, %613, %cst_297 {dimension_numbers = #tpu.dot_dimension_numbers<[1], [0], [0], [1], [0, 0, 1, 1], [], []>} : vector<8x8xf32>, vector<8x32xf32>, vector<8x32xf32> -> vector<8x32xf32>
    %615 = arith.addf %593, %614 : vector<8x32xf32>
    %616 = vector.broadcast %519 : vector<1x32xf32> to vector<8x32xf32>
    %617 = arith.addf %615, %616 : vector<8x32xf32>
    %618 = arith.addf %503, %617 : vector<8x32xf32>
    %c1_298 = arith.constant 1 : index
    %c0_299 = arith.constant 0 : index
    %c0_300 = arith.constant 0 : index
    %619 = vector.load %arg20[%c1_298, %c0_299, %c0_300] : memref<8x1x32xf32, #tpu.memory_space<vmem>>, vector<1x1x32xf32>
    %620 = vector.shape_cast %619 : vector<1x1x32xf32> to vector<1x32xf32>
    %c1_301 = arith.constant 1 : index
    %c0_302 = arith.constant 0 : index
    %c0_303 = arith.constant 0 : index
    %621 = vector.load %arg21[%c1_301, %c0_302, %c0_303] : memref<8x1x32xf32, #tpu.memory_space<vmem>>, vector<1x1x32xf32>
    %622 = vector.shape_cast %621 : vector<1x1x32xf32> to vector<1x32xf32>
    %cst_304 = arith.constant dense<0.000000e+00> : vector<8xf32>
    %623 = vector.multi_reduction <add>, %618, %cst_304 [1] : vector<8x32xf32> to vector<8xf32>
    %624 = vector.shape_cast %623 : vector<8xf32> to vector<8x1xf32>
    %cst_305 = arith.constant 3.200000e+01 : f32
    %625 = vector.broadcast %cst_305 : f32 to vector<8x1xf32>
    %626 = arith.divf %624, %625 : vector<8x1xf32>
    %627 = vector.broadcast %626 : vector<8x1xf32> to vector<8x32xf32>
    %628 = arith.subf %618, %627 : vector<8x32xf32>
    %629 = arith.mulf %628, %628 : vector<8x32xf32>
    %cst_306 = arith.constant dense<0.000000e+00> : vector<8xf32>
    %630 = vector.multi_reduction <add>, %629, %cst_306 [1] : vector<8x32xf32> to vector<8xf32>
    %631 = vector.shape_cast %630 : vector<8xf32> to vector<8x1xf32>
    %cst_307 = arith.constant 3.100000e+01 : f32
    %632 = vector.broadcast %cst_307 : f32 to vector<8x1xf32>
    %633 = arith.divf %631, %632 : vector<8x1xf32>
    %634 = math.sqrt %633 : vector<8x1xf32>
    %635 = vector.broadcast %620 : vector<1x32xf32> to vector<8x32xf32>
    %636 = arith.mulf %635, %628 : vector<8x32xf32>
    %cst_308 = arith.constant 9.99999997E-7 : f32
    %637 = vector.broadcast %cst_308 : f32 to vector<8x1xf32>
    %638 = arith.addf %634, %637 : vector<8x1xf32>
    %639 = vector.broadcast %638 : vector<8x1xf32> to vector<8x32xf32>
    %640 = arith.divf %636, %639 : vector<8x32xf32>
    %641 = vector.broadcast %622 : vector<1x32xf32> to vector<8x32xf32>
    %642 = arith.addf %640, %641 : vector<8x32xf32>
    %c8 = arith.constant 8 : index
    %c0_309 = arith.constant 0 : index
    %c0_310 = arith.constant 0 : index
    %643 = vector.load %arg14[%c8, %c0_309, %c0_310] : memref<24x32x32xf32, #tpu.memory_space<vmem>>, vector<1x32x32xf32>
    %644 = vector.shape_cast %643 : vector<1x32x32xf32> to vector<32x32xf32>
    %c8_311 = arith.constant 8 : index
    %c0_312 = arith.constant 0 : index
    %c0_313 = arith.constant 0 : index
    %645 = vector.load %arg15[%c8_311, %c0_312, %c0_313] : memref<24x1x32xf32, #tpu.memory_space<vmem>>, vector<1x1x32xf32>
    %646 = vector.shape_cast %645 : vector<1x1x32xf32> to vector<1x32xf32>
    %c9 = arith.constant 9 : index
    %c0_314 = arith.constant 0 : index
    %c0_315 = arith.constant 0 : index
    %647 = vector.load %arg14[%c9, %c0_314, %c0_315] : memref<24x32x32xf32, #tpu.memory_space<vmem>>, vector<1x32x32xf32>
    %648 = vector.shape_cast %647 : vector<1x32x32xf32> to vector<32x32xf32>
    %c9_316 = arith.constant 9 : index
    %c0_317 = arith.constant 0 : index
    %c0_318 = arith.constant 0 : index
    %649 = vector.load %arg15[%c9_316, %c0_317, %c0_318] : memref<24x1x32xf32, #tpu.memory_space<vmem>>, vector<1x1x32xf32>
    %650 = vector.shape_cast %649 : vector<1x1x32xf32> to vector<1x32xf32>
    %c10 = arith.constant 10 : index
    %c0_319 = arith.constant 0 : index
    %c0_320 = arith.constant 0 : index
    %651 = vector.load %arg14[%c10, %c0_319, %c0_320] : memref<24x32x32xf32, #tpu.memory_space<vmem>>, vector<1x32x32xf32>
    %652 = vector.shape_cast %651 : vector<1x32x32xf32> to vector<32x32xf32>
    %c10_321 = arith.constant 10 : index
    %c0_322 = arith.constant 0 : index
    %c0_323 = arith.constant 0 : index
    %653 = vector.load %arg15[%c10_321, %c0_322, %c0_323] : memref<24x1x32xf32, #tpu.memory_space<vmem>>, vector<1x1x32xf32>
    %654 = vector.shape_cast %653 : vector<1x1x32xf32> to vector<1x32xf32>
    %c11 = arith.constant 11 : index
    %c0_324 = arith.constant 0 : index
    %c0_325 = arith.constant 0 : index
    %655 = vector.load %arg14[%c11, %c0_324, %c0_325] : memref<24x32x32xf32, #tpu.memory_space<vmem>>, vector<1x32x32xf32>
    %656 = vector.shape_cast %655 : vector<1x32x32xf32> to vector<32x32xf32>
    %c11_326 = arith.constant 11 : index
    %c0_327 = arith.constant 0 : index
    %c0_328 = arith.constant 0 : index
    %657 = vector.load %arg15[%c11_326, %c0_327, %c0_328] : memref<24x1x32xf32, #tpu.memory_space<vmem>>, vector<1x1x32xf32>
    %658 = vector.shape_cast %657 : vector<1x1x32xf32> to vector<1x32xf32>
    %cst_329 = arith.constant dense<0.000000e+00> : vector<8x32xf32>
    %659 = tpu.matmul %5, %644, %cst_329 {dimension_numbers = #tpu.dot_dimension_numbers<[1], [0], [0], [1], [0, 0, 1, 1], [], []>} : vector<8x32xf32>, vector<32x32xf32>, vector<8x32xf32> -> vector<8x32xf32>
    %660 = vector.broadcast %646 : vector<1x32xf32> to vector<8x32xf32>
    %661 = arith.addf %659, %660 : vector<8x32xf32>
    %cst_330 = arith.constant dense<0.000000e+00> : vector<8x32xf32>
    %662 = tpu.matmul %5, %648, %cst_330 {dimension_numbers = #tpu.dot_dimension_numbers<[1], [0], [0], [1], [0, 0, 1, 1], [], []>} : vector<8x32xf32>, vector<32x32xf32>, vector<8x32xf32> -> vector<8x32xf32>
    %663 = vector.broadcast %650 : vector<1x32xf32> to vector<8x32xf32>
    %664 = arith.addf %662, %663 : vector<8x32xf32>
    %cst_331 = arith.constant dense<0.000000e+00> : vector<8x32xf32>
    %665 = tpu.matmul %642, %652, %cst_331 {dimension_numbers = #tpu.dot_dimension_numbers<[1], [0], [0], [1], [0, 0, 1, 1], [], []>} : vector<8x32xf32>, vector<32x32xf32>, vector<8x32xf32> -> vector<8x32xf32>
    %666 = vector.broadcast %654 : vector<1x32xf32> to vector<8x32xf32>
    %667 = arith.addf %665, %666 : vector<8x32xf32>
    %668 = vector.extract_strided_slice %667 {offsets = [0, 0], sizes = [8, 8], strides = [1, 1]} : vector<8x32xf32> to vector<8x8xf32>
    %669 = vector.extract_strided_slice %664 {offsets = [0, 0], sizes = [8, 8], strides = [1, 1]} : vector<8x32xf32> to vector<8x8xf32>
    %670 = vector.extract_strided_slice %661 {offsets = [0, 0], sizes = [8, 8], strides = [1, 1]} : vector<8x32xf32> to vector<8x8xf32>
    %cst_332 = arith.constant dense<0.000000e+00> : vector<8x8xf32>
    %671 = tpu.matmul %668, %669, %cst_332 {dimension_numbers = #tpu.dot_dimension_numbers<[1], [1], [0], [0], [0, 0, 1, 0], [], []>} : vector<8x8xf32>, vector<8x8xf32>, vector<8x8xf32> -> vector<8x8xf32>
    %cst_333 = arith.constant 0.353553385 : f32
    %672 = vector.broadcast %cst_333 : f32 to vector<8x8xf32>
    %673 = arith.mulf %671, %672 : vector<8x8xf32>
    %674 = vector.broadcast %9 : vector<1x8xf32> to vector<8x8xf32>
    %675 = arith.addf %673, %674 : vector<8x8xf32>
    %cst_334 = arith.constant dense<0xFF800000> : vector<8xf32>
    %676 = vector.multi_reduction <maximumf>, %675, %cst_334 [1] : vector<8x8xf32> to vector<8xf32>
    %677 = vector.shape_cast %676 : vector<8xf32> to vector<8x1xf32>
    %678 = vector.broadcast %677 : vector<8x1xf32> to vector<8x8xf32>
    %679 = arith.subf %675, %678 : vector<8x8xf32>
    %680 = math.exp %679 : vector<8x8xf32>
    %cst_335 = arith.constant dense<0.000000e+00> : vector<8xf32>
    %681 = vector.multi_reduction <add>, %680, %cst_335 [1] : vector<8x8xf32> to vector<8xf32>
    %682 = vector.shape_cast %681 : vector<8xf32> to vector<8x1xf32>
    %683 = tpu.reciprocal %682 {approx = true} : vector<8x1xf32> -> vector<8x1xf32>
    %684 = vector.broadcast %683 : vector<8x1xf32> to vector<8x8xf32>
    %685 = arith.mulf %680, %684 : vector<8x8xf32>
    %cst_336 = arith.constant dense<0.000000e+00> : vector<8x8xf32>
    %686 = tpu.matmul %685, %670, %cst_336 {dimension_numbers = #tpu.dot_dimension_numbers<[1], [0], [0], [1], [0, 0, 1, 1], [], []>} : vector<8x8xf32>, vector<8x8xf32>, vector<8x8xf32> -> vector<8x8xf32>
    %687 = vector.extract_strided_slice %656 {offsets = [0, 0], sizes = [8, 32], strides = [1, 1]} : vector<32x32xf32> to vector<8x32xf32>
    %cst_337 = arith.constant dense<0.000000e+00> : vector<8x32xf32>
    %688 = tpu.matmul %686, %687, %cst_337 {dimension_numbers = #tpu.dot_dimension_numbers<[1], [0], [0], [1], [0, 0, 1, 1], [], []>} : vector<8x8xf32>, vector<8x32xf32>, vector<8x32xf32> -> vector<8x32xf32>
    %689 = vector.extract_strided_slice %667 {offsets = [0, 8], sizes = [8, 8], strides = [1, 1]} : vector<8x32xf32> to vector<8x8xf32>
    %690 = vector.extract_strided_slice %664 {offsets = [0, 8], sizes = [8, 8], strides = [1, 1]} : vector<8x32xf32> to vector<8x8xf32>
    %691 = vector.extract_strided_slice %661 {offsets = [0, 8], sizes = [8, 8], strides = [1, 1]} : vector<8x32xf32> to vector<8x8xf32>
    %cst_338 = arith.constant dense<0.000000e+00> : vector<8x8xf32>
    %692 = tpu.matmul %689, %690, %cst_338 {dimension_numbers = #tpu.dot_dimension_numbers<[1], [1], [0], [0], [0, 0, 1, 0], [], []>} : vector<8x8xf32>, vector<8x8xf32>, vector<8x8xf32> -> vector<8x8xf32>
    %cst_339 = arith.constant 0.353553385 : f32
    %693 = vector.broadcast %cst_339 : f32 to vector<8x8xf32>
    %694 = arith.mulf %692, %693 : vector<8x8xf32>
    %695 = vector.broadcast %9 : vector<1x8xf32> to vector<8x8xf32>
    %696 = arith.addf %694, %695 : vector<8x8xf32>
    %cst_340 = arith.constant dense<0xFF800000> : vector<8xf32>
    %697 = vector.multi_reduction <maximumf>, %696, %cst_340 [1] : vector<8x8xf32> to vector<8xf32>
    %698 = vector.shape_cast %697 : vector<8xf32> to vector<8x1xf32>
    %699 = vector.broadcast %698 : vector<8x1xf32> to vector<8x8xf32>
    %700 = arith.subf %696, %699 : vector<8x8xf32>
    %701 = math.exp %700 : vector<8x8xf32>
    %cst_341 = arith.constant dense<0.000000e+00> : vector<8xf32>
    %702 = vector.multi_reduction <add>, %701, %cst_341 [1] : vector<8x8xf32> to vector<8xf32>
    %703 = vector.shape_cast %702 : vector<8xf32> to vector<8x1xf32>
    %704 = tpu.reciprocal %703 {approx = true} : vector<8x1xf32> -> vector<8x1xf32>
    %705 = vector.broadcast %704 : vector<8x1xf32> to vector<8x8xf32>
    %706 = arith.mulf %701, %705 : vector<8x8xf32>
    %cst_342 = arith.constant dense<0.000000e+00> : vector<8x8xf32>
    %707 = tpu.matmul %706, %691, %cst_342 {dimension_numbers = #tpu.dot_dimension_numbers<[1], [0], [0], [1], [0, 0, 1, 1], [], []>} : vector<8x8xf32>, vector<8x8xf32>, vector<8x8xf32> -> vector<8x8xf32>
    %708 = vector.extract_strided_slice %656 {offsets = [8, 0], sizes = [8, 32], strides = [1, 1]} : vector<32x32xf32> to vector<8x32xf32>
    %cst_343 = arith.constant dense<0.000000e+00> : vector<8x32xf32>
    %709 = tpu.matmul %707, %708, %cst_343 {dimension_numbers = #tpu.dot_dimension_numbers<[1], [0], [0], [1], [0, 0, 1, 1], [], []>} : vector<8x8xf32>, vector<8x32xf32>, vector<8x32xf32> -> vector<8x32xf32>
    %710 = arith.addf %688, %709 : vector<8x32xf32>
    %711 = vector.extract_strided_slice %667 {offsets = [0, 16], sizes = [8, 8], strides = [1, 1]} : vector<8x32xf32> to vector<8x8xf32>
    %712 = vector.extract_strided_slice %664 {offsets = [0, 16], sizes = [8, 8], strides = [1, 1]} : vector<8x32xf32> to vector<8x8xf32>
    %713 = vector.extract_strided_slice %661 {offsets = [0, 16], sizes = [8, 8], strides = [1, 1]} : vector<8x32xf32> to vector<8x8xf32>
    %cst_344 = arith.constant dense<0.000000e+00> : vector<8x8xf32>
    %714 = tpu.matmul %711, %712, %cst_344 {dimension_numbers = #tpu.dot_dimension_numbers<[1], [1], [0], [0], [0, 0, 1, 0], [], []>} : vector<8x8xf32>, vector<8x8xf32>, vector<8x8xf32> -> vector<8x8xf32>
    %cst_345 = arith.constant 0.353553385 : f32
    %715 = vector.broadcast %cst_345 : f32 to vector<8x8xf32>
    %716 = arith.mulf %714, %715 : vector<8x8xf32>
    %717 = vector.broadcast %9 : vector<1x8xf32> to vector<8x8xf32>
    %718 = arith.addf %716, %717 : vector<8x8xf32>
    %cst_346 = arith.constant dense<0xFF800000> : vector<8xf32>
    %719 = vector.multi_reduction <maximumf>, %718, %cst_346 [1] : vector<8x8xf32> to vector<8xf32>
    %720 = vector.shape_cast %719 : vector<8xf32> to vector<8x1xf32>
    %721 = vector.broadcast %720 : vector<8x1xf32> to vector<8x8xf32>
    %722 = arith.subf %718, %721 : vector<8x8xf32>
    %723 = math.exp %722 : vector<8x8xf32>
    %cst_347 = arith.constant dense<0.000000e+00> : vector<8xf32>
    %724 = vector.multi_reduction <add>, %723, %cst_347 [1] : vector<8x8xf32> to vector<8xf32>
    %725 = vector.shape_cast %724 : vector<8xf32> to vector<8x1xf32>
    %726 = tpu.reciprocal %725 {approx = true} : vector<8x1xf32> -> vector<8x1xf32>
    %727 = vector.broadcast %726 : vector<8x1xf32> to vector<8x8xf32>
    %728 = arith.mulf %723, %727 : vector<8x8xf32>
    %cst_348 = arith.constant dense<0.000000e+00> : vector<8x8xf32>
    %729 = tpu.matmul %728, %713, %cst_348 {dimension_numbers = #tpu.dot_dimension_numbers<[1], [0], [0], [1], [0, 0, 1, 1], [], []>} : vector<8x8xf32>, vector<8x8xf32>, vector<8x8xf32> -> vector<8x8xf32>
    %730 = vector.extract_strided_slice %656 {offsets = [16, 0], sizes = [8, 32], strides = [1, 1]} : vector<32x32xf32> to vector<8x32xf32>
    %cst_349 = arith.constant dense<0.000000e+00> : vector<8x32xf32>
    %731 = tpu.matmul %729, %730, %cst_349 {dimension_numbers = #tpu.dot_dimension_numbers<[1], [0], [0], [1], [0, 0, 1, 1], [], []>} : vector<8x8xf32>, vector<8x32xf32>, vector<8x32xf32> -> vector<8x32xf32>
    %732 = arith.addf %710, %731 : vector<8x32xf32>
    %733 = vector.extract_strided_slice %667 {offsets = [0, 24], sizes = [8, 8], strides = [1, 1]} : vector<8x32xf32> to vector<8x8xf32>
    %734 = vector.extract_strided_slice %664 {offsets = [0, 24], sizes = [8, 8], strides = [1, 1]} : vector<8x32xf32> to vector<8x8xf32>
    %735 = vector.extract_strided_slice %661 {offsets = [0, 24], sizes = [8, 8], strides = [1, 1]} : vector<8x32xf32> to vector<8x8xf32>
    %cst_350 = arith.constant dense<0.000000e+00> : vector<8x8xf32>
    %736 = tpu.matmul %733, %734, %cst_350 {dimension_numbers = #tpu.dot_dimension_numbers<[1], [1], [0], [0], [0, 0, 1, 0], [], []>} : vector<8x8xf32>, vector<8x8xf32>, vector<8x8xf32> -> vector<8x8xf32>
    %cst_351 = arith.constant 0.353553385 : f32
    %737 = vector.broadcast %cst_351 : f32 to vector<8x8xf32>
    %738 = arith.mulf %736, %737 : vector<8x8xf32>
    %739 = vector.broadcast %9 : vector<1x8xf32> to vector<8x8xf32>
    %740 = arith.addf %738, %739 : vector<8x8xf32>
    %cst_352 = arith.constant dense<0xFF800000> : vector<8xf32>
    %741 = vector.multi_reduction <maximumf>, %740, %cst_352 [1] : vector<8x8xf32> to vector<8xf32>
    %742 = vector.shape_cast %741 : vector<8xf32> to vector<8x1xf32>
    %743 = vector.broadcast %742 : vector<8x1xf32> to vector<8x8xf32>
    %744 = arith.subf %740, %743 : vector<8x8xf32>
    %745 = math.exp %744 : vector<8x8xf32>
    %cst_353 = arith.constant dense<0.000000e+00> : vector<8xf32>
    %746 = vector.multi_reduction <add>, %745, %cst_353 [1] : vector<8x8xf32> to vector<8xf32>
    %747 = vector.shape_cast %746 : vector<8xf32> to vector<8x1xf32>
    %748 = tpu.reciprocal %747 {approx = true} : vector<8x1xf32> -> vector<8x1xf32>
    %749 = vector.broadcast %748 : vector<8x1xf32> to vector<8x8xf32>
    %750 = arith.mulf %745, %749 : vector<8x8xf32>
    %cst_354 = arith.constant dense<0.000000e+00> : vector<8x8xf32>
    %751 = tpu.matmul %750, %735, %cst_354 {dimension_numbers = #tpu.dot_dimension_numbers<[1], [0], [0], [1], [0, 0, 1, 1], [], []>} : vector<8x8xf32>, vector<8x8xf32>, vector<8x8xf32> -> vector<8x8xf32>
    %752 = vector.extract_strided_slice %656 {offsets = [24, 0], sizes = [8, 32], strides = [1, 1]} : vector<32x32xf32> to vector<8x32xf32>
    %cst_355 = arith.constant dense<0.000000e+00> : vector<8x32xf32>
    %753 = tpu.matmul %751, %752, %cst_355 {dimension_numbers = #tpu.dot_dimension_numbers<[1], [0], [0], [1], [0, 0, 1, 1], [], []>} : vector<8x8xf32>, vector<8x32xf32>, vector<8x32xf32> -> vector<8x32xf32>
    %754 = arith.addf %732, %753 : vector<8x32xf32>
    %755 = vector.broadcast %658 : vector<1x32xf32> to vector<8x32xf32>
    %756 = arith.addf %754, %755 : vector<8x32xf32>
    %757 = arith.addf %642, %756 : vector<8x32xf32>
    %c2_356 = arith.constant 2 : index
    %c0_357 = arith.constant 0 : index
    %c0_358 = arith.constant 0 : index
    %758 = vector.load %arg20[%c2_356, %c0_357, %c0_358] : memref<8x1x32xf32, #tpu.memory_space<vmem>>, vector<1x1x32xf32>
    %759 = vector.shape_cast %758 : vector<1x1x32xf32> to vector<1x32xf32>
    %c2_359 = arith.constant 2 : index
    %c0_360 = arith.constant 0 : index
    %c0_361 = arith.constant 0 : index
    %760 = vector.load %arg21[%c2_359, %c0_360, %c0_361] : memref<8x1x32xf32, #tpu.memory_space<vmem>>, vector<1x1x32xf32>
    %761 = vector.shape_cast %760 : vector<1x1x32xf32> to vector<1x32xf32>
    %cst_362 = arith.constant dense<0.000000e+00> : vector<8xf32>
    %762 = vector.multi_reduction <add>, %757, %cst_362 [1] : vector<8x32xf32> to vector<8xf32>
    %763 = vector.shape_cast %762 : vector<8xf32> to vector<8x1xf32>
    %cst_363 = arith.constant 3.200000e+01 : f32
    %764 = vector.broadcast %cst_363 : f32 to vector<8x1xf32>
    %765 = arith.divf %763, %764 : vector<8x1xf32>
    %766 = vector.broadcast %765 : vector<8x1xf32> to vector<8x32xf32>
    %767 = arith.subf %757, %766 : vector<8x32xf32>
    %768 = arith.mulf %767, %767 : vector<8x32xf32>
    %cst_364 = arith.constant dense<0.000000e+00> : vector<8xf32>
    %769 = vector.multi_reduction <add>, %768, %cst_364 [1] : vector<8x32xf32> to vector<8xf32>
    %770 = vector.shape_cast %769 : vector<8xf32> to vector<8x1xf32>
    %cst_365 = arith.constant 3.100000e+01 : f32
    %771 = vector.broadcast %cst_365 : f32 to vector<8x1xf32>
    %772 = arith.divf %770, %771 : vector<8x1xf32>
    %773 = math.sqrt %772 : vector<8x1xf32>
    %774 = vector.broadcast %759 : vector<1x32xf32> to vector<8x32xf32>
    %775 = arith.mulf %774, %767 : vector<8x32xf32>
    %cst_366 = arith.constant 9.99999997E-7 : f32
    %776 = vector.broadcast %cst_366 : f32 to vector<8x1xf32>
    %777 = arith.addf %773, %776 : vector<8x1xf32>
    %778 = vector.broadcast %777 : vector<8x1xf32> to vector<8x32xf32>
    %779 = arith.divf %775, %778 : vector<8x32xf32>
    %780 = vector.broadcast %761 : vector<1x32xf32> to vector<8x32xf32>
    %781 = arith.addf %779, %780 : vector<8x32xf32>
    %c0_367 = arith.constant 0 : index
    %c0_368 = arith.constant 0 : index
    %c0_369 = arith.constant 0 : index
    %782 = vector.load %arg16[%c0_367, %c0_368, %c0_369] : memref<2x32x128xf32, #tpu.memory_space<vmem>>, vector<1x32x128xf32>
    %783 = vector.shape_cast %782 : vector<1x32x128xf32> to vector<32x128xf32>
    %c0_370 = arith.constant 0 : index
    %c0_371 = arith.constant 0 : index
    %c0_372 = arith.constant 0 : index
    %784 = vector.load %arg17[%c0_370, %c0_371, %c0_372] : memref<2x1x128xf32, #tpu.memory_space<vmem>>, vector<1x1x128xf32>
    %785 = vector.shape_cast %784 : vector<1x1x128xf32> to vector<1x128xf32>
    %c0_373 = arith.constant 0 : index
    %c0_374 = arith.constant 0 : index
    %c0_375 = arith.constant 0 : index
    %786 = vector.load %arg18[%c0_373, %c0_374, %c0_375] : memref<2x128x32xf32, #tpu.memory_space<vmem>>, vector<1x128x32xf32>
    %787 = vector.shape_cast %786 : vector<1x128x32xf32> to vector<128x32xf32>
    %c0_376 = arith.constant 0 : index
    %c0_377 = arith.constant 0 : index
    %c0_378 = arith.constant 0 : index
    %788 = vector.load %arg19[%c0_376, %c0_377, %c0_378] : memref<2x1x32xf32, #tpu.memory_space<vmem>>, vector<1x1x32xf32>
    %789 = vector.shape_cast %788 : vector<1x1x32xf32> to vector<1x32xf32>
    %cst_379 = arith.constant dense<0.000000e+00> : vector<8x128xf32>
    %790 = tpu.matmul %781, %783, %cst_379 {dimension_numbers = #tpu.dot_dimension_numbers<[1], [0], [0], [1], [0, 0, 1, 1], [], []>} : vector<8x32xf32>, vector<32x128xf32>, vector<8x128xf32> -> vector<8x128xf32>
    %791 = vector.broadcast %785 : vector<1x128xf32> to vector<8x128xf32>
    %792 = arith.addf %790, %791 : vector<8x128xf32>
    %cst_380 = arith.constant 0.000000e+00 : f32
    %793 = vector.broadcast %cst_380 : f32 to vector<8x128xf32>
    %794 = arith.maximumf %792, %793 : vector<8x128xf32>
    %cst_381 = arith.constant dense<0.000000e+00> : vector<8x32xf32>
    %795 = tpu.matmul %794, %787, %cst_381 {dimension_numbers = #tpu.dot_dimension_numbers<[1], [0], [0], [1], [0, 0, 1, 1], [], []>} : vector<8x128xf32>, vector<128x32xf32>, vector<8x32xf32> -> vector<8x32xf32>
    %796 = vector.broadcast %789 : vector<1x32xf32> to vector<8x32xf32>
    %797 = arith.addf %795, %796 : vector<8x32xf32>
    %798 = arith.addf %781, %797 : vector<8x32xf32>
    %c3_382 = arith.constant 3 : index
    %c0_383 = arith.constant 0 : index
    %c0_384 = arith.constant 0 : index
    %799 = vector.load %arg20[%c3_382, %c0_383, %c0_384] : memref<8x1x32xf32, #tpu.memory_space<vmem>>, vector<1x1x32xf32>
    %800 = vector.shape_cast %799 : vector<1x1x32xf32> to vector<1x32xf32>
    %c3_385 = arith.constant 3 : index
    %c0_386 = arith.constant 0 : index
    %c0_387 = arith.constant 0 : index
    %801 = vector.load %arg21[%c3_385, %c0_386, %c0_387] : memref<8x1x32xf32, #tpu.memory_space<vmem>>, vector<1x1x32xf32>
    %802 = vector.shape_cast %801 : vector<1x1x32xf32> to vector<1x32xf32>
    %cst_388 = arith.constant dense<0.000000e+00> : vector<8xf32>
    %803 = vector.multi_reduction <add>, %798, %cst_388 [1] : vector<8x32xf32> to vector<8xf32>
    %804 = vector.shape_cast %803 : vector<8xf32> to vector<8x1xf32>
    %cst_389 = arith.constant 3.200000e+01 : f32
    %805 = vector.broadcast %cst_389 : f32 to vector<8x1xf32>
    %806 = arith.divf %804, %805 : vector<8x1xf32>
    %807 = vector.broadcast %806 : vector<8x1xf32> to vector<8x32xf32>
    %808 = arith.subf %798, %807 : vector<8x32xf32>
    %809 = arith.mulf %808, %808 : vector<8x32xf32>
    %cst_390 = arith.constant dense<0.000000e+00> : vector<8xf32>
    %810 = vector.multi_reduction <add>, %809, %cst_390 [1] : vector<8x32xf32> to vector<8xf32>
    %811 = vector.shape_cast %810 : vector<8xf32> to vector<8x1xf32>
    %cst_391 = arith.constant 3.100000e+01 : f32
    %812 = vector.broadcast %cst_391 : f32 to vector<8x1xf32>
    %813 = arith.divf %811, %812 : vector<8x1xf32>
    %814 = math.sqrt %813 : vector<8x1xf32>
    %815 = vector.broadcast %800 : vector<1x32xf32> to vector<8x32xf32>
    %816 = arith.mulf %815, %808 : vector<8x32xf32>
    %cst_392 = arith.constant 9.99999997E-7 : f32
    %817 = vector.broadcast %cst_392 : f32 to vector<8x1xf32>
    %818 = arith.addf %814, %817 : vector<8x1xf32>
    %819 = vector.broadcast %818 : vector<8x1xf32> to vector<8x32xf32>
    %820 = arith.divf %816, %819 : vector<8x32xf32>
    %821 = vector.broadcast %802 : vector<1x32xf32> to vector<8x32xf32>
    %822 = arith.addf %820, %821 : vector<8x32xf32>
    %c12 = arith.constant 12 : index
    %c0_393 = arith.constant 0 : index
    %c0_394 = arith.constant 0 : index
    %823 = vector.load %arg14[%c12, %c0_393, %c0_394] : memref<24x32x32xf32, #tpu.memory_space<vmem>>, vector<1x32x32xf32>
    %824 = vector.shape_cast %823 : vector<1x32x32xf32> to vector<32x32xf32>
    %c12_395 = arith.constant 12 : index
    %c0_396 = arith.constant 0 : index
    %c0_397 = arith.constant 0 : index
    %825 = vector.load %arg15[%c12_395, %c0_396, %c0_397] : memref<24x1x32xf32, #tpu.memory_space<vmem>>, vector<1x1x32xf32>
    %826 = vector.shape_cast %825 : vector<1x1x32xf32> to vector<1x32xf32>
    %c13 = arith.constant 13 : index
    %c0_398 = arith.constant 0 : index
    %c0_399 = arith.constant 0 : index
    %827 = vector.load %arg14[%c13, %c0_398, %c0_399] : memref<24x32x32xf32, #tpu.memory_space<vmem>>, vector<1x32x32xf32>
    %828 = vector.shape_cast %827 : vector<1x32x32xf32> to vector<32x32xf32>
    %c13_400 = arith.constant 13 : index
    %c0_401 = arith.constant 0 : index
    %c0_402 = arith.constant 0 : index
    %829 = vector.load %arg15[%c13_400, %c0_401, %c0_402] : memref<24x1x32xf32, #tpu.memory_space<vmem>>, vector<1x1x32xf32>
    %830 = vector.shape_cast %829 : vector<1x1x32xf32> to vector<1x32xf32>
    %c14 = arith.constant 14 : index
    %c0_403 = arith.constant 0 : index
    %c0_404 = arith.constant 0 : index
    %831 = vector.load %arg14[%c14, %c0_403, %c0_404] : memref<24x32x32xf32, #tpu.memory_space<vmem>>, vector<1x32x32xf32>
    %832 = vector.shape_cast %831 : vector<1x32x32xf32> to vector<32x32xf32>
    %c14_405 = arith.constant 14 : index
    %c0_406 = arith.constant 0 : index
    %c0_407 = arith.constant 0 : index
    %833 = vector.load %arg15[%c14_405, %c0_406, %c0_407] : memref<24x1x32xf32, #tpu.memory_space<vmem>>, vector<1x1x32xf32>
    %834 = vector.shape_cast %833 : vector<1x1x32xf32> to vector<1x32xf32>
    %c15 = arith.constant 15 : index
    %c0_408 = arith.constant 0 : index
    %c0_409 = arith.constant 0 : index
    %835 = vector.load %arg14[%c15, %c0_408, %c0_409] : memref<24x32x32xf32, #tpu.memory_space<vmem>>, vector<1x32x32xf32>
    %836 = vector.shape_cast %835 : vector<1x32x32xf32> to vector<32x32xf32>
    %c15_410 = arith.constant 15 : index
    %c0_411 = arith.constant 0 : index
    %c0_412 = arith.constant 0 : index
    %837 = vector.load %arg15[%c15_410, %c0_411, %c0_412] : memref<24x1x32xf32, #tpu.memory_space<vmem>>, vector<1x1x32xf32>
    %838 = vector.shape_cast %837 : vector<1x1x32xf32> to vector<1x32xf32>
    %cst_413 = arith.constant dense<0.000000e+00> : vector<8x32xf32>
    %839 = tpu.matmul %822, %824, %cst_413 {dimension_numbers = #tpu.dot_dimension_numbers<[1], [0], [0], [1], [0, 0, 1, 1], [], []>} : vector<8x32xf32>, vector<32x32xf32>, vector<8x32xf32> -> vector<8x32xf32>
    %840 = vector.broadcast %826 : vector<1x32xf32> to vector<8x32xf32>
    %841 = arith.addf %839, %840 : vector<8x32xf32>
    %cst_414 = arith.constant dense<0.000000e+00> : vector<8x32xf32>
    %842 = tpu.matmul %822, %828, %cst_414 {dimension_numbers = #tpu.dot_dimension_numbers<[1], [0], [0], [1], [0, 0, 1, 1], [], []>} : vector<8x32xf32>, vector<32x32xf32>, vector<8x32xf32> -> vector<8x32xf32>
    %843 = vector.broadcast %830 : vector<1x32xf32> to vector<8x32xf32>
    %844 = arith.addf %842, %843 : vector<8x32xf32>
    %cst_415 = arith.constant dense<0.000000e+00> : vector<8x32xf32>
    %845 = tpu.matmul %822, %832, %cst_415 {dimension_numbers = #tpu.dot_dimension_numbers<[1], [0], [0], [1], [0, 0, 1, 1], [], []>} : vector<8x32xf32>, vector<32x32xf32>, vector<8x32xf32> -> vector<8x32xf32>
    %846 = vector.broadcast %834 : vector<1x32xf32> to vector<8x32xf32>
    %847 = arith.addf %845, %846 : vector<8x32xf32>
    %848 = vector.extract_strided_slice %847 {offsets = [0, 0], sizes = [8, 8], strides = [1, 1]} : vector<8x32xf32> to vector<8x8xf32>
    %849 = vector.extract_strided_slice %844 {offsets = [0, 0], sizes = [8, 8], strides = [1, 1]} : vector<8x32xf32> to vector<8x8xf32>
    %850 = vector.extract_strided_slice %841 {offsets = [0, 0], sizes = [8, 8], strides = [1, 1]} : vector<8x32xf32> to vector<8x8xf32>
    %cst_416 = arith.constant dense<0.000000e+00> : vector<8x8xf32>
    %851 = tpu.matmul %848, %849, %cst_416 {dimension_numbers = #tpu.dot_dimension_numbers<[1], [1], [0], [0], [0, 0, 1, 0], [], []>} : vector<8x8xf32>, vector<8x8xf32>, vector<8x8xf32> -> vector<8x8xf32>
    %cst_417 = arith.constant 0.353553385 : f32
    %852 = vector.broadcast %cst_417 : f32 to vector<8x8xf32>
    %853 = arith.mulf %851, %852 : vector<8x8xf32>
    %cst_418 = arith.constant dense<0xFF800000> : vector<8xf32>
    %854 = vector.multi_reduction <maximumf>, %853, %cst_418 [1] : vector<8x8xf32> to vector<8xf32>
    %855 = vector.shape_cast %854 : vector<8xf32> to vector<8x1xf32>
    %856 = vector.broadcast %855 : vector<8x1xf32> to vector<8x8xf32>
    %857 = arith.subf %853, %856 : vector<8x8xf32>
    %858 = math.exp %857 : vector<8x8xf32>
    %cst_419 = arith.constant dense<0.000000e+00> : vector<8xf32>
    %859 = vector.multi_reduction <add>, %858, %cst_419 [1] : vector<8x8xf32> to vector<8xf32>
    %860 = vector.shape_cast %859 : vector<8xf32> to vector<8x1xf32>
    %861 = tpu.reciprocal %860 {approx = true} : vector<8x1xf32> -> vector<8x1xf32>
    %862 = vector.broadcast %861 : vector<8x1xf32> to vector<8x8xf32>
    %863 = arith.mulf %858, %862 : vector<8x8xf32>
    %cst_420 = arith.constant dense<0.000000e+00> : vector<8x8xf32>
    %864 = tpu.matmul %863, %850, %cst_420 {dimension_numbers = #tpu.dot_dimension_numbers<[1], [0], [0], [1], [0, 0, 1, 1], [], []>} : vector<8x8xf32>, vector<8x8xf32>, vector<8x8xf32> -> vector<8x8xf32>
    %865 = vector.extract_strided_slice %836 {offsets = [0, 0], sizes = [8, 32], strides = [1, 1]} : vector<32x32xf32> to vector<8x32xf32>
    %cst_421 = arith.constant dense<0.000000e+00> : vector<8x32xf32>
    %866 = tpu.matmul %864, %865, %cst_421 {dimension_numbers = #tpu.dot_dimension_numbers<[1], [0], [0], [1], [0, 0, 1, 1], [], []>} : vector<8x8xf32>, vector<8x32xf32>, vector<8x32xf32> -> vector<8x32xf32>
    %867 = vector.extract_strided_slice %847 {offsets = [0, 8], sizes = [8, 8], strides = [1, 1]} : vector<8x32xf32> to vector<8x8xf32>
    %868 = vector.extract_strided_slice %844 {offsets = [0, 8], sizes = [8, 8], strides = [1, 1]} : vector<8x32xf32> to vector<8x8xf32>
    %869 = vector.extract_strided_slice %841 {offsets = [0, 8], sizes = [8, 8], strides = [1, 1]} : vector<8x32xf32> to vector<8x8xf32>
    %cst_422 = arith.constant dense<0.000000e+00> : vector<8x8xf32>
    %870 = tpu.matmul %867, %868, %cst_422 {dimension_numbers = #tpu.dot_dimension_numbers<[1], [1], [0], [0], [0, 0, 1, 0], [], []>} : vector<8x8xf32>, vector<8x8xf32>, vector<8x8xf32> -> vector<8x8xf32>
    %cst_423 = arith.constant 0.353553385 : f32
    %871 = vector.broadcast %cst_423 : f32 to vector<8x8xf32>
    %872 = arith.mulf %870, %871 : vector<8x8xf32>
    %cst_424 = arith.constant dense<0xFF800000> : vector<8xf32>
    %873 = vector.multi_reduction <maximumf>, %872, %cst_424 [1] : vector<8x8xf32> to vector<8xf32>
    %874 = vector.shape_cast %873 : vector<8xf32> to vector<8x1xf32>
    %875 = vector.broadcast %874 : vector<8x1xf32> to vector<8x8xf32>
    %876 = arith.subf %872, %875 : vector<8x8xf32>
    %877 = math.exp %876 : vector<8x8xf32>
    %cst_425 = arith.constant dense<0.000000e+00> : vector<8xf32>
    %878 = vector.multi_reduction <add>, %877, %cst_425 [1] : vector<8x8xf32> to vector<8xf32>
    %879 = vector.shape_cast %878 : vector<8xf32> to vector<8x1xf32>
    %880 = tpu.reciprocal %879 {approx = true} : vector<8x1xf32> -> vector<8x1xf32>
    %881 = vector.broadcast %880 : vector<8x1xf32> to vector<8x8xf32>
    %882 = arith.mulf %877, %881 : vector<8x8xf32>
    %cst_426 = arith.constant dense<0.000000e+00> : vector<8x8xf32>
    %883 = tpu.matmul %882, %869, %cst_426 {dimension_numbers = #tpu.dot_dimension_numbers<[1], [0], [0], [1], [0, 0, 1, 1], [], []>} : vector<8x8xf32>, vector<8x8xf32>, vector<8x8xf32> -> vector<8x8xf32>
    %884 = vector.extract_strided_slice %836 {offsets = [8, 0], sizes = [8, 32], strides = [1, 1]} : vector<32x32xf32> to vector<8x32xf32>
    %cst_427 = arith.constant dense<0.000000e+00> : vector<8x32xf32>
    %885 = tpu.matmul %883, %884, %cst_427 {dimension_numbers = #tpu.dot_dimension_numbers<[1], [0], [0], [1], [0, 0, 1, 1], [], []>} : vector<8x8xf32>, vector<8x32xf32>, vector<8x32xf32> -> vector<8x32xf32>
    %886 = arith.addf %866, %885 : vector<8x32xf32>
    %887 = vector.extract_strided_slice %847 {offsets = [0, 16], sizes = [8, 8], strides = [1, 1]} : vector<8x32xf32> to vector<8x8xf32>
    %888 = vector.extract_strided_slice %844 {offsets = [0, 16], sizes = [8, 8], strides = [1, 1]} : vector<8x32xf32> to vector<8x8xf32>
    %889 = vector.extract_strided_slice %841 {offsets = [0, 16], sizes = [8, 8], strides = [1, 1]} : vector<8x32xf32> to vector<8x8xf32>
    %cst_428 = arith.constant dense<0.000000e+00> : vector<8x8xf32>
    %890 = tpu.matmul %887, %888, %cst_428 {dimension_numbers = #tpu.dot_dimension_numbers<[1], [1], [0], [0], [0, 0, 1, 0], [], []>} : vector<8x8xf32>, vector<8x8xf32>, vector<8x8xf32> -> vector<8x8xf32>
    %cst_429 = arith.constant 0.353553385 : f32
    %891 = vector.broadcast %cst_429 : f32 to vector<8x8xf32>
    %892 = arith.mulf %890, %891 : vector<8x8xf32>
    %cst_430 = arith.constant dense<0xFF800000> : vector<8xf32>
    %893 = vector.multi_reduction <maximumf>, %892, %cst_430 [1] : vector<8x8xf32> to vector<8xf32>
    %894 = vector.shape_cast %893 : vector<8xf32> to vector<8x1xf32>
    %895 = vector.broadcast %894 : vector<8x1xf32> to vector<8x8xf32>
    %896 = arith.subf %892, %895 : vector<8x8xf32>
    %897 = math.exp %896 : vector<8x8xf32>
    %cst_431 = arith.constant dense<0.000000e+00> : vector<8xf32>
    %898 = vector.multi_reduction <add>, %897, %cst_431 [1] : vector<8x8xf32> to vector<8xf32>
    %899 = vector.shape_cast %898 : vector<8xf32> to vector<8x1xf32>
    %900 = tpu.reciprocal %899 {approx = true} : vector<8x1xf32> -> vector<8x1xf32>
    %901 = vector.broadcast %900 : vector<8x1xf32> to vector<8x8xf32>
    %902 = arith.mulf %897, %901 : vector<8x8xf32>
    %cst_432 = arith.constant dense<0.000000e+00> : vector<8x8xf32>
    %903 = tpu.matmul %902, %889, %cst_432 {dimension_numbers = #tpu.dot_dimension_numbers<[1], [0], [0], [1], [0, 0, 1, 1], [], []>} : vector<8x8xf32>, vector<8x8xf32>, vector<8x8xf32> -> vector<8x8xf32>
    %904 = vector.extract_strided_slice %836 {offsets = [16, 0], sizes = [8, 32], strides = [1, 1]} : vector<32x32xf32> to vector<8x32xf32>
    %cst_433 = arith.constant dense<0.000000e+00> : vector<8x32xf32>
    %905 = tpu.matmul %903, %904, %cst_433 {dimension_numbers = #tpu.dot_dimension_numbers<[1], [0], [0], [1], [0, 0, 1, 1], [], []>} : vector<8x8xf32>, vector<8x32xf32>, vector<8x32xf32> -> vector<8x32xf32>
    %906 = arith.addf %886, %905 : vector<8x32xf32>
    %907 = vector.extract_strided_slice %847 {offsets = [0, 24], sizes = [8, 8], strides = [1, 1]} : vector<8x32xf32> to vector<8x8xf32>
    %908 = vector.extract_strided_slice %844 {offsets = [0, 24], sizes = [8, 8], strides = [1, 1]} : vector<8x32xf32> to vector<8x8xf32>
    %909 = vector.extract_strided_slice %841 {offsets = [0, 24], sizes = [8, 8], strides = [1, 1]} : vector<8x32xf32> to vector<8x8xf32>
    %cst_434 = arith.constant dense<0.000000e+00> : vector<8x8xf32>
    %910 = tpu.matmul %907, %908, %cst_434 {dimension_numbers = #tpu.dot_dimension_numbers<[1], [1], [0], [0], [0, 0, 1, 0], [], []>} : vector<8x8xf32>, vector<8x8xf32>, vector<8x8xf32> -> vector<8x8xf32>
    %cst_435 = arith.constant 0.353553385 : f32
    %911 = vector.broadcast %cst_435 : f32 to vector<8x8xf32>
    %912 = arith.mulf %910, %911 : vector<8x8xf32>
    %cst_436 = arith.constant dense<0xFF800000> : vector<8xf32>
    %913 = vector.multi_reduction <maximumf>, %912, %cst_436 [1] : vector<8x8xf32> to vector<8xf32>
    %914 = vector.shape_cast %913 : vector<8xf32> to vector<8x1xf32>
    %915 = vector.broadcast %914 : vector<8x1xf32> to vector<8x8xf32>
    %916 = arith.subf %912, %915 : vector<8x8xf32>
    %917 = math.exp %916 : vector<8x8xf32>
    %cst_437 = arith.constant dense<0.000000e+00> : vector<8xf32>
    %918 = vector.multi_reduction <add>, %917, %cst_437 [1] : vector<8x8xf32> to vector<8xf32>
    %919 = vector.shape_cast %918 : vector<8xf32> to vector<8x1xf32>
    %920 = tpu.reciprocal %919 {approx = true} : vector<8x1xf32> -> vector<8x1xf32>
    %921 = vector.broadcast %920 : vector<8x1xf32> to vector<8x8xf32>
    %922 = arith.mulf %917, %921 : vector<8x8xf32>
    %cst_438 = arith.constant dense<0.000000e+00> : vector<8x8xf32>
    %923 = tpu.matmul %922, %909, %cst_438 {dimension_numbers = #tpu.dot_dimension_numbers<[1], [0], [0], [1], [0, 0, 1, 1], [], []>} : vector<8x8xf32>, vector<8x8xf32>, vector<8x8xf32> -> vector<8x8xf32>
    %924 = vector.extract_strided_slice %836 {offsets = [24, 0], sizes = [8, 32], strides = [1, 1]} : vector<32x32xf32> to vector<8x32xf32>
    %cst_439 = arith.constant dense<0.000000e+00> : vector<8x32xf32>
    %925 = tpu.matmul %923, %924, %cst_439 {dimension_numbers = #tpu.dot_dimension_numbers<[1], [0], [0], [1], [0, 0, 1, 1], [], []>} : vector<8x8xf32>, vector<8x32xf32>, vector<8x32xf32> -> vector<8x32xf32>
    %926 = arith.addf %906, %925 : vector<8x32xf32>
    %927 = vector.broadcast %838 : vector<1x32xf32> to vector<8x32xf32>
    %928 = arith.addf %926, %927 : vector<8x32xf32>
    %929 = arith.addf %822, %928 : vector<8x32xf32>
    %c4_440 = arith.constant 4 : index
    %c0_441 = arith.constant 0 : index
    %c0_442 = arith.constant 0 : index
    %930 = vector.load %arg20[%c4_440, %c0_441, %c0_442] : memref<8x1x32xf32, #tpu.memory_space<vmem>>, vector<1x1x32xf32>
    %931 = vector.shape_cast %930 : vector<1x1x32xf32> to vector<1x32xf32>
    %c4_443 = arith.constant 4 : index
    %c0_444 = arith.constant 0 : index
    %c0_445 = arith.constant 0 : index
    %932 = vector.load %arg21[%c4_443, %c0_444, %c0_445] : memref<8x1x32xf32, #tpu.memory_space<vmem>>, vector<1x1x32xf32>
    %933 = vector.shape_cast %932 : vector<1x1x32xf32> to vector<1x32xf32>
    %cst_446 = arith.constant dense<0.000000e+00> : vector<8xf32>
    %934 = vector.multi_reduction <add>, %929, %cst_446 [1] : vector<8x32xf32> to vector<8xf32>
    %935 = vector.shape_cast %934 : vector<8xf32> to vector<8x1xf32>
    %cst_447 = arith.constant 3.200000e+01 : f32
    %936 = vector.broadcast %cst_447 : f32 to vector<8x1xf32>
    %937 = arith.divf %935, %936 : vector<8x1xf32>
    %938 = vector.broadcast %937 : vector<8x1xf32> to vector<8x32xf32>
    %939 = arith.subf %929, %938 : vector<8x32xf32>
    %940 = arith.mulf %939, %939 : vector<8x32xf32>
    %cst_448 = arith.constant dense<0.000000e+00> : vector<8xf32>
    %941 = vector.multi_reduction <add>, %940, %cst_448 [1] : vector<8x32xf32> to vector<8xf32>
    %942 = vector.shape_cast %941 : vector<8xf32> to vector<8x1xf32>
    %cst_449 = arith.constant 3.100000e+01 : f32
    %943 = vector.broadcast %cst_449 : f32 to vector<8x1xf32>
    %944 = arith.divf %942, %943 : vector<8x1xf32>
    %945 = math.sqrt %944 : vector<8x1xf32>
    %946 = vector.broadcast %931 : vector<1x32xf32> to vector<8x32xf32>
    %947 = arith.mulf %946, %939 : vector<8x32xf32>
    %cst_450 = arith.constant 9.99999997E-7 : f32
    %948 = vector.broadcast %cst_450 : f32 to vector<8x1xf32>
    %949 = arith.addf %945, %948 : vector<8x1xf32>
    %950 = vector.broadcast %949 : vector<8x1xf32> to vector<8x32xf32>
    %951 = arith.divf %947, %950 : vector<8x32xf32>
    %952 = vector.broadcast %933 : vector<1x32xf32> to vector<8x32xf32>
    %953 = arith.addf %951, %952 : vector<8x32xf32>
    %c16 = arith.constant 16 : index
    %c0_451 = arith.constant 0 : index
    %c0_452 = arith.constant 0 : index
    %954 = vector.load %arg14[%c16, %c0_451, %c0_452] : memref<24x32x32xf32, #tpu.memory_space<vmem>>, vector<1x32x32xf32>
    %955 = vector.shape_cast %954 : vector<1x32x32xf32> to vector<32x32xf32>
    %c16_453 = arith.constant 16 : index
    %c0_454 = arith.constant 0 : index
    %c0_455 = arith.constant 0 : index
    %956 = vector.load %arg15[%c16_453, %c0_454, %c0_455] : memref<24x1x32xf32, #tpu.memory_space<vmem>>, vector<1x1x32xf32>
    %957 = vector.shape_cast %956 : vector<1x1x32xf32> to vector<1x32xf32>
    %c17 = arith.constant 17 : index
    %c0_456 = arith.constant 0 : index
    %c0_457 = arith.constant 0 : index
    %958 = vector.load %arg14[%c17, %c0_456, %c0_457] : memref<24x32x32xf32, #tpu.memory_space<vmem>>, vector<1x32x32xf32>
    %959 = vector.shape_cast %958 : vector<1x32x32xf32> to vector<32x32xf32>
    %c17_458 = arith.constant 17 : index
    %c0_459 = arith.constant 0 : index
    %c0_460 = arith.constant 0 : index
    %960 = vector.load %arg15[%c17_458, %c0_459, %c0_460] : memref<24x1x32xf32, #tpu.memory_space<vmem>>, vector<1x1x32xf32>
    %961 = vector.shape_cast %960 : vector<1x1x32xf32> to vector<1x32xf32>
    %c18 = arith.constant 18 : index
    %c0_461 = arith.constant 0 : index
    %c0_462 = arith.constant 0 : index
    %962 = vector.load %arg14[%c18, %c0_461, %c0_462] : memref<24x32x32xf32, #tpu.memory_space<vmem>>, vector<1x32x32xf32>
    %963 = vector.shape_cast %962 : vector<1x32x32xf32> to vector<32x32xf32>
    %c18_463 = arith.constant 18 : index
    %c0_464 = arith.constant 0 : index
    %c0_465 = arith.constant 0 : index
    %964 = vector.load %arg15[%c18_463, %c0_464, %c0_465] : memref<24x1x32xf32, #tpu.memory_space<vmem>>, vector<1x1x32xf32>
    %965 = vector.shape_cast %964 : vector<1x1x32xf32> to vector<1x32xf32>
    %c19 = arith.constant 19 : index
    %c0_466 = arith.constant 0 : index
    %c0_467 = arith.constant 0 : index
    %966 = vector.load %arg14[%c19, %c0_466, %c0_467] : memref<24x32x32xf32, #tpu.memory_space<vmem>>, vector<1x32x32xf32>
    %967 = vector.shape_cast %966 : vector<1x32x32xf32> to vector<32x32xf32>
    %c19_468 = arith.constant 19 : index
    %c0_469 = arith.constant 0 : index
    %c0_470 = arith.constant 0 : index
    %968 = vector.load %arg15[%c19_468, %c0_469, %c0_470] : memref<24x1x32xf32, #tpu.memory_space<vmem>>, vector<1x1x32xf32>
    %969 = vector.shape_cast %968 : vector<1x1x32xf32> to vector<1x32xf32>
    %cst_471 = arith.constant dense<0.000000e+00> : vector<8x32xf32>
    %970 = tpu.matmul %369, %955, %cst_471 {dimension_numbers = #tpu.dot_dimension_numbers<[1], [0], [0], [1], [0, 0, 1, 1], [], []>} : vector<8x32xf32>, vector<32x32xf32>, vector<8x32xf32> -> vector<8x32xf32>
    %971 = vector.broadcast %957 : vector<1x32xf32> to vector<8x32xf32>
    %972 = arith.addf %970, %971 : vector<8x32xf32>
    %cst_472 = arith.constant dense<0.000000e+00> : vector<8x32xf32>
    %973 = tpu.matmul %369, %959, %cst_472 {dimension_numbers = #tpu.dot_dimension_numbers<[1], [0], [0], [1], [0, 0, 1, 1], [], []>} : vector<8x32xf32>, vector<32x32xf32>, vector<8x32xf32> -> vector<8x32xf32>
    %974 = vector.broadcast %961 : vector<1x32xf32> to vector<8x32xf32>
    %975 = arith.addf %973, %974 : vector<8x32xf32>
    %cst_473 = arith.constant dense<0.000000e+00> : vector<8x32xf32>
    %976 = tpu.matmul %953, %963, %cst_473 {dimension_numbers = #tpu.dot_dimension_numbers<[1], [0], [0], [1], [0, 0, 1, 1], [], []>} : vector<8x32xf32>, vector<32x32xf32>, vector<8x32xf32> -> vector<8x32xf32>
    %977 = vector.broadcast %965 : vector<1x32xf32> to vector<8x32xf32>
    %978 = arith.addf %976, %977 : vector<8x32xf32>
    %979 = vector.extract_strided_slice %978 {offsets = [0, 0], sizes = [8, 8], strides = [1, 1]} : vector<8x32xf32> to vector<8x8xf32>
    %980 = vector.extract_strided_slice %975 {offsets = [0, 0], sizes = [8, 8], strides = [1, 1]} : vector<8x32xf32> to vector<8x8xf32>
    %981 = vector.extract_strided_slice %972 {offsets = [0, 0], sizes = [8, 8], strides = [1, 1]} : vector<8x32xf32> to vector<8x8xf32>
    %cst_474 = arith.constant dense<0.000000e+00> : vector<8x8xf32>
    %982 = tpu.matmul %979, %980, %cst_474 {dimension_numbers = #tpu.dot_dimension_numbers<[1], [1], [0], [0], [0, 0, 1, 0], [], []>} : vector<8x8xf32>, vector<8x8xf32>, vector<8x8xf32> -> vector<8x8xf32>
    %cst_475 = arith.constant 0.353553385 : f32
    %983 = vector.broadcast %cst_475 : f32 to vector<8x8xf32>
    %984 = arith.mulf %982, %983 : vector<8x8xf32>
    %985 = vector.broadcast %7 : vector<1x8xf32> to vector<8x8xf32>
    %986 = arith.addf %984, %985 : vector<8x8xf32>
    %cst_476 = arith.constant dense<0xFF800000> : vector<8xf32>
    %987 = vector.multi_reduction <maximumf>, %986, %cst_476 [1] : vector<8x8xf32> to vector<8xf32>
    %988 = vector.shape_cast %987 : vector<8xf32> to vector<8x1xf32>
    %989 = vector.broadcast %988 : vector<8x1xf32> to vector<8x8xf32>
    %990 = arith.subf %986, %989 : vector<8x8xf32>
    %991 = math.exp %990 : vector<8x8xf32>
    %cst_477 = arith.constant dense<0.000000e+00> : vector<8xf32>
    %992 = vector.multi_reduction <add>, %991, %cst_477 [1] : vector<8x8xf32> to vector<8xf32>
    %993 = vector.shape_cast %992 : vector<8xf32> to vector<8x1xf32>
    %994 = tpu.reciprocal %993 {approx = true} : vector<8x1xf32> -> vector<8x1xf32>
    %995 = vector.broadcast %994 : vector<8x1xf32> to vector<8x8xf32>
    %996 = arith.mulf %991, %995 : vector<8x8xf32>
    %cst_478 = arith.constant dense<0.000000e+00> : vector<8x8xf32>
    %997 = tpu.matmul %996, %981, %cst_478 {dimension_numbers = #tpu.dot_dimension_numbers<[1], [0], [0], [1], [0, 0, 1, 1], [], []>} : vector<8x8xf32>, vector<8x8xf32>, vector<8x8xf32> -> vector<8x8xf32>
    %998 = vector.extract_strided_slice %967 {offsets = [0, 0], sizes = [8, 32], strides = [1, 1]} : vector<32x32xf32> to vector<8x32xf32>
    %cst_479 = arith.constant dense<0.000000e+00> : vector<8x32xf32>
    %999 = tpu.matmul %997, %998, %cst_479 {dimension_numbers = #tpu.dot_dimension_numbers<[1], [0], [0], [1], [0, 0, 1, 1], [], []>} : vector<8x8xf32>, vector<8x32xf32>, vector<8x32xf32> -> vector<8x32xf32>
    %1000 = vector.extract_strided_slice %978 {offsets = [0, 8], sizes = [8, 8], strides = [1, 1]} : vector<8x32xf32> to vector<8x8xf32>
    %1001 = vector.extract_strided_slice %975 {offsets = [0, 8], sizes = [8, 8], strides = [1, 1]} : vector<8x32xf32> to vector<8x8xf32>
    %1002 = vector.extract_strided_slice %972 {offsets = [0, 8], sizes = [8, 8], strides = [1, 1]} : vector<8x32xf32> to vector<8x8xf32>
    %cst_480 = arith.constant dense<0.000000e+00> : vector<8x8xf32>
    %1003 = tpu.matmul %1000, %1001, %cst_480 {dimension_numbers = #tpu.dot_dimension_numbers<[1], [1], [0], [0], [0, 0, 1, 0], [], []>} : vector<8x8xf32>, vector<8x8xf32>, vector<8x8xf32> -> vector<8x8xf32>
    %cst_481 = arith.constant 0.353553385 : f32
    %1004 = vector.broadcast %cst_481 : f32 to vector<8x8xf32>
    %1005 = arith.mulf %1003, %1004 : vector<8x8xf32>
    %1006 = vector.broadcast %7 : vector<1x8xf32> to vector<8x8xf32>
    %1007 = arith.addf %1005, %1006 : vector<8x8xf32>
    %cst_482 = arith.constant dense<0xFF800000> : vector<8xf32>
    %1008 = vector.multi_reduction <maximumf>, %1007, %cst_482 [1] : vector<8x8xf32> to vector<8xf32>
    %1009 = vector.shape_cast %1008 : vector<8xf32> to vector<8x1xf32>
    %1010 = vector.broadcast %1009 : vector<8x1xf32> to vector<8x8xf32>
    %1011 = arith.subf %1007, %1010 : vector<8x8xf32>
    %1012 = math.exp %1011 : vector<8x8xf32>
    %cst_483 = arith.constant dense<0.000000e+00> : vector<8xf32>
    %1013 = vector.multi_reduction <add>, %1012, %cst_483 [1] : vector<8x8xf32> to vector<8xf32>
    %1014 = vector.shape_cast %1013 : vector<8xf32> to vector<8x1xf32>
    %1015 = tpu.reciprocal %1014 {approx = true} : vector<8x1xf32> -> vector<8x1xf32>
    %1016 = vector.broadcast %1015 : vector<8x1xf32> to vector<8x8xf32>
    %1017 = arith.mulf %1012, %1016 : vector<8x8xf32>
    %cst_484 = arith.constant dense<0.000000e+00> : vector<8x8xf32>
    %1018 = tpu.matmul %1017, %1002, %cst_484 {dimension_numbers = #tpu.dot_dimension_numbers<[1], [0], [0], [1], [0, 0, 1, 1], [], []>} : vector<8x8xf32>, vector<8x8xf32>, vector<8x8xf32> -> vector<8x8xf32>
    %1019 = vector.extract_strided_slice %967 {offsets = [8, 0], sizes = [8, 32], strides = [1, 1]} : vector<32x32xf32> to vector<8x32xf32>
    %cst_485 = arith.constant dense<0.000000e+00> : vector<8x32xf32>
    %1020 = tpu.matmul %1018, %1019, %cst_485 {dimension_numbers = #tpu.dot_dimension_numbers<[1], [0], [0], [1], [0, 0, 1, 1], [], []>} : vector<8x8xf32>, vector<8x32xf32>, vector<8x32xf32> -> vector<8x32xf32>
    %1021 = arith.addf %999, %1020 : vector<8x32xf32>
    %1022 = vector.extract_strided_slice %978 {offsets = [0, 16], sizes = [8, 8], strides = [1, 1]} : vector<8x32xf32> to vector<8x8xf32>
    %1023 = vector.extract_strided_slice %975 {offsets = [0, 16], sizes = [8, 8], strides = [1, 1]} : vector<8x32xf32> to vector<8x8xf32>
    %1024 = vector.extract_strided_slice %972 {offsets = [0, 16], sizes = [8, 8], strides = [1, 1]} : vector<8x32xf32> to vector<8x8xf32>
    %cst_486 = arith.constant dense<0.000000e+00> : vector<8x8xf32>
    %1025 = tpu.matmul %1022, %1023, %cst_486 {dimension_numbers = #tpu.dot_dimension_numbers<[1], [1], [0], [0], [0, 0, 1, 0], [], []>} : vector<8x8xf32>, vector<8x8xf32>, vector<8x8xf32> -> vector<8x8xf32>
    %cst_487 = arith.constant 0.353553385 : f32
    %1026 = vector.broadcast %cst_487 : f32 to vector<8x8xf32>
    %1027 = arith.mulf %1025, %1026 : vector<8x8xf32>
    %1028 = vector.broadcast %7 : vector<1x8xf32> to vector<8x8xf32>
    %1029 = arith.addf %1027, %1028 : vector<8x8xf32>
    %cst_488 = arith.constant dense<0xFF800000> : vector<8xf32>
    %1030 = vector.multi_reduction <maximumf>, %1029, %cst_488 [1] : vector<8x8xf32> to vector<8xf32>
    %1031 = vector.shape_cast %1030 : vector<8xf32> to vector<8x1xf32>
    %1032 = vector.broadcast %1031 : vector<8x1xf32> to vector<8x8xf32>
    %1033 = arith.subf %1029, %1032 : vector<8x8xf32>
    %1034 = math.exp %1033 : vector<8x8xf32>
    %cst_489 = arith.constant dense<0.000000e+00> : vector<8xf32>
    %1035 = vector.multi_reduction <add>, %1034, %cst_489 [1] : vector<8x8xf32> to vector<8xf32>
    %1036 = vector.shape_cast %1035 : vector<8xf32> to vector<8x1xf32>
    %1037 = tpu.reciprocal %1036 {approx = true} : vector<8x1xf32> -> vector<8x1xf32>
    %1038 = vector.broadcast %1037 : vector<8x1xf32> to vector<8x8xf32>
    %1039 = arith.mulf %1034, %1038 : vector<8x8xf32>
    %cst_490 = arith.constant dense<0.000000e+00> : vector<8x8xf32>
    %1040 = tpu.matmul %1039, %1024, %cst_490 {dimension_numbers = #tpu.dot_dimension_numbers<[1], [0], [0], [1], [0, 0, 1, 1], [], []>} : vector<8x8xf32>, vector<8x8xf32>, vector<8x8xf32> -> vector<8x8xf32>
    %1041 = vector.extract_strided_slice %967 {offsets = [16, 0], sizes = [8, 32], strides = [1, 1]} : vector<32x32xf32> to vector<8x32xf32>
    %cst_491 = arith.constant dense<0.000000e+00> : vector<8x32xf32>
    %1042 = tpu.matmul %1040, %1041, %cst_491 {dimension_numbers = #tpu.dot_dimension_numbers<[1], [0], [0], [1], [0, 0, 1, 1], [], []>} : vector<8x8xf32>, vector<8x32xf32>, vector<8x32xf32> -> vector<8x32xf32>
    %1043 = arith.addf %1021, %1042 : vector<8x32xf32>
    %1044 = vector.extract_strided_slice %978 {offsets = [0, 24], sizes = [8, 8], strides = [1, 1]} : vector<8x32xf32> to vector<8x8xf32>
    %1045 = vector.extract_strided_slice %975 {offsets = [0, 24], sizes = [8, 8], strides = [1, 1]} : vector<8x32xf32> to vector<8x8xf32>
    %1046 = vector.extract_strided_slice %972 {offsets = [0, 24], sizes = [8, 8], strides = [1, 1]} : vector<8x32xf32> to vector<8x8xf32>
    %cst_492 = arith.constant dense<0.000000e+00> : vector<8x8xf32>
    %1047 = tpu.matmul %1044, %1045, %cst_492 {dimension_numbers = #tpu.dot_dimension_numbers<[1], [1], [0], [0], [0, 0, 1, 0], [], []>} : vector<8x8xf32>, vector<8x8xf32>, vector<8x8xf32> -> vector<8x8xf32>
    %cst_493 = arith.constant 0.353553385 : f32
    %1048 = vector.broadcast %cst_493 : f32 to vector<8x8xf32>
    %1049 = arith.mulf %1047, %1048 : vector<8x8xf32>
    %1050 = vector.broadcast %7 : vector<1x8xf32> to vector<8x8xf32>
    %1051 = arith.addf %1049, %1050 : vector<8x8xf32>
    %cst_494 = arith.constant dense<0xFF800000> : vector<8xf32>
    %1052 = vector.multi_reduction <maximumf>, %1051, %cst_494 [1] : vector<8x8xf32> to vector<8xf32>
    %1053 = vector.shape_cast %1052 : vector<8xf32> to vector<8x1xf32>
    %1054 = vector.broadcast %1053 : vector<8x1xf32> to vector<8x8xf32>
    %1055 = arith.subf %1051, %1054 : vector<8x8xf32>
    %1056 = math.exp %1055 : vector<8x8xf32>
    %cst_495 = arith.constant dense<0.000000e+00> : vector<8xf32>
    %1057 = vector.multi_reduction <add>, %1056, %cst_495 [1] : vector<8x8xf32> to vector<8xf32>
    %1058 = vector.shape_cast %1057 : vector<8xf32> to vector<8x1xf32>
    %1059 = tpu.reciprocal %1058 {approx = true} : vector<8x1xf32> -> vector<8x1xf32>
    %1060 = vector.broadcast %1059 : vector<8x1xf32> to vector<8x8xf32>
    %1061 = arith.mulf %1056, %1060 : vector<8x8xf32>
    %cst_496 = arith.constant dense<0.000000e+00> : vector<8x8xf32>
    %1062 = tpu.matmul %1061, %1046, %cst_496 {dimension_numbers = #tpu.dot_dimension_numbers<[1], [0], [0], [1], [0, 0, 1, 1], [], []>} : vector<8x8xf32>, vector<8x8xf32>, vector<8x8xf32> -> vector<8x8xf32>
    %1063 = vector.extract_strided_slice %967 {offsets = [24, 0], sizes = [8, 32], strides = [1, 1]} : vector<32x32xf32> to vector<8x32xf32>
    %cst_497 = arith.constant dense<0.000000e+00> : vector<8x32xf32>
    %1064 = tpu.matmul %1062, %1063, %cst_497 {dimension_numbers = #tpu.dot_dimension_numbers<[1], [0], [0], [1], [0, 0, 1, 1], [], []>} : vector<8x8xf32>, vector<8x32xf32>, vector<8x32xf32> -> vector<8x32xf32>
    %1065 = arith.addf %1043, %1064 : vector<8x32xf32>
    %1066 = vector.broadcast %969 : vector<1x32xf32> to vector<8x32xf32>
    %1067 = arith.addf %1065, %1066 : vector<8x32xf32>
    %1068 = arith.addf %953, %1067 : vector<8x32xf32>
    %c5_498 = arith.constant 5 : index
    %c0_499 = arith.constant 0 : index
    %c0_500 = arith.constant 0 : index
    %1069 = vector.load %arg20[%c5_498, %c0_499, %c0_500] : memref<8x1x32xf32, #tpu.memory_space<vmem>>, vector<1x1x32xf32>
    %1070 = vector.shape_cast %1069 : vector<1x1x32xf32> to vector<1x32xf32>
    %c5_501 = arith.constant 5 : index
    %c0_502 = arith.constant 0 : index
    %c0_503 = arith.constant 0 : index
    %1071 = vector.load %arg21[%c5_501, %c0_502, %c0_503] : memref<8x1x32xf32, #tpu.memory_space<vmem>>, vector<1x1x32xf32>
    %1072 = vector.shape_cast %1071 : vector<1x1x32xf32> to vector<1x32xf32>
    %cst_504 = arith.constant dense<0.000000e+00> : vector<8xf32>
    %1073 = vector.multi_reduction <add>, %1068, %cst_504 [1] : vector<8x32xf32> to vector<8xf32>
    %1074 = vector.shape_cast %1073 : vector<8xf32> to vector<8x1xf32>
    %cst_505 = arith.constant 3.200000e+01 : f32
    %1075 = vector.broadcast %cst_505 : f32 to vector<8x1xf32>
    %1076 = arith.divf %1074, %1075 : vector<8x1xf32>
    %1077 = vector.broadcast %1076 : vector<8x1xf32> to vector<8x32xf32>
    %1078 = arith.subf %1068, %1077 : vector<8x32xf32>
    %1079 = arith.mulf %1078, %1078 : vector<8x32xf32>
    %cst_506 = arith.constant dense<0.000000e+00> : vector<8xf32>
    %1080 = vector.multi_reduction <add>, %1079, %cst_506 [1] : vector<8x32xf32> to vector<8xf32>
    %1081 = vector.shape_cast %1080 : vector<8xf32> to vector<8x1xf32>
    %cst_507 = arith.constant 3.100000e+01 : f32
    %1082 = vector.broadcast %cst_507 : f32 to vector<8x1xf32>
    %1083 = arith.divf %1081, %1082 : vector<8x1xf32>
    %1084 = math.sqrt %1083 : vector<8x1xf32>
    %1085 = vector.broadcast %1070 : vector<1x32xf32> to vector<8x32xf32>
    %1086 = arith.mulf %1085, %1078 : vector<8x32xf32>
    %cst_508 = arith.constant 9.99999997E-7 : f32
    %1087 = vector.broadcast %cst_508 : f32 to vector<8x1xf32>
    %1088 = arith.addf %1084, %1087 : vector<8x1xf32>
    %1089 = vector.broadcast %1088 : vector<8x1xf32> to vector<8x32xf32>
    %1090 = arith.divf %1086, %1089 : vector<8x32xf32>
    %1091 = vector.broadcast %1072 : vector<1x32xf32> to vector<8x32xf32>
    %1092 = arith.addf %1090, %1091 : vector<8x32xf32>
    %c20 = arith.constant 20 : index
    %c0_509 = arith.constant 0 : index
    %c0_510 = arith.constant 0 : index
    %1093 = vector.load %arg14[%c20, %c0_509, %c0_510] : memref<24x32x32xf32, #tpu.memory_space<vmem>>, vector<1x32x32xf32>
    %1094 = vector.shape_cast %1093 : vector<1x32x32xf32> to vector<32x32xf32>
    %c20_511 = arith.constant 20 : index
    %c0_512 = arith.constant 0 : index
    %c0_513 = arith.constant 0 : index
    %1095 = vector.load %arg15[%c20_511, %c0_512, %c0_513] : memref<24x1x32xf32, #tpu.memory_space<vmem>>, vector<1x1x32xf32>
    %1096 = vector.shape_cast %1095 : vector<1x1x32xf32> to vector<1x32xf32>
    %c21 = arith.constant 21 : index
    %c0_514 = arith.constant 0 : index
    %c0_515 = arith.constant 0 : index
    %1097 = vector.load %arg14[%c21, %c0_514, %c0_515] : memref<24x32x32xf32, #tpu.memory_space<vmem>>, vector<1x32x32xf32>
    %1098 = vector.shape_cast %1097 : vector<1x32x32xf32> to vector<32x32xf32>
    %c21_516 = arith.constant 21 : index
    %c0_517 = arith.constant 0 : index
    %c0_518 = arith.constant 0 : index
    %1099 = vector.load %arg15[%c21_516, %c0_517, %c0_518] : memref<24x1x32xf32, #tpu.memory_space<vmem>>, vector<1x1x32xf32>
    %1100 = vector.shape_cast %1099 : vector<1x1x32xf32> to vector<1x32xf32>
    %c22 = arith.constant 22 : index
    %c0_519 = arith.constant 0 : index
    %c0_520 = arith.constant 0 : index
    %1101 = vector.load %arg14[%c22, %c0_519, %c0_520] : memref<24x32x32xf32, #tpu.memory_space<vmem>>, vector<1x32x32xf32>
    %1102 = vector.shape_cast %1101 : vector<1x32x32xf32> to vector<32x32xf32>
    %c22_521 = arith.constant 22 : index
    %c0_522 = arith.constant 0 : index
    %c0_523 = arith.constant 0 : index
    %1103 = vector.load %arg15[%c22_521, %c0_522, %c0_523] : memref<24x1x32xf32, #tpu.memory_space<vmem>>, vector<1x1x32xf32>
    %1104 = vector.shape_cast %1103 : vector<1x1x32xf32> to vector<1x32xf32>
    %c23 = arith.constant 23 : index
    %c0_524 = arith.constant 0 : index
    %c0_525 = arith.constant 0 : index
    %1105 = vector.load %arg14[%c23, %c0_524, %c0_525] : memref<24x32x32xf32, #tpu.memory_space<vmem>>, vector<1x32x32xf32>
    %1106 = vector.shape_cast %1105 : vector<1x32x32xf32> to vector<32x32xf32>
    %c23_526 = arith.constant 23 : index
    %c0_527 = arith.constant 0 : index
    %c0_528 = arith.constant 0 : index
    %1107 = vector.load %arg15[%c23_526, %c0_527, %c0_528] : memref<24x1x32xf32, #tpu.memory_space<vmem>>, vector<1x1x32xf32>
    %1108 = vector.shape_cast %1107 : vector<1x1x32xf32> to vector<1x32xf32>
    %cst_529 = arith.constant dense<0.000000e+00> : vector<8x32xf32>
    %1109 = tpu.matmul %5, %1094, %cst_529 {dimension_numbers = #tpu.dot_dimension_numbers<[1], [0], [0], [1], [0, 0, 1, 1], [], []>} : vector<8x32xf32>, vector<32x32xf32>, vector<8x32xf32> -> vector<8x32xf32>
    %1110 = vector.broadcast %1096 : vector<1x32xf32> to vector<8x32xf32>
    %1111 = arith.addf %1109, %1110 : vector<8x32xf32>
    %cst_530 = arith.constant dense<0.000000e+00> : vector<8x32xf32>
    %1112 = tpu.matmul %5, %1098, %cst_530 {dimension_numbers = #tpu.dot_dimension_numbers<[1], [0], [0], [1], [0, 0, 1, 1], [], []>} : vector<8x32xf32>, vector<32x32xf32>, vector<8x32xf32> -> vector<8x32xf32>
    %1113 = vector.broadcast %1100 : vector<1x32xf32> to vector<8x32xf32>
    %1114 = arith.addf %1112, %1113 : vector<8x32xf32>
    %cst_531 = arith.constant dense<0.000000e+00> : vector<8x32xf32>
    %1115 = tpu.matmul %1092, %1102, %cst_531 {dimension_numbers = #tpu.dot_dimension_numbers<[1], [0], [0], [1], [0, 0, 1, 1], [], []>} : vector<8x32xf32>, vector<32x32xf32>, vector<8x32xf32> -> vector<8x32xf32>
    %1116 = vector.broadcast %1104 : vector<1x32xf32> to vector<8x32xf32>
    %1117 = arith.addf %1115, %1116 : vector<8x32xf32>
    %1118 = vector.extract_strided_slice %1117 {offsets = [0, 0], sizes = [8, 8], strides = [1, 1]} : vector<8x32xf32> to vector<8x8xf32>
    %1119 = vector.extract_strided_slice %1114 {offsets = [0, 0], sizes = [8, 8], strides = [1, 1]} : vector<8x32xf32> to vector<8x8xf32>
    %1120 = vector.extract_strided_slice %1111 {offsets = [0, 0], sizes = [8, 8], strides = [1, 1]} : vector<8x32xf32> to vector<8x8xf32>
    %cst_532 = arith.constant dense<0.000000e+00> : vector<8x8xf32>
    %1121 = tpu.matmul %1118, %1119, %cst_532 {dimension_numbers = #tpu.dot_dimension_numbers<[1], [1], [0], [0], [0, 0, 1, 0], [], []>} : vector<8x8xf32>, vector<8x8xf32>, vector<8x8xf32> -> vector<8x8xf32>
    %cst_533 = arith.constant 0.353553385 : f32
    %1122 = vector.broadcast %cst_533 : f32 to vector<8x8xf32>
    %1123 = arith.mulf %1121, %1122 : vector<8x8xf32>
    %1124 = vector.broadcast %9 : vector<1x8xf32> to vector<8x8xf32>
    %1125 = arith.addf %1123, %1124 : vector<8x8xf32>
    %cst_534 = arith.constant dense<0xFF800000> : vector<8xf32>
    %1126 = vector.multi_reduction <maximumf>, %1125, %cst_534 [1] : vector<8x8xf32> to vector<8xf32>
    %1127 = vector.shape_cast %1126 : vector<8xf32> to vector<8x1xf32>
    %1128 = vector.broadcast %1127 : vector<8x1xf32> to vector<8x8xf32>
    %1129 = arith.subf %1125, %1128 : vector<8x8xf32>
    %1130 = math.exp %1129 : vector<8x8xf32>
    %cst_535 = arith.constant dense<0.000000e+00> : vector<8xf32>
    %1131 = vector.multi_reduction <add>, %1130, %cst_535 [1] : vector<8x8xf32> to vector<8xf32>
    %1132 = vector.shape_cast %1131 : vector<8xf32> to vector<8x1xf32>
    %1133 = tpu.reciprocal %1132 {approx = true} : vector<8x1xf32> -> vector<8x1xf32>
    %1134 = vector.broadcast %1133 : vector<8x1xf32> to vector<8x8xf32>
    %1135 = arith.mulf %1130, %1134 : vector<8x8xf32>
    %cst_536 = arith.constant dense<0.000000e+00> : vector<8x8xf32>
    %1136 = tpu.matmul %1135, %1120, %cst_536 {dimension_numbers = #tpu.dot_dimension_numbers<[1], [0], [0], [1], [0, 0, 1, 1], [], []>} : vector<8x8xf32>, vector<8x8xf32>, vector<8x8xf32> -> vector<8x8xf32>
    %1137 = vector.extract_strided_slice %1106 {offsets = [0, 0], sizes = [8, 32], strides = [1, 1]} : vector<32x32xf32> to vector<8x32xf32>
    %cst_537 = arith.constant dense<0.000000e+00> : vector<8x32xf32>
    %1138 = tpu.matmul %1136, %1137, %cst_537 {dimension_numbers = #tpu.dot_dimension_numbers<[1], [0], [0], [1], [0, 0, 1, 1], [], []>} : vector<8x8xf32>, vector<8x32xf32>, vector<8x32xf32> -> vector<8x32xf32>
    %1139 = vector.extract_strided_slice %1117 {offsets = [0, 8], sizes = [8, 8], strides = [1, 1]} : vector<8x32xf32> to vector<8x8xf32>
    %1140 = vector.extract_strided_slice %1114 {offsets = [0, 8], sizes = [8, 8], strides = [1, 1]} : vector<8x32xf32> to vector<8x8xf32>
    %1141 = vector.extract_strided_slice %1111 {offsets = [0, 8], sizes = [8, 8], strides = [1, 1]} : vector<8x32xf32> to vector<8x8xf32>
    %cst_538 = arith.constant dense<0.000000e+00> : vector<8x8xf32>
    %1142 = tpu.matmul %1139, %1140, %cst_538 {dimension_numbers = #tpu.dot_dimension_numbers<[1], [1], [0], [0], [0, 0, 1, 0], [], []>} : vector<8x8xf32>, vector<8x8xf32>, vector<8x8xf32> -> vector<8x8xf32>
    %cst_539 = arith.constant 0.353553385 : f32
    %1143 = vector.broadcast %cst_539 : f32 to vector<8x8xf32>
    %1144 = arith.mulf %1142, %1143 : vector<8x8xf32>
    %1145 = vector.broadcast %9 : vector<1x8xf32> to vector<8x8xf32>
    %1146 = arith.addf %1144, %1145 : vector<8x8xf32>
    %cst_540 = arith.constant dense<0xFF800000> : vector<8xf32>
    %1147 = vector.multi_reduction <maximumf>, %1146, %cst_540 [1] : vector<8x8xf32> to vector<8xf32>
    %1148 = vector.shape_cast %1147 : vector<8xf32> to vector<8x1xf32>
    %1149 = vector.broadcast %1148 : vector<8x1xf32> to vector<8x8xf32>
    %1150 = arith.subf %1146, %1149 : vector<8x8xf32>
    %1151 = math.exp %1150 : vector<8x8xf32>
    %cst_541 = arith.constant dense<0.000000e+00> : vector<8xf32>
    %1152 = vector.multi_reduction <add>, %1151, %cst_541 [1] : vector<8x8xf32> to vector<8xf32>
    %1153 = vector.shape_cast %1152 : vector<8xf32> to vector<8x1xf32>
    %1154 = tpu.reciprocal %1153 {approx = true} : vector<8x1xf32> -> vector<8x1xf32>
    %1155 = vector.broadcast %1154 : vector<8x1xf32> to vector<8x8xf32>
    %1156 = arith.mulf %1151, %1155 : vector<8x8xf32>
    %cst_542 = arith.constant dense<0.000000e+00> : vector<8x8xf32>
    %1157 = tpu.matmul %1156, %1141, %cst_542 {dimension_numbers = #tpu.dot_dimension_numbers<[1], [0], [0], [1], [0, 0, 1, 1], [], []>} : vector<8x8xf32>, vector<8x8xf32>, vector<8x8xf32> -> vector<8x8xf32>
    %1158 = vector.extract_strided_slice %1106 {offsets = [8, 0], sizes = [8, 32], strides = [1, 1]} : vector<32x32xf32> to vector<8x32xf32>
    %cst_543 = arith.constant dense<0.000000e+00> : vector<8x32xf32>
    %1159 = tpu.matmul %1157, %1158, %cst_543 {dimension_numbers = #tpu.dot_dimension_numbers<[1], [0], [0], [1], [0, 0, 1, 1], [], []>} : vector<8x8xf32>, vector<8x32xf32>, vector<8x32xf32> -> vector<8x32xf32>
    %1160 = arith.addf %1138, %1159 : vector<8x32xf32>
    %1161 = vector.extract_strided_slice %1117 {offsets = [0, 16], sizes = [8, 8], strides = [1, 1]} : vector<8x32xf32> to vector<8x8xf32>
    %1162 = vector.extract_strided_slice %1114 {offsets = [0, 16], sizes = [8, 8], strides = [1, 1]} : vector<8x32xf32> to vector<8x8xf32>
    %1163 = vector.extract_strided_slice %1111 {offsets = [0, 16], sizes = [8, 8], strides = [1, 1]} : vector<8x32xf32> to vector<8x8xf32>
    %cst_544 = arith.constant dense<0.000000e+00> : vector<8x8xf32>
    %1164 = tpu.matmul %1161, %1162, %cst_544 {dimension_numbers = #tpu.dot_dimension_numbers<[1], [1], [0], [0], [0, 0, 1, 0], [], []>} : vector<8x8xf32>, vector<8x8xf32>, vector<8x8xf32> -> vector<8x8xf32>
    %cst_545 = arith.constant 0.353553385 : f32
    %1165 = vector.broadcast %cst_545 : f32 to vector<8x8xf32>
    %1166 = arith.mulf %1164, %1165 : vector<8x8xf32>
    %1167 = vector.broadcast %9 : vector<1x8xf32> to vector<8x8xf32>
    %1168 = arith.addf %1166, %1167 : vector<8x8xf32>
    %cst_546 = arith.constant dense<0xFF800000> : vector<8xf32>
    %1169 = vector.multi_reduction <maximumf>, %1168, %cst_546 [1] : vector<8x8xf32> to vector<8xf32>
    %1170 = vector.shape_cast %1169 : vector<8xf32> to vector<8x1xf32>
    %1171 = vector.broadcast %1170 : vector<8x1xf32> to vector<8x8xf32>
    %1172 = arith.subf %1168, %1171 : vector<8x8xf32>
    %1173 = math.exp %1172 : vector<8x8xf32>
    %cst_547 = arith.constant dense<0.000000e+00> : vector<8xf32>
    %1174 = vector.multi_reduction <add>, %1173, %cst_547 [1] : vector<8x8xf32> to vector<8xf32>
    %1175 = vector.shape_cast %1174 : vector<8xf32> to vector<8x1xf32>
    %1176 = tpu.reciprocal %1175 {approx = true} : vector<8x1xf32> -> vector<8x1xf32>
    %1177 = vector.broadcast %1176 : vector<8x1xf32> to vector<8x8xf32>
    %1178 = arith.mulf %1173, %1177 : vector<8x8xf32>
    %cst_548 = arith.constant dense<0.000000e+00> : vector<8x8xf32>
    %1179 = tpu.matmul %1178, %1163, %cst_548 {dimension_numbers = #tpu.dot_dimension_numbers<[1], [0], [0], [1], [0, 0, 1, 1], [], []>} : vector<8x8xf32>, vector<8x8xf32>, vector<8x8xf32> -> vector<8x8xf32>
    %1180 = vector.extract_strided_slice %1106 {offsets = [16, 0], sizes = [8, 32], strides = [1, 1]} : vector<32x32xf32> to vector<8x32xf32>
    %cst_549 = arith.constant dense<0.000000e+00> : vector<8x32xf32>
    %1181 = tpu.matmul %1179, %1180, %cst_549 {dimension_numbers = #tpu.dot_dimension_numbers<[1], [0], [0], [1], [0, 0, 1, 1], [], []>} : vector<8x8xf32>, vector<8x32xf32>, vector<8x32xf32> -> vector<8x32xf32>
    %1182 = arith.addf %1160, %1181 : vector<8x32xf32>
    %1183 = vector.extract_strided_slice %1117 {offsets = [0, 24], sizes = [8, 8], strides = [1, 1]} : vector<8x32xf32> to vector<8x8xf32>
    %1184 = vector.extract_strided_slice %1114 {offsets = [0, 24], sizes = [8, 8], strides = [1, 1]} : vector<8x32xf32> to vector<8x8xf32>
    %1185 = vector.extract_strided_slice %1111 {offsets = [0, 24], sizes = [8, 8], strides = [1, 1]} : vector<8x32xf32> to vector<8x8xf32>
    %cst_550 = arith.constant dense<0.000000e+00> : vector<8x8xf32>
    %1186 = tpu.matmul %1183, %1184, %cst_550 {dimension_numbers = #tpu.dot_dimension_numbers<[1], [1], [0], [0], [0, 0, 1, 0], [], []>} : vector<8x8xf32>, vector<8x8xf32>, vector<8x8xf32> -> vector<8x8xf32>
    %cst_551 = arith.constant 0.353553385 : f32
    %1187 = vector.broadcast %cst_551 : f32 to vector<8x8xf32>
    %1188 = arith.mulf %1186, %1187 : vector<8x8xf32>
    %1189 = vector.broadcast %9 : vector<1x8xf32> to vector<8x8xf32>
    %1190 = arith.addf %1188, %1189 : vector<8x8xf32>
    %cst_552 = arith.constant dense<0xFF800000> : vector<8xf32>
    %1191 = vector.multi_reduction <maximumf>, %1190, %cst_552 [1] : vector<8x8xf32> to vector<8xf32>
    %1192 = vector.shape_cast %1191 : vector<8xf32> to vector<8x1xf32>
    %1193 = vector.broadcast %1192 : vector<8x1xf32> to vector<8x8xf32>
    %1194 = arith.subf %1190, %1193 : vector<8x8xf32>
    %1195 = math.exp %1194 : vector<8x8xf32>
    %cst_553 = arith.constant dense<0.000000e+00> : vector<8xf32>
    %1196 = vector.multi_reduction <add>, %1195, %cst_553 [1] : vector<8x8xf32> to vector<8xf32>
    %1197 = vector.shape_cast %1196 : vector<8xf32> to vector<8x1xf32>
    %1198 = tpu.reciprocal %1197 {approx = true} : vector<8x1xf32> -> vector<8x1xf32>
    %1199 = vector.broadcast %1198 : vector<8x1xf32> to vector<8x8xf32>
    %1200 = arith.mulf %1195, %1199 : vector<8x8xf32>
    %cst_554 = arith.constant dense<0.000000e+00> : vector<8x8xf32>
    %1201 = tpu.matmul %1200, %1185, %cst_554 {dimension_numbers = #tpu.dot_dimension_numbers<[1], [0], [0], [1], [0, 0, 1, 1], [], []>} : vector<8x8xf32>, vector<8x8xf32>, vector<8x8xf32> -> vector<8x8xf32>
    %1202 = vector.extract_strided_slice %1106 {offsets = [24, 0], sizes = [8, 32], strides = [1, 1]} : vector<32x32xf32> to vector<8x32xf32>
    %cst_555 = arith.constant dense<0.000000e+00> : vector<8x32xf32>
    %1203 = tpu.matmul %1201, %1202, %cst_555 {dimension_numbers = #tpu.dot_dimension_numbers<[1], [0], [0], [1], [0, 0, 1, 1], [], []>} : vector<8x8xf32>, vector<8x32xf32>, vector<8x32xf32> -> vector<8x32xf32>
    %1204 = arith.addf %1182, %1203 : vector<8x32xf32>
    %1205 = vector.broadcast %1108 : vector<1x32xf32> to vector<8x32xf32>
    %1206 = arith.addf %1204, %1205 : vector<8x32xf32>
    %1207 = arith.addf %1092, %1206 : vector<8x32xf32>
    %c6_556 = arith.constant 6 : index
    %c0_557 = arith.constant 0 : index
    %c0_558 = arith.constant 0 : index
    %1208 = vector.load %arg20[%c6_556, %c0_557, %c0_558] : memref<8x1x32xf32, #tpu.memory_space<vmem>>, vector<1x1x32xf32>
    %1209 = vector.shape_cast %1208 : vector<1x1x32xf32> to vector<1x32xf32>
    %c6_559 = arith.constant 6 : index
    %c0_560 = arith.constant 0 : index
    %c0_561 = arith.constant 0 : index
    %1210 = vector.load %arg21[%c6_559, %c0_560, %c0_561] : memref<8x1x32xf32, #tpu.memory_space<vmem>>, vector<1x1x32xf32>
    %1211 = vector.shape_cast %1210 : vector<1x1x32xf32> to vector<1x32xf32>
    %cst_562 = arith.constant dense<0.000000e+00> : vector<8xf32>
    %1212 = vector.multi_reduction <add>, %1207, %cst_562 [1] : vector<8x32xf32> to vector<8xf32>
    %1213 = vector.shape_cast %1212 : vector<8xf32> to vector<8x1xf32>
    %cst_563 = arith.constant 3.200000e+01 : f32
    %1214 = vector.broadcast %cst_563 : f32 to vector<8x1xf32>
    %1215 = arith.divf %1213, %1214 : vector<8x1xf32>
    %1216 = vector.broadcast %1215 : vector<8x1xf32> to vector<8x32xf32>
    %1217 = arith.subf %1207, %1216 : vector<8x32xf32>
    %1218 = arith.mulf %1217, %1217 : vector<8x32xf32>
    %cst_564 = arith.constant dense<0.000000e+00> : vector<8xf32>
    %1219 = vector.multi_reduction <add>, %1218, %cst_564 [1] : vector<8x32xf32> to vector<8xf32>
    %1220 = vector.shape_cast %1219 : vector<8xf32> to vector<8x1xf32>
    %cst_565 = arith.constant 3.100000e+01 : f32
    %1221 = vector.broadcast %cst_565 : f32 to vector<8x1xf32>
    %1222 = arith.divf %1220, %1221 : vector<8x1xf32>
    %1223 = math.sqrt %1222 : vector<8x1xf32>
    %1224 = vector.broadcast %1209 : vector<1x32xf32> to vector<8x32xf32>
    %1225 = arith.mulf %1224, %1217 : vector<8x32xf32>
    %cst_566 = arith.constant 9.99999997E-7 : f32
    %1226 = vector.broadcast %cst_566 : f32 to vector<8x1xf32>
    %1227 = arith.addf %1223, %1226 : vector<8x1xf32>
    %1228 = vector.broadcast %1227 : vector<8x1xf32> to vector<8x32xf32>
    %1229 = arith.divf %1225, %1228 : vector<8x32xf32>
    %1230 = vector.broadcast %1211 : vector<1x32xf32> to vector<8x32xf32>
    %1231 = arith.addf %1229, %1230 : vector<8x32xf32>
    %c1_567 = arith.constant 1 : index
    %c0_568 = arith.constant 0 : index
    %c0_569 = arith.constant 0 : index
    %1232 = vector.load %arg16[%c1_567, %c0_568, %c0_569] : memref<2x32x128xf32, #tpu.memory_space<vmem>>, vector<1x32x128xf32>
    %1233 = vector.shape_cast %1232 : vector<1x32x128xf32> to vector<32x128xf32>
    %c1_570 = arith.constant 1 : index
    %c0_571 = arith.constant 0 : index
    %c0_572 = arith.constant 0 : index
    %1234 = vector.load %arg17[%c1_570, %c0_571, %c0_572] : memref<2x1x128xf32, #tpu.memory_space<vmem>>, vector<1x1x128xf32>
    %1235 = vector.shape_cast %1234 : vector<1x1x128xf32> to vector<1x128xf32>
    %c1_573 = arith.constant 1 : index
    %c0_574 = arith.constant 0 : index
    %c0_575 = arith.constant 0 : index
    %1236 = vector.load %arg18[%c1_573, %c0_574, %c0_575] : memref<2x128x32xf32, #tpu.memory_space<vmem>>, vector<1x128x32xf32>
    %1237 = vector.shape_cast %1236 : vector<1x128x32xf32> to vector<128x32xf32>
    %c1_576 = arith.constant 1 : index
    %c0_577 = arith.constant 0 : index
    %c0_578 = arith.constant 0 : index
    %1238 = vector.load %arg19[%c1_576, %c0_577, %c0_578] : memref<2x1x32xf32, #tpu.memory_space<vmem>>, vector<1x1x32xf32>
    %1239 = vector.shape_cast %1238 : vector<1x1x32xf32> to vector<1x32xf32>
    %cst_579 = arith.constant dense<0.000000e+00> : vector<8x128xf32>
    %1240 = tpu.matmul %1231, %1233, %cst_579 {dimension_numbers = #tpu.dot_dimension_numbers<[1], [0], [0], [1], [0, 0, 1, 1], [], []>} : vector<8x32xf32>, vector<32x128xf32>, vector<8x128xf32> -> vector<8x128xf32>
    %1241 = vector.broadcast %1235 : vector<1x128xf32> to vector<8x128xf32>
    %1242 = arith.addf %1240, %1241 : vector<8x128xf32>
    %cst_580 = arith.constant 0.000000e+00 : f32
    %1243 = vector.broadcast %cst_580 : f32 to vector<8x128xf32>
    %1244 = arith.maximumf %1242, %1243 : vector<8x128xf32>
    %cst_581 = arith.constant dense<0.000000e+00> : vector<8x32xf32>
    %1245 = tpu.matmul %1244, %1237, %cst_581 {dimension_numbers = #tpu.dot_dimension_numbers<[1], [0], [0], [1], [0, 0, 1, 1], [], []>} : vector<8x128xf32>, vector<128x32xf32>, vector<8x32xf32> -> vector<8x32xf32>
    %1246 = vector.broadcast %1239 : vector<1x32xf32> to vector<8x32xf32>
    %1247 = arith.addf %1245, %1246 : vector<8x32xf32>
    %1248 = arith.addf %1231, %1247 : vector<8x32xf32>
    %c7_582 = arith.constant 7 : index
    %c0_583 = arith.constant 0 : index
    %c0_584 = arith.constant 0 : index
    %1249 = vector.load %arg20[%c7_582, %c0_583, %c0_584] : memref<8x1x32xf32, #tpu.memory_space<vmem>>, vector<1x1x32xf32>
    %1250 = vector.shape_cast %1249 : vector<1x1x32xf32> to vector<1x32xf32>
    %c7_585 = arith.constant 7 : index
    %c0_586 = arith.constant 0 : index
    %c0_587 = arith.constant 0 : index
    %1251 = vector.load %arg21[%c7_585, %c0_586, %c0_587] : memref<8x1x32xf32, #tpu.memory_space<vmem>>, vector<1x1x32xf32>
    %1252 = vector.shape_cast %1251 : vector<1x1x32xf32> to vector<1x32xf32>
    %cst_588 = arith.constant dense<0.000000e+00> : vector<8xf32>
    %1253 = vector.multi_reduction <add>, %1248, %cst_588 [1] : vector<8x32xf32> to vector<8xf32>
    %1254 = vector.shape_cast %1253 : vector<8xf32> to vector<8x1xf32>
    %cst_589 = arith.constant 3.200000e+01 : f32
    %1255 = vector.broadcast %cst_589 : f32 to vector<8x1xf32>
    %1256 = arith.divf %1254, %1255 : vector<8x1xf32>
    %1257 = vector.broadcast %1256 : vector<8x1xf32> to vector<8x32xf32>
    %1258 = arith.subf %1248, %1257 : vector<8x32xf32>
    %1259 = arith.mulf %1258, %1258 : vector<8x32xf32>
    %cst_590 = arith.constant dense<0.000000e+00> : vector<8xf32>
    %1260 = vector.multi_reduction <add>, %1259, %cst_590 [1] : vector<8x32xf32> to vector<8xf32>
    %1261 = vector.shape_cast %1260 : vector<8xf32> to vector<8x1xf32>
    %cst_591 = arith.constant 3.100000e+01 : f32
    %1262 = vector.broadcast %cst_591 : f32 to vector<8x1xf32>
    %1263 = arith.divf %1261, %1262 : vector<8x1xf32>
    %1264 = math.sqrt %1263 : vector<8x1xf32>
    %1265 = vector.broadcast %1250 : vector<1x32xf32> to vector<8x32xf32>
    %1266 = arith.mulf %1265, %1258 : vector<8x32xf32>
    %cst_592 = arith.constant 9.99999997E-7 : f32
    %1267 = vector.broadcast %cst_592 : f32 to vector<8x1xf32>
    %1268 = arith.addf %1264, %1267 : vector<8x1xf32>
    %1269 = vector.broadcast %1268 : vector<8x1xf32> to vector<8x32xf32>
    %1270 = arith.divf %1266, %1269 : vector<8x32xf32>
    %1271 = vector.broadcast %1252 : vector<1x32xf32> to vector<8x32xf32>
    %1272 = arith.addf %1270, %1271 : vector<8x32xf32>
    %c0_593 = arith.constant 0 : index
    %c0_594 = arith.constant 0 : index
    %c0_595 = arith.constant 0 : index
    %1273 = vector.load %arg23[%c0_593, %c0_594, %c0_595] : memref<1x8x32xf32, #tpu.memory_space<vmem>>, vector<1x8x32xf32>
    %1274 = vector.shape_cast %1273 : vector<1x8x32xf32> to vector<8x32xf32>
    %1275 = vector.shape_cast %1272 : vector<8x32xf32> to vector<1x8x32xf32>
    tpu.vector_store %arg23[%c0_593, %c0_594, %c0_595], %1275 {strides = array<i32>} : memref<1x8x32xf32, #tpu.memory_space<vmem>>, vector<1x8x32xf32>,
    return
  }
  func.func @transform_0(%arg0: i32) -> (i32, i32, i32) {
    %c0_i32 = arith.constant 0 : i32
    %c0_i32_0 = arith.constant 0 : i32
    %c0_i32_1 = arith.constant 0 : i32
    return %arg0, %c0_i32, %c0_i32_0 : i32, i32, i32
  }
  func.func @transform_1(%arg0: i32) -> (i32, i32, i32) {
    %c0_i32 = arith.constant 0 : i32
    %c0_i32_0 = arith.constant 0 : i32
    %c0_i32_1 = arith.constant 0 : i32
    return %arg0, %c0_i32, %c0_i32_0 : i32, i32, i32
  }
  func.func @transform_2(%arg0: i32) -> (i32, i32, i32) {
    %c0_i32 = arith.constant 0 : i32
    %c0_i32_0 = arith.constant 0 : i32
    %c0_i32_1 = arith.constant 0 : i32
    return %arg0, %c0_i32, %c0_i32_0 : i32, i32, i32
  }
  func.func @transform_3(%arg0: i32) -> (i32, i32, i32) {
    %c0_i32 = arith.constant 0 : i32
    %c0_i32_0 = arith.constant 0 : i32
    %c0_i32_1 = arith.constant 0 : i32
    return %arg0, %c0_i32, %c0_i32_0 : i32, i32, i32
  }
  func.func @transform_4(%arg0: i32) -> (i32, i32, i32) {
    %c0_i32 = arith.constant 0 : i32
    %c0_i32_0 = arith.constant 0 : i32
    %c0_i32_1 = arith.constant 0 : i32
    return %arg0, %c0_i32, %c0_i32_0 : i32, i32, i32
  }
  func.func @transform_5(%arg0: i32) -> (i32, i32, i32) {
    %c0_i32 = arith.constant 0 : i32
    %c0_i32_0 = arith.constant 0 : i32
    %c0_i32_1 = arith.constant 0 : i32
    %c0_i32_2 = arith.constant 0 : i32
    return %c0_i32, %c0_i32_0, %c0_i32_1 : i32, i32, i32
  }
  func.func @transform_6(%arg0: i32) -> (i32, i32, i32) {
    %c0_i32 = arith.constant 0 : i32
    %c0_i32_0 = arith.constant 0 : i32
    %c0_i32_1 = arith.constant 0 : i32
    %c0_i32_2 = arith.constant 0 : i32
    return %c0_i32, %c0_i32_0, %c0_i32_1 : i32, i32, i32
  }
  func.func @transform_7(%arg0: i32) -> (i32, i32, i32) {
    %c0_i32 = arith.constant 0 : i32
    %c0_i32_0 = arith.constant 0 : i32
    %c0_i32_1 = arith.constant 0 : i32
    %c0_i32_2 = arith.constant 0 : i32
    return %c0_i32, %c0_i32_0, %c0_i32_1 : i32, i32, i32
  }
  func.func @transform_8(%arg0: i32) -> (i32, i32, i32) {
    %c0_i32 = arith.constant 0 : i32
    %c0_i32_0 = arith.constant 0 : i32
    %c0_i32_1 = arith.constant 0 : i32
    %c0_i32_2 = arith.constant 0 : i32
    return %c0_i32, %c0_i32_0, %c0_i32_1 : i32, i32, i32
  }
  func.func @transform_9(%arg0: i32) -> (i32, i32, i32) {
    %c0_i32 = arith.constant 0 : i32
    %c0_i32_0 = arith.constant 0 : i32
    %c0_i32_1 = arith.constant 0 : i32
    %c0_i32_2 = arith.constant 0 : i32
    return %c0_i32, %c0_i32_0, %c0_i32_1 : i32, i32, i32
  }
  func.func @transform_10(%arg0: i32) -> (i32, i32, i32) {
    %c0_i32 = arith.constant 0 : i32
    %c0_i32_0 = arith.constant 0 : i32
    %c0_i32_1 = arith.constant 0 : i32
    %c0_i32_2 = arith.constant 0 : i32
    return %c0_i32, %c0_i32_0, %c0_i32_1 : i32, i32, i32
  }
  func.func @transform_11(%arg0: i32) -> (i32, i32, i32) {
    %c0_i32 = arith.constant 0 : i32
    %c0_i32_0 = arith.constant 0 : i32
    %c0_i32_1 = arith.constant 0 : i32
    %c0_i32_2 = arith.constant 0 : i32
    return %c0_i32, %c0_i32_0, %c0_i32_1 : i32, i32, i32
  }
  func.func @transform_12(%arg0: i32) -> (i32, i32, i32) {
    %c0_i32 = arith.constant 0 : i32
    %c0_i32_0 = arith.constant 0 : i32
    %c0_i32_1 = arith.constant 0 : i32
    %c0_i32_2 = arith.constant 0 : i32
    return %c0_i32, %c0_i32_0, %c0_i32_1 : i32, i32, i32
  }
  func.func @transform_13(%arg0: i32) -> (i32, i32, i32) {
    %c0_i32 = arith.constant 0 : i32
    %c0_i32_0 = arith.constant 0 : i32
    %c0_i32_1 = arith.constant 0 : i32
    %c0_i32_2 = arith.constant 0 : i32
    return %c0_i32, %c0_i32_0, %c0_i32_1 : i32, i32, i32
  }
  func.func @transform_14(%arg0: i32) -> (i32, i32, i32) {
    %c0_i32 = arith.constant 0 : i32
    %c0_i32_0 = arith.constant 0 : i32
    %c0_i32_1 = arith.constant 0 : i32
    %c0_i32_2 = arith.constant 0 : i32
    return %c0_i32, %c0_i32_0, %c0_i32_1 : i32, i32, i32
  }
  func.func @transform_15(%arg0: i32) -> (i32, i32, i32) {
    %c0_i32 = arith.constant 0 : i32
    %c0_i32_0 = arith.constant 0 : i32
    %c0_i32_1 = arith.constant 0 : i32
    %c0_i32_2 = arith.constant 0 : i32
    return %c0_i32, %c0_i32_0, %c0_i32_1 : i32, i32, i32
  }
  func.func @transform_16(%arg0: i32) -> (i32, i32, i32) {
    %c0_i32 = arith.constant 0 : i32
    %c0_i32_0 = arith.constant 0 : i32
    %c0_i32_1 = arith.constant 0 : i32
    %c0_i32_2 = arith.constant 0 : i32
    return %c0_i32, %c0_i32_0, %c0_i32_1 : i32, i32, i32
  }
  func.func @transform_17(%arg0: i32) -> (i32, i32, i32) {
    %c0_i32 = arith.constant 0 : i32
    %c0_i32_0 = arith.constant 0 : i32
    %c0_i32_1 = arith.constant 0 : i32
    %c0_i32_2 = arith.constant 0 : i32
    return %c0_i32, %c0_i32_0, %c0_i32_1 : i32, i32, i32
  }
  func.func @transform_18(%arg0: i32) -> (i32, i32, i32) {
    %c0_i32 = arith.constant 0 : i32
    %c0_i32_0 = arith.constant 0 : i32
    %c0_i32_1 = arith.constant 0 : i32
    %c0_i32_2 = arith.constant 0 : i32
    return %c0_i32, %c0_i32_0, %c0_i32_1 : i32, i32, i32
  }
  func.func @transform_19(%arg0: i32) -> (i32, i32, i32) {
    %c0_i32 = arith.constant 0 : i32
    %c0_i32_0 = arith.constant 0 : i32
    %c0_i32_1 = arith.constant 0 : i32
    %c0_i32_2 = arith.constant 0 : i32
    return %c0_i32, %c0_i32_0, %c0_i32_1 : i32, i32, i32
  }
  func.func @transform_20(%arg0: i32) -> (i32, i32, i32) {
    %c0_i32 = arith.constant 0 : i32
    %c0_i32_0 = arith.constant 0 : i32
    %c0_i32_1 = arith.constant 0 : i32
    %c0_i32_2 = arith.constant 0 : i32
    return %c0_i32, %c0_i32_0, %c0_i32_1 : i32, i32, i32
  }
  func.func @transform_21(%arg0: i32) -> (i32, i32, i32) {
    %c0_i32 = arith.constant 0 : i32
    %c0_i32_0 = arith.constant 0 : i32
    %c0_i32_1 = arith.constant 0 : i32
    return %arg0, %c0_i32, %c0_i32_0 : i32, i32, i32
  }
  func.func @transform_22(%arg0: i32) -> (i32, i32, i32) {
    %c0_i32 = arith.constant 0 : i32
    %c0_i32_0 = arith.constant 0 : i32
    %c0_i32_1 = arith.constant 0 : i32
    return %arg0, %c0_i32, %c0_i32_0 : i32, i32, i32
  }
}

</mosaic_0001>

<bundles_post_ra>
// kernel: mca_ed_forward.1
= control target key start
LH: loop header
LB: loop body
LE: loop exit
PB: predicated region body
PF: predicated region fallthrough
CT: control target
= control target key end

     0   :  { %s16111_s0 = inlined_call_operand.vmem [shape: f32[2,8,32], index: 0, kind: input, shape index: {}]   ;;  %s16112_s1 = inlined_call_operand.vmem [shape: f32[2,8,32], index: 1, kind: input, shape index: {}]   ;;  %s16113_s2 = inlined_call_operand.vmem [shape: f32[2,8,32], index: 2, kind: input, shape index: {}]   ;;  %s16114_s3 = inlined_call_operand.vmem [shape: f32[2,1,8], index: 3, kind: input, shape index: {}]   ;;  %s16115_s4 = inlined_call_operand.vmem [shape: f32[2,1,8], index: 4, kind: input, shape index: {}]   ;;  %s16116_s5 = inlined_call_operand.vmem [shape: f32[8,32,32], index: 5, kind: input, shape index: {}]   ;;  %s16117_s6 = inlined_call_operand.vmem [shape: f32[8,1,32], index: 6, kind: input, shape index: {}]   ;;  %s16118_s7 = inlined_call_operand.vmem [shape: f32[2,32,128], index: 7, kind: input, shape index: {}]   ;;  %s16119_s8 = inlined_call_operand.vmem [shape: f32[2,1,128], index: 8, kind: input, shape index: {}]   ;;  %s16120_s9 = inlined_call_operand.vmem [shape: f32[2,128,32], index: 9, kind: input, shape index: {}]   ;;  %s16121_s10 = inlined_call_operand.vmem [shape: f32[2,1,32], index: 10, kind: input, shape index: {}]   ;;  %s16122_s11 = inlined_call_operand.vmem [shape: f32[4,1,32], index: 11, kind: input, shape index: {}]   ;;  %s16123_s12 = inlined_call_operand.vmem [shape: f32[4,1,32], index: 12, kind: input, shape index: {}]   ;;  %s16124_s13 = inlined_call_operand.hbm [shape: f32[24,32,32], index: 13, kind: input, shape index: {}]   ;;  %s16125_s14 = inlined_call_operand.vmem [shape: f32[24,1,32], index: 14, kind: input, shape index: {}]   ;;  %s16126_s15 = inlined_call_operand.vmem [shape: f32[2,32,128], index: 15, kind: input, shape index: {}]   ;;  %s16127_s16 = inlined_call_operand.vmem [shape: f32[2,1,128], index: 16, kind: input, shape index: {}]   ;;  %s16128_s17 = inlined_call_operand.vmem [shape: f32[2,128,32], index: 17, kind: input, shape index: {}]   ;;  %s16129_s18 = inlined_call_operand.vmem [shape: f32[2,1,32], index: 18, kind: input, shape index: {}]   ;;  %s16130_s19 = inlined_call_operand.vmem [shape: f32[8,1,32], index: 19, kind: input, shape index: {}]   ;;  %s16131_s20 = inlined_call_operand.vmem [shape: f32[8,1,32], index: 20, kind: input, shape index: {}]   ;;  %s16132_s21 = inlined_call_operand.hbm [shape: f32[2,8,32], index: 21, kind: output, shape index: {0}]   ;;  %s16133_s22 = inlined_call_operand.hbm [shape: f32[2,8,32], index: 22, kind: output, shape index: {1}]  }
   0x1   :  { %16155 = sst [smem:[#allocation17_spill]] %s16111_s0 }
   0x2   :  { %16156 = sst [smem:[#allocation18_spill]] %s16112_s1 }
   0x3   :  { %16157 = sst [smem:[#allocation19_spill]] %s16113_s2 }
   0x4   :  { %16158 = sst [smem:[#allocation20_spill]] %s16114_s3 }
   0x5   :  { %16159 = sst [smem:[#allocation21_spill]] %s16115_s4 }
   0x6   :  { %16160 = sst [smem:[#allocation22_spill]] %s16116_s5 }
   0x7   :  { %16161 = sst [smem:[#allocation23_spill]] %s16117_s6 }
   0x8   :  { %16162 = sst [smem:[#allocation24_spill]] %s16118_s7 }
   0x9   :  { %16163 = sst [smem:[#allocation25_spill]] %s16119_s8 }
   0xa   :  { %16164 = sst [smem:[#allocation26_spill]] %s16120_s9 }
   0xb   :  { %16165 = sst [smem:[#allocation27_spill]] %s16124_s13 }
   0xc   :  { %16166 = sst [smem:[#allocation28_spill]] %s16133_s22 }
   0xd   :  { %28 = vsyncpa [#allocation3], 0 }
   0xe   :  { %29 = vsyncpa [#allocation4], 0 }
   0xf   :  { %31 = vsyncpa [#allocation4 + $0x1], 0 }
  0x10   :  { %32 = vsyncpa [#allocation7], 0 }
  0x11   :  { %34 = vsyncpa [#allocation7 + $0x1], 0  ;;  %s14387_s3 = smov 0   ;;  %s14389_s28 = smov 0  }
  0x12   :  { %s14391_s29 = smov 0   ;;  %s14393_s30 = smov 0  }
  0x13 LB: > { %16167 = sst [smem:[#allocation11_spill]] %s14247_s3  ;;  %s14408_s4 = sadd.s32 4294967295, %s14259_s30   ;;  %s14259_s30 = sphi %s14393_s30, %s16201_s30   ;;  %s14255_s29 = sphi %s14391_s29, %s16203_s29   ;;  %s14251_s28 = sphi %s14389_s28, %s16205_s28   ;;  %s14247_s3 = sphi %s14387_s3, %s16204_s3  }
  0x14   : > { %16168 = sst [smem:[#allocation12_spill]] %s14255_s29  ;;  %s11937_s0 = sadd.s32 4294967294, %s14259_s30  }
  0x15   : > { %16169 = sst [smem:[#allocation13_spill]] %s14259_s30  ;;  %s14412_s23 = sadd.s32 1, %s14259_s30  }
  0x16   : > { %16170 = sst [smem:[#allocation14_spill]] %s14412_s23  ;;  %s513_s1 = sadd.s32 1, %s14255_s29 }
  0x17   : > { %s510_s5 = ssub.s32 %s14259_s30, %s14412_s23  ;;  %p523_p0 = scmp.ne.s32.totalorder %s14255_s29, %s14251_s28 }
  0x18   : > { %p511_p1 = scmp.eq.s32.totalorder %s510_s5, 0  ;;  %p524_p2 = scmp.eq.s32.totalorder %s14408_s4, 1 }
  0x19   : > { %p529_p3 = scmp.ne.s32.totalorder %s14251_s28, %s14247_s3  ;;  %p530_p4 = scmp.eq.s32.totalorder %s11937_s0, 1 }
  0x1a   : > { %s14423_s24 = scalar_select %p511_p1, %s14255_s29, %s513_s1  }
  0x1b   : > { %p14425_p5 = por %p524_p2, %p523_p0  ;;  %p14429_p6 = por %p530_p4, %p529_p3 }
  0x1c   : > { %16171 = sst [smem:[#allocation15_spill]] %s14423_s24  ;;  %p11938_p7 = scmp.ge.s32.totalorder %s14259_s30, 1 }
  0x1d   : > { %s16172_s6 = scalar_select %p14425_p5, 1, 0 }
  0x1e   : > { %s16173_s25 = scalar_select %p14429_p6, 1, 0 }
  0x1f   : > { %p563_p8 = scmp.lt.s32.totalorder %s14259_s30, 3  ;;  %p16141_p9 = scmp.eq.s32.totalorder %s14408_s4, 0 }
  0x20   : > { %16174 = sst [smem:[#allocation16_spill]] %s16173_s25  ;;  %s14261_s2 = smov [#allocation2]  }
  0x21   : > { %p14436_p10 = pnand %p11938_p7, %p563_p8  ;;  %s599_s27 = sshll.u32 %s14261_s2, 4  ;;  %s600_s27 = int_to_ptr.vmem [resolvable:$true] %s599_s27 }
  0x22   : > { %s16177_s13 = sld [smem:[#allocation27_spill]] }
  0x23   : > { %s16175_s26 = scalar_select %p14436_p10, 1, 0 }
  0x24   : > { %p13898_p11 = pneg %p14436_p10 }
  0x26   : > { %p14444_p12 = pnand %p16141_p9, %p13898_p11 }
  0x28   : > { %s14133_s24 = scalar_lea.hbm %s16177_s13, 12288  ;;  %p14135_p0 = pneg %p14444_p12 }
  0x29   : > { %p14134_p13 = scmp.ne.s32.totalorder %s16177_s13, %s14133_s24  ;;  %p14140_p3 = scmp.lt.u32.totalorder %s14133_s24, %s16177_s13 }
  0x2b   : > { %p14136_p1 = pnand %p14135_p0, %p14134_p13 }
  0x2d   : > { %p14137_p2 = pneg %p14136_p1 }
  0x2f   : > { %p14142_p4 = pnand %p14140_p3, %p14137_p2 }
  0x31   : > { %14145 = shalt.err (!%p14142_p4)
}
  0x32   : > { %s14146_s3 = scalar_lea.vmem %s600_s27, 12288  ;;  %p14154_p9 = scmp.lt.s32.totalorder %s600_s27, %s600_s27 }
  0x33   : > { %p14147_p7 = scmp.ne.s32.totalorder %s600_s27, %s14146_s3  ;;  %p14155_p6 = scmp.lt.s32.totalorder %s14146_s3, %s14146_s3 }
  0x35   : > { %p14149_p8 = pnand %p14147_p7, %p14135_p0  ;;  %p14156_p5 = por %p14155_p6, %p14154_p9 }
  0x37   : > { %p14150_p11 = pneg %p14149_p8 }
  0x39   : > { %p14157_p10 = pnand %p14156_p5, %p14150_p11 }
  0x3b   : > { %14160 = shalt.err (!%p14157_p10)
}
  0x3c   : > { %s14262_s29 = smov 128   ;;  %s14263_s23 = smov 8  }
  0x3d   : > { %13901 = dma.hbm_to_vmem [thread:$0]  (!%p14444_p12), %s16177_s13, 12288, %s600_s27, [#allocation3], %s14262_s29, %s14262_s29, %s14263_s23  }
  0x3e   : > { %p16178_p13 = scmp.ne.s32.totalorder %s16175_s26, 0 }
  0x3f   : > { %p16179_p1 = scmp.eq.s32.totalorder (!%p16178_p13), %s14408_s4, 0 }
  0x40   : > { %669 = sbr.rel (%p16178_p13) target bundleno = 25596 (0x63fc), region = 104 }
  0x47   : > { %14234 = dma.done.wait (%p16179_p1), [#allocation3], 12288   ;;  %p16180_p0 = pmov %p16179_p1 }
  0x48   : > { %p749_p5 = scmp.lt.s32.totalorder %s14408_s4, 1  ;;  %v14264_v0 = vmov 0.0|0.0   ;;  %vm14265_vm0 = vmmov 0   ;;  %v14266_v1 = vmov 0.0   ;;  %s16181_s26 = sld [smem:[#allocation22_spill]]  ;;  %vm804_vm1 = vcmask 261120  }
  0x49   : > { %14236 = vsyncadd (%p16180_p0), [#allocation3], 4294955008  ;;  %13626 = vmatprep.subr.bf16.mxu0 %v14264_v0  ;;  %12706 = vmatprep.mubr.msk.f32.mxu0 %vm14265_vm0, %v14266_v1  ;;  %s16182_s27 = sld [smem:[#allocation17_spill]]  ;;  %s16183_s13 = sld [smem:[#allocation23_spill]]  ;;  %vm1030_vm2 = vcmask 64512  }
  0x4a   : > { %12736 = vmatprep.subr.mxu1 %v14266_v1  ;;  %12738 = vmatprep.mubr.msk.f32.mxu1 %vm14265_vm0, %v14266_v1  ;;  %s14478_s3 = scalar_select %p749_p5, %s14408_s4, 1 }
  0x4b   : > { %s16184_s24 = sld [smem:[#allocation20_spill]]  ;;  %s16147_s30 = smov 112  }
  0x4c   : > { %s14493_s5 = sshll.u32 %s14478_s3, 3  ;;  %s16185_s7 = sld [smem:[#allocation24_spill]] }
  0x4d   : > { %s16186_s9 = sld [smem:[#allocation26_spill]]  ;;  %s16187_s8 = sld [smem:[#allocation25_spill]] }
  0x4e   : > { %v772_v2 = vld [vmem:[%s16181_s26] sm:$0xff]  ;;  %v773_v3 = vld [vmem:[%s16181_s26 + $0x8] sm:$0xff]  ;;  %v774_v4 = vld [vmem:[%s16181_s26 + $0x10] sm:$0xff]  ;;  %s16188_s2 = smov 120   ;;  %s16189_s1 = smov 112  }
  0x4f   : > { %v13627_v5 = vpack.c.bf16 %v773_v3, %v772_v2  ;;  %v775_v6 = vld [vmem:[%s16181_s26 + $0x18] sm:$0xff]  ;;  %s752_s0 = scalar_lea.vmem %s16182_s27, %s14493_s5  ;;  %v11948_v8 = vld [vmem:[%s16181_s26 + $0x20] sm:$0xff]  ;;  %v11949_v9 = vld [vmem:[%s16181_s26 + $0x28] sm:$0xff]  ;;  %s16145_s27 = smov 104  }
  0x50   : > { %v13630_v7 = vpack.c.bf16 %v775_v6, %v774_v4  ;;  %v14506_v10 = vld [vmem:[%s752_s0] sm:$0xff]  ;;  %v13633_v11 = vpack.c.bf16 %v11949_v9, %v11948_v8  ;;  %v11950_v12 = vld [vmem:[%s16181_s26 + $0x30] sm:$0xff]  ;;  %v11951_v13 = vld [vmem:[%s16181_s26 + $0x38] sm:$0xff]  ;;  %s16149_s0 = smov 120   ;;  %s15163_s29 = sand.u32 1, %s14251_s28  }
  0x51   : > { %13628 = vmatpush3.bf16.msra.mxu0 %v13627_v5  ;;  %v13636_v14 = vpack.c.bf16 %v11951_v13, %v11950_v12  ;;  %v11953_v15 = vld [vmem:[%s16181_s26 + $0x40] sm:$0xff]  ;;  %v11954_v16 = vld [vmem:[%s16181_s26 + $0x48] sm:$0xff]  ;;  %v11955_v18 = vld [vmem:[%s16181_s26 + $0x50] sm:$0xff]  ;;  %s14576_s25 = scalar_lea.vmem %s16184_s24, %s14478_s3  ;;  %s16154_s23 = sshll.u32 %s15163_s29, 3 }
  0x52   : > { %13629 = vmatprep.subr.bf16.mxu0 %v14264_v0  ;;  %v13639_v17 = vpack.c.bf16 %v11954_v16, %v11953_v15  ;;  %v11956_v19 = vld [vmem:[%s16181_s26 + $0x58] sm:$0xff]  ;;  %v11963_v21 = vld [vmem:[%s16183_s13] ss:$0 sm:$0xff]  ;;  %v11965_v25 = vld [vmem:[%s16183_s13 + $0x1] ss:$0 sm:$0xff]  ;;  %p16194_p9 = scmp.ne.s32.totalorder %s16172_s6, 0 }
  0x53   : > { %v13642_v20 = vpack.c.bf16 %v11956_v19, %v11955_v18  ;;  %v11967_v29 = vld [vmem:[%s16183_s13 + $0x2] ss:$0 sm:$0xff]  ;;  %v14579_v35 = vld [vmem:[%s14576_s25] ss:$0 sm:$0xff]  ;;  %v11959_v59 = vld [vmem:[%s16181_s26 + $0x68] sm:$0xff] }
  0x54   : > { %v11958_v2 = vld [vmem:[%s16181_s26 + $0x60] sm:$0xff] }
  0x55   : > { %13631 = vmatpush3.bf16.msra.mxu0 %v13630_v7 }
  0x56   : > { %13632 = vmatprep.subr.bf16.mxu0 %v14264_v0 }
  0x58   : > { %12707 = vmatmul.mubr.msk.f32.vlgmr.msra.gmra.mrb[0].mxu0 %vm804_vm1, %v14506_v10 }
  0x59   : > { %13634 = vmatpush3.bf16.msra.mxu0 %v13633_v11  ;;  %12717 = vmatprep.mubr.msk.f32.mxu0 %vm14265_vm0, %v14266_v1 }
  0x5a   : > { %13635 = vmatprep.subr.bf16.mxu0 %v14264_v0 }
  0x5d   : > { %13637 = vmatpush3.bf16.msra.mxu0 %v13636_v14 }
  0x5e   : > { %13638 = vmatprep.subr.bf16.mxu0 %v14264_v0 }
  0x60   : > { %12718 = vmatmul.mubr.msk.f32.vlgmr.msra.gmra.mrb[2].mxu0 %vm804_vm1, %v14506_v10 }
  0x61   : > { %13640 = vmatpush3.bf16.msra.mxu0 %v13639_v17  ;;  %12728 = vmatprep.mubr.msk.f32.mxu0 %vm14265_vm0, %v14266_v1 }
  0x62   : > { %13641 = vmatprep.subr.bf16.mxu0 %v14264_v0 }
  0x65   : > { %13643 = vmatpush3.bf16.msra.mxu0 %v13642_v20 }
  0x66   : > { %12731 = vmatprep.subr.mxu0 %v14266_v1 }
  0x68   : > { %12729 = vmatmul.mubr.msk.f32.vlgmr.msra.gmra.mrb[4].mxu0 %vm804_vm1, %v14506_v10 }
  0x69   : > { %12733 = vmatprep.mubr.msk.f32.mxu0 %vm14265_vm0, %v14266_v1 }
 0x12b   : > { %v874_v22 = vpop.f32.mrb[0].mxu0 }
 0x12c   : > { %v14546_v23 = vadd.f32 %v11963_v21, %v874_v22  ;;  %v12708_v24 = vpop.f32.mrb[1].mxu0 }
 0x12e   : > { %12737 = vmatpush3.msra.mxu1 %v14546_v23 }
 0x12f   : > { %12746 = vmatprep.subr.mxu1 %v14266_v1 }
 0x133   : > { %v950_v26 = vpop.f32.mrb[2].mxu0 }
 0x134   : > { %v951_v27 = vadd.f32 %v11965_v25, %v950_v26  ;;  %v12719_v28 = vpop.f32.mrb[3].mxu0 }
 0x136   : > { %1201 = vrot.lane.b32.xlu0 %v951_v27, %s16149_s0  ;;  %12732 = vmatpush3.xpose.msk.msra.mxu0 %vm1030_vm2, %v951_v27 }
 0x137   : > { %12741 = vmatprep.subr.mxu0 %v14266_v1 }
 0x13b   : > { %v1026_v30 = vpop.f32.mrb[4].mxu0 }
 0x13c   : > { %v14559_v31 = vadd.f32 %v11967_v29, %v1026_v30  ;;  %v12730_v32 = vpop.f32.mrb[5].mxu0 }
 0x13e   : > { %1199 = vrot.lane.b32.xlu0 %v14559_v31, %s16149_s0  ;;  %12734 = vmatmul.mubr.msk.f32.vlgmr.msra.gmra.mrb[6].mxu0 %vm1030_vm2, %v14559_v31 }
 0x13f   : > { %12743 = vmatprep.mubr.msk.f32.mxu0 %vm14265_vm0, %v14266_v1 }
 0x1a8   : > { %v1202_v33 = vpop.permute.xlu0 %1201 }
 0x1a9   : > { %12742 = vmatpush3.xpose.msk.msra.mxu0 %vm1030_vm2, %v1202_v33 }
 0x1aa   : > { %12751 = vmatprep.subr.mxu0 %v14266_v1 }
 0x1b0   : > { %v1200_v34 = vpop.permute.xlu0 %1199 }
 0x1b1   : > { %12744 = vmatmul.mubr.msk.f32.vlgmr.msra.gmra.mrb[8].mxu0 %vm1030_vm2, %v1200_v34 }
 0x1b2   : > { %12753 = vmatprep.mubr.msk.f32.mxu0 %vm14265_vm0, %v14266_v1  ;;  %12752 = vmatpush3.msra.mxu0 %v11959_v59 }
 0x1b3   : > { %12761 = vmatprep.subr.mxu0 %v14266_v1 }
 0x211   : > { %v1103_v36 = vpop.f32.mrb[6].mxu0 }
 0x212   : > { %v1107_v37 = vmul.f32 0.35355338, %v1103_v36  ;;  %v12735_v38 = vpop.f32.mrb[7].mxu0 }
 0x214   : > { %v1114_v39 = vadd.f32 %v14579_v35, %v1107_v37 }
 0x216   : > { %v1115_v40 = vsel %vm1030_vm2, %v1114_v39, -inf }
 0x217   : > { %1116 = vmax.xlane.f32.xlu1 %v1115_v40 }
 0x284   : > { %v1273_v41 = vpop.f32.mrb[8].mxu0 }
 0x285   : > { %v1277_v42 = vmul.f32 0.35355338, %v1273_v41  ;;  %v12745_v43 = vpop.f32.mrb[9].mxu0 }
 0x287   : > { %v1278_v44 = vadd.f32 %v14579_v35, %v1277_v42 }
 0x289   : > { %v1279_v45 = vsel %vm1030_vm2, %v1278_v44, -inf }
 0x28a   : > { %1280 = vmax.xlane.f32.xlu1 %v1279_v45 }
 0x2a4   : > { %v1117_v46 = vpop.xlane.xlu1 %1116 }
 0x2a5   : > { %v1118_v47 = vsub.f32 %v1114_v39, %v1117_v46  ;;  %v11961_v46 = vld [vmem:[%s16181_s26 + $0x78] sm:$0xff] }
 0x2a7   : > { %v1119_v48 = vmul.f32 1.442695, %v1118_v47 }
 0x2a9   : > { %13953 = vpow2.f32 %v1119_v48 }
 0x2b3   : > { %v13954_v49 = vpop.eup %13953 }
 0x2b4   : > { %v1121_v50 = vsel %vm1030_vm2, %v13954_v49, 0.0 }
 0x2b5   : > { %1122 = vadd.xlane.f32.xlu0 %v1121_v50 }
 0x2cb   : > { %1604 = vrot.lane.b32.xlu0 %v14546_v23, %s16147_s30 }
 0x2cf   : > { %1756 = vrot.lane.b32.xlu0 %v951_v27, %s16145_s27 }
 0x317   : > { %v1281_v51 = vpop.xlane.xlu1 %1280 }
 0x318   : > { %v1282_v52 = vsub.f32 %v1278_v44, %v1281_v51 }
 0x31a   : > { %v1283_v53 = vmul.f32 1.442695, %v1282_v52 }
 0x31c   : > { %13955 = vpow2.f32 %v1283_v53 }
 0x326   : > { %v13956_v54 = vpop.eup %13955 }
 0x327   : > { %v1285_v55 = vsel %vm1030_vm2, %v13956_v54, 0.0 }
 0x328   : > { %1286 = vadd.xlane.f32.xlu1 %v1285_v55  ;;  %v11986_v55 = vld [vmem:[%s16183_s13 + $0x3] ss:$0 sm:$0xff] }
 0x339   : > { %1291 = vrot.lane.b32.xlu1 %v14546_v23, %s16149_s0  ;;  %s15177_s0 = scalar_lea.vmem [#allocation5], %s16154_s23 }
 0x33d   : > { %1515 = vrot.lane.b32.xlu1 %v951_v27, %s16147_s30 }
 0x341   : > { %1513 = vrot.lane.b32.xlu1 %v14559_v31, %s16147_s30  ;;  %s16190_s30 = smov 104  }
 0x342   : > { %v1123_v56 = vpop.xlane.xlu0 %1122 }
 0x343   : > { %13957 = vrcp.f32 %v1123_v56 }
 0x346   : > { %v1605_v4 = vpop.permute.xlu0 %1604 }
 0x34a   : > { %v1757_v27 = vpop.permute.xlu0 %1756 }
 0x34d   : > { %v13958_v57 = vpop.eup %13957 }
 0x34e   : > { %v1125_v58 = vmul.f32 %v13958_v57, %v13954_v49 }
 0x350   : > { %12739 = vmatmul.mubr.msk.f32.vlgmr.msra.gmra.mrb[0].mxu1 %vm1030_vm2, %v1125_v58 }
 0x351   : > { %12748 = vmatprep.mubr.msk.f32.mxu1 %vm14265_vm0, %v14266_v1 }
 0x3b5   : > { %v1287_v60 = vpop.xlane.xlu1 %1286 }
 0x3b6   : > { %13959 = vrcp.f32 %v1287_v60 }
 0x3b9   : > { %v1292_v61 = vpop.permute.xlu1 %1291 }
 0x3ba   : > { %12747 = vmatpush3.msra.mxu1 %v1292_v61 }
 0x3bb   : > { %12756 = vmatprep.subr.mxu1 %v14266_v1 }
 0x3bd   : > { %v1516_v6 = vpop.permute.xlu1 %1515 }
 0x3c0   : > { %v13960_v62 = vpop.eup %13959 }
 0x3c1   : > { %v1289_v63 = vmul.f32 %v13960_v62, %v13956_v54  ;;  %v1514_v9 = vpop.permute.xlu1 %1513 }
 0x3c3   : > { %12749 = vmatmul.mubr.msk.f32.vlgmr.msra.gmra.mrb[2].mxu1 %vm1030_vm2, %v1289_v63 }
 0x3c4   : > { %12757 = vmatpush3.msra.mxu1 %v11958_v2  ;;  %12758 = vmatprep.mubr.msk.f32.mxu1 %vm14265_vm0, %v14266_v1 }
 0x3c5   : > { %12766 = vmatprep.subr.mxu1 %v14266_v1 }
 0x423   : > { %v1195_v3 = vpop.f32.mrb[0].mxu1 }
 0x424   : > { %v12740_v5 = vpop.f32.mrb[1].mxu1  ;;  %12759 = vmatmul.mubr.msk.f32.vlgmr.msra.gmra.mrb[4].mxu1 %vm1030_vm2, %v1195_v3 }
 0x425   : > { %12767 = vmatpush3.msra.mxu1 %v1605_v4  ;;  %12768 = vmatprep.mubr.msk.f32.mxu1 %vm14265_vm0, %v14266_v1  ;;  %v2041_v5 = vld [vmem:[%s16185_s7] sm:$0xff] }
 0x426   : > { %12776 = vmatprep.subr.mxu1 %v14266_v1 }
 0x496   : > { %v1363_v7 = vpop.f32.mrb[2].mxu1 }
 0x497   : > { %v12750_v8 = vpop.f32.mrb[3].mxu1  ;;  %12754 = vmatmul.mubr.msk.f32.vlgmr.msra.gmra.mrb[10].mxu0 %vm1030_vm2, %v1363_v7 }
 0x498   : > { %12762 = vmatpush3.xpose.msk.msra.mxu0 %vm1030_vm2, %v1516_v6  ;;  %12763 = vmatprep.mubr.msk.f32.mxu0 %vm14265_vm0, %v14266_v1  ;;  %v2042_v6 = vld [vmem:[%s16185_s7 + $0x8] sm:$0xff]  ;;  %v2044_v8 = vld [vmem:[%s16185_s7 + $0x18] sm:$0xff] }
 0x499   : > { %12771 = vmatprep.subr.mxu0 %v14266_v1  ;;  %v13645_v7 = vpack.c.bf16 %v2042_v6, %v2041_v5  ;;  %v11997_v5 = vld [vmem:[%s16181_s26 + $0x88] sm:$0xff]  ;;  %v11998_v6 = vld [vmem:[%s16181_s26 + $0x90] sm:$0xff] }
 0x49b   : > { %12764 = vmatmul.mubr.msk.f32.vlgmr.msra.gmra.mrb[12].mxu0 %vm1030_vm2, %v1514_v9 }
 0x49c   : > { %12773 = vmatprep.mubr.msk.f32.mxu0 %vm14265_vm0, %v14266_v1 }
 0x4f7   : > { %v1509_v11 = vpop.f32.mrb[4].mxu1 }
 0x4f8   : > { %v12760_v12 = vpop.f32.mrb[5].mxu1 }
 0x4f9   : > { %v2047_v12 = vld [vmem:[%s16186_s9 + $0x8] sm:$0xff] }
 0x56a   : > { %v1436_v13 = vpop.f32.mrb[10].mxu0 }
 0x56b   : > { %v1510_v14 = vadd.f32 %v1509_v11, %v1436_v13  ;;  %v12755_v15 = vpop.f32.mrb[11].mxu0  ;;  %v2046_v11 = vld [vmem:[%s16186_s9] sm:$0xff]  ;;  %v2048_v13 = vld [vmem:[%s16186_s9 + $0x10] sm:$0xff] }
 0x56c   : > { %v2049_v15 = vld [vmem:[%s16186_s9 + $0x18] sm:$0xff] }
 0x56e   : > { %v1587_v16 = vpop.f32.mrb[12].mxu0 }
 0x56f   : > { %v1591_v17 = vmul.f32 0.35355338, %v1587_v16  ;;  %v12765_v18 = vpop.f32.mrb[13].mxu0  ;;  %v13654_v16 = vpack.c.bf16 %v2049_v15, %v2048_v13 }
 0x570   : > { %v2051_v18 = vld [vmem:[%s16186_s9 + $0x28] sm:$0xff] }
 0x571   : > { %v1592_v19 = vadd.f32 %v14579_v35, %v1591_v17  ;;  %v2050_v17 = vld [vmem:[%s16186_s9 + $0x20] sm:$0xff] }
 0x573   : > { %v1593_v20 = vsel %vm1030_vm2, %v1592_v19, -inf }
 0x574   : > { %1594 = vmax.xlane.f32.xlu1 %v1593_v20  ;;  %v2052_v20 = vld [vmem:[%s16186_s9 + $0x30] sm:$0xff] }
 0x601   : > { %v1595_v21 = vpop.xlane.xlu1 %1594 }
 0x602   : > { %v1596_v22 = vsub.f32 %v1592_v19, %v1595_v21  ;;  %v13657_v19 = vpack.c.bf16 %v2051_v18, %v2050_v17  ;;  %v2053_v21 = vld [vmem:[%s16186_s9 + $0x38] sm:$0xff]  ;;  %v11994_v18 = vld [vmem:[%s16122_s11 + $0x1] ss:$0 sm:$0xff] }
 0x604   : > { %v1597_v24 = vmul.f32 1.442695, %v1596_v22  ;;  %v13660_v22 = vpack.c.bf16 %v2053_v21, %v2052_v20  ;;  %v12001_v20 = vld [vmem:[%s16181_s26 + $0xa0] sm:$0xff]  ;;  %v12002_v21 = vld [vmem:[%s16181_s26 + $0xa8] sm:$0xff] }
 0x606   : > { %13961 = vpow2.f32 %v1597_v24  ;;  %v2054_v24 = vld [vmem:[%s16186_s9 + $0x40] sm:$0xff] }
 0x610   : > { %v13962_v25 = vpop.eup %13961 }
 0x611   : > { %v1599_v26 = vsel %vm1030_vm2, %v13962_v25, 0.0 }
 0x612   : > { %1600 = vadd.xlane.f32.xlu0 %v1599_v26 }
 0x628   : > { %1754 = vrot.lane.b32.xlu0 %v14559_v31, %s16145_s27  ;;  %v11960_v31 = vld [vmem:[%s16181_s26 + $0x70] sm:$0xff] }
 0x629   : > { %12772 = vmatpush3.msra.mxu0 %v11960_v31 }
 0x62a   : > { %12781 = vmatprep.subr.mxu0 %v14266_v1 }
 0x69f   : > { %v1601_v28 = vpop.xlane.xlu0 %1600 }
 0x6a0   : > { %13963 = vrcp.f32 %v1601_v28  ;;  %v2057_v28 = vld [vmem:[%s16186_s9 + $0x58] sm:$0xff] }
 0x6a3   : > { %v1755_v32 = vpop.permute.xlu0 %1754 }
 0x6aa   : > { %v13964_v29 = vpop.eup %13963 }
 0x6ab   : > { %v1603_v30 = vmul.f32 %v13964_v29, %v13962_v25  ;;  %v2055_v25 = vld [vmem:[%s16186_s9 + $0x48] sm:$0xff] }
 0x6ac   : > { %v13663_v26 = vpack.c.bf16 %v2055_v25, %v2054_v24  ;;  %v11995_v24 = vld [vmem:[%s16123_s12 + $0x1] ss:$0 sm:$0xff] }
 0x6ad   : > { %12769 = vmatmul.mubr.msk.f32.vlgmr.msra.gmra.mrb[6].mxu1 %vm1030_vm2, %v1603_v30  ;;  %v2058_v30 = vld [vmem:[%s16186_s9 + $0x60] sm:$0xff] }
 0x6ae   : > { %12777 = vmatpush3.xpose.msk.msra.mxu1 %vm1030_vm2, %v1757_v27  ;;  %12778 = vmatprep.mubr.msk.f32.mxu1 %vm14265_vm0, %v14266_v1  ;;  %v2056_v27 = vld [vmem:[%s16186_s9 + $0x50] sm:$0xff] }
 0x6af   : > { %12786 = vmatprep.subr.mxu1 %v14266_v1  ;;  %v13666_v29 = vpack.c.bf16 %v2057_v28, %v2056_v27  ;;  %v12003_v28 = vld [vmem:[%s16181_s26 + $0xb0] sm:$0xff] }
 0x6b1   : > { %12779 = vmatmul.mubr.msk.f32.vlgmr.msra.gmra.mrb[8].mxu1 %vm1030_vm2, %v1755_v32  ;;  %v2059_v32 = vld [vmem:[%s16186_s9 + $0x68] sm:$0xff] }
 0x6b2   : > { %12788 = vmatprep.mubr.msk.f32.mxu1 %vm14265_vm0, %v14266_v1  ;;  %12787 = vmatpush3.msra.mxu1 %v11961_v46  ;;  %v13669_v31 = vpack.c.bf16 %v2059_v32, %v2058_v30  ;;  %v12006_v32 = vld [vmem:[%s16181_s26 + $0xc0] sm:$0xff] }
 0x6b3   : > { %13650 = vmatprep.subr.bf16.mxu1 %v14264_v0 }
 0x780   : > { %v1676_v33 = vpop.f32.mrb[6].mxu1 }
 0x781   : > { %v12770_v34 = vpop.f32.mrb[7].mxu1  ;;  %12774 = vmatmul.mubr.msk.f32.vlgmr.msra.gmra.mrb[14].mxu0 %vm1030_vm2, %v1676_v33 }
 0x782   : > { %12783 = vmatprep.mubr.msk.f32.mxu0 %vm14265_vm0, %v14266_v1 }
 0x784   : > { %v1828_v36 = vpop.f32.mrb[8].mxu1 }
 0x785   : > { %v1832_v37 = vmul.f32 0.35355338, %v1828_v36  ;;  %v12780_v38 = vpop.f32.mrb[9].mxu1 }
 0x787   : > { %v1833_v39 = vadd.f32 %v14579_v35, %v1832_v37 }
 0x789   : > { %v1834_v40 = vsel %vm1030_vm2, %v1833_v39, -inf }
 0x78a   : > { %1835 = vmax.xlane.f32.xlu0 %v1834_v40 }
 0x817   : > { %v1836_v41 = vpop.xlane.xlu0 %1835 }
 0x818   : > { %v1837_v42 = vsub.f32 %v1833_v39, %v1836_v41 }
 0x81a   : > { %v1838_v43 = vmul.f32 1.442695, %v1837_v42  ;;  %v11987_v42 = vld [vmem:[%s16122_s11] ss:$0 sm:$0xff] }
 0x81c   : > { %13965 = vpow2.f32 %v1838_v43 }
 0x826   : > { %v13966_v44 = vpop.eup %13965 }
 0x827   : > { %v1840_v45 = vsel %vm1030_vm2, %v13966_v44, 0.0 }
 0x828   : > { %1841 = vadd.xlane.f32.xlu1 %v1840_v45  ;;  %v11988_v45 = vld [vmem:[%s16123_s12] ss:$0 sm:$0xff] }
 0x839   : > { %1845 = vrot.lane.b32.xlu1 %v14546_v23, %s16145_s27 }
 0x854   : > { %v1749_v47 = vpop.f32.mrb[14].mxu0 }
 0x855   : > { %v1753_v48 = vadd.f32 %v1749_v47, %v1510_v14  ;;  %v12775_v49 = vpop.f32.mrb[15].mxu0  ;;  %v13651_v14 = vpack.c.bf16 %v2047_v12, %v2046_v11 }
 0x856   : > { %v2061_v49 = vld [vmem:[%s16186_s9 + $0x78] sm:$0xff] }
 0x8b5   : > { %v1842_v50 = vpop.xlane.xlu1 %1841 }
 0x8b6   : > { %13967 = vrcp.f32 %v1842_v50 }
 0x8b9   : > { %v1846_v51 = vpop.permute.xlu1 %1845 }
 0x8ba   : > { %12782 = vmatpush3.msra.mxu0 %v1846_v51  ;;  %v11989_v51 = vld [vmem:[%s16187_s8] ss:$0 sm:$0xff] }
 0x8bb   : > { %13644 = vmatprep.subr.bf16.mxu0 %v14264_v0 }
 0x8c0   : > { %v13968_v52 = vpop.eup %13967 }
 0x8c1   : > { %v1844_v53 = vmul.f32 %v13968_v52, %v13966_v44 }
 0x8c3   : > { %12784 = vmatmul.mubr.msk.f32.vlgmr.msra.gmra.mrb[16].mxu0 %vm1030_vm2, %v1844_v53 }
 0x8c4   : > { %12799 = vmatprep.mubr.msk.f32.mxu0 %vm14265_vm0, %v14266_v1  ;;  %13646 = vmatpush3.bf16.msra.mxu0 %v13645_v7  ;;  %v11999_v7 = vld [vmem:[%s16181_s26 + $0x98] sm:$0xff] }
 0x8c5   : > { %13647 = vmatprep.subr.bf16.mxu0 %v14264_v0 }
 0x996   : > { %v1917_v23 = vpop.f32.mrb[16].mxu0 }
 0x997   : > { %v12785_v54 = vpop.f32.mrb[17].mxu0  ;;  %12789 = vmatmul.mubr.msk.f32.vlgmr.msra.gmra.mrb[10].mxu1 %vm1030_vm2, %v1917_v23 }
 0x998   : > { %12834 = vmatprep.mubr.msk.f32.mxu1 %vm14265_vm0, %v14266_v1  ;;  %13652 = vmatpush3.bf16.msra.mxu1 %v13651_v14 }
 0x999   : > { %13653 = vmatprep.subr.bf16.mxu1 %v14264_v0 }
 0x99c   : > { %13655 = vmatpush3.bf16.msra.mxu1 %v13654_v16 }
 0x99d   : > { %13656 = vmatprep.subr.bf16.mxu1 %v14264_v0 }
 0x9a0   : > { %13658 = vmatpush3.bf16.msra.mxu1 %v13657_v19 }
 0x9a1   : > { %13659 = vmatprep.subr.bf16.mxu1 %v14264_v0 }
 0x9a4   : > { %13661 = vmatpush3.bf16.msra.mxu1 %v13660_v22 }
 0x9a5   : > { %13662 = vmatprep.subr.bf16.mxu1 %v14264_v0 }
 0x9a8   : > { %13664 = vmatpush3.bf16.msra.mxu1 %v13663_v26  ;;  %v13681_v26 = vpack.c.bf16 %v12002_v21, %v12001_v20 }
 0x9a9   : > { %13665 = vmatprep.subr.bf16.mxu1 %v14264_v0 }
 0x9ac   : > { %13667 = vmatpush3.bf16.msra.mxu1 %v13666_v29  ;;  %v12004_v29 = vld [vmem:[%s16181_s26 + $0xb8] sm:$0xff] }
 0x9ad   : > { %13668 = vmatprep.subr.bf16.mxu1 %v14264_v0  ;;  %v13684_v30 = vpack.c.bf16 %v12004_v29, %v12003_v28 }
 0x9b0   : > { %13670 = vmatpush3.bf16.msra.mxu1 %v13669_v31  ;;  %v12007_v31 = vld [vmem:[%s16181_s26 + $0xc8] sm:$0xff] }
 0x9b1   : > { %13671 = vmatprep.subr.bf16.mxu1 %v14264_v0 }
 0xa6a   : > { %v1990_v56 = vpop.f32.mrb[10].mxu1 }
 0xa6b   : > { %v1994_v57 = vadd.f32 %v1990_v56, %v1753_v48  ;;  %v12790_v58 = vpop.f32.mrb[11].mxu1  ;;  %v2060_v48 = vld [vmem:[%s16186_s9 + $0x70] sm:$0xff] }
 0xa6c   : > { %v13672_v50 = vpack.c.bf16 %v2061_v49, %v2060_v48 }
 0xa6d   : > { %v2001_v59 = vadd.f32 %v11986_v55, %v1994_v57  ;;  %v11991_v55 = vld [vmem:[%s16121_s10] ss:$0 sm:$0xff] }
 0xa6e   : > { %13673 = vmatpush3.bf16.msra.mxu1 %v13672_v50 }
 0xa6f   : > { %v2002_v60 = vadd.f32 %v2001_v59, %v14506_v10  ;;  %v2043_v10 = vld [vmem:[%s16185_s7 + $0x10] sm:$0xff]  ;;  %12875 = vmatprep.subr.mxu1 %v14266_v1 }
 0xa70   : > { %v13648_v9 = vpack.c.bf16 %v2044_v8, %v2043_v10  ;;  %v13678_v8 = vpack.c.bf16 %v11999_v7, %v11998_v6 }
 0xa71   : > { %v2005_v61 = vsel %vm804_vm1, %v2002_v60, 0.0 }
 0xa72   : > { %2006 = vadd.xlane.f32.xlu1 %v2005_v61  ;;  %13649 = vmatpush3.bf16.msra.mxu0 %v13648_v9 }
 0xa73   : > { %13674 = vmatprep.subr.bf16.mxu0 %v14264_v0 }
 0xaff   : > { %v2007_v62 = vpop.xlane.xlu1 %2006 }
 0xb00   : > { %v2009_v63 = vmul.f32 0.03125, %v2007_v62 }
 0xb02   : > { %v2010_v2 = vsub.f32 %v2002_v60, %v2009_v63 }
 0xb04   : > { %v2011_v3 = vmul.f32 %v2010_v2, %v2010_v2  ;;  %v2030_v43 = vmul.f32 %v11987_v42, %v2010_v2  ;;  %v12018_v42 = vld [vmem:[%s16183_s13 + $0x5] ss:$0 sm:$0xff] }
 0xb06   : > { %v2012_v4 = vsel %vm804_vm1, %v2011_v3, 0.0 }
 0xb07   : > { %2013 = vadd.xlane.f32.xlu0 %v2012_v4  ;;  %v11996_v4 = vld [vmem:[%s16181_s26 + $0x80] sm:$0xff] }
 0xb08   : > { %v13675_v10 = vpack.c.bf16 %v11997_v5, %v11996_v4 }
 0xb94   : > { %v2014_v33 = vpop.xlane.xlu0 %2013 }
 0xb95   : > { %v2016_v34 = vmul.f32 0.032258064, %v2014_v33  ;;  %v13687_v33 = vpack.c.bf16 %v12007_v31, %v12006_v32 }
 0xb97   : > { %13969 = vrsqrt.f32 %v2016_v34  ;;  %vm2019_vm3 = vcmp.eq.f32.partialorder %v2016_v34, inf  ;;  %v2022_v38 = vand.u32 2147483648, %v2016_v34  ;;  %vm2021_vm4 = vcmp.eq.f32.partialorder %v2016_v34, 0.0 }
 0xba1   : > { %v13970_v36 = vpop.eup %13969 }
 0xba2   : > { %v2018_v37 = vmul.f32 %v13970_v36, %v2016_v34  ;;  %v12009_v36 = vld [vmem:[%s16181_s26 + $0xd8] sm:$0xff] }
 0xba4   : > { %v2020_v39 = vsel %vm2019_vm3, %v2016_v34, %v2018_v37  ;;  %v12008_v34 = vld [vmem:[%s16181_s26 + $0xd0] sm:$0xff] }
 0xba5   : > { %v2023_v40 = vsel %vm2021_vm4, %v2022_v38, %v2020_v39  ;;  %v13690_v37 = vpack.c.bf16 %v12009_v36, %v12008_v34  ;;  %v12016_v38 = vld [vmem:[%s16183_s13 + $0x4] ss:$0 sm:$0xff] }
 0xba6   : > { %v2031_v41 = vadd.f32 1e-06, %v2023_v40 }
 0xba8   : > { %13971 = vrcp.f32 %v2031_v41 }
 0xbb2   : > { %v13972_v44 = vpop.eup %13971 }
 0xbb3   : > { %v2033_v46 = vmul.f32 %v13972_v44, %v2030_v43 }
 0xbb5   : > { %v2040_v47 = vadd.f32 %v11988_v45, %v2033_v46  ;;  %v12020_v46 = vld [vmem:[%s16183_s13 + $0x6] ss:$0 sm:$0xff] }
 0xbb7   : > { %12800 = vmatmul.mubr.msk.f32.vlgmr.msra.gmra.mrb[18].mxu0 %vm804_vm1, %v2040_v47 }
 0xbb8   : > { %12845 = vmatprep.mubr.msk.f32.mxu0 %vm14265_vm0, %v14266_v1  ;;  %13676 = vmatpush3.bf16.msra.mxu0 %v13675_v10 }
 0xbb9   : > { %13677 = vmatprep.subr.bf16.mxu0 %v14264_v0 }
 0xbbc   : > { %13679 = vmatpush3.bf16.msra.mxu0 %v13678_v8 }
 0xbbd   : > { %13680 = vmatprep.subr.bf16.mxu0 %v14264_v0 }
 0xc8a   : > { %v2138_v52 = vpop.f32.mrb[18].mxu0 }
 0xc8b   : > { %v2139_v53 = vadd.f32 %v11989_v51, %v2138_v52  ;;  %v12801_v23 = vpop.f32.mrb[19].mxu0 }
 0xc8d   : > { %v2142_v54 = vmax.f32 %v2139_v53, 0.0 }
 0xc8f   : > { %12835 = vmatmul.mubr.f32.vlgmr.msra.gmra.mrb[12].mxu1 %v2142_v54 }
 0xc90   : > { %12877 = vmatprep.mubr.msk.f32.mxu1 %vm14265_vm0, %v14266_v1 }
 0xd62   : > { %v2215_v56 = vpop.f32.mrb[12].mxu1 }
 0xd63   : > { %v2216_v57 = vadd.f32 %v11991_v55, %v2215_v56  ;;  %v12836_v58 = vpop.f32.mrb[13].mxu1 }
 0xd65   : > { %v2219_v59 = vadd.f32 %v2216_v57, %v2040_v47 }
 0xd67   : > { %v2224_v60 = vsel %vm804_vm1, %v2219_v59, 0.0 }
 0xd68   : > { %2225 = vadd.xlane.f32.xlu0 %v2224_v60 }
 0xdf5   : > { %v2226_v61 = vpop.xlane.xlu0 %2225 }
 0xdf6   : > { %v2227_v62 = vmul.f32 0.03125, %v2226_v61 }
 0xdf8   : > { %v2228_v63 = vsub.f32 %v2219_v59, %v2227_v62 }
 0xdfa   : > { %v2229_v2 = vmul.f32 %v2228_v63, %v2228_v63  ;;  %v2247_v19 = vmul.f32 %v11994_v18, %v2228_v63 }
 0xdfc   : > { %v2230_v3 = vsel %vm804_vm1, %v2229_v2, 0.0 }
 0xdfd   : > { %2231 = vadd.xlane.f32.xlu0 %v2230_v3 }
 0xe8a   : > { %v2232_v9 = vpop.xlane.xlu0 %2231 }
 0xe8b   : > { %v2233_v11 = vmul.f32 0.032258064, %v2232_v9 }
 0xe8d   : > { %13973 = vrsqrt.f32 %v2233_v11  ;;  %vm2236_vm5 = vcmp.eq.f32.partialorder %v2233_v11, inf  ;;  %v2239_v14 = vand.u32 2147483648, %v2233_v11  ;;  %vm2238_vm6 = vcmp.eq.f32.partialorder %v2233_v11, 0.0 }
 0xe97   : > { %v13974_v12 = vpop.eup %13973 }
 0xe98   : > { %v2235_v13 = vmul.f32 %v13974_v12, %v2233_v11  ;;  %v12012_v12 = vld [vmem:[%s16181_s26 + $0xe8] sm:$0xff] }
 0xe9a   : > { %v2237_v15 = vsel %vm2236_vm5, %v2233_v11, %v2235_v13 }
 0xe9b   : > { %v2240_v16 = vsel %vm2238_vm6, %v2239_v14, %v2237_v15 }
 0xe9c   : > { %v2248_v17 = vadd.f32 1e-06, %v2240_v16 }
 0xe9e   : > { %13975 = vrcp.f32 %v2248_v17  ;;  %v12011_v17 = vld [vmem:[%s16181_s26 + $0xe0] sm:$0xff] }
 0xea8   : > { %v13976_v22 = vpop.eup %13975 }
 0xea9   : > { %v2250_v25 = vmul.f32 %v13976_v22, %v2247_v19 }
 0xeab   : > { %v14779_v27 = vadd.f32 %v11995_v24, %v2250_v25 }
 0xead   : > { %12846 = vmatmul.mubr.msk.f32.vlgmr.msra.gmra.mrb[20].mxu0 %vm804_vm1, %v14779_v27 }
 0xeae   : > { %13682 = vmatpush3.bf16.msra.mxu0 %v13681_v26  ;;  %12856 = vmatprep.mubr.msk.f32.mxu0 %vm14265_vm0, %v14266_v1 }
 0xeaf   : > { %13683 = vmatprep.subr.bf16.mxu0 %v14264_v0 }
 0xeb2   : > { %13685 = vmatpush3.bf16.msra.mxu0 %v13684_v30 }
 0xeb3   : > { %13686 = vmatprep.subr.bf16.mxu0 %v14264_v0 }
 0xeb5   : > { %12857 = vmatmul.mubr.msk.f32.vlgmr.msra.gmra.mrb[22].mxu0 %vm804_vm1, %v14779_v27 }
 0xeb6   : > { %13688 = vmatpush3.bf16.msra.mxu0 %v13687_v33  ;;  %12867 = vmatprep.mubr.msk.f32.mxu0 %vm14265_vm0, %v14266_v1 }
 0xeb7   : > { %13689 = vmatprep.subr.bf16.mxu0 %v14264_v0 }
 0xeba   : > { %13691 = vmatpush3.bf16.msra.mxu0 %v13690_v37 }
 0xebb   : > { %12870 = vmatprep.subr.mxu0 %v14266_v1 }
 0xebd   : > { %12868 = vmatmul.mubr.msk.f32.vlgmr.msra.gmra.mrb[24].mxu0 %vm804_vm1, %v14779_v27 }
 0xebe   : > { %12872 = vmatprep.mubr.msk.f32.mxu0 %vm14265_vm0, %v14266_v1 }
 0xf80   : > { %v2361_v39 = vpop.f32.mrb[20].mxu0 }
 0xf81   : > { %v14818_v40 = vadd.f32 %v12016_v38, %v2361_v39  ;;  %v12847_v41 = vpop.f32.mrb[21].mxu0 }
 0xf83   : > { %12876 = vmatpush3.msra.mxu1 %v14818_v40 }
 0xf84   : > { %12885 = vmatprep.subr.mxu1 %v14266_v1 }
 0xf88   : > { %v2437_v43 = vpop.f32.mrb[22].mxu0 }
 0xf89   : > { %v14825_v44 = vadd.f32 %v12018_v42, %v2437_v43  ;;  %v12858_v45 = vpop.f32.mrb[23].mxu0 }
 0xf8b   : > { %2681 = vrot.lane.b32.xlu0 %v14825_v44, %s16188_s2  ;;  %12871 = vmatpush3.xpose.msk.msra.mxu0 %vm1030_vm2, %v14825_v44 }
 0xf8c   : > { %12880 = vmatprep.subr.mxu0 %v14266_v1 }
 0xf90   : > { %v2513_v47 = vpop.f32.mrb[24].mxu0 }
 0xf91   : > { %v14835_v48 = vadd.f32 %v12020_v46, %v2513_v47  ;;  %v12869_v49 = vpop.f32.mrb[25].mxu0 }
 0xf92   : > { %v12013_v49 = vld [vmem:[%s16181_s26 + $0xf0] sm:$0xff] }
 0xf93   : > { %2679 = vrot.lane.b32.xlu1 %v14835_v48, %s16188_s2  ;;  %12873 = vmatmul.mubr.msk.f32.vlgmr.msra.gmra.mrb[26].mxu0 %vm1030_vm2, %v14835_v48 }
 0xf94   : > { %12882 = vmatprep.mubr.msk.f32.mxu0 %vm14265_vm0, %v14266_v1 }
 0xffd   : > { %v2682_v50 = vpop.permute.xlu0 %2681 }
 0xffe   : > { %12881 = vmatpush3.xpose.msk.msra.mxu0 %vm1030_vm2, %v2682_v50 }
 0xfff   : > { %12890 = vmatprep.subr.mxu0 %v14266_v1 }
0x1005   : > { %v2680_v51 = vpop.permute.xlu1 %2679 }
0x1006   : > { %12883 = vmatmul.mubr.msk.f32.vlgmr.msra.gmra.mrb[28].mxu0 %vm1030_vm2, %v2680_v51 }
0x1007   : > { %12892 = vmatprep.mubr.msk.f32.mxu0 %vm14265_vm0, %v14266_v1  ;;  %12891 = vmatpush3.msra.mxu0 %v12012_v12 }
0x1008   : > { %12900 = vmatprep.subr.mxu0 %v14266_v1 }
0x1066   : > { %v2589_v52 = vpop.f32.mrb[26].mxu0 }
0x1067   : > { %v2593_v53 = vmul.f32 0.35355338, %v2589_v52  ;;  %v12874_v23 = vpop.f32.mrb[27].mxu0 }
0x1069   : > { %v2594_v54 = vadd.f32 %v14579_v35, %v2593_v53 }
0x106b   : > { %v2595_v55 = vsel %vm1030_vm2, %v2594_v54, -inf }
0x106c   : > { %2596 = vmax.xlane.f32.xlu0 %v2595_v55 }
0x10d9   : > { %v2753_v56 = vpop.f32.mrb[28].mxu0 }
0x10da   : > { %v2757_v57 = vmul.f32 0.35355338, %v2753_v56  ;;  %v12884_v58 = vpop.f32.mrb[29].mxu0 }
0x10dc   : > { %v2758_v59 = vadd.f32 %v14579_v35, %v2757_v57 }
0x10de   : > { %v2759_v60 = vsel %vm1030_vm2, %v2758_v59, -inf }
0x10df   : > { %2760 = vmax.xlane.f32.xlu1 %v2759_v60 }
0x10f0   : > { %2995 = vrot.lane.b32.xlu1 %v14825_v44, %s16189_s1 }
0x10f9   : > { %v2597_v61 = vpop.xlane.xlu0 %2596 }
0x10fa   : > { %v2598_v62 = vsub.f32 %v2594_v54, %v2597_v61 }
0x10fc   : > { %v2599_v63 = vmul.f32 1.442695, %v2598_v62 }
0x10fe   : > { %13977 = vpow2.f32 %v2599_v63 }
0x1108   : > { %v13978_v2 = vpop.eup %13977 }
0x1109   : > { %v2601_v3 = vsel %vm1030_vm2, %v13978_v2, 0.0 }
0x110a   : > { %2602 = vadd.xlane.f32.xlu0 %v2601_v3 }
0x116c   : > { %v2761_v4 = vpop.xlane.xlu1 %2760 }
0x116d   : > { %v2762_v5 = vsub.f32 %v2758_v59, %v2761_v4 }
0x116f   : > { %v2763_v6 = vmul.f32 1.442695, %v2762_v5 }
0x1170   : > { %v2996_v21 = vpop.permute.xlu1 %2995 }
0x1171   : > { %13979 = vpow2.f32 %v2763_v6 }
0x117b   : > { %v13980_v10 = vpop.eup %13979 }
0x117c   : > { %v2765_v7 = vsel %vm1030_vm2, %v13980_v10, 0.0 }
0x117d   : > { %2766 = vadd.xlane.f32.xlu0 %v2765_v7 }
0x1193   : > { %2771 = vrot.lane.b32.xlu0 %v14818_v40, %s16188_s2 }
0x1197   : > { %v2603_v8 = vpop.xlane.xlu0 %2602  ;;  %2993 = vrot.lane.b32.xlu0 %v14835_v48, %s16189_s1 }
0x1198   : > { %13981 = vrcp.f32 %v2603_v8 }
0x11a2   : > { %v13982_v9 = vpop.eup %13981 }
0x11a3   : > { %v2605_v11 = vmul.f32 %v13982_v9, %v13978_v2 }
0x11a5   : > { %12878 = vmatmul.mubr.msk.f32.vlgmr.msra.gmra.mrb[14].mxu1 %vm1030_vm2, %v2605_v11 }
0x11a6   : > { %12887 = vmatprep.mubr.msk.f32.mxu1 %vm14265_vm0, %v14266_v1 }
0x120a   : > { %v2767_v13 = vpop.xlane.xlu0 %2766 }
0x120b   : > { %13983 = vrcp.f32 %v2767_v13 }
0x120e   : > { %v2772_v14 = vpop.permute.xlu0 %2771 }
0x120f   : > { %12886 = vmatpush3.msra.mxu1 %v2772_v14 }
0x1210   : > { %12895 = vmatprep.subr.mxu1 %v14266_v1 }
0x1212   : > { %v2994_v24 = vpop.permute.xlu0 %2993 }
0x1215   : > { %v13984_v15 = vpop.eup %13983 }
0x1216   : > { %v2769_v16 = vmul.f32 %v13984_v15, %v13980_v10  ;;  %v12038_v10 = vld [vmem:[%s16183_s13 + $0x7] ss:$0 sm:$0xff] }
0x1218   : > { %12888 = vmatmul.mubr.msk.f32.vlgmr.msra.gmra.mrb[16].mxu1 %vm1030_vm2, %v2769_v16 }
0x1219   : > { %12896 = vmatpush3.msra.mxu1 %v12011_v17  ;;  %12897 = vmatprep.mubr.msk.f32.mxu1 %vm14265_vm0, %v14266_v1 }
0x121a   : > { %12905 = vmatprep.subr.mxu1 %v14266_v1 }
0x1278   : > { %v2675_v18 = vpop.f32.mrb[14].mxu1 }
0x1279   : > { %v12879_v19 = vpop.f32.mrb[15].mxu1  ;;  %12898 = vmatmul.mubr.msk.f32.vlgmr.msra.gmra.mrb[18].mxu1 %vm1030_vm2, %v2675_v18 }
0x127a   : > { %12907 = vmatprep.mubr.msk.f32.mxu1 %vm14265_vm0, %v14266_v1  ;;  %v12043_v19 = vld [vmem:[%s16185_s7 + $0x20] sm:$0xff] }
0x12eb   : > { %v2843_v20 = vpop.f32.mrb[16].mxu1 }
0x12ec   : > { %v12889_v22 = vpop.f32.mrb[17].mxu1  ;;  %12893 = vmatmul.mubr.msk.f32.vlgmr.msra.gmra.mrb[30].mxu0 %vm1030_vm2, %v2843_v20  ;;  %v12044_v20 = vld [vmem:[%s16185_s7 + $0x28] sm:$0xff] }
0x12ed   : > { %12901 = vmatpush3.xpose.msk.msra.mxu0 %vm1030_vm2, %v2996_v21  ;;  %12902 = vmatprep.mubr.msk.f32.mxu0 %vm14265_vm0, %v14266_v1  ;;  %v13693_v21 = vpack.c.bf16 %v12044_v20, %v12043_v19  ;;  %v12046_v22 = vld [vmem:[%s16185_s7 + $0x38] sm:$0xff]  ;;  %v12065_v20 = vld [vmem:[%s16187_s8 + $0x1] ss:$0 sm:$0xff]  ;;  %s14270_s8 = smov [#allocation5]  }
0x12ee   : > { %12910 = vmatprep.subr.mxu0 %v14266_v1 }
0x12f0   : > { %12903 = vmatmul.mubr.msk.f32.vlgmr.msra.gmra.mrb[32].mxu0 %vm1030_vm2, %v2994_v24 }
0x12f1   : > { %12912 = vmatprep.mubr.msk.f32.mxu0 %vm14265_vm0, %v14266_v1  ;;  %12911 = vmatpush3.msra.mxu0 %v12013_v49 }
0x12f2   : > { %12920 = vmatprep.subr.mxu0 %v14266_v1 }
0x134c   : > { %v2989_v25 = vpop.f32.mrb[18].mxu1 }
0x134d   : > { %v12899_v26 = vpop.f32.mrb[19].mxu1 }
0x134e   : > { %v12049_v26 = vld [vmem:[%s16186_s9 + $0x88] sm:$0xff] }
0x13bf   : > { %v2916_v28 = vpop.f32.mrb[30].mxu0 }
0x13c0   : > { %v2990_v29 = vadd.f32 %v2989_v25, %v2916_v28  ;;  %v12894_v30 = vpop.f32.mrb[31].mxu0  ;;  %v12048_v25 = vld [vmem:[%s16186_s9 + $0x80] sm:$0xff]  ;;  %v12050_v28 = vld [vmem:[%s16186_s9 + $0x90] sm:$0xff] }
0x13c1   : > { %v12051_v30 = vld [vmem:[%s16186_s9 + $0x98] sm:$0xff] }
0x13c3   : > { %v3067_v32 = vpop.f32.mrb[32].mxu0 }
0x13c4   : > { %v3071_v31 = vmul.f32 0.35355338, %v3067_v32  ;;  %v12904_v33 = vpop.f32.mrb[33].mxu0  ;;  %v13702_v32 = vpack.c.bf16 %v12051_v30, %v12050_v28  ;;  %v12077_v30 = vld [vmem:[%s16125_s14 + $0x1] ss:$0 sm:$0xff] }
0x13c5   : > { %v12053_v33 = vld [vmem:[%s16186_s9 + $0xa8] sm:$0xff] }
0x13c6   : > { %v3072_v34 = vadd.f32 %v14579_v35, %v3071_v31  ;;  %v12052_v31 = vld [vmem:[%s16186_s9 + $0xa0] sm:$0xff] }
0x13c8   : > { %v3073_v36 = vsel %vm1030_vm2, %v3072_v34, -inf }
0x13c9   : > { %3074 = vmax.xlane.f32.xlu1 %v3073_v36  ;;  %v12054_v36 = vld [vmem:[%s16186_s9 + $0xb0] sm:$0xff] }
0x13da   : > { %3236 = vrot.lane.b32.xlu1 %v14825_v44, %s16190_s30 }
0x13de   : > { %3234 = vrot.lane.b32.xlu1 %v14835_v48, %s16190_s30 }
0x1456   : > { %v3075_v37 = vpop.xlane.xlu1 %3074 }
0x1457   : > { %v3076_v38 = vsub.f32 %v3072_v34, %v3075_v37  ;;  %v13705_v34 = vpack.c.bf16 %v12053_v33, %v12052_v31  ;;  %v12055_v37 = vld [vmem:[%s16186_s9 + $0xb8] sm:$0xff] }
0x1459   : > { %v3077_v39 = vmul.f32 1.442695, %v3076_v38  ;;  %v13708_v38 = vpack.c.bf16 %v12055_v37, %v12054_v36 }
0x145a   : > { %v3237_v46 = vpop.permute.xlu1 %3236 }
0x145b   : > { %13985 = vpow2.f32 %v3077_v39  ;;  %v12056_v39 = vld [vmem:[%s16186_s9 + $0xc0] sm:$0xff] }
0x145e   : > { %v3235_v48 = vpop.permute.xlu1 %3234 }
0x1465   : > { %v13986_v41 = vpop.eup %13985 }
0x1466   : > { %v3079_v42 = vsel %vm1030_vm2, %v13986_v41, 0.0 }
0x1467   : > { %3080 = vadd.xlane.f32.xlu0 %v3079_v42 }
0x147d   : > { %3084 = vrot.lane.b32.xlu0 %v14818_v40, %s16189_s1 }
0x14f4   : > { %v3081_v43 = vpop.xlane.xlu0 %3080 }
0x14f5   : > { %13987 = vrcp.f32 %v3081_v43  ;;  %v12058_v43 = vld [vmem:[%s16186_s9 + $0xd0] sm:$0xff] }
0x14f8   : > { %v3085_v45 = vpop.permute.xlu0 %3084 }
0x14f9   : > { %12906 = vmatpush3.msra.mxu1 %v3085_v45  ;;  %v12059_v45 = vld [vmem:[%s16186_s9 + $0xd8] sm:$0xff] }
0x14fa   : > { %12915 = vmatprep.subr.mxu1 %v14266_v1 }
0x14ff   : > { %v13988_v44 = vpop.eup %13987 }
0x1500   : > { %v3083_v47 = vmul.f32 %v13988_v44, %v13986_v41  ;;  %v12057_v41 = vld [vmem:[%s16186_s9 + $0xc8] sm:$0xff]  ;;  %v13714_v44 = vpack.c.bf16 %v12059_v45, %v12058_v43 }
0x1501   : > { %v13711_v42 = vpack.c.bf16 %v12057_v41, %v12056_v39 }
0x1502   : > { %12908 = vmatmul.mubr.msk.f32.vlgmr.msra.gmra.mrb[20].mxu1 %vm1030_vm2, %v3083_v47  ;;  %v12061_v47 = vld [vmem:[%s16186_s9 + $0xe8] sm:$0xff] }
0x1503   : > { %12916 = vmatpush3.xpose.msk.msra.mxu1 %vm1030_vm2, %v3237_v46  ;;  %12917 = vmatprep.mubr.msk.f32.mxu1 %vm14265_vm0, %v14266_v1  ;;  %v12060_v46 = vld [vmem:[%s16186_s9 + $0xe0] sm:$0xff] }
0x1504   : > { %12925 = vmatprep.subr.mxu1 %v14266_v1 }
0x1506   : > { %12918 = vmatmul.mubr.msk.f32.vlgmr.msra.gmra.mrb[22].mxu1 %vm1030_vm2, %v3235_v48  ;;  %v13717_v48 = vpack.c.bf16 %v12061_v47, %v12060_v46 }
0x1507   : > { %12927 = vmatprep.mubr.msk.f32.mxu1 %vm14265_vm0, %v14266_v1 }
0x15d5   : > { %v3156_v50 = vpop.f32.mrb[20].mxu1 }
0x15d6   : > { %v12909_v51 = vpop.f32.mrb[21].mxu1  ;;  %12913 = vmatmul.mubr.msk.f32.vlgmr.msra.gmra.mrb[34].mxu0 %vm1030_vm2, %v3156_v50 }
0x15d7   : > { %12922 = vmatprep.mubr.msk.f32.mxu0 %vm14265_vm0, %v14266_v1 }
0x15d9   : > { %v3308_v52 = vpop.f32.mrb[22].mxu1 }
0x15da   : > { %v3312_v53 = vmul.f32 0.35355338, %v3308_v52  ;;  %v12919_v23 = vpop.f32.mrb[23].mxu1 }
0x15dc   : > { %v3313_v54 = vadd.f32 %v14579_v35, %v3312_v53  ;;  %v12014_v35 = vld [vmem:[%s16181_s26 + $0xf8] sm:$0xff] }
0x15dd   : > { %12926 = vmatpush3.msra.mxu1 %v12014_v35 }
0x15de   : > { %v3314_v55 = vsel %vm1030_vm2, %v3313_v54, -inf  ;;  %13698 = vmatprep.subr.bf16.mxu1 %v14264_v0 }
0x15df   : > { %3315 = vmax.xlane.f32.xlu0 %v3314_v55 }
0x15f5   : > { %3325 = vrot.lane.b32.xlu0 %v14818_v40, %s16190_s30 }
0x166c   : > { %v3316_v56 = vpop.xlane.xlu0 %3315 }
0x166d   : > { %v3317_v57 = vsub.f32 %v3313_v54, %v3316_v56  ;;  %v12041_v56 = vld [vmem:[%s16122_s11 + $0x2] ss:$0 sm:$0xff] }
0x166f   : > { %v3318_v58 = vmul.f32 1.442695, %v3317_v57 }
0x1670   : > { %v3326_v59 = vpop.permute.xlu0 %3325 }
0x1671   : > { %13989 = vpow2.f32 %v3318_v58  ;;  %12921 = vmatpush3.msra.mxu0 %v3326_v59  ;;  %v3743_v58 = vld [vmem:[#allocation2] sm:$0xff]  ;;  %v3744_v59 = vld [vmem:[#allocation2 + $0x8] sm:$0xff] }
0x1672   : > { %13692 = vmatprep.subr.bf16.mxu0 %v14264_v0 }
0x167b   : > { %v13990_v60 = vpop.eup %13989 }
0x167c   : > { %v3320_v61 = vsel %vm1030_vm2, %v13990_v60, 0.0 }
0x167d   : > { %3321 = vadd.xlane.f32.xlu1 %v3320_v61  ;;  %v12042_v61 = vld [vmem:[%s16123_s12 + $0x2] ss:$0 sm:$0xff] }
0x16a9   : > { %v3229_v40 = vpop.f32.mrb[34].mxu0 }
0x16aa   : > { %v3233_v62 = vadd.f32 %v3229_v40, %v2990_v29  ;;  %v12914_v63 = vpop.f32.mrb[35].mxu0  ;;  %v13699_v29 = vpack.c.bf16 %v12049_v26, %v12048_v25  ;;  %v13723_v40 = vpack.c.bf16 %v3744_v59, %v3743_v58  ;;  %v12075_v25 = vld [vmem:[%s16125_s14] ss:$0 sm:$0xff] }
0x16ab   : > { %v3745_v63 = vld [vmem:[#allocation2 + $0x10] sm:$0xff] }
0x170a   : > { %v3322_v2 = vpop.xlane.xlu1 %3321 }
0x170b   : > { %13991 = vrcp.f32 %v3322_v2  ;;  %v3746_v2 = vld [vmem:[#allocation2 + $0x18] sm:$0xff] }
0x1715   : > { %v13992_v3 = vpop.eup %13991 }
0x1716   : > { %v3324_v4 = vmul.f32 %v13992_v3, %v13990_v60  ;;  %v13726_v3 = vpack.c.bf16 %v3746_v2, %v3745_v63  ;;  %v3764_v63 = vld [vmem:[#allocation2 + $0x68] sm:$0xff] }
0x1718   : > { %12923 = vmatmul.mubr.msk.f32.vlgmr.msra.gmra.mrb[36].mxu0 %vm1030_vm2, %v3324_v4  ;;  %v3749_v4 = vld [vmem:[#allocation2 + $0x20] sm:$0xff] }
0x1719   : > { %12938 = vmatprep.mubr.msk.f32.mxu0 %vm14265_vm0, %v14266_v1  ;;  %13694 = vmatpush3.bf16.msra.mxu0 %v13693_v21 }
0x171a   : > { %13695 = vmatprep.subr.bf16.mxu0 %v14264_v0 }
0x17eb   : > { %v3397_v5 = vpop.f32.mrb[36].mxu0 }
0x17ec   : > { %v12924_v6 = vpop.f32.mrb[37].mxu0  ;;  %12928 = vmatmul.mubr.msk.f32.vlgmr.msra.gmra.mrb[24].mxu1 %vm1030_vm2, %v3397_v5  ;;  %v3750_v5 = vld [vmem:[#allocation2 + $0x28] sm:$0xff] }
0x17ed   : > { %12973 = vmatprep.mubr.msk.f32.mxu1 %vm14265_vm0, %v14266_v1  ;;  %13700 = vmatpush3.bf16.msra.mxu1 %v13699_v29 }
0x17ee   : > { %13701 = vmatprep.subr.bf16.mxu1 %v14264_v0 }
0x17f1   : > { %13703 = vmatpush3.bf16.msra.mxu1 %v13702_v32 }
0x17f2   : > { %13704 = vmatprep.subr.bf16.mxu1 %v14264_v0 }
0x17f5   : > { %13706 = vmatpush3.bf16.msra.mxu1 %v13705_v34  ;;  %v12079_v34 = vld [vmem:[%s16125_s14 + $0x2] ss:$0 sm:$0xff] }
0x17f6   : > { %13707 = vmatprep.subr.bf16.mxu1 %v14264_v0 }
0x17f9   : > { %13709 = vmatpush3.bf16.msra.mxu1 %v13708_v38 }
0x17fa   : > { %13710 = vmatprep.subr.bf16.mxu1 %v14264_v0 }
0x17fd   : > { %13712 = vmatpush3.bf16.msra.mxu1 %v13711_v42 }
0x17fe   : > { %13713 = vmatprep.subr.bf16.mxu1 %v14264_v0 }
0x1801   : > { %13715 = vmatpush3.bf16.msra.mxu1 %v13714_v44 }
0x1802   : > { %13716 = vmatprep.subr.bf16.mxu1 %v14264_v0 }
0x1805   : > { %13718 = vmatpush3.bf16.msra.mxu1 %v13717_v48 }
0x1806   : > { %13719 = vmatprep.subr.bf16.mxu1 %v14264_v0 }
0x18bf   : > { %v3470_v7 = vpop.f32.mrb[24].mxu1 }
0x18c0   : > { %v3474_v8 = vadd.f32 %v3470_v7, %v3233_v62  ;;  %v12929_v9 = vpop.f32.mrb[25].mxu1  ;;  %v3751_v7 = vld [vmem:[#allocation2 + $0x30] sm:$0xff] }
0x18c2   : > { %v3481_v11 = vadd.f32 %v12038_v10, %v3474_v8  ;;  %v13729_v10 = vpack.c.bf16 %v3750_v5, %v3749_v4  ;;  %v3752_v8 = vld [vmem:[#allocation2 + $0x38] sm:$0xff] }
0x18c3   : > { %v13732_v9 = vpack.c.bf16 %v3752_v8, %v3751_v7 }
0x18c4   : > { %v3482_v12 = vadd.f32 %v3481_v11, %v14779_v27  ;;  %v12045_v27 = vld [vmem:[%s16185_s7 + $0x30] sm:$0xff]  ;;  %s16191_s7 = sld [smem:[#allocation18_spill]]  ;;  %v3756_v11 = vld [vmem:[#allocation2 + $0x40] sm:$0xff] }
0x18c5   : > { %v13696_v24 = vpack.c.bf16 %v12046_v22, %v12045_v27 }
0x18c6   : > { %v3487_v13 = vsel %vm804_vm1, %v3482_v12, 0.0 }
0x18c7   : > { %3488 = vadd.xlane.f32.xlu1 %v3487_v13  ;;  %13697 = vmatpush3.bf16.msra.mxu0 %v13696_v24 }
0x18c8   : > { %13722 = vmatprep.subr.bf16.mxu0 %v14264_v0 }
0x18ca   : > { %s756_s13 = scalar_lea.vmem %s16191_s7, %s14493_s5  ;;  %s16192_s7 = sld [smem:[#allocation19_spill]] }
0x18cb   : > { %v15013_v6 = vld [vmem:[%s756_s13] sm:$0xff] }
0x18d0   : > { %s15314_s13 = scalar_lea.vmem %s16192_s7, %s14493_s5  ;;  %s16193_s5 = sld [smem:[#allocation21_spill]] }
0x18d6   : > { %s15377_s27 = scalar_lea.vmem %s16193_s5, %s14478_s3  ;;  %s11779_s5 = sshll.u32 %s15177_s0, 4  ;;  %s11780_s5 = int_to_ptr.vmem [resolvable:$true] %s11779_s5 }
0x18d7   : > { %s11761_s3 = scalar_lea.sflag [#allocation4], %s15163_s29  ;;  %s14161_s24 = scalar_lea.vmem %s11780_s5, 128 }
0x18d8   : > { %p14162_p6 = scmp.ne.s32.totalorder %s11780_s5, %s14161_s24 }
0x18da   : > { %p14163_p10 = pnand %p14162_p6, %p16194_p9 }
0x18dc   : > { %p14164_p12 = pneg %p14163_p10 }
0x1954   : > { %v3489_v14 = vpop.xlane.xlu1 %3488 }
0x1955   : > { %v3490_v15 = vmul.f32 0.03125, %v3489_v14  ;;  %v3758_v14 = vld [vmem:[#allocation2 + $0x50] sm:$0xff] }
0x1957   : > { %v3491_v16 = vsub.f32 %v3482_v12, %v3490_v15  ;;  %v3757_v12 = vld [vmem:[#allocation2 + $0x48] sm:$0xff]  ;;  %v3759_v15 = vld [vmem:[#allocation2 + $0x58] sm:$0xff] }
0x1958   : > { %v13735_v13 = vpack.c.bf16 %v3757_v12, %v3756_v11 }
0x1959   : > { %v3492_v17 = vmul.f32 %v3491_v16, %v3491_v16  ;;  %v3510_v57 = vmul.f32 %v12041_v56, %v3491_v16  ;;  %v13738_v16 = vpack.c.bf16 %v3759_v15, %v3758_v14 }
0x195b   : > { %v3493_v18 = vsel %vm804_vm1, %v3492_v17, 0.0  ;;  %v12062_v17 = vld [vmem:[%s16186_s9 + $0xf0] sm:$0xff] }
0x195c   : > { %3494 = vadd.xlane.f32.xlu1 %v3493_v18  ;;  %v12063_v18 = vld [vmem:[%s16186_s9 + $0xf8] sm:$0xff]  ;;  %s14165_s9 = sshll.u32 %s14270_s8, 4  ;;  %s14166_s9 = int_to_ptr.vmem [resolvable:$false] %s14165_s9 }
0x195d   : > { %v13720_v19 = vpack.c.bf16 %v12063_v18, %v12062_v17  ;;  %p14168_p2 = scmp.lt.s32.totalorder %s11780_s5, %s14166_s9 }
0x195f   : > { %13721 = vmatpush3.bf16.msra.mxu1 %v13720_v19 }
0x1960   : > { %13014 = vmatprep.subr.mxu1 %v14266_v1 }
0x19e9   : > { %v3495_v49 = vpop.xlane.xlu1 %3494 }
0x19ea   : > { %v3496_v50 = vmul.f32 0.032258064, %v3495_v49 }
0x19ec   : > { %13993 = vrsqrt.f32 %v3496_v50  ;;  %vm3499_vm7 = vcmp.eq.f32.partialorder %v3496_v50, inf  ;;  %v3502_v53 = vand.u32 2147483648, %v3496_v50  ;;  %vm3501_vm8 = vcmp.eq.f32.partialorder %v3496_v50, 0.0 }
0x19f6   : > { %v13994_v51 = vpop.eup %13993 }
0x19f7   : > { %v3498_v52 = vmul.f32 %v13994_v51, %v3496_v50 }
0x19f9   : > { %v3500_v23 = vsel %vm3499_vm7, %v3496_v50, %v3498_v52 }
0x19fa   : > { %v3503_v54 = vsel %vm3501_vm8, %v3502_v53, %v3500_v23 }
0x19fb   : > { %v3511_v55 = vadd.f32 1e-06, %v3503_v54 }
0x19fd   : > { %13995 = vrcp.f32 %v3511_v55 }
0x1a07   : > { %v13996_v60 = vpop.eup %13995 }
0x1a08   : > { %v3513_v35 = vmul.f32 %v13996_v60, %v3510_v57 }
0x1a0a   : > { %v15002_v62 = vadd.f32 %v12042_v61, %v3513_v35 }
0x1a0c   : > { %12939 = vmatmul.mubr.msk.f32.vlgmr.msra.gmra.mrb[38].mxu0 %vm804_vm1, %v15002_v62 }
0x1a0d   : > { %13724 = vmatpush3.bf16.msra.mxu0 %v13723_v40  ;;  %12984 = vmatprep.mubr.msk.f32.mxu0 %vm14265_vm0, %v14266_v1 }
0x1a0e   : > { %13725 = vmatprep.subr.bf16.mxu0 %v14264_v0 }
0x1a11   : > { %13727 = vmatpush3.bf16.msra.mxu0 %v13726_v3 }
0x1a12   : > { %13728 = vmatprep.subr.bf16.mxu0 %v14264_v0 }
0x1a14   : > { %12985 = vmatmul.mubr.msk.f32.vlgmr.msra.gmra.mrb[40].mxu0 %vm804_vm1, %v15013_v6 }
0x1a15   : > { %13730 = vmatpush3.bf16.msra.mxu0 %v13729_v10  ;;  %12995 = vmatprep.mubr.msk.f32.mxu0 %vm14265_vm0, %v14266_v1  ;;  %v3763_v10 = vld [vmem:[#allocation2 + $0x60] sm:$0xff] }
0x1a16   : > { %13731 = vmatprep.subr.bf16.mxu0 %v14264_v0 }
0x1a19   : > { %13733 = vmatpush3.bf16.msra.mxu0 %v13732_v9 }
0x1a1a   : > { %13734 = vmatprep.subr.bf16.mxu0 %v14264_v0 }
0x1a1c   : > { %12996 = vmatmul.mubr.msk.f32.vlgmr.msra.gmra.mrb[42].mxu0 %vm804_vm1, %v15013_v6 }
0x1a1d   : > { %13736 = vmatpush3.bf16.msra.mxu0 %v13735_v13  ;;  %13006 = vmatprep.mubr.msk.f32.mxu0 %vm14265_vm0, %v14266_v1 }
0x1a1e   : > { %13737 = vmatprep.subr.bf16.mxu0 %v14264_v0 }
0x1a21   : > { %13739 = vmatpush3.bf16.msra.mxu0 %v13738_v16 }
0x1a22   : > { %13009 = vmatprep.subr.mxu0 %v14266_v1 }
0x1a24   : > { %13007 = vmatmul.mubr.msk.f32.vlgmr.msra.gmra.mrb[44].mxu0 %vm804_vm1, %v15013_v6 }
0x1a25   : > { %13011 = vmatprep.mubr.msk.f32.mxu0 %vm14265_vm0, %v14266_v1 }
0x1adf   : > { %v3622_v27 = vpop.f32.mrb[38].mxu0 }
0x1ae0   : > { %v3623_v21 = vadd.f32 %v12065_v20, %v3622_v27  ;;  %v12940_v22 = vpop.f32.mrb[39].mxu0 }
0x1ae2   : > { %v3626_v24 = vmax.f32 %v3623_v21, 0.0 }
0x1ae4   : > { %12974 = vmatmul.mubr.f32.vlgmr.msra.gmra.mrb[26].mxu1 %v3626_v24 }
0x1ae5   : > { %13016 = vmatprep.mubr.msk.f32.mxu1 %vm14265_vm0, %v14266_v1 }
0x1ae7   : > { %v3844_v26 = vpop.f32.mrb[40].mxu0 }
0x1ae8   : > { %v15047_v28 = vadd.f32 %v12075_v25, %v3844_v26  ;;  %v12986_v29 = vpop.f32.mrb[41].mxu0 }
0x1aea   : > { %13015 = vmatpush3.msra.mxu1 %v15047_v28 }
0x1aeb   : > { %13024 = vmatprep.subr.mxu1 %v14266_v1 }
0x1aef   : > { %v3920_v32 = vpop.f32.mrb[42].mxu0 }
0x1af0   : > { %v15054_v31 = vadd.f32 %v12077_v30, %v3920_v32  ;;  %v12997_v33 = vpop.f32.mrb[43].mxu0 }
0x1af2   : > { %4163 = vrot.lane.b32.xlu1 %v15054_v31, %s16188_s2  ;;  %13010 = vmatpush3.xpose.msk.msra.mxu0 %vm1030_vm2, %v15054_v31 }
0x1af3   : > { %13019 = vmatprep.subr.mxu0 %v14266_v1 }
0x1af7   : > { %v3996_v36 = vpop.f32.mrb[44].mxu0 }
0x1af8   : > { %v15064_v37 = vadd.f32 %v12079_v34, %v3996_v36  ;;  %v13008_v38 = vpop.f32.mrb[45].mxu0 }
0x1af9   : > { %v12067_v38 = vld [vmem:[%s16121_s10 + $0x1] ss:$0 sm:$0xff] }
0x1afa   : > { %4161 = vrot.lane.b32.xlu0 %v15064_v37, %s16188_s2  ;;  %13012 = vmatmul.mubr.msk.f32.vlgmr.msra.gmra.mrb[46].mxu0 %vm1030_vm2, %v15064_v37 }
0x1afb   : > { %13021 = vmatprep.mubr.msk.f32.mxu0 %vm14265_vm0, %v14266_v1 }
0x1b64   : > { %v4164_v39 = vpop.permute.xlu1 %4163 }
0x1b65   : > { %13020 = vmatpush3.xpose.msk.msra.mxu0 %vm1030_vm2, %v4164_v39 }
0x1b66   : > { %13029 = vmatprep.subr.mxu0 %v14266_v1 }
0x1b6c   : > { %v4162_v41 = vpop.permute.xlu0 %4161 }
0x1b6d   : > { %13022 = vmatmul.mubr.msk.f32.vlgmr.msra.gmra.mrb[48].mxu0 %vm1030_vm2, %v4162_v41 }
0x1b6e   : > { %13031 = vmatprep.mubr.msk.f32.mxu0 %vm14265_vm0, %v14266_v1  ;;  %13030 = vmatpush3.msra.mxu0 %v3764_v63 }
0x1b6f   : > { %13039 = vmatprep.subr.mxu0 %v14266_v1 }
0x1bb7   : > { %v15077_v42 = vpop.f32.mrb[26].mxu1 }
0x1bb8   : > { %v12975_v43 = vpop.f32.mrb[27].mxu1 }
0x1bb9   : > { %v3700_v43 = vadd.f32 %v12067_v38, %v15077_v42  ;;  %v3766_v42 = vld [vmem:[#allocation2 + $0x78] sm:$0xff]  ;;  %v12070_v38 = vld [vmem:[%s16122_s11 + $0x3] ss:$0 sm:$0xff] }
0x1bcd   : > { %v4072_v45 = vpop.f32.mrb[46].mxu0 }
0x1bce   : > { %v4076_v44 = vmul.f32 0.35355338, %v4072_v45  ;;  %v13013_v46 = vpop.f32.mrb[47].mxu0 }
0x1bd0   : > { %v4077_v47 = vsel %vm1030_vm2, %v4076_v44, -inf }
0x1bd1   : > { %4078 = vmax.xlane.f32.xlu0 %v4077_v47 }
0x1c40   : > { %v4235_v48 = vpop.f32.mrb[48].mxu0 }
0x1c41   : > { %v4239_v49 = vmul.f32 0.35355338, %v4235_v48  ;;  %v13023_v50 = vpop.f32.mrb[49].mxu0  ;;  %v3703_v48 = vadd.f32 %v3700_v43, %v15002_v62  ;;  %v12071_v43 = vld [vmem:[%s16123_s12 + $0x3] ss:$0 sm:$0xff] }
0x1c43   : > { %v4240_v51 = vsel %vm1030_vm2, %v4239_v49, -inf }
0x1c44   : > { %4241 = vmax.xlane.f32.xlu1 %v4240_v51 }
0x1c55   : > { %4476 = vrot.lane.b32.xlu1 %v15054_v31, %s16189_s1 }
0x1c59   : > { %4474 = vrot.lane.b32.xlu1 %v15064_v37, %s16189_s1 }
0x1c5e   : > { %v4079_v52 = vpop.xlane.xlu0 %4078 }
0x1c5f   : > { %v4080_v53 = vsub.f32 %v4076_v44, %v4079_v52 }
0x1c61   : > { %v4081_v23 = vmul.f32 1.442695, %v4080_v53 }
0x1c63   : > { %13997 = vpow2.f32 %v4081_v23 }
0x1c6d   : > { %v13998_v54 = vpop.eup %13997 }
0x1c6e   : > { %v4083_v55 = vsel %vm1030_vm2, %v13998_v54, 0.0 }
0x1c6f   : > { %4084 = vadd.xlane.f32.xlu0 %v4083_v55 }
0x1cd1   : > { %v4242_v56 = vpop.xlane.xlu1 %4241 }
0x1cd2   : > { %v4243_v57 = vsub.f32 %v4239_v49, %v4242_v56  ;;  %v3708_v49 = vsel %vm804_vm1, %v3703_v48, 0.0 }
0x1cd4   : > { %v4244_v58 = vmul.f32 1.442695, %v4243_v57 }
0x1cd5   : > { %v4477_v9 = vpop.permute.xlu1 %4476 }
0x1cd6   : > { %13999 = vpow2.f32 %v4244_v58 }
0x1cd9   : > { %v4475_v13 = vpop.permute.xlu1 %4474 }
0x1ce0   : > { %v14000_v59 = vpop.eup %13999 }
0x1ce1   : > { %v4246_v60 = vsel %vm1030_vm2, %v14000_v59, 0.0 }
0x1ce2   : > { %4247 = vadd.xlane.f32.xlu0 %v4246_v60 }
0x1cf8   : > { %4252 = vrot.lane.b32.xlu0 %v15047_v28, %s16188_s2 }
0x1cfc   : > { %v4085_v61 = vpop.xlane.xlu0 %4084 }
0x1cfd   : > { %14001 = vrcp.f32 %v4085_v61 }
0x1d07   : > { %v14002_v35 = vpop.eup %14001 }
0x1d08   : > { %v4087_v40 = vmul.f32 %v14002_v35, %v13998_v54 }
0x1d0a   : > { %13017 = vmatmul.mubr.msk.f32.vlgmr.msra.gmra.mrb[28].mxu1 %vm1030_vm2, %v4087_v40  ;;  %v12097_v40 = vld [vmem:[%s16125_s14 + $0x3] ss:$0 sm:$0xff] }
0x1d0b   : > { %13026 = vmatprep.mubr.msk.f32.mxu1 %vm14265_vm0, %v14266_v1 }
0x1d6f   : > { %v4248_v2 = vpop.xlane.xlu0 %4247 }
0x1d70   : > { %14003 = vrcp.f32 %v4248_v2 }
0x1d73   : > { %v4253_v3 = vpop.permute.xlu0 %4252 }
0x1d74   : > { %13025 = vmatpush3.msra.mxu1 %v4253_v3 }
0x1d75   : > { %13034 = vmatprep.subr.mxu1 %v14266_v1 }
0x1d7a   : > { %v14004_v4 = vpop.eup %14003 }
0x1d7b   : > { %v4250_v5 = vmul.f32 %v14004_v4, %v14000_v59 }
0x1d7d   : > { %13027 = vmatmul.mubr.msk.f32.vlgmr.msra.gmra.mrb[30].mxu1 %vm1030_vm2, %v4250_v5 }
0x1d7e   : > { %13035 = vmatpush3.msra.mxu1 %v3763_v10  ;;  %13036 = vmatprep.mubr.msk.f32.mxu1 %vm14265_vm0, %v14266_v1 }
0x1d7f   : > { %13044 = vmatprep.subr.mxu1 %v14266_v1 }
0x1ddd   : > { %v4157_v7 = vpop.f32.mrb[28].mxu1 }
0x1dde   : > { %v13018_v8 = vpop.f32.mrb[29].mxu1  ;;  %13037 = vmatmul.mubr.msk.f32.vlgmr.msra.gmra.mrb[32].mxu1 %vm1030_vm2, %v4157_v7 }
0x1ddf   : > { %13046 = vmatprep.mubr.msk.f32.mxu1 %vm14265_vm0, %v14266_v1 }
0x1e50   : > { %v4324_v11 = vpop.f32.mrb[30].mxu1 }
0x1e51   : > { %v13028_v12 = vpop.f32.mrb[31].mxu1  ;;  %13032 = vmatmul.mubr.msk.f32.vlgmr.msra.gmra.mrb[50].mxu0 %vm1030_vm2, %v4324_v11  ;;  %v4999_v11 = vld [vmem:[#allocation2 + $0x80] sm:$0xff] }
0x1e52   : > { %13040 = vmatpush3.xpose.msk.msra.mxu0 %vm1030_vm2, %v4477_v9  ;;  %13041 = vmatprep.mubr.msk.f32.mxu0 %vm14265_vm0, %v14266_v1  ;;  %v5000_v12 = vld [vmem:[#allocation2 + $0x88] sm:$0xff] }
0x1e53   : > { %13049 = vmatprep.subr.mxu0 %v14266_v1 }
0x1e55   : > { %13042 = vmatmul.mubr.msk.f32.vlgmr.msra.gmra.mrb[52].mxu0 %vm1030_vm2, %v4475_v13  ;;  %v5006_v13 = vld [vmem:[#allocation2 + $0xa0] sm:$0xff] }
0x1e56   : > { %13051 = vmatprep.mubr.msk.f32.mxu0 %vm14265_vm0, %v14266_v1 }
0x1eb1   : > { %v4470_v14 = vpop.f32.mrb[32].mxu1 }
0x1eb2   : > { %v13038_v15 = vpop.f32.mrb[33].mxu1 }
0x1eb3   : > { %v5007_v15 = vld [vmem:[#allocation2 + $0xa8] sm:$0xff] }
0x1f24   : > { %v4397_v16 = vpop.f32.mrb[50].mxu0 }
0x1f25   : > { %v4471_v17 = vadd.f32 %v4470_v14, %v4397_v16  ;;  %v13033_v18 = vpop.f32.mrb[51].mxu0  ;;  %v13741_v14 = vpack.c.bf16 %v5000_v12, %v4999_v11  ;;  %v5001_v16 = vld [vmem:[#allocation2 + $0x90] sm:$0xff] }
0x1f26   : > { %v13747_v18 = vpack.c.bf16 %v5007_v15, %v5006_v13 }
0x1f28   : > { %v4548_v19 = vpop.f32.mrb[52].mxu0 }
0x1f29   : > { %v4552_v20 = vmul.f32 0.35355338, %v4548_v19  ;;  %v13043_v27 = vpop.f32.mrb[53].mxu0  ;;  %v5008_v19 = vld [vmem:[#allocation2 + $0xb0] sm:$0xff] }
0x1f2b   : > { %v4553_v21 = vsel %vm1030_vm2, %v4552_v20, -inf }
0x1f2c   : > { %4554 = vmax.xlane.f32.xlu0 %v4553_v21 }
0x1f42   : > { %4564 = vrot.lane.b32.xlu0 %v15047_v28, %s16189_s1 }
0x1f46   : > { %4714 = vrot.lane.b32.xlu0 %v15064_v37, %s16190_s30 }
0x1fb9   : > { %v4555_v22 = vpop.xlane.xlu0 %4554 }
0x1fba   : > { %v4556_v24 = vsub.f32 %v4552_v20, %v4555_v22  ;;  %v5009_v20 = vld [vmem:[#allocation2 + $0xb8] sm:$0xff] }
0x1fbc   : > { %v4557_v25 = vmul.f32 1.442695, %v4556_v24 }
0x1fbd   : > { %v4565_v26 = vpop.permute.xlu0 %4564 }
0x1fbe   : > { %14005 = vpow2.f32 %v4557_v25  ;;  %13045 = vmatpush3.msra.mxu1 %v4565_v26 }
0x1fbf   : > { %13054 = vmatprep.subr.mxu1 %v14266_v1 }
0x1fc1   : > { %v4715_v37 = vpop.permute.xlu0 %4714 }
0x1fc8   : > { %v14006_v29 = vpop.eup %14005 }
0x1fc9   : > { %v4559_v30 = vsel %vm1030_vm2, %v14006_v29, 0.0 }
0x1fca   : > { %4560 = vadd.xlane.f32.xlu1 %v4559_v30 }
0x1fdb   : > { %4716 = vrot.lane.b32.xlu1 %v15054_v31, %s16190_s30  ;;  %v3765_v31 = vld [vmem:[#allocation2 + $0x70] sm:$0xff] }
0x1fdc   : > { %13050 = vmatpush3.msra.mxu0 %v3765_v31 }
0x1fdd   : > { %13059 = vmatprep.subr.mxu0 %v14266_v1 }
0x2057   : > { %v4561_v32 = vpop.xlane.xlu1 %4560 }
0x2058   : > { %14007 = vrcp.f32 %v4561_v32 }
0x205b   : > { %v4717_v36 = vpop.permute.xlu1 %4716 }
0x2062   : > { %v14008_v33 = vpop.eup %14007 }
0x2063   : > { %v4563_v34 = vmul.f32 %v14008_v33, %v14006_v29 }
0x2065   : > { %13047 = vmatmul.mubr.msk.f32.vlgmr.msra.gmra.mrb[34].mxu1 %vm1030_vm2, %v4563_v34 }
0x2066   : > { %13055 = vmatpush3.xpose.msk.msra.mxu1 %vm1030_vm2, %v4717_v36  ;;  %13056 = vmatprep.mubr.msk.f32.mxu1 %vm14265_vm0, %v14266_v1 }
0x2067   : > { %13064 = vmatprep.subr.mxu1 %v14266_v1 }
0x2069   : > { %13057 = vmatmul.mubr.msk.f32.vlgmr.msra.gmra.mrb[36].mxu1 %vm1030_vm2, %v4715_v37 }
0x206a   : > { %13066 = vmatprep.mubr.msk.f32.mxu1 %vm14265_vm0, %v14266_v1  ;;  %13065 = vmatpush3.msra.mxu1 %v3766_v42 }
0x206b   : > { %13746 = vmatprep.subr.bf16.mxu1 %v14264_v0 }
0x2138   : > { %v4636_v39 = vpop.f32.mrb[34].mxu1 }
0x2139   : > { %v13048_v41 = vpop.f32.mrb[35].mxu1  ;;  %13052 = vmatmul.mubr.msk.f32.vlgmr.msra.gmra.mrb[54].mxu0 %vm1030_vm2, %v4636_v39 }
0x213a   : > { %13061 = vmatprep.mubr.msk.f32.mxu0 %vm14265_vm0, %v14266_v1 }
0x213c   : > { %v4788_v45 = vpop.f32.mrb[36].mxu1 }
0x213d   : > { %v4792_v44 = vmul.f32 0.35355338, %v4788_v45  ;;  %v13058_v46 = vpop.f32.mrb[37].mxu1 }
0x213e   : > { %v5013_v46 = vld [vmem:[#allocation2 + $0xc0] sm:$0xff] }
0x213f   : > { %v4793_v47 = vsel %vm1030_vm2, %v4792_v44, -inf }
0x2140   : > { %4794 = vmax.xlane.f32.xlu1 %v4793_v47  ;;  %v5014_v47 = vld [vmem:[#allocation2 + $0xc8] sm:$0xff] }
0x2144   : > { %3709 = vadd.xlane.f32.xlu1 %v3708_v49  ;;  %v13753_v49 = vpack.c.bf16 %v5014_v47, %v5013_v46 }
0x21cd   : > { %v4795_v50 = vpop.xlane.xlu1 %4794 }
0x21ce   : > { %v4796_v51 = vsub.f32 %v4792_v44, %v4795_v50  ;;  %v5016_v50 = vld [vmem:[#allocation2 + $0xd8] sm:$0xff] }
0x21d0   : > { %v4797_v52 = vmul.f32 1.442695, %v4796_v51 }
0x21d1   : > { %v3710_v61 = vpop.xlane.xlu1 %3709 }
0x21d2   : > { %14009 = vpow2.f32 %v4797_v52  ;;  %v3711_v35 = vmul.f32 0.03125, %v3710_v61 }
0x21d4   : > { %v3712_v4 = vsub.f32 %v3703_v48, %v3711_v35  ;;  %v5015_v48 = vld [vmem:[#allocation2 + $0xd0] sm:$0xff]  ;;  %v12106_v35 = vld [vmem:[%s16125_s14 + $0x5] ss:$0 sm:$0xff] }
0x21d5   : > { %v13756_v51 = vpack.c.bf16 %v5016_v50, %v5015_v48  ;;  %v5020_v48 = vld [vmem:[#allocation2 + $0xe0] sm:$0xff] }
0x21d6   : > { %v3713_v8 = vmul.f32 %v3712_v4, %v3712_v4  ;;  %v3731_v39 = vmul.f32 %v12070_v38, %v3712_v4 }
0x21d8   : > { %v3714_v9 = vsel %vm804_vm1, %v3713_v8, 0.0 }
0x21dc   : > { %v14010_v53 = vpop.eup %14009 }
0x21dd   : > { %v4799_v23 = vsel %vm1030_vm2, %v14010_v53, 0.0 }
0x21de   : > { %4800 = vadd.xlane.f32.xlu0 %v4799_v23 }
0x21f4   : > { %4804 = vrot.lane.b32.xlu0 %v15047_v28, %s16190_s30 }
0x220c   : > { %v4709_v62 = vpop.f32.mrb[54].mxu0 }
0x220d   : > { %v4713_v54 = vadd.f32 %v4709_v62, %v4471_v17  ;;  %v13053_v55 = vpop.f32.mrb[55].mxu0  ;;  %v5002_v17 = vld [vmem:[#allocation2 + $0x98] sm:$0xff] }
0x220e   : > { %v13744_v27 = vpack.c.bf16 %v5002_v17, %v5001_v16  ;;  %v15234_v17 = vld [vmem:[%s14576_s25] ss:$0 sm:$0xff] }
0x226b   : > { %v4801_v56 = vpop.xlane.xlu0 %4800 }
0x226c   : > { %14011 = vrcp.f32 %v4801_v56 }
0x226f   : > { %v4805_v57 = vpop.permute.xlu0 %4804 }
0x2270   : > { %13060 = vmatpush3.msra.mxu0 %v4805_v57  ;;  %v12098_v57 = vld [vmem:[%s16130_s19] ss:$0 sm:$0xff] }
0x2271   : > { %13740 = vmatprep.subr.bf16.mxu0 %v14264_v0 }
0x2276   : > { %v14012_v58 = vpop.eup %14011 }
0x2277   : > { %v4803_v59 = vmul.f32 %v14012_v58, %v14010_v53 }
0x2279   : > { %13062 = vmatmul.mubr.msk.f32.vlgmr.msra.gmra.mrb[56].mxu0 %vm1030_vm2, %v4803_v59 }
0x227a   : > { %13077 = vmatprep.mubr.msk.f32.mxu0 %vm14265_vm0, %v14266_v1  ;;  %13742 = vmatpush3.bf16.msra.mxu0 %v13741_v14 }
0x227b   : > { %13743 = vmatprep.subr.bf16.mxu0 %v14264_v0 }
0x227e   : > { %13745 = vmatpush3.bf16.msra.mxu0 %v13744_v27 }
0x227f   : > { %13752 = vmatprep.subr.bf16.mxu0 %v14264_v0 }
0x234c   : > { %v4876_v28 = vpop.f32.mrb[56].mxu0 }
0x234d   : > { %v13063_v60 = vpop.f32.mrb[57].mxu0  ;;  %13067 = vmatmul.mubr.msk.f32.vlgmr.msra.gmra.mrb[38].mxu1 %vm1030_vm2, %v4876_v28  ;;  %v12099_v28 = vld [vmem:[%s16131_s20] ss:$0 sm:$0xff] }
0x234e   : > { %13088 = vmatprep.mubr.msk.f32.mxu1 %vm14265_vm0, %v14266_v1  ;;  %13748 = vmatpush3.bf16.msra.mxu1 %v13747_v18 }
0x234f   : > { %13749 = vmatprep.subr.bf16.mxu1 %v14264_v0 }
0x2420   : > { %v4949_v63 = vpop.f32.mrb[38].mxu1 }
0x2421   : > { %v4953_v2 = vadd.f32 %v4949_v63, %v4713_v54  ;;  %v13068_v3 = vpop.f32.mrb[39].mxu1 }
0x2423   : > { %v4960_v5 = vadd.f32 %v12097_v40, %v4953_v2 }
0x2425   : > { %v4961_v10 = vadd.f32 %v4960_v5, %v15013_v6  ;;  %v13750_v6 = vpack.c.bf16 %v5009_v20, %v5008_v19 }
0x2427   : > { %v4964_v7 = vsel %vm804_vm1, %v4961_v10, 0.0  ;;  %13751 = vmatpush3.bf16.msra.mxu1 %v13750_v6 }
0x2428   : > { %4965 = vadd.xlane.f32.xlu1 %v4964_v7  ;;  %13102 = vmatprep.subr.mxu1 %v14266_v1  ;;  %v12104_v7 = vld [vmem:[%s16125_s14 + $0x4] ss:$0 sm:$0xff] }
0x242c   : > { %3715 = vadd.xlane.f32.xlu1 %v3714_v9 }
0x24b5   : > { %v4966_v21 = vpop.xlane.xlu1 %4965 }
0x24b6   : > { %v4967_v22 = vmul.f32 0.03125, %v4966_v21 }
0x24b8   : > { %v4968_v24 = vsub.f32 %v4961_v10, %v4967_v22  ;;  %v12108_v10 = vld [vmem:[%s16125_s14 + $0x6] ss:$0 sm:$0xff] }
0x24b9   : > { %v3716_v25 = vpop.xlane.xlu1 %3715 }
0x24ba   : > { %v3717_v26 = vmul.f32 0.032258064, %v3716_v25  ;;  %v4969_v29 = vmul.f32 %v4968_v24, %v4968_v24  ;;  %v4987_v58 = vmul.f32 %v12098_v57, %v4968_v24 }
0x24bc   : > { %14013 = vrsqrt.f32 %v3717_v26  ;;  %v4970_v30 = vsel %vm804_vm1, %v4969_v29, 0.0  ;;  %vm3720_vm9 = vcmp.eq.f32.partialorder %v3717_v26, inf  ;;  %v3723_v34 = vand.u32 2147483648, %v3717_v26 }
0x24bd   : > { %4971 = vadd.xlane.f32.xlu1 %v4970_v30  ;;  %vm3722_vm10 = vcmp.eq.f32.partialorder %v3717_v26, 0.0 }
0x24c6   : > { %v14014_v32 = vpop.eup %14013 }
0x24c7   : > { %v3719_v33 = vmul.f32 %v14014_v32, %v3717_v26 }
0x24c9   : > { %v3721_v36 = vsel %vm3720_vm9, %v3717_v26, %v3719_v33 }
0x24ca   : > { %v3724_v37 = vsel %vm3722_vm10, %v3723_v34, %v3721_v36 }
0x24cb   : > { %v3732_v31 = vadd.f32 1e-06, %v3724_v37 }
0x24cd   : > { %14015 = vrcp.f32 %v3732_v31 }
0x24d7   : > { %v14016_v41 = vpop.eup %14015 }
0x24d8   : > { %v3734_v45 = vmul.f32 %v14016_v41, %v3731_v39  ;;  %v5021_v41 = vld [vmem:[#allocation2 + $0xe8] sm:$0xff] }
0x24da   : > { %v15169_v44 = vadd.f32 %v12071_v43, %v3734_v45 }
0x24dc   : > { %13078 = vmatmul.mubr.msk.f32.vlgmr.msra.gmra.mrb[58].mxu0 %vm804_vm1, %v15169_v44  ;;  %13089 = vmatmul.mubr.msk.f32.vlgmr.msra.gmra.mrb[40].mxu1 %vm804_vm1, %v15169_v44  ;;  %3742 = vst.msk [vmem:[%s15177_s0] sm:$0xff] %vm804_vm1, %v15169_v44 }
0x24dd   : > { %13099 = vmatprep.mubr.msk.f32.mxu0 %vm14265_vm0, %v14266_v1  ;;  %13104 = vmatprep.mubr.msk.f32.mxu1 %vm14265_vm0, %v14266_v1 }
0x24de   : > { %13754 = vmatpush3.bf16.msra.mxu0 %v13753_v49 }
0x24df   : > { %13755 = vmatprep.subr.bf16.mxu0 %v14264_v0 }
0x24e2   : > { %13757 = vmatpush3.bf16.msra.mxu0 %v13756_v51 }
0x24e3   : > { %13112 = vmatprep.subr.mxu0 %v14266_v1 }
0x254a   : > { %v4972_v52 = vpop.xlane.xlu1 %4971 }
0x254b   : > { %v4973_v53 = vmul.f32 0.032258064, %v4972_v52 }
0x254d   : > { %14017 = vrsqrt.f32 %v4973_v53  ;;  %vm4976_vm11 = vcmp.eq.f32.partialorder %v4973_v53, inf  ;;  %v4979_v62 = vand.u32 2147483648, %v4973_v53  ;;  %vm4978_vm12 = vcmp.eq.f32.partialorder %v4973_v53, 0.0 }
0x2557   : > { %v14018_v23 = vpop.eup %14017 }
0x2558   : > { %v4975_v42 = vmul.f32 %v14018_v23, %v4973_v53 }
0x255a   : > { %v4977_v54 = vsel %vm4976_vm11, %v4973_v53, %v4975_v42 }
0x255b   : > { %v4980_v55 = vsel %vm4978_vm12, %v4979_v62, %v4977_v54 }
0x255c   : > { %v4988_v56 = vadd.f32 1e-06, %v4980_v55 }
0x255e   : > { %14019 = vrcp.f32 %v4988_v56 }
0x2568   : > { %v14020_v59 = vpop.eup %14019 }
0x2569   : > { %v4990_v60 = vmul.f32 %v14020_v59, %v4987_v58 }
0x256b   : > { %v15194_v61 = vadd.f32 %v12099_v28, %v4990_v60 }
0x256d   : > { %13100 = vmatmul.mubr.msk.f32.vlgmr.msra.gmra.mrb[60].mxu0 %vm804_vm1, %v15194_v61 }
0x256e   : > { %13114 = vmatprep.mubr.msk.f32.mxu0 %vm14265_vm0, %v14266_v1 }
0x25af   : > { %v5101_v40 = vpop.f32.mrb[58].mxu0  ;;  %v5177_v63 = vpop.f32.mrb[40].mxu1 }
0x25b0   : > { %v15203_v2 = vadd.f32 %v12106_v35, %v5177_v63  ;;  %v13079_v3 = vpop.f32.mrb[59].mxu0  ;;  %v13090_v4 = vpop.f32.mrb[41].mxu1  ;;  %v15220_v12 = vadd.f32 %v12104_v7, %v5101_v40 }
0x25b2   : > { %5424 = vrot.lane.b32.xlu1 %v15203_v2, %s16188_s2  ;;  %13103 = vmatpush3.xpose.msk.msra.mxu1 %vm1030_vm2, %v15203_v2 }
0x25b3   : > { %13107 = vmatprep.subr.mxu1 %v14266_v1 }
0x2624   : > { %v5425_v5 = vpop.permute.xlu1 %5424 }
0x2625   : > { %13113 = vmatpush3.xpose.msk.msra.mxu0 %vm1030_vm2, %v5425_v5 }
0x2626   : > { %13122 = vmatprep.subr.mxu0 %v14266_v1 }
0x2640   : > { %v5256_v8 = vpop.f32.mrb[60].mxu0 }
0x2641   : > { %v15218_v9 = vadd.f32 %v12108_v10, %v5256_v8  ;;  %v13101_v11 = vpop.f32.mrb[61].mxu0 }
0x2642   : > { %v5022_v11 = vld [vmem:[#allocation2 + $0xf0] sm:$0xff] }
0x2643   : > { %5422 = vrot.lane.b32.xlu0 %v15218_v9, %s16188_s2  ;;  %13105 = vmatmul.mubr.msk.f32.vlgmr.msra.gmra.mrb[42].mxu1 %vm1030_vm2, %v15218_v9 }
0x2644   : > { %13108 = vmatpush3.msra.mxu1 %v15220_v12  ;;  %13109 = vmatprep.mubr.msk.f32.mxu1 %vm14265_vm0, %v14266_v1 }
0x2645   : > { %13117 = vmatprep.subr.mxu1 %v14266_v1 }
0x26b5   : > { %v5423_v13 = vpop.permute.xlu0 %5422 }
0x26b6   : > { %13115 = vmatmul.mubr.msk.f32.vlgmr.msra.gmra.mrb[62].mxu0 %vm1030_vm2, %v5423_v13 }
0x26b7   : > { %13124 = vmatprep.mubr.msk.f32.mxu0 %vm14265_vm0, %v14266_v1  ;;  %13123 = vmatpush3.msra.mxu0 %v5021_v41 }
0x26b8   : > { %13132 = vmatprep.subr.mxu0 %v14266_v1 }
0x2716   : > { %v5332_v14 = vpop.f32.mrb[42].mxu1 }
0x2717   : > { %v5336_v15 = vmul.f32 0.35355338, %v5332_v14  ;;  %v13106_v16 = vpop.f32.mrb[43].mxu1 }
0x2719   : > { %v5337_v18 = vadd.f32 %v15234_v17, %v5336_v15 }
0x271b   : > { %v5338_v19 = vsel %vm1030_vm2, %v5337_v18, -inf }
0x271c   : > { %5339 = vmax.xlane.f32.xlu0 %v5338_v19 }
0x2789   : > { %v5496_v20 = vpop.f32.mrb[62].mxu0 }
0x278a   : > { %v5500_v27 = vmul.f32 0.35355338, %v5496_v20  ;;  %v13116_v6 = vpop.f32.mrb[63].mxu0 }
0x278c   : > { %v5501_v21 = vadd.f32 %v15234_v17, %v5500_v27 }
0x278e   : > { %v5502_v22 = vsel %vm1030_vm2, %v5501_v21, -inf }
0x278f   : > { %5503 = vmax.xlane.f32.xlu1 %v5502_v22 }
0x27a0   : > { %5738 = vrot.lane.b32.xlu1 %v15203_v2, %s16189_s1 }
0x27a9   : > { %v5340_v24 = vpop.xlane.xlu0 %5339 }
0x27aa   : > { %v5341_v25 = vsub.f32 %v5337_v18, %v5340_v24 }
0x27ac   : > { %v5342_v26 = vmul.f32 1.442695, %v5341_v25 }
0x27ae   : > { %14021 = vpow2.f32 %v5342_v26  ;;  %v5023_v26 = vld [vmem:[#allocation2 + $0xf8] sm:$0xff] }
0x27b8   : > { %v14022_v29 = vpop.eup %14021 }
0x27b9   : > { %v5344_v30 = vsel %vm1030_vm2, %v14022_v29, 0.0 }
0x27ba   : > { %5345 = vadd.xlane.f32.xlu0 %v5344_v30 }
0x281c   : > { %v5504_v32 = vpop.xlane.xlu1 %5503 }
0x281d   : > { %v5505_v33 = vsub.f32 %v5501_v21, %v5504_v32 }
0x281f   : > { %v5506_v34 = vmul.f32 1.442695, %v5505_v33 }
0x2820   : > { %v5739_v52 = vpop.permute.xlu1 %5738 }
0x2821   : > { %14023 = vpow2.f32 %v5506_v34 }
0x282b   : > { %v14024_v36 = vpop.eup %14023 }
0x282c   : > { %v5508_v37 = vsel %vm1030_vm2, %v14024_v36, 0.0 }
0x282d   : > { %5509 = vadd.xlane.f32.xlu0 %v5508_v37  ;;  %v12126_v37 = vld [vmem:[%s16125_s14 + $0x7] ss:$0 sm:$0xff] }
0x2843   : > { %5514 = vrot.lane.b32.xlu0 %v15220_v12, %s16188_s2 }
0x2847   : > { %v5346_v31 = vpop.xlane.xlu0 %5345  ;;  %5736 = vrot.lane.b32.xlu0 %v15218_v9, %s16189_s1 }
0x2848   : > { %14025 = vrcp.f32 %v5346_v31 }
0x2852   : > { %v14026_v38 = vpop.eup %14025 }
0x2853   : > { %v5348_v39 = vmul.f32 %v14026_v38, %v14022_v29 }
0x2855   : > { %13110 = vmatmul.mubr.msk.f32.vlgmr.msra.gmra.mrb[44].mxu1 %vm1030_vm2, %v5348_v39 }
0x2856   : > { %13119 = vmatprep.mubr.msk.f32.mxu1 %vm14265_vm0, %v14266_v1 }
0x28ba   : > { %v5510_v43 = vpop.xlane.xlu0 %5509 }
0x28bb   : > { %14027 = vrcp.f32 %v5510_v43 }
0x28be   : > { %v5515_v45 = vpop.permute.xlu0 %5514 }
0x28bf   : > { %13118 = vmatpush3.msra.mxu1 %v5515_v45 }
0x28c0   : > { %13127 = vmatprep.subr.mxu1 %v14266_v1 }
0x28c2   : > { %v5737_v23 = vpop.permute.xlu0 %5736 }
0x28c5   : > { %v14028_v46 = vpop.eup %14027 }
0x28c6   : > { %v5512_v47 = vmul.f32 %v14028_v46, %v14024_v36 }
0x28c8   : > { %13120 = vmatmul.mubr.msk.f32.vlgmr.msra.gmra.mrb[46].mxu1 %vm1030_vm2, %v5512_v47 }
0x28c9   : > { %13128 = vmatpush3.msra.mxu1 %v5020_v48  ;;  %13129 = vmatprep.mubr.msk.f32.mxu1 %vm14265_vm0, %v14266_v1 }
0x28ca   : > { %13137 = vmatprep.subr.mxu1 %v14266_v1 }
0x2928   : > { %v5418_v49 = vpop.f32.mrb[44].mxu1 }
0x2929   : > { %v13111_v50 = vpop.f32.mrb[45].mxu1  ;;  %13130 = vmatmul.mubr.msk.f32.vlgmr.msra.gmra.mrb[48].mxu1 %vm1030_vm2, %v5418_v49 }
0x292a   : > { %13139 = vmatprep.mubr.msk.f32.mxu1 %vm14265_vm0, %v14266_v1 }
0x299b   : > { %v5586_v51 = vpop.f32.mrb[46].mxu1 }
0x299c   : > { %v13121_v53 = vpop.f32.mrb[47].mxu1  ;;  %13125 = vmatmul.mubr.msk.f32.vlgmr.msra.gmra.mrb[64].mxu0 %vm1030_vm2, %v5586_v51  ;;  %v6265_v51 = vld [vmem:[#allocation2 + $0x100] sm:$0xff] }
0x299d   : > { %13133 = vmatpush3.xpose.msk.msra.mxu0 %vm1030_vm2, %v5739_v52  ;;  %13134 = vmatprep.mubr.msk.f32.mxu0 %vm14265_vm0, %v14266_v1  ;;  %v6266_v52 = vld [vmem:[#allocation2 + $0x108] sm:$0xff] }
0x299e   : > { %13142 = vmatprep.subr.mxu0 %v14266_v1  ;;  %v13759_v53 = vpack.c.bf16 %v6266_v52, %v6265_v51 }
0x29a0   : > { %13135 = vmatmul.mubr.msk.f32.vlgmr.msra.gmra.mrb[66].mxu0 %vm1030_vm2, %v5737_v23  ;;  %v6272_v23 = vld [vmem:[#allocation2 + $0x120] sm:$0xff] }
0x29a1   : > { %13144 = vmatprep.mubr.msk.f32.mxu0 %vm14265_vm0, %v14266_v1  ;;  %13143 = vmatpush3.msra.mxu0 %v5022_v11 }
0x29a2   : > { %13152 = vmatprep.subr.mxu0 %v14266_v1 }
0x29fc   : > { %v5732_v42 = vpop.f32.mrb[48].mxu1 }
0x29fd   : > { %v13131_v62 = vpop.f32.mrb[49].mxu1 }
0x29fe   : > { %v6267_v62 = vld [vmem:[#allocation2 + $0x110] sm:$0xff] }
0x2a6f   : > { %v5659_v54 = vpop.f32.mrb[64].mxu0 }
0x2a70   : > { %v5733_v55 = vadd.f32 %v5732_v42, %v5659_v54  ;;  %v13126_v56 = vpop.f32.mrb[65].mxu0  ;;  %v6273_v42 = vld [vmem:[#allocation2 + $0x128] sm:$0xff] }
0x2a71   : > { %v13765_v54 = vpack.c.bf16 %v6273_v42, %v6272_v23 }
0x2a73   : > { %v5810_v57 = vpop.f32.mrb[66].mxu0 }
0x2a74   : > { %v5814_v58 = vmul.f32 0.35355338, %v5810_v57  ;;  %v13136_v59 = vpop.f32.mrb[67].mxu0  ;;  %v6275_v57 = vld [vmem:[#allocation2 + $0x138] sm:$0xff] }
0x2a75   : > { %v6280_v59 = vld [vmem:[#allocation2 + $0x148] sm:$0xff] }
0x2a76   : > { %v5815_v28 = vadd.f32 %v15234_v17, %v5814_v58  ;;  %v6279_v58 = vld [vmem:[#allocation2 + $0x140] sm:$0xff] }
0x2a78   : > { %v5816_v60 = vsel %vm1030_vm2, %v5815_v28, -inf }
0x2a79   : > { %5817 = vmax.xlane.f32.xlu1 %v5816_v60  ;;  %v769_v60 = vld [vmem:[%s15314_s13] sm:$0xff] }
0x2a8a   : > { %5979 = vrot.lane.b32.xlu1 %v15203_v2, %s16190_s30 }
0x2a8e   : > { %5977 = vrot.lane.b32.xlu1 %v15218_v9, %s16190_s30 }
0x2b06   : > { %v5818_v35 = vpop.xlane.xlu1 %5817 }
0x2b07   : > { %v5819_v40 = vsub.f32 %v5815_v28, %v5818_v35  ;;  %v13771_v35 = vpack.c.bf16 %v6280_v59, %v6279_v58 }
0x2b09   : > { %v5820_v63 = vmul.f32 1.442695, %v5819_v40  ;;  %v6281_v40 = vld [vmem:[#allocation2 + $0x150] sm:$0xff] }
0x2b0a   : > { %v5980_v7 = vpop.permute.xlu1 %5979 }
0x2b0b   : > { %14029 = vpow2.f32 %v5820_v63  ;;  %v6282_v63 = vld [vmem:[#allocation2 + $0x158] sm:$0xff] }
0x2b0e   : > { %v5978_v9 = vpop.permute.xlu1 %5977 }
0x2b15   : > { %v14030_v3 = vpop.eup %14029 }
0x2b16   : > { %v5822_v4 = vsel %vm1030_vm2, %v14030_v3, 0.0 }
0x2b17   : > { %5823 = vadd.xlane.f32.xlu0 %v5822_v4 }
0x2b2d   : > { %5827 = vrot.lane.b32.xlu0 %v15220_v12, %s16189_s1 }
0x2ba4   : > { %v5824_v5 = vpop.xlane.xlu0 %5823 }
0x2ba5   : > { %14031 = vrcp.f32 %v5824_v5 }
0x2ba8   : > { %v5828_v10 = vpop.permute.xlu0 %5827 }
0x2ba9   : > { %13138 = vmatpush3.msra.mxu1 %v5828_v10 }
0x2baa   : > { %13147 = vmatprep.subr.mxu1 %v14266_v1 }
0x2baf   : > { %v14032_v2 = vpop.eup %14031 }
0x2bb0   : > { %v5826_v8 = vmul.f32 %v14032_v2, %v14030_v3  ;;  %v13774_v3 = vpack.c.bf16 %v6282_v63, %v6281_v40 }
0x2bb2   : > { %13140 = vmatmul.mubr.msk.f32.vlgmr.msra.gmra.mrb[50].mxu1 %vm1030_vm2, %v5826_v8 }
0x2bb3   : > { %13148 = vmatpush3.xpose.msk.msra.mxu1 %vm1030_vm2, %v5980_v7  ;;  %13149 = vmatprep.mubr.msk.f32.mxu1 %vm14265_vm0, %v14266_v1 }
0x2bb4   : > { %13157 = vmatprep.subr.mxu1 %v14266_v1 }
0x2bb6   : > { %13150 = vmatmul.mubr.msk.f32.vlgmr.msra.gmra.mrb[52].mxu1 %vm1030_vm2, %v5978_v9 }
0x2bb7   : > { %13159 = vmatprep.mubr.msk.f32.mxu1 %vm14265_vm0, %v14266_v1  ;;  %13158 = vmatpush3.msra.mxu1 %v5023_v26  ;;  %v12139_v26 = vld [vmem:[%s16125_s14 + $0xa] ss:$0 sm:$0xff] }
0x2bb8   : > { %13764 = vmatprep.subr.bf16.mxu1 %v14264_v0 }
0x2c85   : > { %v5899_v13 = vpop.f32.mrb[50].mxu1 }
0x2c86   : > { %v13141_v14 = vpop.f32.mrb[51].mxu1  ;;  %13145 = vmatmul.mubr.msk.f32.vlgmr.msra.gmra.mrb[68].mxu0 %vm1030_vm2, %v5899_v13  ;;  %v12129_v13 = vld [vmem:[%s16130_s19 + $0x1] ss:$0 sm:$0xff] }
0x2c87   : > { %13154 = vmatprep.mubr.msk.f32.mxu0 %vm14265_vm0, %v14266_v1 }
0x2c89   : > { %v6051_v15 = vpop.f32.mrb[52].mxu1 }
0x2c8a   : > { %v6055_v16 = vmul.f32 0.35355338, %v6051_v15  ;;  %v13151_v18 = vpop.f32.mrb[53].mxu1 }
0x2c8c   : > { %v6056_v19 = vadd.f32 %v15234_v17, %v6055_v16  ;;  %v12130_v16 = vld [vmem:[%s16131_s20 + $0x1] ss:$0 sm:$0xff] }
0x2c8e   : > { %v6057_v20 = vsel %vm1030_vm2, %v6056_v19, -inf }
0x2c8f   : > { %6058 = vmax.xlane.f32.xlu0 %v6057_v20 }
0x2ca5   : > { %6068 = vrot.lane.b32.xlu0 %v15220_v12, %s16190_s30 }
0x2d1c   : > { %v6059_v27 = vpop.xlane.xlu0 %6058 }
0x2d1d   : > { %v6060_v6 = vsub.f32 %v6056_v19, %v6059_v27  ;;  %v12137_v27 = vld [vmem:[%s16125_s14 + $0x9] ss:$0 sm:$0xff] }
0x2d1f   : > { %v6061_v21 = vmul.f32 1.442695, %v6060_v6 }
0x2d20   : > { %v6069_v22 = vpop.permute.xlu0 %6068 }
0x2d21   : > { %14033 = vpow2.f32 %v6061_v21  ;;  %13153 = vmatpush3.msra.mxu0 %v6069_v22 }
0x2d22   : > { %13758 = vmatprep.subr.bf16.mxu0 %v14264_v0 }
0x2d2b   : > { %v14034_v24 = vpop.eup %14033 }
0x2d2c   : > { %v6063_v25 = vsel %vm1030_vm2, %v14034_v24, 0.0 }
0x2d2d   : > { %6064 = vadd.xlane.f32.xlu1 %v6063_v25 }
0x2d59   : > { %v5972_v17 = vpop.f32.mrb[68].mxu0 }
0x2d5a   : > { %v5976_v29 = vadd.f32 %v5972_v17, %v5733_v55  ;;  %v13146_v30 = vpop.f32.mrb[69].mxu0  ;;  %v6274_v55 = vld [vmem:[#allocation2 + $0x130] sm:$0xff]  ;;  %v12135_v17 = vld [vmem:[%s16125_s14 + $0x8] ss:$0 sm:$0xff] }
0x2d5b   : > { %v13768_v28 = vpack.c.bf16 %v6275_v57, %v6274_v55  ;;  %v6287_v57 = vld [vmem:[#allocation2 + $0x168] sm:$0xff] }
0x2dba   : > { %v6065_v12 = vpop.xlane.xlu1 %6064 }
0x2dbb   : > { %14035 = vrcp.f32 %v6065_v12 }
0x2dc5   : > { %v14036_v32 = vpop.eup %14035 }
0x2dc6   : > { %v6067_v33 = vmul.f32 %v14036_v32, %v14034_v24 }
0x2dc8   : > { %13155 = vmatmul.mubr.msk.f32.vlgmr.msra.gmra.mrb[70].mxu0 %vm1030_vm2, %v6067_v33 }
0x2dc9   : > { %13170 = vmatprep.mubr.msk.f32.mxu0 %vm14265_vm0, %v14266_v1  ;;  %13760 = vmatpush3.bf16.msra.mxu0 %v13759_v53 }
0x2dca   : > { %13761 = vmatprep.subr.bf16.mxu0 %v14264_v0 }
0x2e9b   : > { %v6140_v34 = vpop.f32.mrb[70].mxu0 }
0x2e9c   : > { %v13156_v36 = vpop.f32.mrb[71].mxu0  ;;  %13160 = vmatmul.mubr.msk.f32.vlgmr.msra.gmra.mrb[54].mxu1 %vm1030_vm2, %v6140_v34  ;;  %v15380_v34 = vld [vmem:[%s15377_s27] ss:$0 sm:$0xff] }
0x2e9d   : > { %13181 = vmatprep.mubr.msk.f32.mxu1 %vm14265_vm0, %v14266_v1  ;;  %13766 = vmatpush3.bf16.msra.mxu1 %v13765_v54 }
0x2e9e   : > { %13767 = vmatprep.subr.bf16.mxu1 %v14264_v0 }
0x2ea1   : > { %13769 = vmatpush3.bf16.msra.mxu1 %v13768_v28 }
0x2ea2   : > { %13195 = vmatprep.subr.mxu1 %v14266_v1 }
0x2ea4   : > { %13182 = vmatmul.mubr.msk.f32.vlgmr.msra.gmra.mrb[56].mxu1 %vm804_vm1, %v769_v60 }
0x2ea5   : > { %13197 = vmatprep.mubr.msk.f32.mxu1 %vm14265_vm0, %v14266_v1 }
0x2f6f   : > { %v6213_v31 = vpop.f32.mrb[54].mxu1 }
0x2f70   : > { %v6217_v38 = vadd.f32 %v6213_v31, %v5976_v29  ;;  %v13161_v39 = vpop.f32.mrb[55].mxu1 }
0x2f72   : > { %v6224_v41 = vadd.f32 %v12126_v37, %v6217_v38 }
0x2f74   : > { %v6225_v43 = vadd.f32 %v6224_v41, %v15194_v61  ;;  %v6268_v61 = vld [vmem:[#allocation2 + $0x118] sm:$0xff] }
0x2f75   : > { %v13762_v56 = vpack.c.bf16 %v6268_v61, %v6267_v62 }
0x2f76   : > { %v6230_v45 = vsel %vm804_vm1, %v6225_v43, 0.0 }
0x2f77   : > { %6231 = vadd.xlane.f32.xlu1 %v6230_v45  ;;  %13763 = vmatpush3.bf16.msra.mxu0 %v13762_v56  ;;  %v6443_v21 = vpop.f32.mrb[56].mxu1 }
0x2f78   : > { %13770 = vmatprep.subr.bf16.mxu0 %v14264_v0  ;;  %v15343_v22 = vadd.f32 %v12137_v27, %v6443_v21  ;;  %v13183_v24 = vpop.f32.mrb[57].mxu1 }
0x2f7a   : > { %13171 = vmatmul.mubr.msk.f32.vlgmr.msra.gmra.mrb[72].mxu0 %vm804_vm1, %v769_v60  ;;  %13196 = vmatpush3.xpose.msk.msra.mxu1 %vm1030_vm2, %v15343_v22 }
0x2f7b   : > { %13772 = vmatpush3.bf16.msra.mxu0 %v13771_v35  ;;  %13192 = vmatprep.mubr.msk.f32.mxu0 %vm14265_vm0, %v14266_v1  ;;  %v6286_v35 = vld [vmem:[#allocation2 + $0x160] sm:$0xff] }
0x2f7c   : > { %13773 = vmatprep.subr.bf16.mxu0 %v14264_v0  ;;  %13200 = vmatprep.subr.mxu1 %v14266_v1 }
0x2f7f   : > { %13775 = vmatpush3.bf16.msra.mxu0 %v13774_v3 }
0x2f80   : > { %13205 = vmatprep.subr.mxu0 %v14266_v1 }
0x3004   : > { %v6232_v46 = vpop.xlane.xlu1 %6231 }
0x3005   : > { %v6233_v47 = vmul.f32 0.03125, %v6232_v46 }
0x3007   : > { %v6234_v48 = vsub.f32 %v6225_v43, %v6233_v47 }
0x3009   : > { %v6235_v49 = vmul.f32 %v6234_v48, %v6234_v48  ;;  %v6253_v14 = vmul.f32 %v12129_v13, %v6234_v48 }
0x300b   : > { %v6236_v50 = vsel %vm804_vm1, %v6235_v49, 0.0 }
0x300c   : > { %6237 = vadd.xlane.f32.xlu1 %v6236_v50 }
0x301d   : > { %6696 = vrot.lane.b32.xlu1 %v15343_v22, %s16188_s2 }
0x304d   : > { %v6367_v20 = vpop.f32.mrb[72].mxu0 }
0x304e   : > { %v13172_v6 = vpop.f32.mrb[73].mxu0  ;;  %v15360_v32 = vadd.f32 %v12135_v17, %v6367_v20 }
0x3099   : > { %v6238_v4 = vpop.xlane.xlu1 %6237 }
0x309a   : > { %v6239_v5 = vmul.f32 0.032258064, %v6238_v4 }
0x309c   : > { %14037 = vrsqrt.f32 %v6239_v5  ;;  %vm6242_vm13 = vcmp.eq.f32.partialorder %v6239_v5, inf  ;;  %v6245_v7 = vand.u32 2147483648, %v6239_v5  ;;  %vm6244_vm14 = vcmp.eq.f32.partialorder %v6239_v5, 0.0 }
0x309d   : > { %v6697_v25 = vpop.permute.xlu1 %6696 }
0x30a6   : > { %v14038_v10 = vpop.eup %14037 }
0x30a7   : > { %v6241_v2 = vmul.f32 %v14038_v10, %v6239_v5 }
0x30a9   : > { %v6243_v8 = vsel %vm6242_vm13, %v6239_v5, %v6241_v2 }
0x30aa   : > { %v6246_v9 = vsel %vm6244_vm14, %v6245_v7, %v6243_v8 }
0x30ab   : > { %v6254_v11 = vadd.f32 1e-06, %v6246_v9 }
0x30ad   : > { %14039 = vrcp.f32 %v6254_v11 }
0x30b7   : > { %v14040_v15 = vpop.eup %14039 }
0x30b8   : > { %v6256_v18 = vmul.f32 %v14040_v15, %v6253_v14 }
0x30ba   : > { %v15334_v19 = vadd.f32 %v12130_v16, %v6256_v18 }
0x30bc   : > { %13193 = vmatmul.mubr.msk.f32.vlgmr.msra.gmra.mrb[74].mxu0 %vm804_vm1, %v15334_v19 }
0x30bd   : > { %13207 = vmatprep.mubr.msk.f32.mxu0 %vm14265_vm0, %v14266_v1  ;;  %13206 = vmatpush3.xpose.msk.msra.mxu0 %vm1030_vm2, %v6697_v25 }
0x30be   : > { %13215 = vmatprep.subr.mxu0 %v14266_v1 }
0x318f   : > { %v6522_v29 = vpop.f32.mrb[74].mxu0 }
0x3190   : > { %v15358_v30 = vadd.f32 %v12139_v26, %v6522_v29  ;;  %v13194_v12 = vpop.f32.mrb[75].mxu0 }
0x3192   : > { %6694 = vrot.lane.b32.xlu0 %v15358_v30, %s16188_s2  ;;  %13198 = vmatmul.mubr.msk.f32.vlgmr.msra.gmra.mrb[58].mxu1 %vm1030_vm2, %v15358_v30 }
0x3193   : > { %13201 = vmatpush3.msra.mxu1 %v15360_v32  ;;  %13202 = vmatprep.mubr.msk.f32.mxu1 %vm14265_vm0, %v14266_v1 }
0x3194   : > { %13210 = vmatprep.subr.mxu1 %v14266_v1 }
0x3204   : > { %v6695_v33 = vpop.permute.xlu0 %6694 }
0x3205   : > { %13208 = vmatmul.mubr.msk.f32.vlgmr.msra.gmra.mrb[76].mxu0 %vm1030_vm2, %v6695_v33 }
0x3206   : > { %13217 = vmatprep.mubr.msk.f32.mxu0 %vm14265_vm0, %v14266_v1  ;;  %13216 = vmatpush3.msra.mxu0 %v6287_v57 }
0x3207   : > { %13225 = vmatprep.subr.mxu0 %v14266_v1 }
0x3265   : > { %v6598_v36 = vpop.f32.mrb[58].mxu1 }
0x3266   : > { %v6602_v37 = vmul.f32 0.35355338, %v6598_v36  ;;  %v13199_v31 = vpop.f32.mrb[59].mxu1 }
0x3268   : > { %v6609_v38 = vadd.f32 %v15380_v34, %v6602_v37 }
0x326a   : > { %v6610_v39 = vsel %vm1030_vm2, %v6609_v38, -inf }
0x326b   : > { %6611 = vmax.xlane.f32.xlu0 %v6610_v39 }
0x32d8   : > { %v6768_v41 = vpop.f32.mrb[76].mxu0 }
0x32d9   : > { %v6772_v43 = vmul.f32 0.35355338, %v6768_v41  ;;  %v13209_v45 = vpop.f32.mrb[77].mxu0 }
0x32db   : > { %v6773_v46 = vadd.f32 %v15380_v34, %v6772_v43 }
0x32dd   : > { %v6774_v47 = vsel %vm1030_vm2, %v6773_v46, -inf }
0x32de   : > { %6775 = vmax.xlane.f32.xlu1 %v6774_v47 }
0x32ef   : > { %7010 = vrot.lane.b32.xlu1 %v15343_v22, %s16189_s1 }
0x32f3   : > { %7008 = vrot.lane.b32.xlu1 %v15358_v30, %s16189_s1 }
0x32f8   : > { %v6612_v48 = vpop.xlane.xlu0 %6611 }
0x32f9   : > { %v6613_v49 = vsub.f32 %v6609_v38, %v6612_v48 }
0x32fb   : > { %v6614_v50 = vmul.f32 1.442695, %v6613_v49  ;;  %v6289_v49 = vld [vmem:[#allocation2 + $0x178] sm:$0xff] }
0x32fd   : > { %14041 = vpow2.f32 %v6614_v50 }
0x3307   : > { %v14042_v51 = vpop.eup %14041 }
0x3308   : > { %v6616_v52 = vsel %vm1030_vm2, %v14042_v51, 0.0 }
0x3309   : > { %6617 = vadd.xlane.f32.xlu0 %v6616_v52 }
0x336b   : > { %v6776_v53 = vpop.xlane.xlu1 %6775 }
0x336c   : > { %v6777_v23 = vsub.f32 %v6773_v46, %v6776_v53 }
0x336e   : > { %v6778_v42 = vmul.f32 1.442695, %v6777_v23 }
0x336f   : > { %v7011_v3 = vpop.permute.xlu1 %7010 }
0x3370   : > { %14043 = vpow2.f32 %v6778_v42 }
0x3373   : > { %v7009_v10 = vpop.permute.xlu1 %7008 }
0x337a   : > { %v14044_v62 = vpop.eup %14043 }
0x337b   : > { %v6780_v54 = vsel %vm1030_vm2, %v14044_v62, 0.0 }
0x337c   : > { %6781 = vadd.xlane.f32.xlu0 %v6780_v54  ;;  %v12158_v54 = vld [vmem:[%s16125_s14 + $0xb] ss:$0 sm:$0xff] }
0x3392   : > { %6786 = vrot.lane.b32.xlu0 %v15360_v32, %s16188_s2 }
0x3396   : > { %v6618_v61 = vpop.xlane.xlu0 %6617 }
0x3397   : > { %14045 = vrcp.f32 %v6618_v61 }
0x33a1   : > { %v14046_v55 = vpop.eup %14045 }
0x33a2   : > { %v6620_v56 = vmul.f32 %v14046_v55, %v14042_v51 }
0x33a4   : > { %13203 = vmatmul.mubr.msk.f32.vlgmr.msra.gmra.mrb[60].mxu1 %vm1030_vm2, %v6620_v56 }
0x33a5   : > { %13212 = vmatprep.mubr.msk.f32.mxu1 %vm14265_vm0, %v14266_v1 }
0x3409   : > { %v6782_v58 = vpop.xlane.xlu0 %6781 }
0x340a   : > { %14047 = vrcp.f32 %v6782_v58 }
0x340d   : > { %v6787_v59 = vpop.permute.xlu0 %6786 }
0x340e   : > { %13211 = vmatpush3.msra.mxu1 %v6787_v59 }
0x340f   : > { %13220 = vmatprep.subr.mxu1 %v14266_v1 }
0x3414   : > { %v14048_v28 = vpop.eup %14047 }
0x3415   : > { %v6784_v60 = vmul.f32 %v14048_v28, %v14044_v62 }
0x3417   : > { %13213 = vmatmul.mubr.msk.f32.vlgmr.msra.gmra.mrb[62].mxu1 %vm1030_vm2, %v6784_v60 }
0x3418   : > { %13221 = vmatpush3.msra.mxu1 %v6286_v35  ;;  %13222 = vmatprep.mubr.msk.f32.mxu1 %vm14265_vm0, %v14266_v1 }
0x3419   : > { %13230 = vmatprep.subr.mxu1 %v14266_v1 }
0x3477   : > { %v6690_v40 = vpop.f32.mrb[60].mxu1 }
0x3478   : > { %v13204_v63 = vpop.f32.mrb[61].mxu1  ;;  %13223 = vmatmul.mubr.msk.f32.vlgmr.msra.gmra.mrb[64].mxu1 %vm1030_vm2, %v6690_v40 }
0x3479   : > { %13232 = vmatprep.mubr.msk.f32.mxu1 %vm14265_vm0, %v14266_v1 }
0x34ea   : > { %v6858_v4 = vpop.f32.mrb[62].mxu1 }
0x34eb   : > { %v13214_v5 = vpop.f32.mrb[63].mxu1  ;;  %13218 = vmatmul.mubr.msk.f32.vlgmr.msra.gmra.mrb[78].mxu0 %vm1030_vm2, %v6858_v4  ;;  %v7537_v4 = vld [vmem:[%s16126_s15 + $0x8] sm:$0xff] }
0x34ec   : > { %13226 = vmatpush3.xpose.msk.msra.mxu0 %vm1030_vm2, %v7011_v3  ;;  %13227 = vmatprep.mubr.msk.f32.mxu0 %vm14265_vm0, %v14266_v1  ;;  %v7536_v3 = vld [vmem:[%s16126_s15] sm:$0xff] }
0x34ed   : > { %13235 = vmatprep.subr.mxu0 %v14266_v1  ;;  %v13777_v5 = vpack.c.bf16 %v7537_v4, %v7536_v3  ;;  %v7755_v3 = vld [vmem:[#allocation2 + $0x188] sm:$0xff]  ;;  %v7756_v4 = vld [vmem:[#allocation2 + $0x190] sm:$0xff] }
0x34ef   : > { %13228 = vmatmul.mubr.msk.f32.vlgmr.msra.gmra.mrb[80].mxu0 %vm1030_vm2, %v7009_v10  ;;  %v7539_v10 = vld [vmem:[%s16126_s15 + $0x18] sm:$0xff] }
0x34f0   : > { %13237 = vmatprep.mubr.msk.f32.mxu0 %vm14265_vm0, %v14266_v1 }
0x354b   : > { %v7004_v2 = vpop.f32.mrb[64].mxu1 }
0x354c   : > { %v13224_v7 = vpop.f32.mrb[65].mxu1 }
0x354d   : > { %v7541_v7 = vld [vmem:[%s16128_s17] sm:$0xff] }
0x35be   : > { %v6931_v8 = vpop.f32.mrb[78].mxu0 }
0x35bf   : > { %v7005_v9 = vadd.f32 %v7004_v2, %v6931_v8  ;;  %v13219_v11 = vpop.f32.mrb[79].mxu0  ;;  %v7542_v8 = vld [vmem:[%s16128_s17 + $0x8] sm:$0xff] }
0x35c0   : > { %v13783_v11 = vpack.c.bf16 %v7542_v8, %v7541_v7 }
0x35c2   : > { %v7082_v13 = vpop.f32.mrb[80].mxu0 }
0x35c3   : > { %v7086_v14 = vmul.f32 0.35355338, %v7082_v13  ;;  %v13229_v15 = vpop.f32.mrb[81].mxu0  ;;  %v7544_v13 = vld [vmem:[%s16128_s17 + $0x18] sm:$0xff] }
0x35c4   : > { %v7545_v15 = vld [vmem:[%s16128_s17 + $0x20] sm:$0xff] }
0x35c5   : > { %v7087_v16 = vadd.f32 %v15380_v34, %v7086_v14 }
0x35c7   : > { %v7088_v18 = vsel %vm1030_vm2, %v7087_v16, -inf }
0x35c8   : > { %7089 = vmax.xlane.f32.xlu0 %v7088_v18 }
0x35de   : > { %7099 = vrot.lane.b32.xlu0 %v15360_v32, %s16189_s1 }
0x35e2   : > { %7249 = vrot.lane.b32.xlu0 %v15358_v30, %s16190_s30 }
0x3655   : > { %v7090_v20 = vpop.xlane.xlu0 %7089 }
0x3656   : > { %v7091_v27 = vsub.f32 %v7087_v16, %v7090_v20  ;;  %v7546_v16 = vld [vmem:[%s16128_s17 + $0x28] sm:$0xff]  ;;  %v7547_v20 = vld [vmem:[%s16128_s17 + $0x30] sm:$0xff] }
0x3657   : > { %v13789_v18 = vpack.c.bf16 %v7546_v16, %v7545_v15  ;;  %v12168_v16 = vld [vmem:[%s16130_s19 + $0x3] ss:$0 sm:$0xff] }
0x3658   : > { %v7092_v6 = vmul.f32 1.442695, %v7091_v27  ;;  %v7548_v27 = vld [vmem:[%s16128_s17 + $0x38] sm:$0xff] }
0x3659   : > { %v7100_v21 = vpop.permute.xlu0 %7099 }
0x365a   : > { %14049 = vpow2.f32 %v7092_v6  ;;  %13231 = vmatpush3.msra.mxu1 %v7100_v21  ;;  %v13792_v6 = vpack.c.bf16 %v7548_v27, %v7547_v20  ;;  %v7549_v21 = vld [vmem:[%s16128_s17 + $0x40] sm:$0xff]  ;;  %v7762_v27 = vld [vmem:[#allocation2 + $0x1a8] sm:$0xff] }
0x365b   : > { %13240 = vmatprep.subr.mxu1 %v14266_v1  ;;  %v7761_v20 = vld [vmem:[#allocation2 + $0x1a0] sm:$0xff] }
0x365d   : > { %v7250_v12 = vpop.permute.xlu0 %7249 }
0x3664   : > { %v14050_v24 = vpop.eup %14049 }
0x3665   : > { %v7094_v25 = vsel %vm1030_vm2, %v14050_v24, 0.0 }
0x3666   : > { %7095 = vadd.xlane.f32.xlu1 %v7094_v25 }
0x3677   : > { %7251 = vrot.lane.b32.xlu1 %v15343_v22, %s16190_s30  ;;  %v6288_v22 = vld [vmem:[#allocation2 + $0x170] sm:$0xff] }
0x3678   : > { %13236 = vmatpush3.msra.mxu0 %v6288_v22 }
0x3679   : > { %13245 = vmatprep.subr.mxu0 %v14266_v1 }
0x36f3   : > { %v7096_v26 = vpop.xlane.xlu1 %7095 }
0x36f4   : > { %14051 = vrcp.f32 %v7096_v26  ;;  %v7551_v26 = vld [vmem:[%s16128_s17 + $0x50] sm:$0xff] }
0x36f7   : > { %v7252_v30 = vpop.permute.xlu1 %7251 }
0x36fe   : > { %v14052_v17 = vpop.eup %14051 }
0x36ff   : > { %v7098_v29 = vmul.f32 %v14052_v17, %v14050_v24  ;;  %v7550_v24 = vld [vmem:[%s16128_s17 + $0x48] sm:$0xff]  ;;  %v7552_v17 = vld [vmem:[%s16128_s17 + $0x58] sm:$0xff] }
0x3700   : > { %v13795_v25 = vpack.c.bf16 %v7550_v24, %v7549_v21  ;;  %v12169_v21 = vld [vmem:[%s16131_s20 + $0x3] ss:$0 sm:$0xff] }
0x3701   : > { %13233 = vmatmul.mubr.msk.f32.vlgmr.msra.gmra.mrb[66].mxu1 %vm1030_vm2, %v7098_v29  ;;  %v13798_v29 = vpack.c.bf16 %v7552_v17, %v7551_v26  ;;  %v7763_v17 = vld [vmem:[#allocation2 + $0x1b0] sm:$0xff] }
0x3702   : > { %13241 = vmatpush3.xpose.msk.msra.mxu1 %vm1030_vm2, %v7252_v30  ;;  %13242 = vmatprep.mubr.msk.f32.mxu1 %vm14265_vm0, %v14266_v1  ;;  %v7553_v30 = vld [vmem:[%s16128_s17 + $0x60] sm:$0xff] }
0x3703   : > { %13250 = vmatprep.subr.mxu1 %v14266_v1 }
0x3705   : > { %13243 = vmatmul.mubr.msk.f32.vlgmr.msra.gmra.mrb[68].mxu1 %vm1030_vm2, %v7250_v12  ;;  %v7554_v12 = vld [vmem:[%s16128_s17 + $0x68] sm:$0xff] }
0x3706   : > { %13252 = vmatprep.mubr.msk.f32.mxu1 %vm14265_vm0, %v14266_v1  ;;  %13251 = vmatpush3.msra.mxu1 %v6289_v49  ;;  %v13801_v22 = vpack.c.bf16 %v7554_v12, %v7553_v30  ;;  %v7768_v12 = vld [vmem:[#allocation2 + $0x1c0] sm:$0xff] }
0x3707   : > { %13782 = vmatprep.subr.bf16.mxu1 %v14264_v0 }
0x37d4   : > { %v7171_v33 = vpop.f32.mrb[66].mxu1 }
0x37d5   : > { %v13234_v36 = vpop.f32.mrb[67].mxu1  ;;  %13238 = vmatmul.mubr.msk.f32.vlgmr.msra.gmra.mrb[82].mxu0 %vm1030_vm2, %v7171_v33 }
0x37d6   : > { %13247 = vmatprep.mubr.msk.f32.mxu0 %vm14265_vm0, %v14266_v1 }
0x37d8   : > { %v7323_v37 = vpop.f32.mrb[68].mxu1 }
0x37d9   : > { %v7327_v31 = vmul.f32 0.35355338, %v7323_v37  ;;  %v13244_v38 = vpop.f32.mrb[69].mxu1 }
0x37db   : > { %v7328_v39 = vadd.f32 %v15380_v34, %v7327_v31 }
0x37dd   : > { %v7329_v41 = vsel %vm1030_vm2, %v7328_v39, -inf }
0x37de   : > { %7330 = vmax.xlane.f32.xlu1 %v7329_v41 }
0x386b   : > { %v7331_v43 = vpop.xlane.xlu1 %7330 }
0x386c   : > { %v7332_v45 = vsub.f32 %v7328_v39, %v7331_v43 }
0x386e   : > { %v7333_v46 = vmul.f32 1.442695, %v7332_v45  ;;  %v12161_v45 = vld [vmem:[%s16130_s19 + $0x2] ss:$0 sm:$0xff] }
0x3870   : > { %14053 = vpow2.f32 %v7333_v46 }
0x387a   : > { %v14054_v47 = vpop.eup %14053 }
0x387b   : > { %v7335_v48 = vsel %vm1030_vm2, %v14054_v47, 0.0 }
0x387c   : > { %7336 = vadd.xlane.f32.xlu0 %v7335_v48  ;;  %v12162_v48 = vld [vmem:[%s16131_s20 + $0x2] ss:$0 sm:$0xff] }
0x3892   : > { %7340 = vrot.lane.b32.xlu0 %v15360_v32, %s16190_s30 }
0x38a8   : > { %v7244_v50 = vpop.f32.mrb[82].mxu0 }
0x38a9   : > { %v7248_v34 = vadd.f32 %v7244_v50, %v7005_v9  ;;  %v13239_v51 = vpop.f32.mrb[83].mxu0  ;;  %v7543_v9 = vld [vmem:[%s16128_s17 + $0x10] sm:$0xff] }
0x38aa   : > { %v13786_v14 = vpack.c.bf16 %v7544_v13, %v7543_v9  ;;  %v7556_v51 = vld [vmem:[%s16128_s17 + $0x78] sm:$0xff] }
0x3909   : > { %v7337_v52 = vpop.xlane.xlu0 %7336 }
0x390a   : > { %14055 = vrcp.f32 %v7337_v52 }
0x390d   : > { %v7341_v53 = vpop.permute.xlu0 %7340 }
0x390e   : > { %13246 = vmatpush3.msra.mxu0 %v7341_v53  ;;  %v12163_v53 = vld [vmem:[%s16127_s16] ss:$0 sm:$0xff] }
0x390f   : > { %13776 = vmatprep.subr.bf16.mxu0 %v14264_v0 }
0x3914   : > { %v14056_v23 = vpop.eup %14055 }
0x3915   : > { %v7339_v42 = vmul.f32 %v14056_v23, %v14054_v47 }
0x3917   : > { %13248 = vmatmul.mubr.msk.f32.vlgmr.msra.gmra.mrb[84].mxu0 %vm1030_vm2, %v7339_v42 }
0x3918   : > { %13263 = vmatprep.mubr.msk.f32.mxu0 %vm14265_vm0, %v14266_v1  ;;  %13778 = vmatpush3.bf16.msra.mxu0 %v13777_v5  ;;  %v7757_v5 = vld [vmem:[#allocation2 + $0x198] sm:$0xff] }
0x3919   : > { %13779 = vmatprep.subr.bf16.mxu0 %v14264_v0 }
0x39ea   : > { %v7412_v32 = vpop.f32.mrb[84].mxu0 }
0x39eb   : > { %v13249_v62 = vpop.f32.mrb[85].mxu0  ;;  %13253 = vmatmul.mubr.msk.f32.vlgmr.msra.gmra.mrb[70].mxu1 %vm1030_vm2, %v7412_v32 }
0x39ec   : > { %13298 = vmatprep.mubr.msk.f32.mxu1 %vm14265_vm0, %v14266_v1  ;;  %13784 = vmatpush3.bf16.msra.mxu1 %v13783_v11 }
0x39ed   : > { %13785 = vmatprep.subr.bf16.mxu1 %v14264_v0 }
0x39f0   : > { %13787 = vmatpush3.bf16.msra.mxu1 %v13786_v14 }
0x39f1   : > { %13788 = vmatprep.subr.bf16.mxu1 %v14264_v0 }
0x39f4   : > { %13790 = vmatpush3.bf16.msra.mxu1 %v13789_v18 }
0x39f5   : > { %13791 = vmatprep.subr.bf16.mxu1 %v14264_v0 }
0x39f8   : > { %13793 = vmatpush3.bf16.msra.mxu1 %v13792_v6 }
0x39f9   : > { %13794 = vmatprep.subr.bf16.mxu1 %v14264_v0 }
0x39fc   : > { %13796 = vmatpush3.bf16.msra.mxu1 %v13795_v25  ;;  %v13813_v25 = vpack.c.bf16 %v7762_v27, %v7761_v20 }
0x39fd   : > { %13797 = vmatprep.subr.bf16.mxu1 %v14264_v0 }
0x3a00   : > { %13799 = vmatpush3.bf16.msra.mxu1 %v13798_v29  ;;  %v7764_v29 = vld [vmem:[#allocation2 + $0x1b8] sm:$0xff] }
0x3a01   : > { %13800 = vmatprep.subr.bf16.mxu1 %v14264_v0  ;;  %v13816_v30 = vpack.c.bf16 %v7764_v29, %v7763_v17 }
0x3a04   : > { %13802 = vmatpush3.bf16.msra.mxu1 %v13801_v22  ;;  %v7769_v22 = vld [vmem:[#allocation2 + $0x1c8] sm:$0xff] }
0x3a05   : > { %13803 = vmatprep.subr.bf16.mxu1 %v14264_v0 }
0x3abe   : > { %v7485_v61 = vpop.f32.mrb[70].mxu1 }
0x3abf   : > { %v7489_v55 = vadd.f32 %v7485_v61, %v7248_v34  ;;  %v13254_v56 = vpop.f32.mrb[71].mxu1  ;;  %v7555_v34 = vld [vmem:[%s16128_s17 + $0x70] sm:$0xff] }
0x3ac0   : > { %v13804_v52 = vpack.c.bf16 %v7556_v51, %v7555_v34 }
0x3ac1   : > { %v7496_v57 = vadd.f32 %v12158_v54, %v7489_v55  ;;  %v12165_v54 = vld [vmem:[%s16129_s18] ss:$0 sm:$0xff] }
0x3ac2   : > { %13805 = vmatpush3.bf16.msra.mxu1 %v13804_v52 }
0x3ac3   : > { %v7497_v58 = vadd.f32 %v7496_v57, %v15334_v19  ;;  %v7538_v19 = vld [vmem:[%s16126_s15 + $0x10] sm:$0xff]  ;;  %13339 = vmatprep.subr.mxu1 %v14266_v1 }
0x3ac4   : > { %v13780_v2 = vpack.c.bf16 %v7539_v10, %v7538_v19  ;;  %v13810_v10 = vpack.c.bf16 %v7757_v5, %v7756_v4 }
0x3ac5   : > { %v7502_v59 = vsel %vm804_vm1, %v7497_v58, 0.0 }
0x3ac6   : > { %7503 = vadd.xlane.f32.xlu1 %v7502_v59  ;;  %13781 = vmatpush3.bf16.msra.mxu0 %v13780_v2 }
0x3ac7   : > { %13806 = vmatprep.subr.bf16.mxu0 %v14264_v0 }
0x3b53   : > { %v7504_v28 = vpop.xlane.xlu1 %7503 }
0x3b54   : > { %v7505_v60 = vmul.f32 0.03125, %v7504_v28 }
0x3b56   : > { %v7506_v35 = vsub.f32 %v7497_v58, %v7505_v60 }
0x3b58   : > { %v7507_v40 = vmul.f32 %v7506_v35, %v7506_v35  ;;  %v7525_v46 = vmul.f32 %v12161_v45, %v7506_v35  ;;  %v12176_v45 = vld [vmem:[%s16125_s14 + $0xd] ss:$0 sm:$0xff] }
0x3b5a   : > { %v7508_v63 = vsel %vm804_vm1, %v7507_v40, 0.0 }
0x3b5b   : > { %7509 = vadd.xlane.f32.xlu1 %v7508_v63  ;;  %v7754_v63 = vld [vmem:[#allocation2 + $0x180] sm:$0xff] }
0x3b5c   : > { %v13807_v19 = vpack.c.bf16 %v7755_v3, %v7754_v63 }
0x3be8   : > { %v7510_v33 = vpop.xlane.xlu1 %7509 }
0x3be9   : > { %v7511_v36 = vmul.f32 0.032258064, %v7510_v33  ;;  %v13819_v33 = vpack.c.bf16 %v7769_v22, %v7768_v12 }
0x3beb   : > { %14057 = vrsqrt.f32 %v7511_v36  ;;  %vm7514_vm15 = vcmp.eq.f32.partialorder %v7511_v36, inf  ;;  %v7517_v38 = vand.u32 2147483648, %v7511_v36  ;;  %vm7516_vm3 = vcmp.eq.f32.partialorder %v7511_v36, 0.0 }
0x3bf5   : > { %v14058_v37 = vpop.eup %14057 }
0x3bf6   : > { %v7513_v31 = vmul.f32 %v14058_v37, %v7511_v36  ;;  %v7771_v37 = vld [vmem:[#allocation2 + $0x1d8] sm:$0xff] }
0x3bf8   : > { %v7515_v39 = vsel %vm7514_vm15, %v7511_v36, %v7513_v31  ;;  %v7770_v36 = vld [vmem:[#allocation2 + $0x1d0] sm:$0xff] }
0x3bf9   : > { %v7518_v41 = vsel %vm7516_vm3, %v7517_v38, %v7515_v39  ;;  %v13822_v31 = vpack.c.bf16 %v7771_v37, %v7770_v36  ;;  %v12174_v38 = vld [vmem:[%s16125_s14 + $0xc] ss:$0 sm:$0xff] }
0x3bfa   : > { %v7526_v43 = vadd.f32 1e-06, %v7518_v41 }
0x3bfc   : > { %14059 = vrcp.f32 %v7526_v43 }
0x3c06   : > { %v14060_v47 = vpop.eup %14059 }
0x3c07   : > { %v7528_v49 = vmul.f32 %v14060_v47, %v7525_v46 }
0x3c09   : > { %v7535_v50 = vadd.f32 %v12162_v48, %v7528_v49  ;;  %v12178_v49 = vld [vmem:[%s16125_s14 + $0xe] ss:$0 sm:$0xff] }
0x3c0b   : > { %13264 = vmatmul.mubr.msk.f32.vlgmr.msra.gmra.mrb[86].mxu0 %vm804_vm1, %v7535_v50 }
0x3c0c   : > { %13309 = vmatprep.mubr.msk.f32.mxu0 %vm14265_vm0, %v14266_v1  ;;  %13808 = vmatpush3.bf16.msra.mxu0 %v13807_v19 }
0x3c0d   : > { %13809 = vmatprep.subr.bf16.mxu0 %v14264_v0 }
0x3c10   : > { %13811 = vmatpush3.bf16.msra.mxu0 %v13810_v10 }
0x3c11   : > { %13812 = vmatprep.subr.bf16.mxu0 %v14264_v0 }
0x3cde   : > { %v7633_v23 = vpop.f32.mrb[86].mxu0 }
0x3cdf   : > { %v7634_v42 = vadd.f32 %v12163_v53, %v7633_v23  ;;  %v13265_v32 = vpop.f32.mrb[87].mxu0 }
0x3ce1   : > { %v7637_v62 = vmax.f32 %v7634_v42, 0.0 }
0x3ce3   : > { %13299 = vmatmul.mubr.f32.vlgmr.msra.gmra.mrb[72].mxu1 %v7637_v62 }
0x3ce4   : > { %13341 = vmatprep.mubr.msk.f32.mxu1 %vm14265_vm0, %v14266_v1 }
0x3db6   : > { %v7710_v61 = vpop.f32.mrb[72].mxu1 }
0x3db7   : > { %v7711_v55 = vadd.f32 %v12165_v54, %v7710_v61  ;;  %v13300_v56 = vpop.f32.mrb[73].mxu1 }
0x3db9   : > { %v7714_v57 = vadd.f32 %v7711_v55, %v7535_v50 }
0x3dbb   : > { %v7719_v58 = vsel %vm804_vm1, %v7714_v57, 0.0 }
0x3dbc   : > { %7720 = vadd.xlane.f32.xlu1 %v7719_v58 }
0x3e49   : > { %v7721_v59 = vpop.xlane.xlu1 %7720 }
0x3e4a   : > { %v7722_v28 = vmul.f32 0.03125, %v7721_v59 }
0x3e4c   : > { %v7723_v60 = vsub.f32 %v7714_v57, %v7722_v28 }
0x3e4e   : > { %v7724_v35 = vmul.f32 %v7723_v60, %v7723_v60  ;;  %v7742_v18 = vmul.f32 %v12168_v16, %v7723_v60 }
0x3e50   : > { %v7725_v40 = vsel %vm804_vm1, %v7724_v35, 0.0 }
0x3e51   : > { %7726 = vadd.xlane.f32.xlu1 %v7725_v40 }
0x3ede   : > { %v7727_v2 = vpop.xlane.xlu1 %7726 }
0x3edf   : > { %v7728_v7 = vmul.f32 0.032258064, %v7727_v2  ;;  %v7776_v2 = vld [vmem:[#allocation2 + $0x1e8] sm:$0xff] }
0x3ee1   : > { %14061 = vrsqrt.f32 %v7728_v7  ;;  %vm7731_vm4 = vcmp.eq.f32.partialorder %v7728_v7, inf  ;;  %v7734_v11 = vand.u32 2147483648, %v7728_v7  ;;  %vm7733_vm5 = vcmp.eq.f32.partialorder %v7728_v7, 0.0 }
0x3eeb   : > { %v14062_v8 = vpop.eup %14061 }
0x3eec   : > { %v7730_v9 = vmul.f32 %v14062_v8, %v7728_v7 }
0x3eee   : > { %v7732_v13 = vsel %vm7731_vm4, %v7728_v7, %v7730_v9 }
0x3eef   : > { %v7735_v14 = vsel %vm7733_vm5, %v7734_v11, %v7732_v13  ;;  %v7775_v13 = vld [vmem:[#allocation2 + $0x1e0] sm:$0xff] }
0x3ef0   : > { %v7743_v15 = vadd.f32 1e-06, %v7735_v14 }
0x3ef2   : > { %14063 = vrcp.f32 %v7743_v15 }
0x3efc   : > { %v14064_v6 = vpop.eup %14063 }
0x3efd   : > { %v7745_v24 = vmul.f32 %v14064_v6, %v7742_v18 }
0x3eff   : > { %v15552_v26 = vadd.f32 %v12169_v21, %v7745_v24 }
0x3f01   : > { %13310 = vmatmul.mubr.msk.f32.vlgmr.msra.gmra.mrb[88].mxu0 %vm804_vm1, %v15552_v26 }
0x3f02   : > { %13814 = vmatpush3.bf16.msra.mxu0 %v13813_v25  ;;  %13320 = vmatprep.mubr.msk.f32.mxu0 %vm14265_vm0, %v14266_v1 }
0x3f03   : > { %13815 = vmatprep.subr.bf16.mxu0 %v14264_v0 }
0x3f06   : > { %13817 = vmatpush3.bf16.msra.mxu0 %v13816_v30 }
0x3f07   : > { %13818 = vmatprep.subr.bf16.mxu0 %v14264_v0 }
0x3f09   : > { %13321 = vmatmul.mubr.msk.f32.vlgmr.msra.gmra.mrb[90].mxu0 %vm804_vm1, %v15552_v26 }
0x3f0a   : > { %13820 = vmatpush3.bf16.msra.mxu0 %v13819_v33  ;;  %13331 = vmatprep.mubr.msk.f32.mxu0 %vm14265_vm0, %v14266_v1 }
0x3f0b   : > { %13821 = vmatprep.subr.bf16.mxu0 %v14264_v0 }
0x3f0e   : > { %13823 = vmatpush3.bf16.msra.mxu0 %v13822_v31 }
0x3f0f   : > { %13334 = vmatprep.subr.mxu0 %v14266_v1 }
0x3f11   : > { %13332 = vmatmul.mubr.msk.f32.vlgmr.msra.gmra.mrb[92].mxu0 %vm804_vm1, %v15552_v26 }
0x3f12   : > { %13336 = vmatprep.mubr.msk.f32.mxu0 %vm14265_vm0, %v14266_v1 }
0x3fd4   : > { %v7856_v39 = vpop.f32.mrb[88].mxu0 }
0x3fd5   : > { %v15573_v41 = vadd.f32 %v12174_v38, %v7856_v39  ;;  %v13311_v43 = vpop.f32.mrb[89].mxu0 }
0x3fd7   : > { %13340 = vmatpush3.msra.mxu1 %v15573_v41 }
0x3fd8   : > { %13349 = vmatprep.subr.mxu1 %v14266_v1 }
0x3fdc   : > { %v7932_v46 = vpop.f32.mrb[90].mxu0 }
0x3fdd   : > { %v15580_v47 = vadd.f32 %v12176_v45, %v7932_v46  ;;  %v13322_v48 = vpop.f32.mrb[91].mxu0 }
0x3fdf   : > { %8175 = vrot.lane.b32.xlu1 %v15580_v47, %s16188_s2  ;;  %13335 = vmatpush3.xpose.msk.msra.mxu0 %vm1030_vm2, %v15580_v47 }
0x3fe0   : > { %13344 = vmatprep.subr.mxu0 %v14266_v1 }
0x3fe4   : > { %v8008_v50 = vpop.f32.mrb[92].mxu0 }
0x3fe5   : > { %v15590_v34 = vadd.f32 %v12178_v49, %v8008_v50  ;;  %v13333_v51 = vpop.f32.mrb[93].mxu0  ;;  %v7777_v49 = vld [vmem:[#allocation2 + $0x1f0] sm:$0xff] }
0x3fe7   : > { %8173 = vrot.lane.b32.xlu0 %v15590_v34, %s16188_s2  ;;  %13337 = vmatmul.mubr.msk.f32.vlgmr.msra.gmra.mrb[94].mxu0 %vm1030_vm2, %v15590_v34 }
0x3fe8   : > { %13346 = vmatprep.mubr.msk.f32.mxu0 %vm14265_vm0, %v14266_v1 }
0x4051   : > { %v8176_v52 = vpop.permute.xlu1 %8175 }
0x4052   : > { %13345 = vmatpush3.xpose.msk.msra.mxu0 %vm1030_vm2, %v8176_v52 }
0x4053   : > { %13354 = vmatprep.subr.mxu0 %v14266_v1 }
0x4059   : > { %v8174_v53 = vpop.permute.xlu0 %8173 }
0x405a   : > { %13347 = vmatmul.mubr.msk.f32.vlgmr.msra.gmra.mrb[96].mxu0 %vm1030_vm2, %v8174_v53 }
0x405b   : > { %13356 = vmatprep.mubr.msk.f32.mxu0 %vm14265_vm0, %v14266_v1  ;;  %13355 = vmatpush3.msra.mxu0 %v7776_v2 }
0x405c   : > { %13364 = vmatprep.subr.mxu0 %v14266_v1 }
0x40ba   : > { %v8084_v23 = vpop.f32.mrb[94].mxu0 }
0x40bb   : > { %v8088_v42 = vmul.f32 0.35355338, %v8084_v23  ;;  %v13338_v32 = vpop.f32.mrb[95].mxu0 }
0x40bd   : > { %v8089_v62 = vsel %vm1030_vm2, %v8088_v42, -inf }
0x40be   : > { %8090 = vmax.xlane.f32.xlu0 %v8089_v62 }
0x412d   : > { %v8247_v54 = vpop.f32.mrb[96].mxu0 }
0x412e   : > { %v8251_v61 = vmul.f32 0.35355338, %v8247_v54  ;;  %v13348_v55 = vpop.f32.mrb[97].mxu0 }
0x4130   : > { %v8252_v56 = vsel %vm1030_vm2, %v8251_v61, -inf }
0x4131   : > { %8253 = vmax.xlane.f32.xlu1 %v8252_v56  ;;  %v7778_v56 = vld [vmem:[#allocation2 + $0x1f8] sm:$0xff] }
0x4142   : > { %8488 = vrot.lane.b32.xlu1 %v15580_v47, %s16189_s1 }
0x414b   : > { %v8091_v57 = vpop.xlane.xlu0 %8090 }
0x414c   : > { %v8092_v58 = vsub.f32 %v8088_v42, %v8091_v57 }
0x414e   : > { %v8093_v59 = vmul.f32 1.442695, %v8092_v58 }
0x4150   : > { %14065 = vpow2.f32 %v8093_v59 }
0x415a   : > { %v14066_v28 = vpop.eup %14065 }
0x415b   : > { %v8095_v60 = vsel %vm1030_vm2, %v14066_v28, 0.0 }
0x415c   : > { %8096 = vadd.xlane.f32.xlu0 %v8095_v60  ;;  %v9014_v60 = vld [vmem:[#allocation2 + $0x208] sm:$0xff] }
0x41be   : > { %v8254_v35 = vpop.xlane.xlu1 %8253 }
0x41bf   : > { %v8255_v40 = vsub.f32 %v8251_v61, %v8254_v35 }
0x41c1   : > { %v8256_v63 = vmul.f32 1.442695, %v8255_v40 }
0x41c2   : > { %v8489_v18 = vpop.permute.xlu1 %8488 }
0x41c3   : > { %14067 = vpow2.f32 %v8256_v63 }
0x41cd   : > { %v14068_v3 = vpop.eup %14067 }
0x41ce   : > { %v8258_v4 = vsel %vm1030_vm2, %v14068_v3, 0.0 }
0x41cf   : > { %8259 = vadd.xlane.f32.xlu0 %v8258_v4  ;;  %v9016_v4 = vld [vmem:[#allocation2 + $0x218] sm:$0xff] }
0x41e5   : > { %8264 = vrot.lane.b32.xlu0 %v15573_v41, %s16188_s2 }
0x41e9   : > { %v8097_v19 = vpop.xlane.xlu0 %8096  ;;  %8486 = vrot.lane.b32.xlu0 %v15590_v34, %s16189_s1 }
0x41ea   : > { %14069 = vrcp.f32 %v8097_v19 }
0x41f4   : > { %v14070_v5 = vpop.eup %14069 }
0x41f5   : > { %v8099_v10 = vmul.f32 %v14070_v5, %v14066_v28  ;;  %v9013_v28 = vld [vmem:[#allocation2 + $0x200] sm:$0xff] }
0x41f6   : > { %v13825_v40 = vpack.c.bf16 %v9014_v60, %v9013_v28  ;;  %v9020_v5 = vld [vmem:[#allocation2 + $0x220] sm:$0xff] }
0x41f7   : > { %13342 = vmatmul.mubr.msk.f32.vlgmr.msra.gmra.mrb[74].mxu1 %vm1030_vm2, %v8099_v10  ;;  %v9021_v10 = vld [vmem:[#allocation2 + $0x228] sm:$0xff] }
0x41f8   : > { %13351 = vmatprep.mubr.msk.f32.mxu1 %vm14265_vm0, %v14266_v1  ;;  %v13831_v2 = vpack.c.bf16 %v9021_v10, %v9020_v5 }
0x425c   : > { %v8260_v7 = vpop.xlane.xlu0 %8259 }
0x425d   : > { %14071 = vrcp.f32 %v8260_v7  ;;  %v9022_v7 = vld [vmem:[#allocation2 + $0x230] sm:$0xff] }
0x4260   : > { %v8265_v8 = vpop.permute.xlu0 %8264 }
0x4261   : > { %13350 = vmatpush3.msra.mxu1 %v8265_v8  ;;  %v9023_v8 = vld [vmem:[#allocation2 + $0x238] sm:$0xff] }
0x4262   : > { %13359 = vmatprep.subr.mxu1 %v14266_v1 }
0x4264   : > { %v8487_v27 = vpop.permute.xlu0 %8486 }
0x4267   : > { %v14072_v9 = vpop.eup %14071 }
0x4268   : > { %v8262_v11 = vmul.f32 %v14072_v9, %v14068_v3  ;;  %v9015_v3 = vld [vmem:[#allocation2 + $0x210] sm:$0xff] }
0x4269   : > { %v13828_v19 = vpack.c.bf16 %v9016_v4, %v9015_v3 }
0x426a   : > { %13352 = vmatmul.mubr.msk.f32.vlgmr.msra.gmra.mrb[76].mxu1 %vm1030_vm2, %v8262_v11 }
0x426b   : > { %13360 = vmatpush3.msra.mxu1 %v7775_v13  ;;  %13361 = vmatprep.mubr.msk.f32.mxu1 %vm14265_vm0, %v14266_v1  ;;  %v13834_v13 = vpack.c.bf16 %v9023_v8, %v9022_v7 }
0x426c   : > { %13369 = vmatprep.subr.mxu1 %v14266_v1 }
0x42ca   : > { %v8169_v14 = vpop.f32.mrb[74].mxu1 }
0x42cb   : > { %v13343_v15 = vpop.f32.mrb[75].mxu1  ;;  %13362 = vmatmul.mubr.msk.f32.vlgmr.msra.gmra.mrb[78].mxu1 %vm1030_vm2, %v8169_v14 }
0x42cc   : > { %13371 = vmatprep.mubr.msk.f32.mxu1 %vm14265_vm0, %v14266_v1 }
0x433d   : > { %v8336_v16 = vpop.f32.mrb[76].mxu1 }
0x433e   : > { %v13353_v20 = vpop.f32.mrb[77].mxu1  ;;  %13357 = vmatmul.mubr.msk.f32.vlgmr.msra.gmra.mrb[98].mxu0 %vm1030_vm2, %v8336_v16  ;;  %v12196_v16 = vld [vmem:[%s16125_s14 + $0xf] ss:$0 sm:$0xff] }
0x433f   : > { %13365 = vmatpush3.xpose.msk.msra.mxu0 %vm1030_vm2, %v8489_v18  ;;  %13366 = vmatprep.mubr.msk.f32.mxu0 %vm14265_vm0, %v14266_v1 }
0x4340   : > { %13374 = vmatprep.subr.mxu0 %v14266_v1 }
0x4342   : > { %13367 = vmatmul.mubr.msk.f32.vlgmr.msra.gmra.mrb[100].mxu0 %vm1030_vm2, %v8487_v27 }
0x4343   : > { %13376 = vmatprep.mubr.msk.f32.mxu0 %vm14265_vm0, %v14266_v1  ;;  %13375 = vmatpush3.msra.mxu0 %v7777_v49 }
0x4344   : > { %13384 = vmatprep.subr.mxu0 %v14266_v1 }
0x439e   : > { %v8482_v6 = vpop.f32.mrb[78].mxu1 }
0x439f   : > { %v13363_v21 = vpop.f32.mrb[79].mxu1 }
0x4411   : > { %v8409_v24 = vpop.f32.mrb[98].mxu0 }
0x4412   : > { %v8483_v25 = vadd.f32 %v8482_v6, %v8409_v24  ;;  %v13358_v17 = vpop.f32.mrb[99].mxu0  ;;  %v12207_v24 = vld [vmem:[%s16125_s14 + $0x11] ss:$0 sm:$0xff] }
0x4415   : > { %v8560_v29 = vpop.f32.mrb[100].mxu0 }
0x4416   : > { %v8564_v30 = vmul.f32 0.35355338, %v8560_v29  ;;  %v13368_v12 = vpop.f32.mrb[101].mxu0 }
0x4418   : > { %v8565_v22 = vsel %vm1030_vm2, %v8564_v30, -inf }
0x4419   : > { %8566 = vmax.xlane.f32.xlu1 %v8565_v22 }
0x442a   : > { %8728 = vrot.lane.b32.xlu1 %v15580_v47, %s16190_s30 }
0x442e   : > { %8726 = vrot.lane.b32.xlu1 %v15590_v34, %s16190_s30 }
0x44a6   : > { %v8567_v33 = vpop.xlane.xlu1 %8566 }
0x44a7   : > { %v8568_v36 = vsub.f32 %v8564_v30, %v8567_v33 }
0x44a9   : > { %v8569_v37 = vmul.f32 1.442695, %v8568_v36  ;;  %v9027_v36 = vld [vmem:[#allocation2 + $0x240] sm:$0xff] }
0x44aa   : > { %v8729_v46 = vpop.permute.xlu1 %8728 }
0x44ab   : > { %14073 = vpow2.f32 %v8569_v37  ;;  %v9028_v37 = vld [vmem:[#allocation2 + $0x248] sm:$0xff] }
0x44ae   : > { %v8727_v48 = vpop.permute.xlu1 %8726 }
0x44b5   : > { %v14074_v31 = vpop.eup %14073 }
0x44b6   : > { %v8571_v38 = vsel %vm1030_vm2, %v14074_v31, 0.0 }
0x44b7   : > { %8572 = vadd.xlane.f32.xlu0 %v8571_v38  ;;  %v13837_v38 = vpack.c.bf16 %v9028_v37, %v9027_v36 }
0x44cd   : > { %8576 = vrot.lane.b32.xlu0 %v15573_v41, %s16189_s1 }
0x4544   : > { %v8573_v39 = vpop.xlane.xlu0 %8572 }
0x4545   : > { %14075 = vrcp.f32 %v8573_v39  ;;  %v9030_v39 = vld [vmem:[#allocation2 + $0x258] sm:$0xff] }
0x4548   : > { %v8577_v43 = vpop.permute.xlu0 %8576 }
0x4549   : > { %13370 = vmatpush3.msra.mxu1 %v8577_v43 }
0x454a   : > { %13379 = vmatprep.subr.mxu1 %v14266_v1 }
0x454f   : > { %v14076_v45 = vpop.eup %14075 }
0x4550   : > { %v8575_v47 = vmul.f32 %v14076_v45, %v14074_v31  ;;  %v9029_v31 = vld [vmem:[#allocation2 + $0x250] sm:$0xff] }
0x4551   : > { %v13840_v43 = vpack.c.bf16 %v9030_v39, %v9029_v31 }
0x4552   : > { %13372 = vmatmul.mubr.msk.f32.vlgmr.msra.gmra.mrb[80].mxu1 %vm1030_vm2, %v8575_v47 }
0x4553   : > { %13380 = vmatpush3.xpose.msk.msra.mxu1 %vm1030_vm2, %v8729_v46  ;;  %13381 = vmatprep.mubr.msk.f32.mxu1 %vm14265_vm0, %v14266_v1 }
0x4554   : > { %13389 = vmatprep.subr.mxu1 %v14266_v1 }
0x4556   : > { %13382 = vmatmul.mubr.msk.f32.vlgmr.msra.gmra.mrb[82].mxu1 %vm1030_vm2, %v8727_v48 }
0x4557   : > { %13391 = vmatprep.mubr.msk.f32.mxu1 %vm14265_vm0, %v14266_v1  ;;  %13390 = vmatpush3.msra.mxu1 %v7778_v56 }
0x4558   : > { %13830 = vmatprep.subr.bf16.mxu1 %v14264_v0 }
0x4625   : > { %v8648_v50 = vpop.f32.mrb[80].mxu1 }
0x4626   : > { %v13373_v34 = vpop.f32.mrb[81].mxu1  ;;  %13377 = vmatmul.mubr.msk.f32.vlgmr.msra.gmra.mrb[102].mxu0 %vm1030_vm2, %v8648_v50 }
0x4627   : > { %13386 = vmatprep.mubr.msk.f32.mxu0 %vm14265_vm0, %v14266_v1 }
0x4629   : > { %v8800_v51 = vpop.f32.mrb[82].mxu1 }
0x462a   : > { %v8804_v52 = vmul.f32 0.35355338, %v8800_v51  ;;  %v13383_v53 = vpop.f32.mrb[83].mxu1 }
0x462c   : > { %v8805_v23 = vsel %vm1030_vm2, %v8804_v52, -inf }
0x462d   : > { %8806 = vmax.xlane.f32.xlu0 %v8805_v23 }
0x4643   : > { %8816 = vrot.lane.b32.xlu0 %v15573_v41, %s16190_s30 }
0x46ba   : > { %v8807_v42 = vpop.xlane.xlu0 %8806 }
0x46bb   : > { %v8808_v32 = vsub.f32 %v8804_v52, %v8807_v42  ;;  %v12199_v52 = vld [vmem:[%s16130_s19 + $0x4] ss:$0 sm:$0xff] }
0x46bc   : > { %v12200_v42 = vld [vmem:[%s16131_s20 + $0x4] ss:$0 sm:$0xff] }
0x46bd   : > { %v8809_v62 = vmul.f32 1.442695, %v8808_v32 }
0x46be   : > { %v8817_v54 = vpop.permute.xlu0 %8816 }
0x46bf   : > { %14077 = vpow2.f32 %v8809_v62  ;;  %13385 = vmatpush3.msra.mxu0 %v8817_v54 }
0x46c0   : > { %13824 = vmatprep.subr.bf16.mxu0 %v14264_v0 }
0x46c9   : > { %v14078_v61 = vpop.eup %14077 }
0x46ca   : > { %v8811_v55 = vsel %vm1030_vm2, %v14078_v61, 0.0 }
0x46cb   : > { %8812 = vadd.xlane.f32.xlu1 %v8811_v55  ;;  %v12205_v55 = vld [vmem:[%s16125_s14 + $0x10] ss:$0 sm:$0xff] }
0x46f9   : > { %v8721_v57 = vpop.f32.mrb[102].mxu0 }
0x46fa   : > { %v8725_v58 = vadd.f32 %v8721_v57, %v8483_v25  ;;  %v13378_v59 = vpop.f32.mrb[103].mxu0 }
0x4758   : > { %v8813_v41 = vpop.xlane.xlu1 %8812 }
0x4759   : > { %14079 = vrcp.f32 %v8813_v41 }
0x4763   : > { %v14080_v35 = vpop.eup %14079 }
0x4764   : > { %v8815_v63 = vmul.f32 %v14080_v35, %v14078_v61  ;;  %v12209_v61 = vld [vmem:[%s16125_s14 + $0x12] ss:$0 sm:$0xff] }
0x4766   : > { %13387 = vmatmul.mubr.msk.f32.vlgmr.msra.gmra.mrb[104].mxu0 %vm1030_vm2, %v8815_v63 }
0x4767   : > { %13826 = vmatpush3.bf16.msra.mxu0 %v13825_v40  ;;  %13402 = vmatprep.mubr.msk.f32.mxu0 %vm14265_vm0, %v14266_v1  ;;  %v15735_v40 = vld [vmem:[%s14576_s25] ss:$0 sm:$0xff]  ;;  %s14167_s25 = scalar_lea.vmem %s14166_s9, 256 }
0x4768   : > { %13827 = vmatprep.subr.bf16.mxu0 %v14264_v0  ;;  %p14169_p3 = scmp.lt.s32.totalorder %s14167_s25, %s14161_s24 }
0x476a   : > { %p14170_p4 = por %p14169_p3, %p14168_p2 }
0x476b   : > { %13829 = vmatpush3.bf16.msra.mxu0 %v13828_v19 }
0x476c   : > { %13836 = vmatprep.subr.bf16.mxu0 %v14264_v0  ;;  %p14171_p7 = pnand %p14170_p4, %p14164_p12 }
0x476e   : > { %13403 = vmatmul.mubr.msk.f32.vlgmr.msra.gmra.mrb[106].mxu0 %vm804_vm1, %v15169_v44 }
0x476f   : > { %13424 = vmatprep.mubr.msk.f32.mxu0 %vm14265_vm0, %v14266_v1  ;;  %13838 = vmatpush3.bf16.msra.mxu0 %v13837_v38 }
0x4770   : > { %13839 = vmatprep.subr.bf16.mxu0 %v14264_v0 }
0x4773   : > { %13841 = vmatpush3.bf16.msra.mxu0 %v13840_v43 }
0x4774   : > { %13437 = vmatprep.subr.mxu0 %v14266_v1 }
0x4839   : > { %v8888_v9 = vpop.f32.mrb[104].mxu0 }
0x483a   : > { %v13388_v11 = vpop.f32.mrb[105].mxu0  ;;  %13392 = vmatmul.mubr.msk.f32.vlgmr.msra.gmra.mrb[84].mxu1 %vm1030_vm2, %v8888_v9 }
0x483b   : > { %13832 = vmatpush3.bf16.msra.mxu1 %v13831_v2  ;;  %13413 = vmatprep.mubr.msk.f32.mxu1 %vm14265_vm0, %v14266_v1 }
0x483c   : > { %13833 = vmatprep.subr.bf16.mxu1 %v14264_v0 }
0x483f   : > { %13835 = vmatpush3.bf16.msra.mxu1 %v13834_v13 }
0x4840   : > { %13427 = vmatprep.subr.mxu1 %v14266_v1 }
0x4841   : > { %v15674_v14 = vpop.f32.mrb[106].mxu0 }
0x4842   : > { %v13404_v15 = vpop.f32.mrb[107].mxu0  ;;  %13414 = vmatmul.mubr.msk.f32.vlgmr.msra.gmra.mrb[86].mxu1 %vm804_vm1, %v15169_v44  ;;  %v15721_v59 = vadd.f32 %v12205_v55, %v15674_v14 }
0x4843   : > { %13429 = vmatprep.mubr.msk.f32.mxu1 %vm14265_vm0, %v14266_v1 }
0x490d   : > { %v8961_v18 = vpop.f32.mrb[84].mxu1 }
0x490e   : > { %v8965_v20 = vadd.f32 %v8961_v18, %v8725_v58  ;;  %v13393_v27 = vpop.f32.mrb[85].mxu1 }
0x4910   : > { %v8972_v6 = vadd.f32 %v12196_v16, %v8965_v20 }
0x4912   : > { %v8973_v21 = vadd.f32 %v8972_v6, %v15552_v26 }
0x4914   : > { %v8978_v25 = vsel %vm804_vm1, %v8973_v21, 0.0 }
0x4915   : > { %v9188_v44 = vpop.f32.mrb[86].mxu1  ;;  %8979 = vadd.xlane.f32.xlu1 %v8978_v25 }
0x4916   : > { %v15688_v17 = vadd.f32 %v12207_v24, %v9188_v44  ;;  %v13415_v29 = vpop.f32.mrb[87].mxu1  ;;  %v9035_v24 = vld [vmem:[#allocation2 + $0x268] sm:$0xff] }
0x4918   : > { %13428 = vmatpush3.xpose.msk.msra.mxu1 %vm1030_vm2, %v15688_v17 }
0x4919   : > { %13432 = vmatprep.subr.mxu1 %v14266_v1 }
0x49a2   : > { %v8980_v30 = vpop.xlane.xlu1 %8979 }
0x49a3   : > { %v8981_v12 = vmul.f32 0.03125, %v8980_v30 }
0x49a5   : > { %v8982_v22 = vsub.f32 %v8973_v21, %v8981_v12  ;;  %v9034_v12 = vld [vmem:[#allocation2 + $0x260] sm:$0xff] }
0x49a7   : > { %v8983_v26 = vmul.f32 %v8982_v22, %v8982_v22  ;;  %v9001_v53 = vmul.f32 %v12199_v52, %v8982_v22 }
0x49a9   : > { %v8984_v33 = vsel %vm804_vm1, %v8983_v26, 0.0 }
0x49aa   : > { %8985 = vadd.xlane.f32.xlu1 %v8984_v33 }
0x49bb   : > { %9435 = vrot.lane.b32.xlu1 %v15688_v17, %s16188_s2 }
0x4a37   : > { %v8986_v45 = vpop.xlane.xlu1 %8985 }
0x4a38   : > { %v8987_v46 = vmul.f32 0.032258064, %v8986_v45 }
0x4a3a   : > { %14081 = vrsqrt.f32 %v8987_v46  ;;  %vm8990_vm6 = vcmp.eq.f32.partialorder %v8987_v46, inf  ;;  %v8993_v49 = vand.u32 2147483648, %v8987_v46  ;;  %vm8992_vm7 = vcmp.eq.f32.partialorder %v8987_v46, 0.0 }
0x4a3b   : > { %v9436_v54 = vpop.permute.xlu1 %9435 }
0x4a44   : > { %v14082_v47 = vpop.eup %14081 }
0x4a45   : > { %v8989_v48 = vmul.f32 %v14082_v47, %v8987_v46 }
0x4a47   : > { %v8991_v50 = vsel %vm8990_vm6, %v8987_v46, %v8989_v48 }
0x4a48   : > { %v8994_v34 = vsel %vm8992_vm7, %v8993_v49, %v8991_v50 }
0x4a49   : > { %v9002_v51 = vadd.f32 1e-06, %v8994_v34 }
0x4a4b   : > { %14083 = vrcp.f32 %v9002_v51 }
0x4a55   : > { %v14084_v23 = vpop.eup %14083 }
0x4a56   : > { %v9004_v32 = vmul.f32 %v14084_v23, %v9001_v53 }
0x4a58   : > { %v15704_v62 = vadd.f32 %v12200_v42, %v9004_v32 }
0x4a5a   : > { %13425 = vmatmul.mubr.msk.f32.vlgmr.msra.gmra.mrb[108].mxu0 %vm804_vm1, %v15704_v62 }
0x4a5b   : > { %13438 = vmatpush3.xpose.msk.msra.mxu0 %vm1030_vm2, %v9436_v54  ;;  %13439 = vmatprep.mubr.msk.f32.mxu0 %vm14265_vm0, %v14266_v1 }
0x4a5c   : > { %13447 = vmatprep.subr.mxu0 %v14266_v1 }
0x4b2d   : > { %v9267_v56 = vpop.f32.mrb[108].mxu0 }
0x4b2e   : > { %v15718_v57 = vadd.f32 %v12209_v61, %v9267_v56  ;;  %v13426_v58 = vpop.f32.mrb[109].mxu0 }
0x4b30   : > { %9433 = vrot.lane.b32.xlu0 %v15718_v57, %s16188_s2  ;;  %13430 = vmatmul.mubr.msk.f32.vlgmr.msra.gmra.mrb[88].mxu1 %vm1030_vm2, %v15718_v57 }
0x4b31   : > { %13433 = vmatpush3.msra.mxu1 %v15721_v59  ;;  %13434 = vmatprep.mubr.msk.f32.mxu1 %vm14265_vm0, %v14266_v1 }
0x4b32   : > { %13442 = vmatprep.subr.mxu1 %v14266_v1 }
0x4ba2   : > { %v9434_v41 = vpop.permute.xlu0 %9433 }
0x4ba3   : > { %13440 = vmatmul.mubr.msk.f32.vlgmr.msra.gmra.mrb[110].mxu0 %vm1030_vm2, %v9434_v41 }
0x4ba4   : > { %13449 = vmatprep.mubr.msk.f32.mxu0 %vm14265_vm0, %v14266_v1  ;;  %13448 = vmatpush3.msra.mxu0 %v9035_v24 }
0x4ba5   : > { %13457 = vmatprep.subr.mxu0 %v14266_v1 }
0x4c03   : > { %v9343_v28 = vpop.f32.mrb[88].mxu1 }
0x4c04   : > { %v9347_v60 = vmul.f32 0.35355338, %v9343_v28  ;;  %v13431_v35 = vpop.f32.mrb[89].mxu1 }
0x4c06   : > { %v9348_v63 = vadd.f32 %v15735_v40, %v9347_v60 }
0x4c08   : > { %v9349_v3 = vsel %vm1030_vm2, %v9348_v63, -inf }
0x4c09   : > { %9350 = vmax.xlane.f32.xlu0 %v9349_v3 }
0x4c76   : > { %v9507_v4 = vpop.f32.mrb[110].mxu0 }
0x4c77   : > { %v9511_v19 = vmul.f32 0.35355338, %v9507_v4  ;;  %v13441_v5 = vpop.f32.mrb[111].mxu0 }
0x4c79   : > { %v9512_v10 = vadd.f32 %v15735_v40, %v9511_v19 }
0x4c7b   : > { %v9513_v2 = vsel %vm1030_vm2, %v9512_v10, -inf }
0x4c7c   : > { %9514 = vmax.xlane.f32.xlu1 %v9513_v2 }
0x4c8d   : > { %9749 = vrot.lane.b32.xlu1 %v15688_v17, %s16189_s1 }
0x4c91   : > { %9747 = vrot.lane.b32.xlu1 %v15718_v57, %s16189_s1 }
0x4c96   : > { %v9351_v7 = vpop.xlane.xlu0 %9350 }
0x4c97   : > { %v9352_v8 = vsub.f32 %v9348_v63, %v9351_v7  ;;  %v9037_v7 = vld [vmem:[#allocation2 + $0x278] sm:$0xff] }
0x4c99   : > { %v9353_v9 = vmul.f32 1.442695, %v9352_v8 }
0x4c9b   : > { %14085 = vpow2.f32 %v9353_v9 }
0x4ca5   : > { %v14086_v11 = vpop.eup %14085 }
0x4ca6   : > { %v9355_v13 = vsel %vm1030_vm2, %v14086_v11, 0.0 }
0x4ca7   : > { %9356 = vadd.xlane.f32.xlu0 %v9355_v13 }
0x4d09   : > { %v9515_v14 = vpop.xlane.xlu1 %9514 }
0x4d0a   : > { %v9516_v15 = vsub.f32 %v9512_v10, %v9515_v14 }
0x4d0c   : > { %v9517_v16 = vmul.f32 1.442695, %v9516_v15 }
0x4d0d   : > { %v9750_v33 = vpop.permute.xlu1 %9749 }
0x4d0e   : > { %14087 = vpow2.f32 %v9517_v16 }
0x4d11   : > { %v9748_v31 = vpop.permute.xlu1 %9747 }
0x4d18   : > { %v14088_v18 = vpop.eup %14087 }
0x4d19   : > { %v9519_v20 = vsel %vm1030_vm2, %v14088_v18, 0.0 }
0x4d1a   : > { %9520 = vadd.xlane.f32.xlu0 %v9519_v20 }
0x4d30   : > { %9525 = vrot.lane.b32.xlu0 %v15721_v59, %s16188_s2 }
0x4d34   : > { %v9357_v27 = vpop.xlane.xlu0 %9356 }
0x4d35   : > { %14089 = vrcp.f32 %v9357_v27 }
0x4d3f   : > { %v14090_v6 = vpop.eup %14089 }
0x4d40   : > { %v9359_v21 = vmul.f32 %v14090_v6, %v14086_v11 }
0x4d42   : > { %13435 = vmatmul.mubr.msk.f32.vlgmr.msra.gmra.mrb[90].mxu1 %vm1030_vm2, %v9359_v21 }
0x4d43   : > { %13444 = vmatprep.mubr.msk.f32.mxu1 %vm14265_vm0, %v14266_v1 }
0x4da7   : > { %v9521_v25 = vpop.xlane.xlu0 %9520 }
0x4da8   : > { %14091 = vrcp.f32 %v9521_v25 }
0x4dab   : > { %v9526_v44 = vpop.permute.xlu0 %9525 }
0x4dac   : > { %13443 = vmatpush3.msra.mxu1 %v9526_v44 }
0x4dad   : > { %13452 = vmatprep.subr.mxu1 %v14266_v1 }
0x4db2   : > { %v14092_v29 = vpop.eup %14091 }
0x4db3   : > { %v9523_v30 = vmul.f32 %v14092_v29, %v14088_v18  ;;  %v12227_v18 = vld [vmem:[%s16125_s14 + $0x13] ss:$0 sm:$0xff] }
0x4db5   : > { %13445 = vmatmul.mubr.msk.f32.vlgmr.msra.gmra.mrb[92].mxu1 %vm1030_vm2, %v9523_v30 }
0x4db6   : > { %13453 = vmatpush3.msra.mxu1 %v9034_v12  ;;  %13454 = vmatprep.mubr.msk.f32.mxu1 %vm14265_vm0, %v14266_v1 }
0x4db7   : > { %13462 = vmatprep.subr.mxu1 %v14266_v1 }
0x4e15   : > { %v9429_v22 = vpop.f32.mrb[90].mxu1 }
0x4e16   : > { %v13436_v26 = vpop.f32.mrb[91].mxu1  ;;  %13455 = vmatmul.mubr.msk.f32.vlgmr.msra.gmra.mrb[94].mxu1 %vm1030_vm2, %v9429_v22 }
0x4e17   : > { %13464 = vmatprep.mubr.msk.f32.mxu1 %vm14265_vm0, %v14266_v1  ;;  %v10276_v26 = vld [vmem:[#allocation2 + $0x280] sm:$0xff] }
0x4e88   : > { %v9597_v36 = vpop.f32.mrb[92].mxu1 }
0x4e89   : > { %v13446_v37 = vpop.f32.mrb[93].mxu1  ;;  %13450 = vmatmul.mubr.msk.f32.vlgmr.msra.gmra.mrb[112].mxu0 %vm1030_vm2, %v9597_v36 }
0x4e8a   : > { %13458 = vmatpush3.xpose.msk.msra.mxu0 %vm1030_vm2, %v9750_v33  ;;  %13459 = vmatprep.mubr.msk.f32.mxu0 %vm14265_vm0, %v14266_v1  ;;  %v10277_v33 = vld [vmem:[#allocation2 + $0x288] sm:$0xff]  ;;  %v10283_v37 = vld [vmem:[#allocation2 + $0x2a0] sm:$0xff] }
0x4e8b   : > { %13467 = vmatprep.subr.mxu0 %v14266_v1  ;;  %v13843_v36 = vpack.c.bf16 %v10277_v33, %v10276_v26 }
0x4e8d   : > { %13460 = vmatmul.mubr.msk.f32.vlgmr.msra.gmra.mrb[114].mxu0 %vm1030_vm2, %v9748_v31  ;;  %v10284_v31 = vld [vmem:[#allocation2 + $0x2a8] sm:$0xff] }
0x4e8e   : > { %13469 = vmatprep.mubr.msk.f32.mxu0 %vm14265_vm0, %v14266_v1 }
0x4ee9   : > { %v9743_v38 = vpop.f32.mrb[94].mxu1 }
0x4eea   : > { %v13456_v39 = vpop.f32.mrb[95].mxu1 }
0x4eeb   : > { %v13849_v39 = vpack.c.bf16 %v10284_v31, %v10283_v37 }
0x4f5c   : > { %v9670_v43 = vpop.f32.mrb[112].mxu0 }
0x4f5d   : > { %v9744_v45 = vadd.f32 %v9743_v38, %v9670_v43  ;;  %v13451_v46 = vpop.f32.mrb[113].mxu0  ;;  %v10278_v38 = vld [vmem:[#allocation2 + $0x290] sm:$0xff]  ;;  %v10279_v43 = vld [vmem:[#allocation2 + $0x298] sm:$0xff] }
0x4f5e   : > { %v13846_v46 = vpack.c.bf16 %v10279_v43, %v10278_v38 }
0x4f60   : > { %v9821_v47 = vpop.f32.mrb[114].mxu0 }
0x4f61   : > { %v9825_v48 = vmul.f32 0.35355338, %v9821_v47  ;;  %v13461_v49 = vpop.f32.mrb[115].mxu0  ;;  %v10290_v47 = vld [vmem:[#allocation2 + $0x2c0] sm:$0xff] }
0x4f63   : > { %v9826_v50 = vadd.f32 %v15735_v40, %v9825_v48  ;;  %v10291_v48 = vld [vmem:[#allocation2 + $0x2c8] sm:$0xff] }
0x4f65   : > { %v9827_v34 = vsel %vm1030_vm2, %v9826_v50, -inf }
0x4f66   : > { %9828 = vmax.xlane.f32.xlu0 %v9827_v34  ;;  %v10292_v34 = vld [vmem:[#allocation2 + $0x2d0] sm:$0xff] }
0x4f7c   : > { %9838 = vrot.lane.b32.xlu0 %v15721_v59, %s16189_s1 }
0x4f80   : > { %9988 = vrot.lane.b32.xlu0 %v15718_v57, %s16190_s30 }
0x4ff3   : > { %v9829_v51 = vpop.xlane.xlu0 %9828 }
0x4ff4   : > { %v9830_v52 = vsub.f32 %v9826_v50, %v9829_v51  ;;  %v13855_v50 = vpack.c.bf16 %v10291_v48, %v10290_v47  ;;  %v10293_v51 = vld [vmem:[#allocation2 + $0x2d8] sm:$0xff] }
0x4ff6   : > { %v9831_v53 = vmul.f32 1.442695, %v9830_v52  ;;  %v14131_v52 = vld [vmem:[%s15314_s13] sm:$0xff]  ;;  %s12294_s13 = sshll.u32 %s14408_s4, 7 }
0x4ff7   : > { %v9839_v23 = vpop.permute.xlu0 %9838  ;;  %s16033_s7 = scalar_lea.hbm %s16132_s21, %s12294_s13 }
0x4ff8   : > { %14093 = vpow2.f32 %v9831_v53  ;;  %13463 = vmatpush3.msra.mxu1 %v9839_v23  ;;  %v13858_v53 = vpack.c.bf16 %v10293_v51, %v10292_v34 }
0x4ff9   : > { %13472 = vmatprep.subr.mxu1 %v14266_v1 }
0x4ffb   : > { %v9989_v57 = vpop.permute.xlu0 %9988 }
0x5002   : > { %v14094_v42 = vpop.eup %14093 }
0x5003   : > { %v9833_v32 = vsel %vm1030_vm2, %v14094_v42, 0.0 }
0x5004   : > { %9834 = vadd.xlane.f32.xlu1 %v9833_v32 }
0x5015   : > { %9990 = vrot.lane.b32.xlu1 %v15688_v17, %s16190_s30  ;;  %v9036_v17 = vld [vmem:[#allocation2 + $0x270] sm:$0xff] }
0x5016   : > { %13468 = vmatpush3.msra.mxu0 %v9036_v17  ;;  %v12230_v17 = vld [vmem:[%s16130_s19 + $0x5] ss:$0 sm:$0xff] }
0x5017   : > { %13477 = vmatprep.subr.mxu0 %v14266_v1 }
0x5091   : > { %v9835_v54 = vpop.xlane.xlu1 %9834 }
0x5092   : > { %14095 = vrcp.f32 %v9835_v54 }
0x5095   : > { %v9991_v56 = vpop.permute.xlu1 %9990 }
0x509c   : > { %v14096_v61 = vpop.eup %14095 }
0x509d   : > { %v9837_v55 = vmul.f32 %v14096_v61, %v14094_v42 }
0x509f   : > { %13465 = vmatmul.mubr.msk.f32.vlgmr.msra.gmra.mrb[96].mxu1 %vm1030_vm2, %v9837_v55 }
0x50a0   : > { %13473 = vmatpush3.xpose.msk.msra.mxu1 %vm1030_vm2, %v9991_v56  ;;  %13474 = vmatprep.mubr.msk.f32.mxu1 %vm14265_vm0, %v14266_v1 }
0x50a1   : > { %13482 = vmatprep.subr.mxu1 %v14266_v1 }
0x50a3   : > { %13475 = vmatmul.mubr.msk.f32.vlgmr.msra.gmra.mrb[98].mxu1 %vm1030_vm2, %v9989_v57 }
0x50a4   : > { %13484 = vmatprep.mubr.msk.f32.mxu1 %vm14265_vm0, %v14266_v1  ;;  %13483 = vmatpush3.msra.mxu1 %v9037_v7  ;;  %v12240_v7 = vld [vmem:[%s16125_s14 + $0x16] ss:$0 sm:$0xff] }
0x50a5   : > { %13848 = vmatprep.subr.bf16.mxu1 %v14264_v0 }
0x5172   : > { %v9910_v58 = vpop.f32.mrb[96].mxu1 }
0x5173   : > { %v13466_v41 = vpop.f32.mrb[97].mxu1  ;;  %13470 = vmatmul.mubr.msk.f32.vlgmr.msra.gmra.mrb[116].mxu0 %vm1030_vm2, %v9910_v58 }
0x5174   : > { %13479 = vmatprep.mubr.msk.f32.mxu0 %vm14265_vm0, %v14266_v1 }
0x5176   : > { %v10062_v28 = vpop.f32.mrb[98].mxu1 }
0x5177   : > { %v10066_v60 = vmul.f32 0.35355338, %v10062_v28  ;;  %v13476_v35 = vpop.f32.mrb[99].mxu1  ;;  %v12231_v28 = vld [vmem:[%s16131_s20 + $0x5] ss:$0 sm:$0xff] }
0x5179   : > { %v10067_v63 = vadd.f32 %v15735_v40, %v10066_v60 }
0x517b   : > { %v10068_v3 = vsel %vm1030_vm2, %v10067_v63, -inf }
0x517c   : > { %10069 = vmax.xlane.f32.xlu1 %v10068_v3  ;;  %v12238_v3 = vld [vmem:[%s16125_s14 + $0x15] ss:$0 sm:$0xff] }
0x5209   : > { %v10070_v4 = vpop.xlane.xlu1 %10069 }
0x520a   : > { %v10071_v19 = vsub.f32 %v10067_v63, %v10070_v4 }
0x520c   : > { %v10072_v5 = vmul.f32 1.442695, %v10071_v19 }
0x520e   : > { %14097 = vpow2.f32 %v10072_v5 }
0x5218   : > { %v14098_v10 = vpop.eup %14097 }
0x5219   : > { %v10074_v2 = vsel %vm1030_vm2, %v14098_v10, 0.0 }
0x521a   : > { %10075 = vadd.xlane.f32.xlu0 %v10074_v2 }
0x5230   : > { %10079 = vrot.lane.b32.xlu0 %v15721_v59, %s16190_s30 }
0x5246   : > { %v9983_v8 = vpop.f32.mrb[116].mxu0 }
0x5247   : > { %v9987_v40 = vadd.f32 %v9983_v8, %v9744_v45  ;;  %v13471_v9 = vpop.f32.mrb[117].mxu0  ;;  %v10286_v45 = vld [vmem:[#allocation2 + $0x2b8] sm:$0xff]  ;;  %v12236_v8 = vld [vmem:[%s16125_s14 + $0x14] ss:$0 sm:$0xff] }
0x52a7   : > { %v10076_v11 = vpop.xlane.xlu0 %10075 }
0x52a8   : > { %14099 = vrcp.f32 %v10076_v11 }
0x52ab   : > { %v10080_v13 = vpop.permute.xlu0 %10079 }
0x52ac   : > { %13478 = vmatpush3.msra.mxu0 %v10080_v13 }
0x52ad   : > { %13842 = vmatprep.subr.bf16.mxu0 %v14264_v0 }
0x52b2   : > { %v14100_v14 = vpop.eup %14099 }
0x52b3   : > { %v10078_v15 = vmul.f32 %v14100_v14, %v14098_v10 }
0x52b5   : > { %13480 = vmatmul.mubr.msk.f32.vlgmr.msra.gmra.mrb[118].mxu0 %vm1030_vm2, %v10078_v15 }
0x52b6   : > { %13495 = vmatprep.mubr.msk.f32.mxu0 %vm14265_vm0, %v14266_v1  ;;  %13844 = vmatpush3.bf16.msra.mxu0 %v13843_v36 }
0x52b7   : > { %13845 = vmatprep.subr.bf16.mxu0 %v14264_v0 }
0x52ba   : > { %13847 = vmatpush3.bf16.msra.mxu0 %v13846_v46  ;;  %v10298_v46 = vld [vmem:[#allocation2 + $0x2e8] sm:$0xff] }
0x52bb   : > { %13854 = vmatprep.subr.bf16.mxu0 %v14264_v0 }
0x52bd   : > { %13496 = vmatmul.mubr.msk.f32.vlgmr.msra.gmra.mrb[120].mxu0 %vm804_vm1, %v14131_v52 }
0x52be   : > { %13856 = vmatpush3.bf16.msra.mxu0 %v13855_v50  ;;  %13517 = vmatprep.mubr.msk.f32.mxu0 %vm14265_vm0, %v14266_v1  ;;  %v10297_v50 = vld [vmem:[#allocation2 + $0x2e0] sm:$0xff] }
0x52bf   : > { %13857 = vmatprep.subr.bf16.mxu0 %v14264_v0 }
0x52c2   : > { %13859 = vmatpush3.bf16.msra.mxu0 %v13858_v53 }
0x52c3   : > { %13530 = vmatprep.subr.mxu0 %v14266_v1 }
0x5388   : > { %v10151_v59 = vpop.f32.mrb[118].mxu0 }
0x5389   : > { %v13481_v16 = vpop.f32.mrb[119].mxu0  ;;  %13485 = vmatmul.mubr.msk.f32.vlgmr.msra.gmra.mrb[100].mxu1 %vm1030_vm2, %v10151_v59 }
0x538a   : > { %13506 = vmatprep.mubr.msk.f32.mxu1 %vm14265_vm0, %v14266_v1  ;;  %13850 = vmatpush3.bf16.msra.mxu1 %v13849_v39 }
0x538b   : > { %13851 = vmatprep.subr.bf16.mxu1 %v14264_v0 }
0x5390   : > { %v10375_v63 = vpop.f32.mrb[120].mxu0 }
0x5391   : > { %v13497_v4 = vpop.f32.mrb[121].mxu0  ;;  %v15855_v13 = vadd.f32 %v12236_v8, %v10375_v63 }
0x545c   : > { %v10224_v20 = vpop.f32.mrb[100].mxu1 }
0x545d   : > { %v10228_v27 = vadd.f32 %v10224_v20, %v9987_v40  ;;  %v13486_v6 = vpop.f32.mrb[101].mxu1 }
0x545f   : > { %v10235_v21 = vadd.f32 %v12227_v18, %v10228_v27  ;;  %v15869_v18 = vld [vmem:[%s15377_s27] ss:$0 sm:$0xff] }
0x5461   : > { %v10236_v24 = vadd.f32 %v10235_v21, %v15704_v62  ;;  %v10285_v62 = vld [vmem:[#allocation2 + $0x2b0] sm:$0xff] }
0x5462   : > { %v13852_v49 = vpack.c.bf16 %v10286_v45, %v10285_v62 }
0x5463   : > { %v10241_v25 = vsel %vm804_vm1, %v10236_v24, 0.0 }
0x5464   : > { %10242 = vadd.xlane.f32.xlu1 %v10241_v25  ;;  %13853 = vmatpush3.bf16.msra.mxu1 %v13852_v49 }
0x5465   : > { %13520 = vmatprep.subr.mxu1 %v14266_v1 }
0x5467   : > { %13507 = vmatmul.mubr.msk.f32.vlgmr.msra.gmra.mrb[102].mxu1 %vm804_vm1, %v14131_v52 }
0x5468   : > { %13522 = vmatprep.mubr.msk.f32.mxu1 %vm14265_vm0, %v14266_v1 }
0x54f1   : > { %v10243_v44 = vpop.xlane.xlu1 %10242 }
0x54f2   : > { %v10244_v29 = vmul.f32 0.03125, %v10243_v44 }
0x54f4   : > { %v10245_v30 = vsub.f32 %v10236_v24, %v10244_v29 }
0x54f6   : > { %v10246_v12 = vmul.f32 %v10245_v30, %v10245_v30  ;;  %v10264_v58 = vmul.f32 %v12230_v17, %v10245_v30 }
0x54f8   : > { %v10247_v22 = vsel %vm804_vm1, %v10246_v12, 0.0 }
0x54f9   : > { %10248 = vadd.xlane.f32.xlu1 %v10247_v22 }
0x553a   : > { %v10451_v19 = vpop.f32.mrb[102].mxu1 }
0x553b   : > { %v15838_v5 = vadd.f32 %v12238_v3, %v10451_v19  ;;  %v13508_v10 = vpop.f32.mrb[103].mxu1 }
0x553d   : > { %10698 = vrot.lane.b32.xlu1 %v15838_v5, %s16188_s2  ;;  %13521 = vmatpush3.xpose.msk.msra.mxu1 %vm1030_vm2, %v15838_v5 }
0x553e   : > { %13525 = vmatprep.subr.mxu1 %v14266_v1 }
0x5586   : > { %v10249_v23 = vpop.xlane.xlu1 %10248 }
0x5587   : > { %v10250_v42 = vmul.f32 0.032258064, %v10249_v23 }
0x5589   : > { %14101 = vrsqrt.f32 %v10250_v42  ;;  %vm10253_vm8 = vcmp.eq.f32.partialorder %v10250_v42, inf  ;;  %v10256_v61 = vand.u32 2147483648, %v10250_v42  ;;  %vm10255_vm9 = vcmp.eq.f32.partialorder %v10250_v42, 0.0 }
0x5593   : > { %v14102_v32 = vpop.eup %14101 }
0x5594   : > { %v10252_v54 = vmul.f32 %v14102_v32, %v10250_v42 }
0x5596   : > { %v10254_v55 = vsel %vm10253_vm8, %v10250_v42, %v10252_v54 }
0x5597   : > { %v10257_v56 = vsel %vm10255_vm9, %v10256_v61, %v10254_v55 }
0x5598   : > { %v10265_v57 = vadd.f32 1e-06, %v10257_v56 }
0x559a   : > { %14103 = vrcp.f32 %v10265_v57 }
0x55a4   : > { %v14104_v41 = vpop.eup %14103 }
0x55a5   : > { %v10267_v60 = vmul.f32 %v14104_v41, %v10264_v58 }
0x55a7   : > { %v15829_v35 = vadd.f32 %v12231_v28, %v10267_v60 }
0x55a9   : > { %13518 = vmatmul.mubr.msk.f32.vlgmr.msra.gmra.mrb[122].mxu0 %vm804_vm1, %v15829_v35 }
0x55aa   : > { %13532 = vmatprep.mubr.msk.f32.mxu0 %vm14265_vm0, %v14266_v1 }
0x55af   : > { %v10699_v2 = vpop.permute.xlu1 %10698 }
0x55b0   : > { %13531 = vmatpush3.xpose.msk.msra.mxu0 %vm1030_vm2, %v10699_v2 }
0x55b1   : > { %13540 = vmatprep.subr.mxu0 %v14266_v1 }
0x567c   : > { %v10530_v40 = vpop.f32.mrb[122].mxu0 }
0x567d   : > { %v15853_v9 = vadd.f32 %v12240_v7, %v10530_v40  ;;  %v13519_v11 = vpop.f32.mrb[123].mxu0 }
0x567f   : > { %10696 = vrot.lane.b32.xlu0 %v15853_v9, %s16188_s2  ;;  %13523 = vmatmul.mubr.msk.f32.vlgmr.msra.gmra.mrb[104].mxu1 %vm1030_vm2, %v15853_v9 }
0x5680   : > { %13526 = vmatpush3.msra.mxu1 %v15855_v13  ;;  %13527 = vmatprep.mubr.msk.f32.mxu1 %vm14265_vm0, %v14266_v1 }
0x5681   : > { %13535 = vmatprep.subr.mxu1 %v14266_v1 }
0x56f1   : > { %v10697_v14 = vpop.permute.xlu0 %10696 }
0x56f2   : > { %13533 = vmatmul.mubr.msk.f32.vlgmr.msra.gmra.mrb[124].mxu0 %vm1030_vm2, %v10697_v14 }
0x56f3   : > { %13542 = vmatprep.mubr.msk.f32.mxu0 %vm14265_vm0, %v14266_v1  ;;  %13541 = vmatpush3.msra.mxu0 %v10298_v46 }
0x56f4   : > { %13550 = vmatprep.subr.mxu0 %v14266_v1 }
0x5752   : > { %v10606_v15 = vpop.f32.mrb[104].mxu1 }
0x5753   : > { %v10610_v59 = vmul.f32 0.35355338, %v10606_v15  ;;  %v13524_v16 = vpop.f32.mrb[105].mxu1 }
0x5755   : > { %v10611_v20 = vadd.f32 %v15869_v18, %v10610_v59 }
0x5757   : > { %v10612_v27 = vsel %vm1030_vm2, %v10611_v20, -inf }
0x5758   : > { %10613 = vmax.xlane.f32.xlu0 %v10612_v27 }
0x57c5   : > { %v10770_v6 = vpop.f32.mrb[124].mxu0 }
0x57c6   : > { %v10774_v21 = vmul.f32 0.35355338, %v10770_v6  ;;  %v13534_v24 = vpop.f32.mrb[125].mxu0 }
0x57c8   : > { %v10775_v25 = vadd.f32 %v15869_v18, %v10774_v21 }
0x57ca   : > { %v10776_v44 = vsel %vm1030_vm2, %v10775_v25, -inf }
0x57cb   : > { %10777 = vmax.xlane.f32.xlu1 %v10776_v44 }
0x57dc   : > { %10788 = vrot.lane.b32.xlu1 %v15855_v13, %s16188_s2 }
0x57e0   : > { %11010 = vrot.lane.b32.xlu1 %v15853_v9, %s16189_s1 }
0x57e5   : > { %v10614_v29 = vpop.xlane.xlu0 %10613 }
0x57e6   : > { %v10615_v30 = vsub.f32 %v10611_v20, %v10614_v29 }
0x57e8   : > { %v10616_v12 = vmul.f32 1.442695, %v10615_v30  ;;  %v10300_v30 = vld [vmem:[#allocation2 + $0x2f8] sm:$0xff] }
0x57ea   : > { %14105 = vpow2.f32 %v10616_v12 }
0x57f4   : > { %v14106_v22 = vpop.eup %14105 }
0x57f5   : > { %v10618_v26 = vsel %vm1030_vm2, %v14106_v22, 0.0 }
0x57f6   : > { %10619 = vadd.xlane.f32.xlu0 %v10618_v26 }
0x5858   : > { %v10778_v33 = vpop.xlane.xlu1 %10777 }
0x5859   : > { %v10779_v36 = vsub.f32 %v10775_v25, %v10778_v33 }
0x585b   : > { %v10780_v37 = vmul.f32 1.442695, %v10779_v36 }
0x585c   : > { %v10789_v45 = vpop.permute.xlu1 %10788 }
0x585d   : > { %14107 = vpow2.f32 %v10780_v37 }
0x5860   : > { %v11011_v42 = vpop.permute.xlu1 %11010 }
0x5867   : > { %v14108_v31 = vpop.eup %14107 }
0x5868   : > { %v10782_v38 = vsel %vm1030_vm2, %v14108_v31, 0.0 }
0x5869   : > { %10783 = vadd.xlane.f32.xlu0 %v10782_v38 }
0x587f   : > { %11012 = vrot.lane.b32.xlu0 %v15838_v5, %s16189_s1 }
0x5883   : > { %v10620_v39 = vpop.xlane.xlu0 %10619 }
0x5884   : > { %14109 = vrcp.f32 %v10620_v39 }
0x588e   : > { %v14110_v43 = vpop.eup %14109 }
0x588f   : > { %v10622_v62 = vmul.f32 %v14110_v43, %v14106_v22 }
0x5891   : > { %13528 = vmatmul.mubr.msk.f32.vlgmr.msra.gmra.mrb[106].mxu1 %vm1030_vm2, %v10622_v62 }
0x5892   : > { %13536 = vmatpush3.msra.mxu1 %v10789_v45  ;;  %13537 = vmatprep.mubr.msk.f32.mxu1 %vm14265_vm0, %v14266_v1 }
0x5893   : > { %13545 = vmatprep.subr.mxu1 %v14266_v1 }
0x58f6   : > { %v10784_v47 = vpop.xlane.xlu0 %10783 }
0x58f7   : > { %14111 = vrcp.f32 %v10784_v47 }
0x58fa   : > { %v11013_v53 = vpop.permute.xlu0 %11012 }
0x5901   : > { %v14112_v48 = vpop.eup %14111 }
0x5902   : > { %v10786_v49 = vmul.f32 %v14112_v48, %v14108_v31  ;;  %v12258_v31 = vld [vmem:[%s16125_s14 + $0x17] ss:$0 sm:$0xff] }
0x5904   : > { %13538 = vmatmul.mubr.msk.f32.vlgmr.msra.gmra.mrb[108].mxu1 %vm1030_vm2, %v10786_v49 }
0x5905   : > { %13546 = vmatpush3.msra.mxu1 %v10297_v50  ;;  %13547 = vmatprep.mubr.msk.f32.mxu1 %vm14265_vm0, %v14266_v1 }
0x5906   : > { %13555 = vmatprep.subr.mxu1 %v14266_v1 }
0x5964   : > { %v10692_v34 = vpop.f32.mrb[106].mxu1 }
0x5965   : > { %v13529_v51 = vpop.f32.mrb[107].mxu1  ;;  %13548 = vmatmul.mubr.msk.f32.vlgmr.msra.gmra.mrb[110].mxu1 %vm1030_vm2, %v10692_v34 }
0x5966   : > { %13557 = vmatprep.mubr.msk.f32.mxu1 %vm14265_vm0, %v14266_v1  ;;  %v12264_v51 = vld [vmem:[%s16126_s15 + $0x28] sm:$0xff] }
0x59d7   : > { %v10860_v52 = vpop.f32.mrb[108].mxu1 }
0x59d8   : > { %v13539_v23 = vpop.f32.mrb[109].mxu1  ;;  %13543 = vmatmul.mubr.msk.f32.vlgmr.msra.gmra.mrb[126].mxu0 %vm1030_vm2, %v10860_v52 }
0x59d9   : > { %13551 = vmatpush3.xpose.msk.msra.mxu0 %vm1030_vm2, %v11013_v53  ;;  %13552 = vmatprep.mubr.msk.f32.mxu0 %vm14265_vm0, %v14266_v1  ;;  %v12266_v53 = vld [vmem:[%s16126_s15 + $0x38] sm:$0xff] }
0x59da   : > { %13560 = vmatprep.subr.mxu0 %v14266_v1 }
0x59dc   : > { %13553 = vmatmul.mubr.msk.f32.vlgmr.msra.gmra.mrb[128].mxu0 %vm1030_vm2, %v11011_v42  ;;  %v12268_v42 = vld [vmem:[%s16128_s17 + $0x80] sm:$0xff] }
0x59dd   : > { %13562 = vmatprep.mubr.msk.f32.mxu0 %vm14265_vm0, %v14266_v1 }
0x5a38   : > { %v11006_v32 = vpop.f32.mrb[110].mxu1 }
0x5a39   : > { %v13549_v54 = vpop.f32.mrb[111].mxu1 }
0x5a3a   : > { %v12270_v54 = vld [vmem:[%s16128_s17 + $0x90] sm:$0xff] }
0x5aab   : > { %v10933_v61 = vpop.f32.mrb[126].mxu0 }
0x5aac   : > { %v11007_v55 = vadd.f32 %v11006_v32, %v10933_v61  ;;  %v13544_v56 = vpop.f32.mrb[127].mxu0  ;;  %v12269_v32 = vld [vmem:[%s16128_s17 + $0x88] sm:$0xff] }
0x5aad   : > { %v13867_v61 = vpack.c.bf16 %v12269_v32, %v12268_v42 }
0x5aaf   : > { %v11084_v57 = vpop.f32.mrb[128].mxu0 }
0x5ab0   : > { %v11088_v17 = vmul.f32 0.35355338, %v11084_v57  ;;  %v13554_v58 = vpop.f32.mrb[129].mxu0  ;;  %v12272_v57 = vld [vmem:[%s16128_s17 + $0xa0] sm:$0xff] }
0x5ab2   : > { %v11089_v41 = vadd.f32 %v15869_v18, %v11088_v17  ;;  %v12273_v17 = vld [vmem:[%s16128_s17 + $0xa8] sm:$0xff] }
0x5ab3   : > { %v13873_v58 = vpack.c.bf16 %v12273_v17, %v12272_v57 }
0x5ab4   : > { %v11090_v28 = vsel %vm1030_vm2, %v11089_v41, -inf }
0x5ab5   : > { %11091 = vmax.xlane.f32.xlu1 %v11090_v28  ;;  %v12275_v28 = vld [vmem:[%s16128_s17 + $0xb8] sm:$0xff] }
0x5ac6   : > { %11253 = vrot.lane.b32.xlu1 %v15838_v5, %s16190_s30 }
0x5aca   : > { %11251 = vrot.lane.b32.xlu1 %v15853_v9, %s16190_s30  ;;  %v10299_v9 = vld [vmem:[#allocation2 + $0x2f0] sm:$0xff] }
0x5acb   : > { %13561 = vmatpush3.msra.mxu0 %v10299_v9 }
0x5acc   : > { %13570 = vmatprep.subr.mxu0 %v14266_v1 }
0x5b42   : > { %v11092_v60 = vpop.xlane.xlu1 %11091 }
0x5b43   : > { %v11093_v63 = vsub.f32 %v11089_v41, %v11092_v60  ;;  %v12274_v41 = vld [vmem:[%s16128_s17 + $0xb0] sm:$0xff] }
0x5b44   : > { %v13876_v60 = vpack.c.bf16 %v12275_v28, %v12274_v41 }
0x5b45   : > { %v11094_v3 = vmul.f32 1.442695, %v11093_v63  ;;  %v12276_v63 = vld [vmem:[%s16128_s17 + $0xc0] sm:$0xff] }
0x5b46   : > { %v11254_v7 = vpop.permute.xlu1 %11253 }
0x5b47   : > { %14113 = vpow2.f32 %v11094_v3  ;;  %v12277_v3 = vld [vmem:[%s16128_s17 + $0xc8] sm:$0xff] }
0x5b4a   : > { %v11252_v40 = vpop.permute.xlu1 %11251 }
0x5b51   : > { %v14114_v4 = vpop.eup %14113 }
0x5b52   : > { %v11096_v19 = vsel %vm1030_vm2, %v14114_v4, 0.0 }
0x5b53   : > { %11097 = vadd.xlane.f32.xlu0 %v11096_v19  ;;  %v12278_v19 = vld [vmem:[%s16128_s17 + $0xd0] sm:$0xff] }
0x5b69   : > { %11101 = vrot.lane.b32.xlu0 %v15855_v13, %s16189_s1 }
0x5be0   : > { %v11098_v10 = vpop.xlane.xlu0 %11097 }
0x5be1   : > { %14115 = vrcp.f32 %v11098_v10  ;;  %v12279_v10 = vld [vmem:[%s16128_s17 + $0xd8] sm:$0xff] }
0x5be4   : > { %v11102_v2 = vpop.permute.xlu0 %11101 }
0x5be5   : > { %13556 = vmatpush3.msra.mxu1 %v11102_v2  ;;  %v13882_v2 = vpack.c.bf16 %v12279_v10, %v12278_v19 }
0x5be6   : > { %13565 = vmatprep.subr.mxu1 %v14266_v1 }
0x5beb   : > { %v14116_v5 = vpop.eup %14115 }
0x5bec   : > { %v11100_v8 = vmul.f32 %v14116_v5, %v14114_v4  ;;  %v13879_v4 = vpack.c.bf16 %v12277_v3, %v12276_v63  ;;  %v12280_v5 = vld [vmem:[%s16128_s17 + $0xe0] sm:$0xff] }
0x5bee   : > { %13558 = vmatmul.mubr.msk.f32.vlgmr.msra.gmra.mrb[112].mxu1 %vm1030_vm2, %v11100_v8 }
0x5bef   : > { %13566 = vmatpush3.xpose.msk.msra.mxu1 %vm1030_vm2, %v11254_v7  ;;  %13567 = vmatprep.mubr.msk.f32.mxu1 %vm14265_vm0, %v14266_v1  ;;  %v12281_v7 = vld [vmem:[%s16128_s17 + $0xe8] sm:$0xff] }
0x5bf0   : > { %13575 = vmatprep.subr.mxu1 %v14266_v1  ;;  %v13885_v8 = vpack.c.bf16 %v12281_v7, %v12280_v5 }
0x5bf2   : > { %13568 = vmatmul.mubr.msk.f32.vlgmr.msra.gmra.mrb[114].mxu1 %vm1030_vm2, %v11252_v40 }
0x5bf3   : > { %13577 = vmatprep.mubr.msk.f32.mxu1 %vm14265_vm0, %v14266_v1  ;;  %13576 = vmatpush3.msra.mxu1 %v10300_v30 }
0x5bf4   : > { %13866 = vmatprep.subr.bf16.mxu1 %v14264_v0 }
0x5cc1   : > { %v11173_v11 = vpop.f32.mrb[112].mxu1 }
0x5cc2   : > { %v13559_v14 = vpop.f32.mrb[113].mxu1  ;;  %13563 = vmatmul.mubr.msk.f32.vlgmr.msra.gmra.mrb[130].mxu0 %vm1030_vm2, %v11173_v11 }
0x5cc3   : > { %13572 = vmatprep.mubr.msk.f32.mxu0 %vm14265_vm0, %v14266_v1 }
0x5cc5   : > { %v11325_v15 = vpop.f32.mrb[114].mxu1 }
0x5cc6   : > { %v11329_v59 = vmul.f32 0.35355338, %v11325_v15  ;;  %v13569_v16 = vpop.f32.mrb[115].mxu1 }
0x5cc8   : > { %v11330_v20 = vadd.f32 %v15869_v18, %v11329_v59 }
0x5cca   : > { %v11331_v27 = vsel %vm1030_vm2, %v11330_v20, -inf }
0x5ccb   : > { %11332 = vmax.xlane.f32.xlu0 %v11331_v27  ;;  %v12261_v27 = vld [vmem:[%s16130_s19 + $0x6] ss:$0 sm:$0xff] }
0x5ce1   : > { %11342 = vrot.lane.b32.xlu0 %v15855_v13, %s16190_s30 }
0x5d58   : > { %v11333_v6 = vpop.xlane.xlu0 %11332 }
0x5d59   : > { %v11334_v21 = vsub.f32 %v11330_v20, %v11333_v6 }
0x5d5b   : > { %v11335_v24 = vmul.f32 1.442695, %v11334_v21 }
0x5d5c   : > { %v11343_v25 = vpop.permute.xlu0 %11342 }
0x5d5d   : > { %14117 = vpow2.f32 %v11335_v24  ;;  %13571 = vmatpush3.msra.mxu0 %v11343_v25 }
0x5d5e   : > { %13860 = vmatprep.subr.bf16.mxu0 %v14264_v0 }
0x5d67   : > { %v14118_v44 = vpop.eup %14117 }
0x5d68   : > { %v11337_v29 = vsel %vm1030_vm2, %v14118_v44, 0.0 }
0x5d69   : > { %11338 = vadd.xlane.f32.xlu1 %v11337_v29  ;;  %v12283_v29 = vld [vmem:[%s16128_s17 + $0xf8] sm:$0xff] }
0x5d95   : > { %v11246_v18 = vpop.f32.mrb[130].mxu0 }
0x5d96   : > { %v11250_v12 = vadd.f32 %v11246_v18, %v11007_v55  ;;  %v13564_v22 = vpop.f32.mrb[131].mxu0  ;;  %v12271_v55 = vld [vmem:[%s16128_s17 + $0x98] sm:$0xff]  ;;  %v12285_v18 = vld [vmem:[%s16127_s16 + $0x1] ss:$0 sm:$0xff] }
0x5d97   : > { %v13870_v56 = vpack.c.bf16 %v12271_v55, %v12270_v54 }
0x5df6   : > { %v11339_v13 = vpop.xlane.xlu1 %11338 }
0x5df7   : > { %14119 = vrcp.f32 %v11339_v13 }
0x5e01   : > { %v14120_v26 = vpop.eup %14119 }
0x5e02   : > { %v11341_v33 = vmul.f32 %v14120_v26, %v14118_v44  ;;  %v12282_v44 = vld [vmem:[%s16128_s17 + $0xf0] sm:$0xff] }
0x5e03   : > { %v13888_v30 = vpack.c.bf16 %v12283_v29, %v12282_v44 }
0x5e04   : > { %13573 = vmatmul.mubr.msk.f32.vlgmr.msra.gmra.mrb[132].mxu0 %vm1030_vm2, %v11341_v33  ;;  %v12287_v33 = vld [vmem:[%s16129_s18 + $0x1] ss:$0 sm:$0xff] }
0x5e05   : > { %13588 = vmatprep.mubr.msk.f32.mxu0 %vm14265_vm0, %v14266_v1 }
0x5ed7   : > { %v11414_v36 = vpop.f32.mrb[132].mxu0 }
0x5ed8   : > { %v13574_v37 = vpop.f32.mrb[133].mxu0  ;;  %13578 = vmatmul.mubr.msk.f32.vlgmr.msra.gmra.mrb[116].mxu1 %vm1030_vm2, %v11414_v36 }
0x5ed9   : > { %13623 = vmatprep.mubr.msk.f32.mxu1 %vm14265_vm0, %v14266_v1  ;;  %v12263_v1 = vld [vmem:[%s16126_s15 + $0x20] sm:$0xff]  ;;  %13868 = vmatpush3.bf16.msra.mxu1 %v13867_v61 }
0x5eda   : > { %v13861_v52 = vpack.c.bf16 %v12264_v51, %v12263_v1  ;;  %13869 = vmatprep.subr.bf16.mxu1 %v14264_v0 }
0x5edc   : > { %13862 = vmatpush3.bf16.msra.mxu0 %v13861_v52 }
0x5edd   : > { %13863 = vmatprep.subr.bf16.mxu0 %v14264_v0  ;;  %13871 = vmatpush3.bf16.msra.mxu1 %v13870_v56 }
0x5ede   : > { %13872 = vmatprep.subr.bf16.mxu1 %v14264_v0 }
0x5ee1   : > { %13874 = vmatpush3.bf16.msra.mxu1 %v13873_v58 }
0x5ee2   : > { %13875 = vmatprep.subr.bf16.mxu1 %v14264_v0 }
0x5ee5   : > { %13877 = vmatpush3.bf16.msra.mxu1 %v13876_v60 }
0x5ee6   : > { %13878 = vmatprep.subr.bf16.mxu1 %v14264_v0 }
0x5ee9   : > { %13880 = vmatpush3.bf16.msra.mxu1 %v13879_v4 }
0x5eea   : > { %13881 = vmatprep.subr.bf16.mxu1 %v14264_v0 }
0x5eed   : > { %13883 = vmatpush3.bf16.msra.mxu1 %v13882_v2 }
0x5eee   : > { %13884 = vmatprep.subr.bf16.mxu1 %v14264_v0 }
0x5ef1   : > { %13886 = vmatpush3.bf16.msra.mxu1 %v13885_v8 }
0x5ef2   : > { %13887 = vmatprep.subr.bf16.mxu1 %v14264_v0  ;;  %v12262_v0 = vld [vmem:[%s16131_s20 + $0x6] ss:$0 sm:$0xff] }
0x5ef5   : > { %13889 = vmatpush3.bf16.msra.mxu1 %v13888_v30 }
0x5fab   : > { %v11487_v38 = vpop.f32.mrb[116].mxu1 }
0x5fac   : > { %v11491_v39 = vadd.f32 %v11487_v38, %v11250_v12  ;;  %v13579_v43 = vpop.f32.mrb[117].mxu1 }
0x5fae   : > { %v11498_v62 = vadd.f32 %v12258_v31, %v11491_v39 }
0x5fb0   : > { %v11499_v45 = vadd.f32 %v11498_v62, %v15829_v35  ;;  %v12265_v35 = vld [vmem:[%s16126_s15 + $0x30] sm:$0xff] }
0x5fb1   : > { %v13864_v23 = vpack.c.bf16 %v12266_v53, %v12265_v35 }
0x5fb2   : > { %v11504_v46 = vsel %vm804_vm1, %v11499_v45, 0.0 }
0x5fb3   : > { %11505 = vadd.xlane.f32.xlu1 %v11504_v46  ;;  %13865 = vmatpush3.bf16.msra.mxu0 %v13864_v23 }
0x6040   : > { %v11506_v47 = vpop.xlane.xlu1 %11505 }
0x6041   : > { %v11507_v48 = vmul.f32 0.03125, %v11506_v47 }
0x6043   : > { %v11508_v49 = vsub.f32 %v11499_v45, %v11507_v48 }
0x6045   : > { %v11509_v50 = vmul.f32 %v11508_v49, %v11508_v49  ;;  %v11527_v6 = vmul.f32 %v12261_v27, %v11508_v49 }
0x6047   : > { %v11510_v34 = vsel %vm804_vm1, %v11509_v50, 0.0 }
0x6048   : > { %11511 = vadd.xlane.f32.xlu1 %v11510_v34 }
0x60d5   : > { %v11512_v40 = vpop.xlane.xlu1 %11511 }
0x60d6   : > { %v11513_v9 = vmul.f32 0.032258064, %v11512_v40 }
0x60d8   : > { %14121 = vrsqrt.f32 %v11513_v9  ;;  %vm11516_vm0 = vcmp.eq.f32.partialorder %v11513_v9, inf  ;;  %v11519_v15 = vand.u32 2147483648, %v11513_v9  ;;  %vm11518_vm2 = vcmp.eq.f32.partialorder %v11513_v9, 0.0 }
0x60e2   : > { %v14122_v11 = vpop.eup %14121 }
0x60e3   : > { %v11515_v14 = vmul.f32 %v14122_v11, %v11513_v9 }
0x60e5   : > { %v11517_v59 = vsel %vm11516_vm0, %v11513_v9, %v11515_v14 }
0x60e6   : > { %v11520_v16 = vsel %vm11518_vm2, %v11519_v15, %v11517_v59 }
0x60e7   : > { %v11528_v20 = vadd.f32 1e-06, %v11520_v16 }
0x60e9   : > { %14123 = vrcp.f32 %v11528_v20 }
0x60f3   : > { %v14124_v21 = vpop.eup %14123 }
0x60f4   : > { %v11530_v24 = vmul.f32 %v14124_v21, %v11527_v6 }
0x60f6   : > { %v11537_v25 = vadd.f32 %v12262_v0, %v11530_v24 }
0x60f8   : > { %13589 = vmatmul.mubr.msk.f32.vlgmr.msra.gmra.mrb[134].mxu0 %vm804_vm1, %v11537_v25 }
0x61cb   : > { %v11639_v12 = vpop.f32.mrb[134].mxu0 }
0x61cc   : > { %v11640_v22 = vadd.f32 %v12285_v18, %v11639_v12  ;;  %v13590_v13 = vpop.f32.mrb[135].mxu0 }
0x61ce   : > { %v11643_v26 = vmax.f32 %v11640_v22, 0.0 }
0x61d0   : > { %13624 = vmatmul.mubr.f32.vlgmr.msra.gmra.mrb[118].mxu1 %v11643_v26 }
0x62a3   : > { %v11716_v36 = vpop.f32.mrb[118].mxu1 }
0x62a4   : > { %v11717_v37 = vadd.f32 %v12287_v33, %v11716_v36  ;;  %v13625_v31 = vpop.f32.mrb[119].mxu1 }
0x62a6   : > { %v11720_v38 = vadd.f32 %v11717_v37, %v11537_v25 }
0x62a8   : > { %v11725_v39 = vsel %vm804_vm1, %v11720_v38, 0.0 }
0x62a9   : > { %11726 = vadd.xlane.f32.xlu1 %v11725_v39 }
0x6336   : > { %v11727_v43 = vpop.xlane.xlu1 %11726 }
0x6337   : > { %v11728_v62 = vmul.f32 0.03125, %v11727_v43 }
0x6339   : > { %v11729_v45 = vsub.f32 %v11720_v38, %v11728_v62 }
0x633b   : > { %v11730_v46 = vmul.f32 %v11729_v45, %v11729_v45 }
0x633d   : > { %v11731_v47 = vsel %vm804_vm1, %v11730_v46, 0.0 }
0x633e   : > { %11732 = vadd.xlane.f32.xlu1 %v11731_v47 }
0x633f   : > { %14174 = shalt.err (!%p14171_p7)
}
0x6340   : > { %s14175_s0 = scalar_lea.hbm %s16033_s7, 128  ;;  %s14179_s30 = scalar_lea.hbm %s16132_s21, 256 }
0x6341   : > { %p14176_p8 = scmp.ne.s32.totalorder %s16033_s7, %s14175_s0  ;;  %p14180_p1 = scmp.lt.u32.totalorder %s16033_s7, %s16132_s21 }
0x6342   : > { %p14181_p0 = scmp.lt.u32.totalorder %s14179_s30, %s14175_s0  ;;  %p14183_p6 = scmp.lt.u32.totalorder %s14175_s0, %s16033_s7 }
0x6343   : > { %p14177_p11 = pnand %p14176_p8, %p16194_p9 }
0x6344   : > { %p14182_p5 = por %p14181_p0, %p14180_p1 }
0x6345   : > { %p14178_p13 = pneg %p14177_p11 }
0x6346   : > { %p14184_p10 = por %p14183_p6, %p14182_p5 }
0x6348   : > { %p14185_p12 = pnand %p14184_p10, %p14178_p13 }
0x634a   : > { %14188 = shalt.err (!%p14185_p12)
}
0x634b   : > { %13894 = dma.vmem_to_hbm [thread:$0]  (%p16194_p9), %s11780_s5, 128, %s16033_s7, %s11761_s3   ;;  %v12290_v53 = vld [vmem:[%s16130_s19 + $0x7] ss:$0 sm:$0xff] }
0x634c   : > { %v11748_v23 = vmul.f32 %v12290_v53, %v11729_v45  ;;  %v12291_v32 = vld [vmem:[%s16131_s20 + $0x7] ss:$0 sm:$0xff]  ;;  %s16195_s3 = sshll.u32 %s15163_s29, 3  ;;  %s16196_s0 = sld [smem:[#allocation28_spill]] }
0x634d   : > { %s748_s24 = scalar_lea.vmem [#allocation6], %s16195_s3  ;;  %s11766_s1 = scalar_lea.sflag [#allocation7], %s15163_s29 }
0x634e   : > { %s11792_s8 = sshll.u32 %s748_s24, 4  ;;  %s14271_s27 = smov [#allocation6]   ;;  %s16069_s8 = int_to_ptr.vmem [resolvable:$true] %s11792_s8 }
0x634f   : > { %s14189_s30 = scalar_lea.vmem %s16069_s8, 128  ;;  %s14193_s4 = sshll.u32 %s14271_s27, 4  ;;  %s14194_s4 = int_to_ptr.vmem [resolvable:$false] %s14193_s4 }
0x6350   : > { %p14190_p2 = scmp.ne.s32.totalorder %s16069_s8, %s14189_s30  ;;  %s14195_s23 = scalar_lea.vmem %s14194_s4, 256 }
0x6351   : > { %p14196_p7 = scmp.lt.s32.totalorder %s16069_s8, %s14194_s4  ;;  %p14197_p8 = scmp.lt.s32.totalorder %s14195_s23, %s14189_s30 }
0x6352   : > { %s16067_s2 = scalar_lea.hbm %s16196_s0, %s12294_s13  ;;  %p14191_p3 = pnand %p14190_p2, %p16194_p9 }
0x6353   : > { %p14198_p11 = por %p14197_p8, %p14196_p7 }
0x6354   : > { %p14192_p4 = pneg %p14191_p3 }
0x6356   : > { %p14199_p13 = pnand %p14198_p11, %p14192_p4 }
0x63cb   : > { %v11733_v48 = vpop.xlane.xlu1 %11732 }
0x63cc   : > { %v11734_v49 = vmul.f32 0.032258064, %v11733_v48 }
0x63ce   : > { %14125 = vrsqrt.f32 %v11734_v49  ;;  %vm11737_vm10 = vcmp.eq.f32.partialorder %v11734_v49, inf  ;;  %v11740_v1 = vand.u32 2147483648, %v11734_v49  ;;  %vm11739_vm11 = vcmp.eq.f32.partialorder %v11734_v49, 0.0 }
0x63d8   : > { %v14126_v50 = vpop.eup %14125 }
0x63d9   : > { %v11736_v34 = vmul.f32 %v14126_v50, %v11734_v49 }
0x63db   : > { %v11738_v51 = vsel %vm11737_vm10, %v11734_v49, %v11736_v34 }
0x63dc   : > { %v11741_v35 = vsel %vm11739_vm11, %v11740_v1, %v11738_v51 }
0x63dd   : > { %v11749_v52 = vadd.f32 1e-06, %v11741_v35 }
0x63df   : > { %14127 = vrcp.f32 %v11749_v52 }
0x63e9   : > { %v14128_v42 = vpop.eup %14127 }
0x63ea   : > { %v11751_v54 = vmul.f32 %v14128_v42, %v11748_v23 }
0x63ec   : > { %v11758_v61 = vadd.f32 %v12291_v32, %v11751_v54 }
0x63ee   : > { %11759 = vst.msk [vmem:[%s748_s24] sm:$0xff] %vm804_vm1, %v11758_v61 }
0x63ef   : > { %14202 = shalt.err (!%p14199_p13)
}
0x63f0   : > { %s14203_s29 = scalar_lea.hbm %s16067_s2, 128  ;;  %s14207_s26 = scalar_lea.hbm %s16196_s0, 256 }
0x63f1   : > { %p14204_p1 = scmp.ne.s32.totalorder %s16067_s2, %s14203_s29  ;;  %p14208_p6 = scmp.lt.u32.totalorder %s16067_s2, %s16196_s0 }
0x63f2   : > { %p14209_p10 = scmp.lt.u32.totalorder %s14207_s26, %s14203_s29  ;;  %p14211_p2 = scmp.lt.u32.totalorder %s14203_s29, %s16067_s2 }
0x63f3   : > { %p14205_p0 = pnand %p14204_p1, %p16194_p9 }
0x63f4   : > { %p14210_p12 = por %p14209_p10, %p14208_p6 }
0x63f5   : > { %p14206_p5 = pneg %p14205_p0 }
0x63f6   : > { %p14212_p3 = por %p14211_p2, %p14210_p12 }
0x63f8   : > { %p14213_p4 = pnand %p14212_p3, %p14206_p5 }
0x63fa   : > { %14216 = shalt.err (!%p14213_p4)
}
0x63fb   : > { %13895 = dma.vmem_to_hbm [thread:$0]  (%p16194_p9), %s16069_s8, 128, %s16067_s2, %s11766_s1  }
0x63fc PF: > { %s16197_s3 = sld [smem:[#allocation13_spill]]  ;;  %s16198_s24 = sld [smem:[#allocation11_spill]] }
0x63fd   : > { %s16199_s9 = sld [smem:[#allocation16_spill]] }
0x6402   : > { %p13911_p7 = scmp.ge.s32.totalorder %s16197_s3, 2  ;;  %s11804_s25 = sand.u32 1, %s16198_s24  }
0x6403   : > { %p16200_p8 = scmp.ne.s32.totalorder %s16199_s9, 0  ;;  %s11805_s30 = scalar_lea.sflag [#allocation4], %s11804_s25 }
0x6405   : > { %p13903_p11 = pnand %p13911_p7, %p16200_p8 }
0x6407   : > { %14238 = dma.done.wait (!%p13903_p11), %s11805_s30, 128  }
0x6408   : > { %14240 = vsyncadd (!%p13903_p11), %s11805_s30, 4294967168  ;;  %s11814_s27 = scalar_lea.sflag [#allocation7], %s11804_s25 }
0x6409   : > { %14242 = dma.done.wait (!%p13903_p11), %s11814_s27, 128  }
0x640a   : > { %14244 = vsyncadd (!%p13903_p11), %s11814_s27, 4294967168  ;;  %s16201_s30 = sld [smem:[#allocation14_spill]]  ;;  %s16202_s6 = sld [smem:[#allocation12_spill]] }
0x640b   : > { %s16203_s29 = sld [smem:[#allocation15_spill]]  ;;  %s16204_s3 = smov %s14251_s28 }
0x6410   : > { %p37_p9 = scmp.ge.s32.totalorder %s16201_s30, 4   ;;  %s16205_s28 = smov %s16202_s6 }
0x6412   :  { %39 = sbr.rel (!%p37_p9) target bundleno = 19 (0x13), region = 261 }
0x6419   :  { %11819 = vsyncpa [#allocation3], 1 }
0x641a   :  { %11821 = vsyncpa [#allocation3 + $0x1], 1 }
0x641b   :  { %11822 = vsyncpa [#allocation4], 1 }
0x641c   :  { %11824 = vsyncpa [#allocation4 + $0x1], 1 }
0x641d   :  { %11825 = vsyncpa [#allocation7], 1 }
0x641e   :  { %11827 = vsyncpa [#allocation7 + $0x1], 1 }

</bundles_post_ra>
